<compile_context>
chip_gen: v6e
topology: v6e:2x2x1
jax: 0.10.0
libtpu: 0.0.40
codegen_flags: <defaults>
</compile_context>

<pallas_src>
import functools

import jax
import jax.numpy as jnp
from jax.experimental import pallas as pl
from jax.experimental.pallas import tpu as pltpu


LANE = 128
ENC_CH = [(3, 32), (32, 64), (64, 128), (128, 256)]
DEC_CH = [(256, 128), (128, 64), (64, 32), (32, 3)]
DEC_ACT = ["relu", "relu", "relu", "sigmoid"]

# ConvTranspose2d(k=4, s=2, p=1): output row oh = 2*m + a reads input row
# ih = m + offset with kernel tap kh, for (offset, kh) pairs:
_PARITY_TAPS = {
    0: ((0, 1), (-1, 3)),   # even output rows/cols
    1: ((1, 0), (0, 2)),    # odd  output rows/cols
}


# ----------------------------------------------------------------------------
# Tiling helper
# ----------------------------------------------------------------------------
def _pick_tm(m, cap=1024):
    """Largest row tile <= cap that divides m (prefers multiples of 256)."""
    if m <= cap:
        return m
    for t in range(cap, 0, -256):
        if m % t == 0:
            return t
    for t in range(cap, 7, -8):
        if m % t == 0:
            return t
    return m


# ----------------------------------------------------------------------------
# Pallas kernels
# ----------------------------------------------------------------------------
def _mm_bias_act_kernel(x_ref, w_ref, b_ref, o_ref, *, act):
    """(tm, K)bf16 @ (K, Cout)bf16 -> f32 acc, +bias, activation, store."""
    acc = jnp.dot(x_ref[...], w_ref[...], preferred_element_type=jnp.float32)
    acc = acc + b_ref[...]
    if act == "relu":
        acc = jnp.maximum(acc, 0.0)
    elif act == "sigmoid":
        acc = jax.nn.sigmoid(acc)
    o_ref[...] = acc.astype(o_ref.dtype)


def matmul_bias_act(x, w, b, *, act="none", out_dtype=jnp.bfloat16):
    """x: (M, K) bf16, w: (K, Cout) bf16, b: (1, Cout) f32 -> (M, Cout)."""
    m, k = x.shape
    cout = w.shape[1]
    tm = _pick_tm(m)
    kernel = functools.partial(_mm_bias_act_kernel, act=act)
    return pl.pallas_call(
        kernel,
        out_shape=jax.ShapeDtypeStruct((m, cout), out_dtype),
        grid=(m // tm,),
        in_specs=[
            pl.BlockSpec((tm, k), lambda i: (i, 0)),
            pl.BlockSpec((k, cout), lambda i: (0, 0)),
            pl.BlockSpec((1, cout), lambda i: (0, 0)),
        ],
        out_specs=pl.BlockSpec((tm, cout), lambda i: (i, 0)),
        compiler_params=pltpu.CompilerParams(
            dimension_semantics=("parallel",)),
    )(x, w, b)


def _bmm_bias_act_kernel(x_ref, w_ref, b_ref, o_ref, *, act):
    """Per-phase matmul: blocks (1,tm,K) @ (1,K,Cout) + bias + activation."""
    acc = jnp.dot(x_ref[0], w_ref[0], preferred_element_type=jnp.float32)
    acc = acc + b_ref[0]
    if act == "relu":
        acc = jnp.maximum(acc, 0.0)
    elif act == "sigmoid":
        acc = jax.nn.sigmoid(acc)
    o_ref[0] = acc.astype(o_ref.dtype)


def batched_matmul_bias_act(x, w, b, *, act="none", out_dtype=jnp.bfloat16):
    """x: (P, M, K) bf16, w: (P, K, Cout) bf16, b: (1, 1, Cout) f32."""
    p, m, k = x.shape
    cout = w.shape[2]
    tm = _pick_tm(m)
    kernel = functools.partial(_bmm_bias_act_kernel, act=act)
    return pl.pallas_call(
        kernel,
        out_shape=jax.ShapeDtypeStruct((p, m, cout), out_dtype),
        grid=(p, m // tm),
        in_specs=[
            pl.BlockSpec((1, tm, k), lambda ph, i: (ph, i, 0)),
            pl.BlockSpec((1, k, cout), lambda ph, i: (ph, 0, 0)),
            pl.BlockSpec((1, 1, cout), lambda ph, i: (0, 0, 0)),
        ],
        out_specs=pl.BlockSpec((1, tm, cout), lambda ph, i: (ph, i, 0)),
        compiler_params=pltpu.CompilerParams(
            dimension_semantics=("parallel", "parallel")),
    )(x, w, b)


def _head_kernel(flat_ref, wml_ref, bml_ref, eps_ref, wd_ref, bd_ref,
                 mu_ref, lv_ref, h_ref, *, latent_dim):
    """fc_mu+fc_logvar (one matmul) -> reparameterize -> decoder fc."""
    ml = jnp.dot(flat_ref[...], wml_ref[...],
                 preferred_element_type=jnp.float32) + bml_ref[...]
    mu = ml[:, :latent_dim]
    logvar = ml[:, latent_dim:]
    z = mu + eps_ref[...] * jnp.exp(0.5 * logvar)
    h = jnp.dot(z.astype(jnp.bfloat16), wd_ref[...],
                preferred_element_type=jnp.float32) + bd_ref[...]
    mu_ref[...] = mu
    lv_ref[...] = logvar
    h_ref[...] = h.astype(h_ref.dtype)


def head_reparam_decoder_fc(flat, wml, bml, eps, wd, bd, latent_dim):
    n = flat.shape[0]
    dh = wd.shape[1]
    kernel = functools.partial(_head_kernel, latent_dim=latent_dim)
    return pl.pallas_call(
        kernel,
        out_shape=(
            jax.ShapeDtypeStruct((n, latent_dim), jnp.float32),   # mu
            jax.ShapeDtypeStruct((n, latent_dim), jnp.float32),   # logvar
            jax.ShapeDtypeStruct((n, dh), jnp.bfloat16),          # decoder fc out
        ),
    )(flat, wml, bml, eps, wd, bd)


# ----------------------------------------------------------------------------
# im2col glue (plain JAX: data movement only; compute stays in the kernels)
# ----------------------------------------------------------------------------
def _patches_conv4s2(x_nhwc):
    """4x4 / stride-2 / pad-1 conv patches -> (N*Ho*Wo, 16*C), Ho, Wo."""
    n, h, w, c = x_nhwc.shape
    ho, wo = h // 2, w // 2
    xp = jnp.pad(x_nhwc, ((0, 0), (1, 1), (1, 1), (0, 0)))
    cols = []
    for kh in range(4):
        for kw in range(4):
            cols.append(xp[:, kh:kh + 2 * ho:2, kw:kw + 2 * wo:2, :])
    p = jnp.stack(cols, axis=3)                     # (N, Ho, Wo, 16, C)
    return p.reshape(n * ho * wo, 16 * c), ho, wo


def _patches_convT_4phase(x_nhwc):
    """Sub-pixel patches for ConvTranspose2d(k=4,s=2,p=1): (4, N*H*W, 4*C)."""
    n, h, w, c = x_nhwc.shape
    xp = jnp.pad(x_nhwc, ((0, 0), (1, 1), (1, 1), (0, 0)))
    phases = []
    for a in (0, 1):
        for b in (0, 1):
            taps = []
            for off_h, _ in _PARITY_TAPS[a]:
                for off_w, _ in _PARITY_TAPS[b]:
                    taps.append(xp[:, 1 + off_h:1 + off_h + h,
                                   1 + off_w:1 + off_w + w, :])
            phases.append(jnp.stack(taps, axis=3).reshape(n * h * w, 4 * c))
    return jnp.stack(phases, axis=0)


def _interleave_phases(y, n, h, w, cout):
    """y: (4, N*H*W, Cpad), phases ordered (a,b) -> (N, 2H, 2W, cout)."""
    y = y[..., :cout].reshape(2, 2, n, h, w, cout)
    y = jnp.transpose(y, (2, 3, 0, 4, 1, 5))        # (N, H, a, W, b, C)
    return y.reshape(n, 2 * h, 2 * w, cout)


# ----------------------------------------------------------------------------
# One-time weight re-layout (outside jit)
# ----------------------------------------------------------------------------
def _pad_cout(wmat, bias, pad_to=LANE):
    cout = wmat.shape[-1]
    cpad = ((cout + pad_to - 1) // pad_to) * pad_to
    if cpad != cout:
        wmat = jnp.pad(wmat, [(0, 0)] * (wmat.ndim - 1) + [(0, cpad - cout)])
        bias = jnp.pad(bias, [(0, 0)] * (bias.ndim - 1) + [(0, cpad - cout)])
    return wmat, bias


def _conv_w_to_mat(w_oihw):
    """Conv2d weight (Cout, Cin, 4, 4) -> (16*Cin, Cout), (kh,kw,ci) rows."""
    cout, cin = w_oihw.shape[0], w_oihw.shape[1]
    return jnp.transpose(w_oihw, (2, 3, 1, 0)).reshape(16 * cin, cout)


def _convT_w_to_phase_mats(w_iohw):
    """ConvTranspose2d weight (Cin, Cout, 4, 4) -> (4, 4*Cin, Cout) sub-pixel
    matrices, phase index = 2*(oh%2) + (ow%2), row order (tap, ci)."""
    cin, cout = w_iohw.shape[0], w_iohw.shape[1]
    mats = []
    for a in (0, 1):
        for b in (0, 1):
            taps = []
            for _, kh in _PARITY_TAPS[a]:
                for _, kw in _PARITY_TAPS[b]:
                    taps.append(w_iohw[:, :, kh, kw])         # (Cin, Cout)
            mats.append(jnp.stack(taps, axis=0).reshape(4 * cin, cout))
    return jnp.stack(mats, axis=0)


def prepare_params(params):
    """Bake all weight transposes / flips / paddings once, outside jit."""
    prep = {"enc": [], "dec": []}

    for i, (_, co) in enumerate(ENC_CH):
        wmat = _conv_w_to_mat(params[f"enc_w{i}"])
        bias = params[f"enc_b{i}"].reshape(1, co)
        wmat, bias = _pad_cout(wmat, bias)
        prep["enc"].append({"w": wmat.astype(jnp.bfloat16),
                            "b": bias.astype(jnp.float32)})

    # fc_mu / fc_logvar fused; rows permuted to the NHWC (h,w,c) flatten order.
    def _fc_rows_nhwc(w_lk):                     # (L, 4096) cols in (c,h,w)
        latent = w_lk.shape[0]
        return jnp.transpose(w_lk.reshape(latent, 256, 4, 4),
                             (2, 3, 1, 0)).reshape(4096, latent)

    wml = jnp.concatenate([_fc_rows_nhwc(params["fc_mu_w"]),
                           _fc_rows_nhwc(params["fc_lv_w"])], axis=1)
    bml = jnp.concatenate([params["fc_mu_b"], params["fc_lv_b"]]).reshape(1, -1)
    prep["wml"] = wml.astype(jnp.bfloat16)
    prep["bml"] = bml.astype(jnp.float32)

    # decoder fc: columns permuted so its output reshapes directly to NHWC.
    wd = params["dec_fc_w"]                      # (4096, L), rows in (c,h,w)
    latent = wd.shape[1]
    wd = jnp.transpose(wd.reshape(256, 4, 4, latent),
                       (1, 2, 0, 3)).reshape(4096, latent).T      # (L, 4096)
    bd = jnp.transpose(params["dec_fc_b"].reshape(256, 4, 4),
                       (1, 2, 0)).reshape(1, 4096)
    prep["wd"] = wd.astype(jnp.bfloat16)
    prep["bd"] = bd.astype(jnp.float32)

    for i, (_, co) in enumerate(DEC_CH):
        wph = _convT_w_to_phase_mats(params[f"dec_w{i}"])   # (4, 4*Cin, Cout)
        bias = params[f"dec_b{i}"].reshape(1, 1, co)
        if i < len(DEC_CH) - 1:   # last layer Cout=3: padding would inflate writes
            wph, bias = _pad_cout(wph, bias)
        prep["dec"].append({"w": wph.astype(jnp.bfloat16),
                            "b": bias.astype(jnp.float32)})
    return prep


# ----------------------------------------------------------------------------
# Parameters (deterministic synthetic init, PyTorch shapes)
# ----------------------------------------------------------------------------
def init_params(key, latent_dim):
    ks = jax.random.split(key, 20)
    s = 0.05

    def w(k, shape):
        return (s * jax.random.normal(k, shape)).astype(jnp.float32)

    p = {}
    for i, (ci, co) in enumerate(ENC_CH):                 # Conv2d (Cout,Cin,4,4)
        p[f"enc_w{i}"] = w(ks[i], (co, ci, 4, 4))
        p[f"enc_b{i}"] = jnp.zeros((co,), jnp.float32)
    p["fc_mu_w"] = w(ks[4], (latent_dim, 256 * 4 * 4))    # Linear (out, in)
    p["fc_mu_b"] = jnp.zeros((latent_dim,), jnp.float32)
    p["fc_lv_w"] = w(ks[5], (latent_dim, 256 * 4 * 4))
    p["fc_lv_b"] = jnp.zeros((latent_dim,), jnp.float32)
    p["dec_fc_w"] = w(ks[6], (256 * 4 * 4, latent_dim))
    p["dec_fc_b"] = jnp.zeros((256 * 4 * 4,), jnp.float32)
    for i, (ci, co) in enumerate(DEC_CH):                 # ConvT (Cin,Cout,4,4)
        p[f"dec_w{i}"] = w(ks[7 + i], (ci, co, 4, 4))
        p[f"dec_b{i}"] = jnp.zeros((co,), jnp.float32)
    return p


# ----------------------------------------------------------------------------
# Forward pass
# ----------------------------------------------------------------------------
def vae_forward(prep, x_nchw, eps, *, latent_dim):
    n = x_nchw.shape[0]
    x = jnp.transpose(x_nchw, (0, 2, 3, 1)).astype(jnp.bfloat16)   # NHWC bf16

    # ----- Encoder: 4 x (im2col + fused matmul/bias/ReLU) -----
    for i, (_, co) in enumerate(ENC_CH):
        patches, ho, wo = _patches_conv4s2(x)
        y = matmul_bias_act(patches, prep["enc"][i]["w"], prep["enc"][i]["b"],
                            act="relu", out_dtype=jnp.bfloat16)
        x = y.reshape(n, ho, wo, -1)[..., :co]            # drop lane padding

    flat = x.reshape(n, 4 * 4 * 256)                      # NHWC flatten order

    # ----- fc_mu + fc_logvar + reparameterize + decoder fc (single kernel) ---
    mu, logvar, h = head_reparam_decoder_fc(
        flat, prep["wml"], prep["bml"], eps, prep["wd"], prep["bd"], latent_dim)
    x = h.reshape(n, 4, 4, 256)                           # already NHWC

    # ----- Decoder: 4 x (4-phase sub-pixel ConvTranspose) -----
    for i, (_, co) in enumerate(DEC_CH):
        hh, ww = x.shape[1], x.shape[2]
        patches = _patches_convT_4phase(x)                # (4, N*H*W, 4*Cin)
        last = i == len(DEC_CH) - 1
        y = batched_matmul_bias_act(
            patches, prep["dec"][i]["w"], prep["dec"][i]["b"],
            act=DEC_ACT[i],
            out_dtype=jnp.float32 if last else jnp.bfloat16)
        x = _interleave_phases(y, n, hh, ww, co)

    recon = jnp.transpose(x, (0, 3, 1, 2)).astype(jnp.float32)   # NCHW
    return recon, mu, logvar


# ----------------------------------------------------------------------------
if __name__ == "__main__":
    latent_dim = 32
    batch = 2
    key = jax.random.PRNGKey(0)
    k_x, k_p, k_eps = jax.random.split(key, 3)

    x = jax.random.normal(k_x, (batch, 3, 64, 64), dtype=jnp.float32)
    params = init_params(k_p, latent_dim)
    eps = jax.random.normal(k_eps, (batch, latent_dim), dtype=jnp.float32)

    prep = prepare_params(params)            # one-time weight re-layout
    fwd = jax.jit(functools.partial(vae_forward, latent_dim=latent_dim))
    recon, mu, logvar = fwd(prep, x, eps)
    jax.block_until_ready((recon, mu, logvar))

    assert recon.shape == (batch, 3, 64, 64)
    assert mu.shape == (batch, latent_dim)
    assert logvar.shape == (batch, latent_dim)
    assert bool(jnp.isfinite(recon).all())
    assert bool(jnp.isfinite(mu).all()) and bool(jnp.isfinite(logvar).all())
    print("KERNEL_OK")
</pallas_src>

<mosaic_0001>
module attributes {stable_mosaic.version = 11 : i64} {
  func.func @_mm_bias_act_kernel(%arg0: i32, %arg1: memref<1024x48xbf16, #tpu.memory_space<vmem>>, %arg2: memref<48x128xbf16, #tpu.memory_space<vmem>>, %arg3: memref<1x128xf32, #tpu.memory_space<vmem>>, %arg4: memref<1024x128xbf16, #tpu.memory_space<vmem>>) attributes {dimension_semantics = [#tpu.dimension_semantics<parallel>], iteration_bounds = array<i64: 2>, scalar_prefetch = 0 : i64, scratch_operands = 0 : i64, tpu.core_type = #tpu.core_type<tc>, window_params = [{transform_indices = @transform_0, window_bounds = array<i64: 1024, 48>}, {pipeline_mode = #tpu.pipeline_mode<synchronous>, transform_indices = @transform_1, window_bounds = array<i64: 48, 128>}, {pipeline_mode = #tpu.pipeline_mode<synchronous>, transform_indices = @transform_2, window_bounds = array<i64: 1, 128>}, {transform_indices = @transform_3, window_bounds = array<i64: 1024, 128>}]} {
    %c0 = arith.constant 0 : index
    %c0_0 = arith.constant 0 : index
    %0 = vector.load %arg1[%c0, %c0_0] : memref<1024x48xbf16, #tpu.memory_space<vmem>>, vector<1024x48xbf16>
    %c0_1 = arith.constant 0 : index
    %c0_2 = arith.constant 0 : index
    %1 = vector.load %arg2[%c0_1, %c0_2] : memref<48x128xbf16, #tpu.memory_space<vmem>>, vector<48x128xbf16>
    %cst = arith.constant dense<0.000000e+00> : vector<1024x128xf32>
    %2 = tpu.matmul %0, %1, %cst {dimension_numbers = #tpu.dot_dimension_numbers<[1], [0], [0], [1], [0, 0, 1, 1], [], []>} : vector<1024x48xbf16>, vector<48x128xbf16>, vector<1024x128xf32> -> vector<1024x128xf32>
    %c0_3 = arith.constant 0 : index
    %c0_4 = arith.constant 0 : index
    %3 = vector.load %arg3[%c0_3, %c0_4] : memref<1x128xf32, #tpu.memory_space<vmem>>, vector<1x128xf32>
    %4 = vector.broadcast %3 : vector<1x128xf32> to vector<1024x128xf32>
    %5 = arith.addf %2, %4 : vector<1024x128xf32>
    %cst_5 = arith.constant 0.000000e+00 : f32
    %6 = vector.broadcast %cst_5 : f32 to vector<1024x128xf32>
    %7 = arith.maximumf %5, %6 : vector<1024x128xf32>
    %8 = arith.truncf %7 : vector<1024x128xf32> to vector<1024x128xbf16>
    %c0_6 = arith.constant 0 : index
    %c0_7 = arith.constant 0 : index
    %9 = vector.load %arg4[%c0_6, %c0_7] : memref<1024x128xbf16, #tpu.memory_space<vmem>>, vector<1024x128xbf16>
    tpu.vector_store %arg4[%c0_6, %c0_7], %8 {strides = array<i32>} : memref<1024x128xbf16, #tpu.memory_space<vmem>>, vector<1024x128xbf16>,
    return
  }
  func.func @transform_0(%arg0: i32) -> (i32, i32) {
    %c0_i32 = arith.constant 0 : i32
    %c0_i32_0 = arith.constant 0 : i32
    return %arg0, %c0_i32 : i32, i32
  }
  func.func @transform_1(%arg0: i32) -> (i32, i32) {
    %c0_i32 = arith.constant 0 : i32
    %c0_i32_0 = arith.constant 0 : i32
    %c0_i32_1 = arith.constant 0 : i32
    return %c0_i32, %c0_i32_0 : i32, i32
  }
  func.func @transform_2(%arg0: i32) -> (i32, i32) {
    %c0_i32 = arith.constant 0 : i32
    %c0_i32_0 = arith.constant 0 : i32
    %c0_i32_1 = arith.constant 0 : i32
    return %c0_i32, %c0_i32_0 : i32, i32
  }
  func.func @transform_3(%arg0: i32) -> (i32, i32) {
    %c0_i32 = arith.constant 0 : i32
    %c0_i32_0 = arith.constant 0 : i32
    return %arg0, %c0_i32 : i32, i32
  }
}

module attributes {stable_mosaic.version = 11 : i64} {
  func.func @_mm_bias_act_kernel(%arg0: i32, %arg1: memref<512x512xbf16, #tpu.memory_space<vmem>>, %arg2: memref<512x128xbf16, #tpu.memory_space<vmem>>, %arg3: memref<1x128xf32, #tpu.memory_space<vmem>>, %arg4: memref<512x128xbf16, #tpu.memory_space<vmem>>) attributes {dimension_semantics = [#tpu.dimension_semantics<parallel>], iteration_bounds = array<i64: 1>, scalar_prefetch = 0 : i64, scratch_operands = 0 : i64, tpu.core_type = #tpu.core_type<tc>, window_params = [{transform_indices = @transform_0, window_bounds = array<i64: 512, 512>}, {pipeline_mode = #tpu.pipeline_mode<synchronous>, transform_indices = @transform_1, window_bounds = array<i64: 512, 128>}, {pipeline_mode = #tpu.pipeline_mode<synchronous>, transform_indices = @transform_2, window_bounds = array<i64: 1, 128>}, {transform_indices = @transform_3, window_bounds = array<i64: 512, 128>}]} {
    %c0 = arith.constant 0 : index
    %c0_0 = arith.constant 0 : index
    %0 = vector.load %arg1[%c0, %c0_0] : memref<512x512xbf16, #tpu.memory_space<vmem>>, vector<512x512xbf16>
    %c0_1 = arith.constant 0 : index
    %c0_2 = arith.constant 0 : index
    %1 = vector.load %arg2[%c0_1, %c0_2] : memref<512x128xbf16, #tpu.memory_space<vmem>>, vector<512x128xbf16>
    %cst = arith.constant dense<0.000000e+00> : vector<512x128xf32>
    %2 = tpu.matmul %0, %1, %cst {dimension_numbers = #tpu.dot_dimension_numbers<[1], [0], [0], [1], [0, 0, 1, 1], [], []>} : vector<512x512xbf16>, vector<512x128xbf16>, vector<512x128xf32> -> vector<512x128xf32>
    %c0_3 = arith.constant 0 : index
    %c0_4 = arith.constant 0 : index
    %3 = vector.load %arg3[%c0_3, %c0_4] : memref<1x128xf32, #tpu.memory_space<vmem>>, vector<1x128xf32>
    %4 = vector.broadcast %3 : vector<1x128xf32> to vector<512x128xf32>
    %5 = arith.addf %2, %4 : vector<512x128xf32>
    %cst_5 = arith.constant 0.000000e+00 : f32
    %6 = vector.broadcast %cst_5 : f32 to vector<512x128xf32>
    %7 = arith.maximumf %5, %6 : vector<512x128xf32>
    %8 = arith.truncf %7 : vector<512x128xf32> to vector<512x128xbf16>
    %c0_6 = arith.constant 0 : index
    %c0_7 = arith.constant 0 : index
    %9 = vector.load %arg4[%c0_6, %c0_7] : memref<512x128xbf16, #tpu.memory_space<vmem>>, vector<512x128xbf16>
    tpu.vector_store %arg4[%c0_6, %c0_7], %8 {strides = array<i32>} : memref<512x128xbf16, #tpu.memory_space<vmem>>, vector<512x128xbf16>,
    return
  }
  func.func @transform_0(%arg0: i32) -> (i32, i32) {
    %c0_i32 = arith.constant 0 : i32
    %c0_i32_0 = arith.constant 0 : i32
    return %arg0, %c0_i32 : i32, i32
  }
  func.func @transform_1(%arg0: i32) -> (i32, i32) {
    %c0_i32 = arith.constant 0 : i32
    %c0_i32_0 = arith.constant 0 : i32
    %c0_i32_1 = arith.constant 0 : i32
    return %c0_i32, %c0_i32_0 : i32, i32
  }
  func.func @transform_2(%arg0: i32) -> (i32, i32) {
    %c0_i32 = arith.constant 0 : i32
    %c0_i32_0 = arith.constant 0 : i32
    %c0_i32_1 = arith.constant 0 : i32
    return %c0_i32, %c0_i32_0 : i32, i32
  }
  func.func @transform_3(%arg0: i32) -> (i32, i32) {
    %c0_i32 = arith.constant 0 : i32
    %c0_i32_0 = arith.constant 0 : i32
    return %arg0, %c0_i32 : i32, i32
  }
}

module attributes {stable_mosaic.version = 11 : i64} {
  func.func @_mm_bias_act_kernel(%arg0: i32, %arg1: memref<128x1024xbf16, #tpu.memory_space<vmem>>, %arg2: memref<1024x128xbf16, #tpu.memory_space<vmem>>, %arg3: memref<1x128xf32, #tpu.memory_space<vmem>>, %arg4: memref<128x128xbf16, #tpu.memory_space<vmem>>) attributes {dimension_semantics = [#tpu.dimension_semantics<parallel>], iteration_bounds = array<i64: 1>, scalar_prefetch = 0 : i64, scratch_operands = 0 : i64, tpu.core_type = #tpu.core_type<tc>, window_params = [{transform_indices = @transform_0, window_bounds = array<i64: 128, 1024>}, {pipeline_mode = #tpu.pipeline_mode<synchronous>, transform_indices = @transform_1, window_bounds = array<i64: 1024, 128>}, {pipeline_mode = #tpu.pipeline_mode<synchronous>, transform_indices = @transform_2, window_bounds = array<i64: 1, 128>}, {transform_indices = @transform_3, window_bounds = array<i64: 128, 128>}]} {
    %c0 = arith.constant 0 : index
    %c0_0 = arith.constant 0 : index
    %0 = vector.load %arg1[%c0, %c0_0] : memref<128x1024xbf16, #tpu.memory_space<vmem>>, vector<128x1024xbf16>
    %c0_1 = arith.constant 0 : index
    %c0_2 = arith.constant 0 : index
    %1 = vector.load %arg2[%c0_1, %c0_2] : memref<1024x128xbf16, #tpu.memory_space<vmem>>, vector<1024x128xbf16>
    %cst = arith.constant dense<0.000000e+00> : vector<128x128xf32>
    %2 = tpu.matmul %0, %1, %cst {dimension_numbers = #tpu.dot_dimension_numbers<[1], [0], [0], [1], [0, 0, 1, 1], [], []>} : vector<128x1024xbf16>, vector<1024x128xbf16>, vector<128x128xf32> -> vector<128x128xf32>
    %c0_3 = arith.constant 0 : index
    %c0_4 = arith.constant 0 : index
    %3 = vector.load %arg3[%c0_3, %c0_4] : memref<1x128xf32, #tpu.memory_space<vmem>>, vector<1x128xf32>
    %4 = vector.broadcast %3 : vector<1x128xf32> to vector<128x128xf32>
    %5 = arith.addf %2, %4 : vector<128x128xf32>
    %cst_5 = arith.constant 0.000000e+00 : f32
    %6 = vector.broadcast %cst_5 : f32 to vector<128x128xf32>
    %7 = arith.maximumf %5, %6 : vector<128x128xf32>
    %8 = arith.truncf %7 : vector<128x128xf32> to vector<128x128xbf16>
    %c0_6 = arith.constant 0 : index
    %c0_7 = arith.constant 0 : index
    %9 = vector.load %arg4[%c0_6, %c0_7] : memref<128x128xbf16, #tpu.memory_space<vmem>>, vector<128x128xbf16>
    tpu.vector_store %arg4[%c0_6, %c0_7], %8 {strides = array<i32>} : memref<128x128xbf16, #tpu.memory_space<vmem>>, vector<128x128xbf16>,
    return
  }
  func.func @transform_0(%arg0: i32) -> (i32, i32) {
    %c0_i32 = arith.constant 0 : i32
    %c0_i32_0 = arith.constant 0 : i32
    return %arg0, %c0_i32 : i32, i32
  }
  func.func @transform_1(%arg0: i32) -> (i32, i32) {
    %c0_i32 = arith.constant 0 : i32
    %c0_i32_0 = arith.constant 0 : i32
    %c0_i32_1 = arith.constant 0 : i32
    return %c0_i32, %c0_i32_0 : i32, i32
  }
  func.func @transform_2(%arg0: i32) -> (i32, i32) {
    %c0_i32 = arith.constant 0 : i32
    %c0_i32_0 = arith.constant 0 : i32
    %c0_i32_1 = arith.constant 0 : i32
    return %c0_i32, %c0_i32_0 : i32, i32
  }
  func.func @transform_3(%arg0: i32) -> (i32, i32) {
    %c0_i32 = arith.constant 0 : i32
    %c0_i32_0 = arith.constant 0 : i32
    return %arg0, %c0_i32 : i32, i32
  }
}

module attributes {stable_mosaic.version = 11 : i64} {
  func.func @_mm_bias_act_kernel(%arg0: i32, %arg1: memref<32x2048xbf16, #tpu.memory_space<vmem>>, %arg2: memref<2048x256xbf16, #tpu.memory_space<vmem>>, %arg3: memref<1x256xf32, #tpu.memory_space<vmem>>, %arg4: memref<32x256xbf16, #tpu.memory_space<vmem>>) attributes {dimension_semantics = [#tpu.dimension_semantics<parallel>], iteration_bounds = array<i64: 1>, scalar_prefetch = 0 : i64, scratch_operands = 0 : i64, tpu.core_type = #tpu.core_type<tc>, window_params = [{transform_indices = @transform_0, window_bounds = array<i64: 32, 2048>}, {pipeline_mode = #tpu.pipeline_mode<synchronous>, transform_indices = @transform_1, window_bounds = array<i64: 2048, 256>}, {pipeline_mode = #tpu.pipeline_mode<synchronous>, transform_indices = @transform_2, window_bounds = array<i64: 1, 256>}, {transform_indices = @transform_3, window_bounds = array<i64: 32, 256>}]} {
    %c0 = arith.constant 0 : index
    %c0_0 = arith.constant 0 : index
    %0 = vector.load %arg1[%c0, %c0_0] : memref<32x2048xbf16, #tpu.memory_space<vmem>>, vector<32x2048xbf16>
    %c0_1 = arith.constant 0 : index
    %c0_2 = arith.constant 0 : index
    %1 = vector.load %arg2[%c0_1, %c0_2] : memref<2048x256xbf16, #tpu.memory_space<vmem>>, vector<2048x256xbf16>
    %cst = arith.constant dense<0.000000e+00> : vector<32x256xf32>
    %2 = tpu.matmul %0, %1, %cst {dimension_numbers = #tpu.dot_dimension_numbers<[1], [0], [0], [1], [0, 0, 1, 1], [], []>} : vector<32x2048xbf16>, vector<2048x256xbf16>, vector<32x256xf32> -> vector<32x256xf32>
    %c0_3 = arith.constant 0 : index
    %c0_4 = arith.constant 0 : index
    %3 = vector.load %arg3[%c0_3, %c0_4] : memref<1x256xf32, #tpu.memory_space<vmem>>, vector<1x256xf32>
    %4 = vector.broadcast %3 : vector<1x256xf32> to vector<32x256xf32>
    %5 = arith.addf %2, %4 : vector<32x256xf32>
    %cst_5 = arith.constant 0.000000e+00 : f32
    %6 = vector.broadcast %cst_5 : f32 to vector<32x256xf32>
    %7 = arith.maximumf %5, %6 : vector<32x256xf32>
    %8 = arith.truncf %7 : vector<32x256xf32> to vector<32x256xbf16>
    %c0_6 = arith.constant 0 : index
    %c0_7 = arith.constant 0 : index
    %9 = vector.load %arg4[%c0_6, %c0_7] : memref<32x256xbf16, #tpu.memory_space<vmem>>, vector<32x256xbf16>
    tpu.vector_store %arg4[%c0_6, %c0_7], %8 {strides = array<i32>} : memref<32x256xbf16, #tpu.memory_space<vmem>>, vector<32x256xbf16>,
    return
  }
  func.func @transform_0(%arg0: i32) -> (i32, i32) {
    %c0_i32 = arith.constant 0 : i32
    %c0_i32_0 = arith.constant 0 : i32
    return %arg0, %c0_i32 : i32, i32
  }
  func.func @transform_1(%arg0: i32) -> (i32, i32) {
    %c0_i32 = arith.constant 0 : i32
    %c0_i32_0 = arith.constant 0 : i32
    %c0_i32_1 = arith.constant 0 : i32
    return %c0_i32, %c0_i32_0 : i32, i32
  }
  func.func @transform_2(%arg0: i32) -> (i32, i32) {
    %c0_i32 = arith.constant 0 : i32
    %c0_i32_0 = arith.constant 0 : i32
    %c0_i32_1 = arith.constant 0 : i32
    return %c0_i32, %c0_i32_0 : i32, i32
  }
  func.func @transform_3(%arg0: i32) -> (i32, i32) {
    %c0_i32 = arith.constant 0 : i32
    %c0_i32_0 = arith.constant 0 : i32
    return %arg0, %c0_i32 : i32, i32
  }
}

module attributes {stable_mosaic.version = 11 : i64} {
  func.func @_head_kernel(%arg0: memref<2x4096xbf16, #tpu.memory_space<vmem>>, %arg1: memref<4096x64xbf16, #tpu.memory_space<vmem>>, %arg2: memref<1x64xf32, #tpu.memory_space<vmem>>, %arg3: memref<2x32xf32, #tpu.memory_space<vmem>>, %arg4: memref<32x4096xbf16, #tpu.memory_space<vmem>>, %arg5: memref<1x4096xf32, #tpu.memory_space<vmem>>, %arg6: memref<2x32xf32, #tpu.memory_space<vmem>>, %arg7: memref<2x32xf32, #tpu.memory_space<vmem>>, %arg8: memref<2x4096xbf16, #tpu.memory_space<vmem>>) attributes {dimension_semantics = [], scalar_prefetch = 0 : i64, scratch_operands = 0 : i64, tpu.core_type = #tpu.core_type<tc>} {
    %c0 = arith.constant 0 : index
    %c0_0 = arith.constant 0 : index
    %0 = vector.load %arg0[%c0, %c0_0] : memref<2x4096xbf16, #tpu.memory_space<vmem>>, vector<2x4096xbf16>
    %c0_1 = arith.constant 0 : index
    %c0_2 = arith.constant 0 : index
    %1 = vector.load %arg1[%c0_1, %c0_2] : memref<4096x64xbf16, #tpu.memory_space<vmem>>, vector<4096x64xbf16>
    %cst = arith.constant dense<0.000000e+00> : vector<2x64xf32>
    %2 = tpu.matmul %0, %1, %cst {dimension_numbers = #tpu.dot_dimension_numbers<[1], [0], [0], [1], [0, 0, 1, 1], [], []>} : vector<2x4096xbf16>, vector<4096x64xbf16>, vector<2x64xf32> -> vector<2x64xf32>
    %c0_3 = arith.constant 0 : index
    %c0_4 = arith.constant 0 : index
    %3 = vector.load %arg2[%c0_3, %c0_4] : memref<1x64xf32, #tpu.memory_space<vmem>>, vector<1x64xf32>
    %4 = vector.broadcast %3 : vector<1x64xf32> to vector<2x64xf32>
    %5 = arith.addf %2, %4 : vector<2x64xf32>
    %6 = vector.extract_strided_slice %5 {offsets = [0, 0], sizes = [2, 32], strides = [1, 1]} : vector<2x64xf32> to vector<2x32xf32>
    %7 = vector.extract_strided_slice %5 {offsets = [0, 32], sizes = [2, 32], strides = [1, 1]} : vector<2x64xf32> to vector<2x32xf32>
    %c0_5 = arith.constant 0 : index
    %c0_6 = arith.constant 0 : index
    %8 = vector.load %arg3[%c0_5, %c0_6] : memref<2x32xf32, #tpu.memory_space<vmem>>, vector<2x32xf32>
    %cst_7 = arith.constant 5.000000e-01 : f32
    %9 = vector.broadcast %cst_7 : f32 to vector<2x32xf32>
    %10 = arith.mulf %9, %7 : vector<2x32xf32>
    %11 = math.exp %10 : vector<2x32xf32>
    %12 = arith.mulf %8, %11 : vector<2x32xf32>
    %13 = arith.addf %6, %12 : vector<2x32xf32>
    %14 = arith.truncf %13 : vector<2x32xf32> to vector<2x32xbf16>
    %c0_8 = arith.constant 0 : index
    %c0_9 = arith.constant 0 : index
    %15 = vector.load %arg4[%c0_8, %c0_9] : memref<32x4096xbf16, #tpu.memory_space<vmem>>, vector<32x4096xbf16>
    %cst_10 = arith.constant dense<0.000000e+00> : vector<2x4096xf32>
    %16 = tpu.matmul %14, %15, %cst_10 {dimension_numbers = #tpu.dot_dimension_numbers<[1], [0], [0], [1], [0, 0, 1, 1], [], []>} : vector<2x32xbf16>, vector<32x4096xbf16>, vector<2x4096xf32> -> vector<2x4096xf32>
    %c0_11 = arith.constant 0 : index
    %c0_12 = arith.constant 0 : index
    %17 = vector.load %arg5[%c0_11, %c0_12] : memref<1x4096xf32, #tpu.memory_space<vmem>>, vector<1x4096xf32>
    %18 = vector.broadcast %17 : vector<1x4096xf32> to vector<2x4096xf32>
    %19 = arith.addf %16, %18 : vector<2x4096xf32>
    %c0_13 = arith.constant 0 : index
    %c0_14 = arith.constant 0 : index
    %20 = vector.load %arg6[%c0_13, %c0_14] : memref<2x32xf32, #tpu.memory_space<vmem>>, vector<2x32xf32>
    tpu.vector_store %arg6[%c0_13, %c0_14], %6 {strides = array<i32>} : memref<2x32xf32, #tpu.memory_space<vmem>>, vector<2x32xf32>,
    %c0_15 = arith.constant 0 : index
    %c0_16 = arith.constant 0 : index
    %21 = vector.load %arg7[%c0_15, %c0_16] : memref<2x32xf32, #tpu.memory_space<vmem>>, vector<2x32xf32>
    tpu.vector_store %arg7[%c0_15, %c0_16], %7 {strides = array<i32>} : memref<2x32xf32, #tpu.memory_space<vmem>>, vector<2x32xf32>,
    %22 = arith.truncf %19 : vector<2x4096xf32> to vector<2x4096xbf16>
    %c0_17 = arith.constant 0 : index
    %c0_18 = arith.constant 0 : index
    %23 = vector.load %arg8[%c0_17, %c0_18] : memref<2x4096xbf16, #tpu.memory_space<vmem>>, vector<2x4096xbf16>
    tpu.vector_store %arg8[%c0_17, %c0_18], %22 {strides = array<i32>} : memref<2x4096xbf16, #tpu.memory_space<vmem>>, vector<2x4096xbf16>,
    return
  }
}

module attributes {stable_mosaic.version = 11 : i64} {
  func.func @_bmm_bias_act_kernel(%arg0: i32, %arg1: i32, %arg2: memref<1x32x1024xbf16, #tpu.memory_space<vmem>>, %arg3: memref<1x1024x128xbf16, #tpu.memory_space<vmem>>, %arg4: memref<1x1x128xf32, #tpu.memory_space<vmem>>, %arg5: memref<1x32x128xbf16, #tpu.memory_space<vmem>>) attributes {dimension_semantics = [#tpu.dimension_semantics<parallel>, #tpu.dimension_semantics<parallel>], iteration_bounds = array<i64: 4, 1>, scalar_prefetch = 0 : i64, scratch_operands = 0 : i64, tpu.core_type = #tpu.core_type<tc>, window_params = [{transform_indices = @transform_0, window_bounds = array<i64: 1, 32, 1024>}, {transform_indices = @transform_1, window_bounds = array<i64: 1, 1024, 128>}, {pipeline_mode = #tpu.pipeline_mode<synchronous>, transform_indices = @transform_2, window_bounds = array<i64: 1, 1, 128>}, {transform_indices = @transform_3, window_bounds = array<i64: 1, 32, 128>}]} {
    %c0 = arith.constant 0 : index
    %c0_0 = arith.constant 0 : index
    %c0_1 = arith.constant 0 : index
    %0 = vector.load %arg2[%c0, %c0_0, %c0_1] : memref<1x32x1024xbf16, #tpu.memory_space<vmem>>, vector<1x32x1024xbf16>
    %1 = vector.shape_cast %0 : vector<1x32x1024xbf16> to vector<32x1024xbf16>
    %c0_2 = arith.constant 0 : index
    %c0_3 = arith.constant 0 : index
    %c0_4 = arith.constant 0 : index
    %2 = vector.load %arg3[%c0_2, %c0_3, %c0_4] : memref<1x1024x128xbf16, #tpu.memory_space<vmem>>, vector<1x1024x128xbf16>
    %3 = vector.shape_cast %2 : vector<1x1024x128xbf16> to vector<1024x128xbf16>
    %cst = arith.constant dense<0.000000e+00> : vector<32x128xf32>
    %4 = tpu.matmul %1, %3, %cst {dimension_numbers = #tpu.dot_dimension_numbers<[1], [0], [0], [1], [0, 0, 1, 1], [], []>} : vector<32x1024xbf16>, vector<1024x128xbf16>, vector<32x128xf32> -> vector<32x128xf32>
    %c0_5 = arith.constant 0 : index
    %c0_6 = arith.constant 0 : index
    %c0_7 = arith.constant 0 : index
    %5 = vector.load %arg4[%c0_5, %c0_6, %c0_7] : memref<1x1x128xf32, #tpu.memory_space<vmem>>, vector<1x1x128xf32>
    %6 = vector.shape_cast %5 : vector<1x1x128xf32> to vector<1x128xf32>
    %7 = vector.broadcast %6 : vector<1x128xf32> to vector<32x128xf32>
    %8 = arith.addf %4, %7 : vector<32x128xf32>
    %cst_8 = arith.constant 0.000000e+00 : f32
    %9 = vector.broadcast %cst_8 : f32 to vector<32x128xf32>
    %10 = arith.maximumf %8, %9 : vector<32x128xf32>
    %11 = arith.truncf %10 : vector<32x128xf32> to vector<32x128xbf16>
    %c0_9 = arith.constant 0 : index
    %c0_10 = arith.constant 0 : index
    %c0_11 = arith.constant 0 : index
    %12 = vector.load %arg5[%c0_9, %c0_10, %c0_11] : memref<1x32x128xbf16, #tpu.memory_space<vmem>>, vector<1x32x128xbf16>
    %13 = vector.shape_cast %12 : vector<1x32x128xbf16> to vector<32x128xbf16>
    %14 = vector.shape_cast %11 : vector<32x128xbf16> to vector<1x32x128xbf16>
    tpu.vector_store %arg5[%c0_9, %c0_10, %c0_11], %14 {strides = array<i32>} : memref<1x32x128xbf16, #tpu.memory_space<vmem>>, vector<1x32x128xbf16>,
    return
  }
  func.func @transform_0(%arg0: i32, %arg1: i32) -> (i32, i32, i32) {
    %c0_i32 = arith.constant 0 : i32
    %c0_i32_0 = arith.constant 0 : i32
    return %arg0, %arg1, %c0_i32 : i32, i32, i32
  }
  func.func @transform_1(%arg0: i32, %arg1: i32) -> (i32, i32, i32) {
    %c0_i32 = arith.constant 0 : i32
    %c0_i32_0 = arith.constant 0 : i32
    %c0_i32_1 = arith.constant 0 : i32
    return %arg0, %c0_i32, %c0_i32_0 : i32, i32, i32
  }
  func.func @transform_2(%arg0: i32, %arg1: i32) -> (i32, i32, i32) {
    %c0_i32 = arith.constant 0 : i32
    %c0_i32_0 = arith.constant 0 : i32
    %c0_i32_1 = arith.constant 0 : i32
    %c0_i32_2 = arith.constant 0 : i32
    return %c0_i32, %c0_i32_0, %c0_i32_1 : i32, i32, i32
  }
  func.func @transform_3(%arg0: i32, %arg1: i32) -> (i32, i32, i32) {
    %c0_i32 = arith.constant 0 : i32
    %c0_i32_0 = arith.constant 0 : i32
    return %arg0, %arg1, %c0_i32 : i32, i32, i32
  }
}

module attributes {stable_mosaic.version = 11 : i64} {
  func.func @_bmm_bias_act_kernel(%arg0: i32, %arg1: i32, %arg2: memref<1x128x512xbf16, #tpu.memory_space<vmem>>, %arg3: memref<1x512x128xbf16, #tpu.memory_space<vmem>>, %arg4: memref<1x1x128xf32, #tpu.memory_space<vmem>>, %arg5: memref<1x128x128xbf16, #tpu.memory_space<vmem>>) attributes {dimension_semantics = [#tpu.dimension_semantics<parallel>, #tpu.dimension_semantics<parallel>], iteration_bounds = array<i64: 4, 1>, scalar_prefetch = 0 : i64, scratch_operands = 0 : i64, tpu.core_type = #tpu.core_type<tc>, window_params = [{transform_indices = @transform_0, window_bounds = array<i64: 1, 128, 512>}, {transform_indices = @transform_1, window_bounds = array<i64: 1, 512, 128>}, {pipeline_mode = #tpu.pipeline_mode<synchronous>, transform_indices = @transform_2, window_bounds = array<i64: 1, 1, 128>}, {transform_indices = @transform_3, window_bounds = array<i64: 1, 128, 128>}]} {
    %c0 = arith.constant 0 : index
    %c0_0 = arith.constant 0 : index
    %c0_1 = arith.constant 0 : index
    %0 = vector.load %arg2[%c0, %c0_0, %c0_1] : memref<1x128x512xbf16, #tpu.memory_space<vmem>>, vector<1x128x512xbf16>
    %1 = vector.shape_cast %0 : vector<1x128x512xbf16> to vector<128x512xbf16>
    %c0_2 = arith.constant 0 : index
    %c0_3 = arith.constant 0 : index
    %c0_4 = arith.constant 0 : index
    %2 = vector.load %arg3[%c0_2, %c0_3, %c0_4] : memref<1x512x128xbf16, #tpu.memory_space<vmem>>, vector<1x512x128xbf16>
    %3 = vector.shape_cast %2 : vector<1x512x128xbf16> to vector<512x128xbf16>
    %cst = arith.constant dense<0.000000e+00> : vector<128x128xf32>
    %4 = tpu.matmul %1, %3, %cst {dimension_numbers = #tpu.dot_dimension_numbers<[1], [0], [0], [1], [0, 0, 1, 1], [], []>} : vector<128x512xbf16>, vector<512x128xbf16>, vector<128x128xf32> -> vector<128x128xf32>
    %c0_5 = arith.constant 0 : index
    %c0_6 = arith.constant 0 : index
    %c0_7 = arith.constant 0 : index
    %5 = vector.load %arg4[%c0_5, %c0_6, %c0_7] : memref<1x1x128xf32, #tpu.memory_space<vmem>>, vector<1x1x128xf32>
    %6 = vector.shape_cast %5 : vector<1x1x128xf32> to vector<1x128xf32>
    %7 = vector.broadcast %6 : vector<1x128xf32> to vector<128x128xf32>
    %8 = arith.addf %4, %7 : vector<128x128xf32>
    %cst_8 = arith.constant 0.000000e+00 : f32
    %9 = vector.broadcast %cst_8 : f32 to vector<128x128xf32>
    %10 = arith.maximumf %8, %9 : vector<128x128xf32>
    %11 = arith.truncf %10 : vector<128x128xf32> to vector<128x128xbf16>
    %c0_9 = arith.constant 0 : index
    %c0_10 = arith.constant 0 : index
    %c0_11 = arith.constant 0 : index
    %12 = vector.load %arg5[%c0_9, %c0_10, %c0_11] : memref<1x128x128xbf16, #tpu.memory_space<vmem>>, vector<1x128x128xbf16>
    %13 = vector.shape_cast %12 : vector<1x128x128xbf16> to vector<128x128xbf16>
    %14 = vector.shape_cast %11 : vector<128x128xbf16> to vector<1x128x128xbf16>
    tpu.vector_store %arg5[%c0_9, %c0_10, %c0_11], %14 {strides = array<i32>} : memref<1x128x128xbf16, #tpu.memory_space<vmem>>, vector<1x128x128xbf16>,
    return
  }
  func.func @transform_0(%arg0: i32, %arg1: i32) -> (i32, i32, i32) {
    %c0_i32 = arith.constant 0 : i32
    %c0_i32_0 = arith.constant 0 : i32
    return %arg0, %arg1, %c0_i32 : i32, i32, i32
  }
  func.func @transform_1(%arg0: i32, %arg1: i32) -> (i32, i32, i32) {
    %c0_i32 = arith.constant 0 : i32
    %c0_i32_0 = arith.constant 0 : i32
    %c0_i32_1 = arith.constant 0 : i32
    return %arg0, %c0_i32, %c0_i32_0 : i32, i32, i32
  }
  func.func @transform_2(%arg0: i32, %arg1: i32) -> (i32, i32, i32) {
    %c0_i32 = arith.constant 0 : i32
    %c0_i32_0 = arith.constant 0 : i32
    %c0_i32_1 = arith.constant 0 : i32
    %c0_i32_2 = arith.constant 0 : i32
    return %c0_i32, %c0_i32_0, %c0_i32_1 : i32, i32, i32
  }
  func.func @transform_3(%arg0: i32, %arg1: i32) -> (i32, i32, i32) {
    %c0_i32 = arith.constant 0 : i32
    %c0_i32_0 = arith.constant 0 : i32
    return %arg0, %arg1, %c0_i32 : i32, i32, i32
  }
}

module attributes {stable_mosaic.version = 11 : i64} {
  func.func @_bmm_bias_act_kernel(%arg0: i32, %arg1: i32, %arg2: memref<1x512x256xbf16, #tpu.memory_space<vmem>>, %arg3: memref<1x256x128xbf16, #tpu.memory_space<vmem>>, %arg4: memref<1x1x128xf32, #tpu.memory_space<vmem>>, %arg5: memref<1x512x128xbf16, #tpu.memory_space<vmem>>) attributes {dimension_semantics = [#tpu.dimension_semantics<parallel>, #tpu.dimension_semantics<parallel>], iteration_bounds = array<i64: 4, 1>, scalar_prefetch = 0 : i64, scratch_operands = 0 : i64, tpu.core_type = #tpu.core_type<tc>, window_params = [{transform_indices = @transform_0, window_bounds = array<i64: 1, 512, 256>}, {transform_indices = @transform_1, window_bounds = array<i64: 1, 256, 128>}, {pipeline_mode = #tpu.pipeline_mode<synchronous>, transform_indices = @transform_2, window_bounds = array<i64: 1, 1, 128>}, {transform_indices = @transform_3, window_bounds = array<i64: 1, 512, 128>}]} {
    %c0 = arith.constant 0 : index
    %c0_0 = arith.constant 0 : index
    %c0_1 = arith.constant 0 : index
    %0 = vector.load %arg2[%c0, %c0_0, %c0_1] : memref<1x512x256xbf16, #tpu.memory_space<vmem>>, vector<1x512x256xbf16>
    %1 = vector.shape_cast %0 : vector<1x512x256xbf16> to vector<512x256xbf16>
    %c0_2 = arith.constant 0 : index
    %c0_3 = arith.constant 0 : index
    %c0_4 = arith.constant 0 : index
    %2 = vector.load %arg3[%c0_2, %c0_3, %c0_4] : memref<1x256x128xbf16, #tpu.memory_space<vmem>>, vector<1x256x128xbf16>
    %3 = vector.shape_cast %2 : vector<1x256x128xbf16> to vector<256x128xbf16>
    %cst = arith.constant dense<0.000000e+00> : vector<512x128xf32>
    %4 = tpu.matmul %1, %3, %cst {dimension_numbers = #tpu.dot_dimension_numbers<[1], [0], [0], [1], [0, 0, 1, 1], [], []>} : vector<512x256xbf16>, vector<256x128xbf16>, vector<512x128xf32> -> vector<512x128xf32>
    %c0_5 = arith.constant 0 : index
    %c0_6 = arith.constant 0 : index
    %c0_7 = arith.constant 0 : index
    %5 = vector.load %arg4[%c0_5, %c0_6, %c0_7] : memref<1x1x128xf32, #tpu.memory_space<vmem>>, vector<1x1x128xf32>
    %6 = vector.shape_cast %5 : vector<1x1x128xf32> to vector<1x128xf32>
    %7 = vector.broadcast %6 : vector<1x128xf32> to vector<512x128xf32>
    %8 = arith.addf %4, %7 : vector<512x128xf32>
    %cst_8 = arith.constant 0.000000e+00 : f32
    %9 = vector.broadcast %cst_8 : f32 to vector<512x128xf32>
    %10 = arith.maximumf %8, %9 : vector<512x128xf32>
    %11 = arith.truncf %10 : vector<512x128xf32> to vector<512x128xbf16>
    %c0_9 = arith.constant 0 : index
    %c0_10 = arith.constant 0 : index
    %c0_11 = arith.constant 0 : index
    %12 = vector.load %arg5[%c0_9, %c0_10, %c0_11] : memref<1x512x128xbf16, #tpu.memory_space<vmem>>, vector<1x512x128xbf16>
    %13 = vector.shape_cast %12 : vector<1x512x128xbf16> to vector<512x128xbf16>
    %14 = vector.shape_cast %11 : vector<512x128xbf16> to vector<1x512x128xbf16>
    tpu.vector_store %arg5[%c0_9, %c0_10, %c0_11], %14 {strides = array<i32>} : memref<1x512x128xbf16, #tpu.memory_space<vmem>>, vector<1x512x128xbf16>,
    return
  }
  func.func @transform_0(%arg0: i32, %arg1: i32) -> (i32, i32, i32) {
    %c0_i32 = arith.constant 0 : i32
    %c0_i32_0 = arith.constant 0 : i32
    return %arg0, %arg1, %c0_i32 : i32, i32, i32
  }
  func.func @transform_1(%arg0: i32, %arg1: i32) -> (i32, i32, i32) {
    %c0_i32 = arith.constant 0 : i32
    %c0_i32_0 = arith.constant 0 : i32
    %c0_i32_1 = arith.constant 0 : i32
    return %arg0, %c0_i32, %c0_i32_0 : i32, i32, i32
  }
  func.func @transform_2(%arg0: i32, %arg1: i32) -> (i32, i32, i32) {
    %c0_i32 = arith.constant 0 : i32
    %c0_i32_0 = arith.constant 0 : i32
    %c0_i32_1 = arith.constant 0 : i32
    %c0_i32_2 = arith.constant 0 : i32
    return %c0_i32, %c0_i32_0, %c0_i32_1 : i32, i32, i32
  }
  func.func @transform_3(%arg0: i32, %arg1: i32) -> (i32, i32, i32) {
    %c0_i32 = arith.constant 0 : i32
    %c0_i32_0 = arith.constant 0 : i32
    return %arg0, %arg1, %c0_i32 : i32, i32, i32
  }
}

module attributes {stable_mosaic.version = 11 : i64} {
  func.func @_bmm_bias_act_kernel(%arg0: i32, %arg1: i32, %arg2: memref<1x1024x128xbf16, #tpu.memory_space<vmem>>, %arg3: memref<1x128x3xbf16, #tpu.memory_space<vmem>>, %arg4: memref<1x1x3xf32, #tpu.memory_space<vmem>>, %arg5: memref<1x1024x3xf32, #tpu.memory_space<vmem>>) attributes {dimension_semantics = [#tpu.dimension_semantics<parallel>, #tpu.dimension_semantics<parallel>], iteration_bounds = array<i64: 4, 2>, scalar_prefetch = 0 : i64, scratch_operands = 0 : i64, tpu.core_type = #tpu.core_type<tc>, window_params = [{transform_indices = @transform_0, window_bounds = array<i64: 1, 1024, 128>}, {transform_indices = @transform_1, window_bounds = array<i64: 1, 128, 3>}, {pipeline_mode = #tpu.pipeline_mode<synchronous>, transform_indices = @transform_2, window_bounds = array<i64: 1, 1, 3>}, {transform_indices = @transform_3, window_bounds = array<i64: 1, 1024, 3>}]} {
    %c0 = arith.constant 0 : index
    %c0_0 = arith.constant 0 : index
    %c0_1 = arith.constant 0 : index
    %0 = vector.load %arg2[%c0, %c0_0, %c0_1] : memref<1x1024x128xbf16, #tpu.memory_space<vmem>>, vector<1x1024x128xbf16>
    %1 = vector.shape_cast %0 : vector<1x1024x128xbf16> to vector<1024x128xbf16>
    %c0_2 = arith.constant 0 : index
    %c0_3 = arith.constant 0 : index
    %c0_4 = arith.constant 0 : index
    %2 = vector.load %arg3[%c0_2, %c0_3, %c0_4] : memref<1x128x3xbf16, #tpu.memory_space<vmem>>, vector<1x128x3xbf16>
    %3 = vector.shape_cast %2 : vector<1x128x3xbf16> to vector<128x3xbf16>
    %cst = arith.constant dense<0.000000e+00> : vector<1024x3xf32>
    %4 = tpu.matmul %1, %3, %cst {dimension_numbers = #tpu.dot_dimension_numbers<[1], [0], [0], [1], [0, 0, 1, 1], [], []>} : vector<1024x128xbf16>, vector<128x3xbf16>, vector<1024x3xf32> -> vector<1024x3xf32>
    %c0_5 = arith.constant 0 : index
    %c0_6 = arith.constant 0 : index
    %c0_7 = arith.constant 0 : index
    %5 = vector.load %arg4[%c0_5, %c0_6, %c0_7] : memref<1x1x3xf32, #tpu.memory_space<vmem>>, vector<1x1x3xf32>
    %6 = vector.shape_cast %5 : vector<1x1x3xf32> to vector<1x3xf32>
    %7 = vector.broadcast %6 : vector<1x3xf32> to vector<1024x3xf32>
    %8 = arith.addf %4, %7 : vector<1024x3xf32>
    %9 = arith.negf %8 : vector<1024x3xf32>
    %10 = math.exp %9 : vector<1024x3xf32>
    %cst_8 = arith.constant 1.000000e+00 : f32
    %11 = vector.broadcast %cst_8 : f32 to vector<1024x3xf32>
    %12 = arith.addf %11, %10 : vector<1024x3xf32>
    %13 = arith.divf %11, %12 : vector<1024x3xf32>
    %c0_9 = arith.constant 0 : index
    %c0_10 = arith.constant 0 : index
    %c0_11 = arith.constant 0 : index
    %14 = vector.load %arg5[%c0_9, %c0_10, %c0_11] : memref<1x1024x3xf32, #tpu.memory_space<vmem>>, vector<1x1024x3xf32>
    %15 = vector.shape_cast %14 : vector<1x1024x3xf32> to vector<1024x3xf32>
    %16 = vector.shape_cast %13 : vector<1024x3xf32> to vector<1x1024x3xf32>
    tpu.vector_store %arg5[%c0_9, %c0_10, %c0_11], %16 {strides = array<i32>} : memref<1x1024x3xf32, #tpu.memory_space<vmem>>, vector<1x1024x3xf32>,
    return
  }
  func.func @transform_0(%arg0: i32, %arg1: i32) -> (i32, i32, i32) {
    %c0_i32 = arith.constant 0 : i32
    %c0_i32_0 = arith.constant 0 : i32
    return %arg0, %arg1, %c0_i32 : i32, i32, i32
  }
  func.func @transform_1(%arg0: i32, %arg1: i32) -> (i32, i32, i32) {
    %c0_i32 = arith.constant 0 : i32
    %c0_i32_0 = arith.constant 0 : i32
    %c0_i32_1 = arith.constant 0 : i32
    return %arg0, %c0_i32, %c0_i32_0 : i32, i32, i32
  }
  func.func @transform_2(%arg0: i32, %arg1: i32) -> (i32, i32, i32) {
    %c0_i32 = arith.constant 0 : i32
    %c0_i32_0 = arith.constant 0 : i32
    %c0_i32_1 = arith.constant 0 : i32
    %c0_i32_2 = arith.constant 0 : i32
    return %c0_i32, %c0_i32_0, %c0_i32_1 : i32, i32, i32
  }
  func.func @transform_3(%arg0: i32, %arg1: i32) -> (i32, i32, i32) {
    %c0_i32 = arith.constant 0 : i32
    %c0_i32_0 = arith.constant 0 : i32
    return %arg0, %arg1, %c0_i32 : i32, i32, i32
  }
}

</mosaic_0001>

<bundles_post_ra>
// kernel: vae_forward.9
= control target key start
LH: loop header
LB: loop body
LE: loop exit
PB: predicated region body
PF: predicated region fallthrough
CT: control target
= control target key end

     0   :  { %s3308_s12 = smov 0   ;;  %s3670_s0 = inlined_call_operand.vmem [shape: bf16[2048,48], index: 0, kind: input, shape index: {}]   ;;  %s3671_s1 = inlined_call_operand.vmem [shape: bf16[48,128], index: 1, kind: input, shape index: {}]   ;;  %s3672_s2 = inlined_call_operand.vmem [shape: f32[1,128], index: 2, kind: input, shape index: {}]   ;;  %s3673_s3 = inlined_call_operand.vmem [shape: bf16[2048,128], index: 3, kind: output, shape index: {}]  }
   0x1 LB: > { %s2216_s13 = sadd.s32 4294967295, %s3286_s12   ;;  %p2220_p0 = scmp.ge.s32.totalorder %s3286_s12, 1  ;;  %s3286_s12 = sphi %s3308_s12, %s13_s12  }
   0x2   : > { %p138_p1 = scmp.lt.s32.totalorder %s3286_s12, 3 }
   0x4   : > { %p139_p2 = pnand %p2220_p0, %p138_p1 }
   0x5   : > { %s2221_s16 = sshll.u32 (!%p139_p2), %s2216_s13, 7 }
   0x6   : > { %142 = sbr.rel (%p139_p2) target bundleno = 350 (0x15e), region = 32  ;;  %p163_p3 = scmp.lt.s32.totalorder (!%p139_p2), %s2221_s16, 255 }
   0xb   : > { %v3213_v0 = vld [vmem:[%s3671_s1 + $0x10] sm:$0xff]   ;;  %v3214_v1 = vld [vmem:[%s3671_s1 + $0x8] sm:$0xff]   ;;  %s3675_s16 = smov (!%p163_p3, %s2221_s16), 255  ;;  %v3215_v2 = vld [vmem:[%s3671_s1] sm:$0xff]   ;;  %vm654_vm0 = vcmask 392192  }
   0xc   : > { %3065 = vmatprep.subr.bf16.mxu0 %v3213_v0  ;;  %3199 = vmatprep.subr.bf16.mxu1 %v3213_v0  ;;  %s2222_s21 = sshll.u32 %s3675_s16, 2 }
   0xd   : > { %3066 = vmatpush3.bf16.msra.mxu0 %v3213_v0  ;;  %3202 = vmatpush3.bf16.msra.mxu1 %v3213_v0  ;;  %s3333_s24 = scalar_lea.vmem %s3670_s0, %s2222_s21  ;;  %s3481_s29 = scalar_lea.vmem %s3673_s3, %s2222_s21 }
   0xe   : > { %3067 = vmatprep.subr.bf16.mxu0 %v3214_v1  ;;  %3200 = vmatprep.subr.bf16.mxu1 %v3214_v1  ;;  %v3216_v3 = vld [vmem:[%s3333_s24] sm:$0xff]   ;;  %v3218_v5 = vld [vmem:[%s3333_s24 + $0x8] sm:$0xff]   ;;  %v3220_v7 = vld [vmem:[%s3333_s24 + $0x10] sm:$0xff]  }
   0xf   : > { %v3217_v4 = vld [vmem:[%s3333_s24 + $0x100] sm:$0xff]   ;;  %3071 = vmatprep.mubr.msk.bf16.mxu0 %vm654_vm0, %v3216_v3  ;;  %v3219_v6 = vld [vmem:[%s3333_s24 + $0x108] sm:$0xff]   ;;  %v3221_v8 = vld [vmem:[%s3333_s24 + $0x110] sm:$0xff]  }
  0x10   : > { %3135 = vmatprep.mubr.msk.bf16.mxu1 %vm654_vm0, %v3217_v4  ;;  %v3222_v9 = vld [vmem:[%s3333_s24 + $0x18] sm:$0xff]   ;;  %v3224_v11 = vld [vmem:[%s3333_s24 + $0x20] sm:$0xff]   ;;  %v3226_v13 = vld [vmem:[%s3333_s24 + $0x28] sm:$0xff]  }
  0x11   : > { %3068 = vmatpush3.bf16.msra.mxu0 %v3214_v1  ;;  %3203 = vmatpush3.bf16.msra.mxu1 %v3214_v1  ;;  %v3223_v10 = vld [vmem:[%s3333_s24 + $0x118] sm:$0xff]   ;;  %v3225_v12 = vld [vmem:[%s3333_s24 + $0x120] sm:$0xff]   ;;  %v3227_v14 = vld [vmem:[%s3333_s24 + $0x128] sm:$0xff]  }
  0x12   : > { %3069 = vmatprep.subr.bf16.mxu0 %v3215_v2  ;;  %3201 = vmatprep.subr.bf16.mxu1 %v3215_v2  ;;  %v3228_v15 = vld [vmem:[%s3333_s24 + $0x30] sm:$0xff]   ;;  %v3230_v17 = vld [vmem:[%s3333_s24 + $0x38] sm:$0xff]   ;;  %v3232_v19 = vld [vmem:[%s3333_s24 + $0x40] sm:$0xff]  }
  0x13   : > { %v3229_v16 = vld [vmem:[%s3333_s24 + $0x130] sm:$0xff]   ;;  %v3231_v18 = vld [vmem:[%s3333_s24 + $0x138] sm:$0xff]   ;;  %v3233_v20 = vld [vmem:[%s3333_s24 + $0x140] sm:$0xff]  }
  0x14   : > { %v3234_v21 = vld [vmem:[%s3333_s24 + $0x48] sm:$0xff]   ;;  %v3236_v23 = vld [vmem:[%s3333_s24 + $0x50] sm:$0xff]   ;;  %v3238_v25 = vld [vmem:[%s3333_s24 + $0x58] sm:$0xff]  }
  0x15   : > { %3070 = vmatpush3.bf16.msra.mxu0 %v3215_v2  ;;  %3204 = vmatpush3.bf16.msra.mxu1 %v3215_v2  ;;  %v3235_v22 = vld [vmem:[%s3333_s24 + $0x148] sm:$0xff]   ;;  %v3237_v24 = vld [vmem:[%s3333_s24 + $0x150] sm:$0xff]   ;;  %v3239_v26 = vld [vmem:[%s3333_s24 + $0x158] sm:$0xff]  }
  0x16   : > { %v3240_v27 = vld [vmem:[%s3333_s24 + $0x60] sm:$0xff]   ;;  %v3242_v29 = vld [vmem:[%s3333_s24 + $0x68] sm:$0xff]   ;;  %v3244_v31 = vld [vmem:[%s3333_s24 + $0x70] sm:$0xff]  }
  0x17   : > { %v3241_v28 = vld [vmem:[%s3333_s24 + $0x160] sm:$0xff]   ;;  %v3243_v30 = vld [vmem:[%s3333_s24 + $0x168] sm:$0xff]   ;;  %v3245_v32 = vld [vmem:[%s3333_s24 + $0x170] sm:$0xff]  }
  0x18   : > { %3072 = vmatmul.mubr.msk.bf16.vlgmr.msra.gmra.mxu0 %vm654_vm0, %v3218_v5  ;;  %3136 = vmatmul.mubr.msk.bf16.vlgmr.msra.gmra.mxu1 %vm654_vm0, %v3219_v6  ;;  %v3246_v33 = vld [vmem:[%s3333_s24 + $0x78] sm:$0xff]   ;;  %v3248_v35 = vld [vmem:[%s3333_s24 + $0x80] sm:$0xff]   ;;  %v3250_v37 = vld [vmem:[%s3333_s24 + $0x88] sm:$0xff]  }
  0x19   : > { %3075 = vmatprep.mubr.msk.bf16.mxu0 %vm654_vm0, %v3220_v7  ;;  %3139 = vmatprep.mubr.msk.bf16.mxu1 %vm654_vm0, %v3221_v8  ;;  %v3247_v34 = vld [vmem:[%s3333_s24 + $0x178] sm:$0xff]   ;;  %v3249_v36 = vld [vmem:[%s3333_s24 + $0x180] sm:$0xff]   ;;  %v3251_v38 = vld [vmem:[%s3333_s24 + $0x188] sm:$0xff]  }
  0x1a   : > { %v3252_v39 = vld [vmem:[%s3333_s24 + $0x90] sm:$0xff]   ;;  %v3254_v41 = vld [vmem:[%s3333_s24 + $0x98] sm:$0xff]   ;;  %v3256_v43 = vld [vmem:[%s3333_s24 + $0xa0] sm:$0xff]  }
  0x1b   : > { %v3253_v40 = vld [vmem:[%s3333_s24 + $0x190] sm:$0xff]   ;;  %v3255_v42 = vld [vmem:[%s3333_s24 + $0x198] sm:$0xff]   ;;  %v3257_v44 = vld [vmem:[%s3333_s24 + $0x1a0] sm:$0xff]  }
  0x1c   : > { %v3258_v45 = vld [vmem:[%s3333_s24 + $0xa8] sm:$0xff]   ;;  %v3260_v47 = vld [vmem:[%s3333_s24 + $0xb0] sm:$0xff]   ;;  %v3262_v49 = vld [vmem:[%s3333_s24 + $0xb8] sm:$0xff]  }
  0x1d   : > { %v3259_v46 = vld [vmem:[%s3333_s24 + $0x1a8] sm:$0xff]   ;;  %v3261_v48 = vld [vmem:[%s3333_s24 + $0x1b0] sm:$0xff]   ;;  %v3263_v50 = vld [vmem:[%s3333_s24 + $0x1b8] sm:$0xff]  }
  0x1e   : > { %v3264_v51 = vld [vmem:[%s3333_s24 + $0xc0] sm:$0xff]   ;;  %v3266_v53 = vld [vmem:[%s3333_s24 + $0xc8] sm:$0xff]   ;;  %v3268_v55 = vld [vmem:[%s3333_s24 + $0xd0] sm:$0xff]  }
  0x1f   : > { %v3265_v52 = vld [vmem:[%s3333_s24 + $0x1c0] sm:$0xff]   ;;  %v3267_v54 = vld [vmem:[%s3333_s24 + $0x1c8] sm:$0xff]   ;;  %v3269_v56 = vld [vmem:[%s3333_s24 + $0x1d0] sm:$0xff]  }
  0x20   : > { %3076 = vmatmul.mubr.msk.bf16.gmra.mxu0 %vm654_vm0, %v3222_v9  ;;  %3140 = vmatmul.mubr.msk.bf16.gmra.mxu1 %vm654_vm0, %v3223_v10  ;;  %v3270_v57 = vld [vmem:[%s3333_s24 + $0xd8] sm:$0xff]   ;;  %v3272_v59 = vld [vmem:[%s3333_s24 + $0xe0] sm:$0xff]   ;;  %v3274_v61 = vld [vmem:[%s3333_s24 + $0xe8] sm:$0xff]  }
  0x21   : > { %3079 = vmatprep.mubr.msk.bf16.mxu0 %vm654_vm0, %v3224_v11  ;;  %3143 = vmatprep.mubr.msk.bf16.mxu1 %vm654_vm0, %v3225_v12  ;;  %v3271_v58 = vld [vmem:[%s3333_s24 + $0x1d8] sm:$0xff]   ;;  %v3273_v60 = vld [vmem:[%s3333_s24 + $0x1e0] sm:$0xff]   ;;  %v3275_v62 = vld [vmem:[%s3333_s24 + $0x1e8] sm:$0xff]  }
  0x22   : > { %v3276_v63 = vld [vmem:[%s3333_s24 + $0xf0] sm:$0xff]   ;;  %v3278_v1 = vld [vmem:[%s3333_s24 + $0xf8] sm:$0xff]   ;;  %v3466_v3 = vld [vmem:[%s3672_s2] ss:$0 sm:$0xff] }
  0x23   : > { %v3277_v0 = vld [vmem:[%s3333_s24 + $0x1f0] sm:$0xff]   ;;  %v3279_v2 = vld [vmem:[%s3333_s24 + $0x1f8] sm:$0xff]  }
  0x28   : > { %3080 = vmatmul.mubr.msk.bf16.gmra.mxu0 %vm654_vm0, %v3226_v13  ;;  %3144 = vmatmul.mubr.msk.bf16.gmra.mxu1 %vm654_vm0, %v3227_v14 }
  0x29   : > { %3083 = vmatprep.mubr.msk.bf16.mxu0 %vm654_vm0, %v3228_v15  ;;  %3147 = vmatprep.mubr.msk.bf16.mxu1 %vm654_vm0, %v3229_v16 }
  0x30   : > { %3084 = vmatmul.mubr.msk.bf16.gmra.mxu0 %vm654_vm0, %v3230_v17  ;;  %3148 = vmatmul.mubr.msk.bf16.gmra.mxu1 %vm654_vm0, %v3231_v18 }
  0x31   : > { %3087 = vmatprep.mubr.msk.bf16.mxu0 %vm654_vm0, %v3232_v19  ;;  %3151 = vmatprep.mubr.msk.bf16.mxu1 %vm654_vm0, %v3233_v20 }
  0x38   : > { %3088 = vmatmul.mubr.msk.bf16.gmra.mxu0 %vm654_vm0, %v3234_v21  ;;  %3152 = vmatmul.mubr.msk.bf16.gmra.mxu1 %vm654_vm0, %v3235_v22 }
  0x39   : > { %3091 = vmatprep.mubr.msk.bf16.mxu0 %vm654_vm0, %v3236_v23  ;;  %3155 = vmatprep.mubr.msk.bf16.mxu1 %vm654_vm0, %v3237_v24 }
  0x40   : > { %3092 = vmatmul.mubr.msk.bf16.gmra.mxu0 %vm654_vm0, %v3238_v25  ;;  %3156 = vmatmul.mubr.msk.bf16.gmra.mxu1 %vm654_vm0, %v3239_v26 }
  0x41   : > { %3095 = vmatprep.mubr.msk.bf16.mxu0 %vm654_vm0, %v3240_v27  ;;  %3159 = vmatprep.mubr.msk.bf16.mxu1 %vm654_vm0, %v3241_v28 }
  0x48   : > { %3096 = vmatmul.mubr.msk.bf16.gmra.mxu0 %vm654_vm0, %v3242_v29  ;;  %3160 = vmatmul.mubr.msk.bf16.gmra.mxu1 %vm654_vm0, %v3243_v30 }
  0x49   : > { %3099 = vmatprep.mubr.msk.bf16.mxu0 %vm654_vm0, %v3244_v31  ;;  %3163 = vmatprep.mubr.msk.bf16.mxu1 %vm654_vm0, %v3245_v32 }
  0x50   : > { %3100 = vmatmul.mubr.msk.bf16.gmra.mxu0 %vm654_vm0, %v3246_v33  ;;  %3164 = vmatmul.mubr.msk.bf16.gmra.mxu1 %vm654_vm0, %v3247_v34 }
  0x51   : > { %3103 = vmatprep.mubr.msk.bf16.mxu0 %vm654_vm0, %v3248_v35  ;;  %3167 = vmatprep.mubr.msk.bf16.mxu1 %vm654_vm0, %v3249_v36 }
  0x58   : > { %3104 = vmatmul.mubr.msk.bf16.gmra.mxu0 %vm654_vm0, %v3250_v37  ;;  %3168 = vmatmul.mubr.msk.bf16.gmra.mxu1 %vm654_vm0, %v3251_v38 }
  0x59   : > { %3107 = vmatprep.mubr.msk.bf16.mxu0 %vm654_vm0, %v3252_v39  ;;  %3171 = vmatprep.mubr.msk.bf16.mxu1 %vm654_vm0, %v3253_v40 }
  0x60   : > { %3108 = vmatmul.mubr.msk.bf16.gmra.mxu0 %vm654_vm0, %v3254_v41  ;;  %3172 = vmatmul.mubr.msk.bf16.gmra.mxu1 %vm654_vm0, %v3255_v42 }
  0x61   : > { %3111 = vmatprep.mubr.msk.bf16.mxu0 %vm654_vm0, %v3256_v43  ;;  %3175 = vmatprep.mubr.msk.bf16.mxu1 %vm654_vm0, %v3257_v44 }
  0x68   : > { %3112 = vmatmul.mubr.msk.bf16.gmra.mxu0 %vm654_vm0, %v3258_v45  ;;  %3176 = vmatmul.mubr.msk.bf16.gmra.mxu1 %vm654_vm0, %v3259_v46 }
  0x69   : > { %3115 = vmatprep.mubr.msk.bf16.mxu0 %vm654_vm0, %v3260_v47  ;;  %3179 = vmatprep.mubr.msk.bf16.mxu1 %vm654_vm0, %v3261_v48 }
  0x70   : > { %3116 = vmatmul.mubr.msk.bf16.gmra.mxu0 %vm654_vm0, %v3262_v49  ;;  %3180 = vmatmul.mubr.msk.bf16.gmra.mxu1 %vm654_vm0, %v3263_v50 }
  0x71   : > { %3119 = vmatprep.mubr.msk.bf16.mxu0 %vm654_vm0, %v3264_v51  ;;  %3183 = vmatprep.mubr.msk.bf16.mxu1 %vm654_vm0, %v3265_v52 }
  0x78   : > { %3120 = vmatmul.mubr.msk.bf16.gmra.mxu0 %vm654_vm0, %v3266_v53  ;;  %3184 = vmatmul.mubr.msk.bf16.gmra.mxu1 %vm654_vm0, %v3267_v54 }
  0x79   : > { %3123 = vmatprep.mubr.msk.bf16.mxu0 %vm654_vm0, %v3268_v55  ;;  %3187 = vmatprep.mubr.msk.bf16.mxu1 %vm654_vm0, %v3269_v56 }
  0x80   : > { %3124 = vmatmul.mubr.msk.bf16.gmra.mxu0 %vm654_vm0, %v3270_v57  ;;  %3188 = vmatmul.mubr.msk.bf16.gmra.mxu1 %vm654_vm0, %v3271_v58 }
  0x81   : > { %3127 = vmatprep.mubr.msk.bf16.mxu0 %vm654_vm0, %v3272_v59  ;;  %3191 = vmatprep.mubr.msk.bf16.mxu1 %vm654_vm0, %v3273_v60 }
  0x88   : > { %3128 = vmatmul.mubr.msk.bf16.gmra.mxu0 %vm654_vm0, %v3274_v61  ;;  %3192 = vmatmul.mubr.msk.bf16.gmra.mxu1 %vm654_vm0, %v3275_v62 }
  0x89   : > { %3131 = vmatprep.mubr.msk.bf16.mxu0 %vm654_vm0, %v3276_v63  ;;  %3195 = vmatprep.mubr.msk.bf16.mxu1 %vm654_vm0, %v3277_v0 }
  0x90   : > { %3132 = vmatmul.mubr.msk.bf16.gmra.mxu0 %vm654_vm0, %v3278_v1  ;;  %3196 = vmatmul.mubr.msk.bf16.gmra.mxu1 %vm654_vm0, %v3279_v2 }
  0xd8   : > { %v3073_v4 = vpop.f32.mrf.mxu0  ;;  %v3137_v5 = vpop.f32.mrf.mxu1 }
  0xd9   : > { %v890_v6 = vadd.f32 %v3073_v4, %v3466_v3  ;;  %v1146_v7 = vadd.f32 %v3137_v5, %v3466_v3 }
  0xda   : > { %v881_v8 = vpop.f32.mrf.mxu0  ;;  %v1137_v9 = vpop.f32.mrf.mxu1 }
  0xdb   : > { %v882_v10 = vadd.f32 %v3466_v3, %v881_v8  ;;  %v1138_v11 = vadd.f32 %v3466_v3, %v1137_v9  ;;  %v1394_v16 = vmax.f32 %v890_v6, 0.0  ;;  %v1458_v17 = vmax.f32 %v1146_v7, 0.0 }
  0xdc   : > { %v3074_v12 = vpop.f32.mrf.mxu0  ;;  %v3138_v13 = vpop.f32.mrf.mxu1 }
  0xdd   : > { %v893_v14 = vadd.f32 %v3074_v12, %v3466_v3  ;;  %v1149_v15 = vadd.f32 %v3138_v13, %v3466_v3  ;;  %v1392_v24 = vmax.f32 %v882_v10, 0.0  ;;  %v1456_v25 = vmax.f32 %v1138_v11, 0.0 }
  0xde   : > { %v884_v18 = vpop.f32.mrf.mxu0  ;;  %v1140_v19 = vpop.f32.mrf.mxu1 }
  0xdf   : > { %v1395_v20 = vmax.f32 %v893_v14, 0.0  ;;  %v1459_v21 = vmax.f32 %v1149_v15, 0.0  ;;  %v885_v22 = vadd.f32 %v3466_v3, %v884_v18  ;;  %v1141_v23 = vadd.f32 %v3466_v3, %v1140_v19 }
  0xe0   : > { %v3077_v26 = vpop.f32.mrf.mxu0  ;;  %v3141_v27 = vpop.f32.mrf.mxu1 }
  0xe1   : > { %v2623_v28 = vpack.c.bf16 %v1395_v20, %v1394_v16  ;;  %v2783_v29 = vpack.c.bf16 %v1459_v21, %v1458_v17  ;;  %v1393_v30 = vmax.f32 %v885_v22, 0.0  ;;  %v1457_v31 = vmax.f32 %v1141_v23, 0.0 }
  0xe2   : > { %v906_v32 = vadd.f32 %v3077_v26, %v3466_v3  ;;  %v1162_v33 = vadd.f32 %v3141_v27, %v3466_v3  ;;  %v897_v34 = vpop.f32.mrf.mxu0  ;;  %v1153_v35 = vpop.f32.mrf.mxu1 }
  0xe3   : > { %2935 = vst [vmem:[%s3481_s29 + $0x8] sm:$0xff] %v2623_v28   ;;  %2967 = vst [vmem:[%s3481_s29 + $0x108] sm:$0xff] %v2783_v29   ;;  %v2618_v36 = vpack.c.bf16 %v1393_v30, %v1392_v24  ;;  %v2778_v37 = vpack.c.bf16 %v1457_v31, %v1456_v25  ;;  %v898_v38 = vadd.f32 %v3466_v3, %v897_v34 }
  0xe4   : > { %v1154_v39 = vadd.f32 %v3466_v3, %v1153_v35  ;;  %v3078_v40 = vpop.f32.mrf.mxu0  ;;  %v3142_v41 = vpop.f32.mrf.mxu1  ;;  %v1398_v44 = vmax.f32 %v906_v32, 0.0  ;;  %v1462_v45 = vmax.f32 %v1162_v33, 0.0 }
  0xe5   : > { %2619 = vst [vmem:[%s3481_s29] sm:$0xff] %v2618_v36   ;;  %2966 = vst [vmem:[%s3481_s29 + $0x100] sm:$0xff] %v2778_v37   ;;  %v909_v42 = vadd.f32 %v3078_v40, %v3466_v3  ;;  %v1165_v43 = vadd.f32 %v3142_v41, %v3466_v3  ;;  %v1396_v52 = vmax.f32 %v898_v38, 0.0 }
  0xe6   : > { %v900_v46 = vpop.f32.mrf.mxu0  ;;  %v1156_v47 = vpop.f32.mrf.mxu1  ;;  %v1460_v53 = vmax.f32 %v1154_v39, 0.0 }
  0xe7   : > { %v1399_v48 = vmax.f32 %v909_v42, 0.0  ;;  %v1463_v49 = vmax.f32 %v1165_v43, 0.0  ;;  %v901_v50 = vadd.f32 %v3466_v3, %v900_v46  ;;  %v1157_v51 = vadd.f32 %v3466_v3, %v1156_v47 }
  0xe8   : > { %v3081_v54 = vpop.f32.mrf.mxu0  ;;  %v3145_v55 = vpop.f32.mrf.mxu1 }
  0xe9   : > { %v2633_v56 = vpack.c.bf16 %v1399_v48, %v1398_v44  ;;  %v2793_v57 = vpack.c.bf16 %v1463_v49, %v1462_v45  ;;  %v1397_v58 = vmax.f32 %v901_v50, 0.0  ;;  %v1461_v59 = vmax.f32 %v1157_v51, 0.0 }
  0xea   : > { %v922_v60 = vadd.f32 %v3081_v54, %v3466_v3  ;;  %v1178_v61 = vadd.f32 %v3145_v55, %v3466_v3  ;;  %v913_v62 = vpop.f32.mrf.mxu0  ;;  %v1169_v63 = vpop.f32.mrf.mxu1 }
  0xeb   : > { %2937 = vst [vmem:[%s3481_s29 + $0x18] sm:$0xff] %v2633_v56   ;;  %2969 = vst [vmem:[%s3481_s29 + $0x118] sm:$0xff] %v2793_v57   ;;  %v2628_v0 = vpack.c.bf16 %v1397_v58, %v1396_v52  ;;  %v2788_v1 = vpack.c.bf16 %v1461_v59, %v1460_v53  ;;  %v914_v2 = vadd.f32 %v3466_v3, %v913_v62 }
  0xec   : > { %v1170_v4 = vadd.f32 %v3466_v3, %v1169_v63  ;;  %v3082_v5 = vpop.f32.mrf.mxu0  ;;  %v3146_v6 = vpop.f32.mrf.mxu1  ;;  %v1402_v9 = vmax.f32 %v922_v60, 0.0  ;;  %v1466_v10 = vmax.f32 %v1178_v61, 0.0 }
  0xed   : > { %2936 = vst [vmem:[%s3481_s29 + $0x10] sm:$0xff] %v2628_v0   ;;  %2968 = vst [vmem:[%s3481_s29 + $0x110] sm:$0xff] %v2788_v1   ;;  %v925_v7 = vadd.f32 %v3082_v5, %v3466_v3  ;;  %v1181_v8 = vadd.f32 %v3146_v6, %v3466_v3  ;;  %v1400_v17 = vmax.f32 %v914_v2, 0.0 }
  0xee   : > { %v916_v11 = vpop.f32.mrf.mxu0  ;;  %v1172_v12 = vpop.f32.mrf.mxu1  ;;  %v1464_v18 = vmax.f32 %v1170_v4, 0.0 }
  0xef   : > { %v1403_v13 = vmax.f32 %v925_v7, 0.0  ;;  %v1467_v14 = vmax.f32 %v1181_v8, 0.0  ;;  %v917_v15 = vadd.f32 %v3466_v3, %v916_v11  ;;  %v1173_v16 = vadd.f32 %v3466_v3, %v1172_v12 }
  0xf0   : > { %v3085_v19 = vpop.f32.mrf.mxu0  ;;  %v3149_v20 = vpop.f32.mrf.mxu1 }
  0xf1   : > { %v2643_v21 = vpack.c.bf16 %v1403_v13, %v1402_v9  ;;  %v2803_v22 = vpack.c.bf16 %v1467_v14, %v1466_v10  ;;  %v1401_v23 = vmax.f32 %v917_v15, 0.0  ;;  %v1465_v24 = vmax.f32 %v1173_v16, 0.0 }
  0xf2   : > { %v938_v25 = vadd.f32 %v3085_v19, %v3466_v3  ;;  %v1194_v26 = vadd.f32 %v3149_v20, %v3466_v3  ;;  %v929_v27 = vpop.f32.mrf.mxu0  ;;  %v1185_v28 = vpop.f32.mrf.mxu1 }
  0xf3   : > { %2939 = vst [vmem:[%s3481_s29 + $0x28] sm:$0xff] %v2643_v21   ;;  %2971 = vst [vmem:[%s3481_s29 + $0x128] sm:$0xff] %v2803_v22   ;;  %v2638_v29 = vpack.c.bf16 %v1401_v23, %v1400_v17  ;;  %v2798_v30 = vpack.c.bf16 %v1465_v24, %v1464_v18  ;;  %v930_v31 = vadd.f32 %v3466_v3, %v929_v27 }
  0xf4   : > { %v1186_v32 = vadd.f32 %v3466_v3, %v1185_v28  ;;  %v3086_v33 = vpop.f32.mrf.mxu0  ;;  %v3150_v34 = vpop.f32.mrf.mxu1  ;;  %v1406_v37 = vmax.f32 %v938_v25, 0.0  ;;  %v1470_v38 = vmax.f32 %v1194_v26, 0.0 }
  0xf5   : > { %2938 = vst [vmem:[%s3481_s29 + $0x20] sm:$0xff] %v2638_v29   ;;  %2970 = vst [vmem:[%s3481_s29 + $0x120] sm:$0xff] %v2798_v30   ;;  %v941_v35 = vadd.f32 %v3086_v33, %v3466_v3  ;;  %v1197_v36 = vadd.f32 %v3150_v34, %v3466_v3  ;;  %v1404_v45 = vmax.f32 %v930_v31, 0.0 }
  0xf6   : > { %v932_v39 = vpop.f32.mrf.mxu0  ;;  %v1188_v40 = vpop.f32.mrf.mxu1  ;;  %v1468_v46 = vmax.f32 %v1186_v32, 0.0 }
  0xf7   : > { %v1407_v41 = vmax.f32 %v941_v35, 0.0  ;;  %v1471_v42 = vmax.f32 %v1197_v36, 0.0  ;;  %v933_v43 = vadd.f32 %v3466_v3, %v932_v39  ;;  %v1189_v44 = vadd.f32 %v3466_v3, %v1188_v40 }
  0xf8   : > { %v3089_v47 = vpop.f32.mrf.mxu0  ;;  %v3153_v48 = vpop.f32.mrf.mxu1 }
  0xf9   : > { %v2653_v49 = vpack.c.bf16 %v1407_v41, %v1406_v37  ;;  %v2813_v50 = vpack.c.bf16 %v1471_v42, %v1470_v38  ;;  %v1405_v51 = vmax.f32 %v933_v43, 0.0  ;;  %v1469_v52 = vmax.f32 %v1189_v44, 0.0 }
  0xfa   : > { %v954_v53 = vadd.f32 %v3089_v47, %v3466_v3  ;;  %v1210_v54 = vadd.f32 %v3153_v48, %v3466_v3  ;;  %v945_v55 = vpop.f32.mrf.mxu0  ;;  %v1201_v56 = vpop.f32.mrf.mxu1 }
  0xfb   : > { %2941 = vst [vmem:[%s3481_s29 + $0x38] sm:$0xff] %v2653_v49   ;;  %2973 = vst [vmem:[%s3481_s29 + $0x138] sm:$0xff] %v2813_v50   ;;  %v2648_v57 = vpack.c.bf16 %v1405_v51, %v1404_v45  ;;  %v2808_v58 = vpack.c.bf16 %v1469_v52, %v1468_v46  ;;  %v946_v59 = vadd.f32 %v3466_v3, %v945_v55 }
  0xfc   : > { %v1202_v60 = vadd.f32 %v3466_v3, %v1201_v56  ;;  %v3090_v61 = vpop.f32.mrf.mxu0  ;;  %v3154_v62 = vpop.f32.mrf.mxu1  ;;  %v1410_v1 = vmax.f32 %v954_v53, 0.0  ;;  %v1474_v2 = vmax.f32 %v1210_v54, 0.0 }
  0xfd   : > { %2940 = vst [vmem:[%s3481_s29 + $0x30] sm:$0xff] %v2648_v57   ;;  %2972 = vst [vmem:[%s3481_s29 + $0x130] sm:$0xff] %v2808_v58   ;;  %v957_v63 = vadd.f32 %v3090_v61, %v3466_v3  ;;  %v1213_v0 = vadd.f32 %v3154_v62, %v3466_v3  ;;  %v1408_v10 = vmax.f32 %v946_v59, 0.0 }
  0xfe   : > { %v948_v4 = vpop.f32.mrf.mxu0  ;;  %v1204_v5 = vpop.f32.mrf.mxu1  ;;  %v1472_v11 = vmax.f32 %v1202_v60, 0.0 }
  0xff   : > { %v1411_v6 = vmax.f32 %v957_v63, 0.0  ;;  %v1475_v7 = vmax.f32 %v1213_v0, 0.0  ;;  %v949_v8 = vadd.f32 %v3466_v3, %v948_v4  ;;  %v1205_v9 = vadd.f32 %v3466_v3, %v1204_v5 }
 0x100   : > { %v3093_v12 = vpop.f32.mrf.mxu0  ;;  %v3157_v13 = vpop.f32.mrf.mxu1 }
 0x101   : > { %v2663_v14 = vpack.c.bf16 %v1411_v6, %v1410_v1  ;;  %v2823_v15 = vpack.c.bf16 %v1475_v7, %v1474_v2  ;;  %v1409_v16 = vmax.f32 %v949_v8, 0.0  ;;  %v1473_v17 = vmax.f32 %v1205_v9, 0.0 }
 0x102   : > { %v970_v18 = vadd.f32 %v3093_v12, %v3466_v3  ;;  %v1226_v19 = vadd.f32 %v3157_v13, %v3466_v3  ;;  %v961_v20 = vpop.f32.mrf.mxu0  ;;  %v1217_v21 = vpop.f32.mrf.mxu1 }
 0x103   : > { %2943 = vst [vmem:[%s3481_s29 + $0x48] sm:$0xff] %v2663_v14   ;;  %2975 = vst [vmem:[%s3481_s29 + $0x148] sm:$0xff] %v2823_v15   ;;  %v2658_v22 = vpack.c.bf16 %v1409_v16, %v1408_v10  ;;  %v2818_v23 = vpack.c.bf16 %v1473_v17, %v1472_v11  ;;  %v962_v24 = vadd.f32 %v3466_v3, %v961_v20 }
 0x104   : > { %v1218_v25 = vadd.f32 %v3466_v3, %v1217_v21  ;;  %v3094_v26 = vpop.f32.mrf.mxu0  ;;  %v3158_v27 = vpop.f32.mrf.mxu1  ;;  %v1414_v30 = vmax.f32 %v970_v18, 0.0  ;;  %v1478_v31 = vmax.f32 %v1226_v19, 0.0 }
 0x105   : > { %2942 = vst [vmem:[%s3481_s29 + $0x40] sm:$0xff] %v2658_v22   ;;  %2974 = vst [vmem:[%s3481_s29 + $0x140] sm:$0xff] %v2818_v23   ;;  %v973_v28 = vadd.f32 %v3094_v26, %v3466_v3  ;;  %v1229_v29 = vadd.f32 %v3158_v27, %v3466_v3  ;;  %v1412_v38 = vmax.f32 %v962_v24, 0.0 }
 0x106   : > { %v964_v32 = vpop.f32.mrf.mxu0  ;;  %v1220_v33 = vpop.f32.mrf.mxu1  ;;  %v1476_v39 = vmax.f32 %v1218_v25, 0.0 }
 0x107   : > { %v1415_v34 = vmax.f32 %v973_v28, 0.0  ;;  %v1479_v35 = vmax.f32 %v1229_v29, 0.0  ;;  %v965_v36 = vadd.f32 %v3466_v3, %v964_v32  ;;  %v1221_v37 = vadd.f32 %v3466_v3, %v1220_v33 }
 0x108   : > { %v3097_v40 = vpop.f32.mrf.mxu0  ;;  %v3161_v41 = vpop.f32.mrf.mxu1 }
 0x109   : > { %v2673_v42 = vpack.c.bf16 %v1415_v34, %v1414_v30  ;;  %v2833_v43 = vpack.c.bf16 %v1479_v35, %v1478_v31  ;;  %v1413_v44 = vmax.f32 %v965_v36, 0.0  ;;  %v1477_v45 = vmax.f32 %v1221_v37, 0.0 }
 0x10a   : > { %v986_v46 = vadd.f32 %v3097_v40, %v3466_v3  ;;  %v1242_v47 = vadd.f32 %v3161_v41, %v3466_v3  ;;  %v977_v48 = vpop.f32.mrf.mxu0  ;;  %v1233_v49 = vpop.f32.mrf.mxu1 }
 0x10b   : > { %2945 = vst [vmem:[%s3481_s29 + $0x58] sm:$0xff] %v2673_v42   ;;  %2977 = vst [vmem:[%s3481_s29 + $0x158] sm:$0xff] %v2833_v43   ;;  %v2668_v50 = vpack.c.bf16 %v1413_v44, %v1412_v38  ;;  %v2828_v51 = vpack.c.bf16 %v1477_v45, %v1476_v39  ;;  %v978_v52 = vadd.f32 %v3466_v3, %v977_v48 }
 0x10c   : > { %v1234_v53 = vadd.f32 %v3466_v3, %v1233_v49  ;;  %v3098_v54 = vpop.f32.mrf.mxu0  ;;  %v3162_v55 = vpop.f32.mrf.mxu1  ;;  %v1418_v58 = vmax.f32 %v986_v46, 0.0  ;;  %v1482_v59 = vmax.f32 %v1242_v47, 0.0 }
 0x10d   : > { %2944 = vst [vmem:[%s3481_s29 + $0x50] sm:$0xff] %v2668_v50   ;;  %2976 = vst [vmem:[%s3481_s29 + $0x150] sm:$0xff] %v2828_v51   ;;  %v989_v56 = vadd.f32 %v3098_v54, %v3466_v3  ;;  %v1245_v57 = vadd.f32 %v3162_v55, %v3466_v3  ;;  %v1416_v2 = vmax.f32 %v978_v52, 0.0 }
 0x10e   : > { %v980_v60 = vpop.f32.mrf.mxu0  ;;  %v1236_v61 = vpop.f32.mrf.mxu1  ;;  %v1480_v4 = vmax.f32 %v1234_v53, 0.0 }
 0x10f   : > { %v1419_v62 = vmax.f32 %v989_v56, 0.0  ;;  %v1483_v63 = vmax.f32 %v1245_v57, 0.0  ;;  %v981_v0 = vadd.f32 %v3466_v3, %v980_v60  ;;  %v1237_v1 = vadd.f32 %v3466_v3, %v1236_v61 }
 0x110   : > { %v3101_v5 = vpop.f32.mrf.mxu0  ;;  %v3165_v6 = vpop.f32.mrf.mxu1 }
 0x111   : > { %v2683_v7 = vpack.c.bf16 %v1419_v62, %v1418_v58  ;;  %v2843_v8 = vpack.c.bf16 %v1483_v63, %v1482_v59  ;;  %v1417_v9 = vmax.f32 %v981_v0, 0.0  ;;  %v1481_v10 = vmax.f32 %v1237_v1, 0.0 }
 0x112   : > { %v1002_v11 = vadd.f32 %v3101_v5, %v3466_v3  ;;  %v1258_v12 = vadd.f32 %v3165_v6, %v3466_v3  ;;  %v993_v13 = vpop.f32.mrf.mxu0  ;;  %v1249_v14 = vpop.f32.mrf.mxu1 }
 0x113   : > { %2947 = vst [vmem:[%s3481_s29 + $0x68] sm:$0xff] %v2683_v7   ;;  %2979 = vst [vmem:[%s3481_s29 + $0x168] sm:$0xff] %v2843_v8   ;;  %v2678_v15 = vpack.c.bf16 %v1417_v9, %v1416_v2  ;;  %v2838_v16 = vpack.c.bf16 %v1481_v10, %v1480_v4  ;;  %v994_v17 = vadd.f32 %v3466_v3, %v993_v13 }
 0x114   : > { %v1250_v18 = vadd.f32 %v3466_v3, %v1249_v14  ;;  %v3102_v19 = vpop.f32.mrf.mxu0  ;;  %v3166_v20 = vpop.f32.mrf.mxu1  ;;  %v1422_v23 = vmax.f32 %v1002_v11, 0.0  ;;  %v1486_v24 = vmax.f32 %v1258_v12, 0.0 }
 0x115   : > { %2946 = vst [vmem:[%s3481_s29 + $0x60] sm:$0xff] %v2678_v15   ;;  %2978 = vst [vmem:[%s3481_s29 + $0x160] sm:$0xff] %v2838_v16   ;;  %v1005_v21 = vadd.f32 %v3102_v19, %v3466_v3  ;;  %v1261_v22 = vadd.f32 %v3166_v20, %v3466_v3  ;;  %v1420_v31 = vmax.f32 %v994_v17, 0.0 }
 0x116   : > { %v996_v25 = vpop.f32.mrf.mxu0  ;;  %v1252_v26 = vpop.f32.mrf.mxu1  ;;  %v1484_v32 = vmax.f32 %v1250_v18, 0.0 }
 0x117   : > { %v1423_v27 = vmax.f32 %v1005_v21, 0.0  ;;  %v1487_v28 = vmax.f32 %v1261_v22, 0.0  ;;  %v997_v29 = vadd.f32 %v3466_v3, %v996_v25  ;;  %v1253_v30 = vadd.f32 %v3466_v3, %v1252_v26 }
 0x118   : > { %v3105_v33 = vpop.f32.mrf.mxu0  ;;  %v3169_v34 = vpop.f32.mrf.mxu1 }
 0x119   : > { %v2693_v35 = vpack.c.bf16 %v1423_v27, %v1422_v23  ;;  %v2853_v36 = vpack.c.bf16 %v1487_v28, %v1486_v24  ;;  %v1421_v37 = vmax.f32 %v997_v29, 0.0  ;;  %v1485_v38 = vmax.f32 %v1253_v30, 0.0 }
 0x11a   : > { %v1018_v39 = vadd.f32 %v3105_v33, %v3466_v3  ;;  %v1274_v40 = vadd.f32 %v3169_v34, %v3466_v3  ;;  %v1009_v41 = vpop.f32.mrf.mxu0  ;;  %v1265_v42 = vpop.f32.mrf.mxu1 }
 0x11b   : > { %2949 = vst [vmem:[%s3481_s29 + $0x78] sm:$0xff] %v2693_v35   ;;  %2981 = vst [vmem:[%s3481_s29 + $0x178] sm:$0xff] %v2853_v36   ;;  %v2688_v43 = vpack.c.bf16 %v1421_v37, %v1420_v31  ;;  %v2848_v44 = vpack.c.bf16 %v1485_v38, %v1484_v32  ;;  %v1010_v45 = vadd.f32 %v3466_v3, %v1009_v41 }
 0x11c   : > { %v1266_v46 = vadd.f32 %v3466_v3, %v1265_v42  ;;  %v3106_v47 = vpop.f32.mrf.mxu0  ;;  %v3170_v48 = vpop.f32.mrf.mxu1  ;;  %v1426_v51 = vmax.f32 %v1018_v39, 0.0  ;;  %v1490_v52 = vmax.f32 %v1274_v40, 0.0 }
 0x11d   : > { %2948 = vst [vmem:[%s3481_s29 + $0x70] sm:$0xff] %v2688_v43   ;;  %2980 = vst [vmem:[%s3481_s29 + $0x170] sm:$0xff] %v2848_v44   ;;  %v1021_v49 = vadd.f32 %v3106_v47, %v3466_v3  ;;  %v1277_v50 = vadd.f32 %v3170_v48, %v3466_v3  ;;  %v1424_v59 = vmax.f32 %v1010_v45, 0.0 }
 0x11e   : > { %v1012_v53 = vpop.f32.mrf.mxu0  ;;  %v1268_v54 = vpop.f32.mrf.mxu1  ;;  %v1488_v60 = vmax.f32 %v1266_v46, 0.0 }
 0x11f   : > { %v1427_v55 = vmax.f32 %v1021_v49, 0.0  ;;  %v1491_v56 = vmax.f32 %v1277_v50, 0.0  ;;  %v1013_v57 = vadd.f32 %v3466_v3, %v1012_v53  ;;  %v1269_v58 = vadd.f32 %v3466_v3, %v1268_v54 }
 0x120   : > { %v3109_v61 = vpop.f32.mrf.mxu0  ;;  %v3173_v62 = vpop.f32.mrf.mxu1 }
 0x121   : > { %v2703_v63 = vpack.c.bf16 %v1427_v55, %v1426_v51  ;;  %v2863_v0 = vpack.c.bf16 %v1491_v56, %v1490_v52  ;;  %v1425_v1 = vmax.f32 %v1013_v57, 0.0  ;;  %v1489_v2 = vmax.f32 %v1269_v58, 0.0 }
 0x122   : > { %v1034_v4 = vadd.f32 %v3109_v61, %v3466_v3  ;;  %v1290_v5 = vadd.f32 %v3173_v62, %v3466_v3  ;;  %v1025_v6 = vpop.f32.mrf.mxu0  ;;  %v1281_v7 = vpop.f32.mrf.mxu1 }
 0x123   : > { %2951 = vst [vmem:[%s3481_s29 + $0x88] sm:$0xff] %v2703_v63   ;;  %2983 = vst [vmem:[%s3481_s29 + $0x188] sm:$0xff] %v2863_v0   ;;  %v2698_v8 = vpack.c.bf16 %v1425_v1, %v1424_v59  ;;  %v2858_v9 = vpack.c.bf16 %v1489_v2, %v1488_v60  ;;  %v1026_v10 = vadd.f32 %v3466_v3, %v1025_v6 }
 0x124   : > { %v1282_v11 = vadd.f32 %v3466_v3, %v1281_v7  ;;  %v3110_v12 = vpop.f32.mrf.mxu0  ;;  %v3174_v13 = vpop.f32.mrf.mxu1  ;;  %v1430_v16 = vmax.f32 %v1034_v4, 0.0  ;;  %v1494_v17 = vmax.f32 %v1290_v5, 0.0 }
 0x125   : > { %2950 = vst [vmem:[%s3481_s29 + $0x80] sm:$0xff] %v2698_v8   ;;  %2982 = vst [vmem:[%s3481_s29 + $0x180] sm:$0xff] %v2858_v9   ;;  %v1037_v14 = vadd.f32 %v3110_v12, %v3466_v3  ;;  %v1293_v15 = vadd.f32 %v3174_v13, %v3466_v3  ;;  %v1428_v24 = vmax.f32 %v1026_v10, 0.0 }
 0x126   : > { %v1028_v18 = vpop.f32.mrf.mxu0  ;;  %v1284_v19 = vpop.f32.mrf.mxu1  ;;  %v1492_v25 = vmax.f32 %v1282_v11, 0.0 }
 0x127   : > { %v1431_v20 = vmax.f32 %v1037_v14, 0.0  ;;  %v1495_v21 = vmax.f32 %v1293_v15, 0.0  ;;  %v1029_v22 = vadd.f32 %v3466_v3, %v1028_v18  ;;  %v1285_v23 = vadd.f32 %v3466_v3, %v1284_v19 }
 0x128   : > { %v3113_v26 = vpop.f32.mrf.mxu0  ;;  %v3177_v27 = vpop.f32.mrf.mxu1 }
 0x129   : > { %v2713_v28 = vpack.c.bf16 %v1431_v20, %v1430_v16  ;;  %v2873_v29 = vpack.c.bf16 %v1495_v21, %v1494_v17  ;;  %v1429_v30 = vmax.f32 %v1029_v22, 0.0  ;;  %v1493_v31 = vmax.f32 %v1285_v23, 0.0 }
 0x12a   : > { %v1050_v32 = vadd.f32 %v3113_v26, %v3466_v3  ;;  %v1306_v33 = vadd.f32 %v3177_v27, %v3466_v3  ;;  %v1041_v34 = vpop.f32.mrf.mxu0  ;;  %v1297_v35 = vpop.f32.mrf.mxu1 }
 0x12b   : > { %2953 = vst [vmem:[%s3481_s29 + $0x98] sm:$0xff] %v2713_v28   ;;  %2985 = vst [vmem:[%s3481_s29 + $0x198] sm:$0xff] %v2873_v29   ;;  %v2708_v36 = vpack.c.bf16 %v1429_v30, %v1428_v24  ;;  %v2868_v37 = vpack.c.bf16 %v1493_v31, %v1492_v25  ;;  %v1042_v38 = vadd.f32 %v3466_v3, %v1041_v34 }
 0x12c   : > { %v1298_v39 = vadd.f32 %v3466_v3, %v1297_v35  ;;  %v3114_v40 = vpop.f32.mrf.mxu0  ;;  %v3178_v41 = vpop.f32.mrf.mxu1  ;;  %v1434_v44 = vmax.f32 %v1050_v32, 0.0  ;;  %v1498_v45 = vmax.f32 %v1306_v33, 0.0 }
 0x12d   : > { %2952 = vst [vmem:[%s3481_s29 + $0x90] sm:$0xff] %v2708_v36   ;;  %2984 = vst [vmem:[%s3481_s29 + $0x190] sm:$0xff] %v2868_v37   ;;  %v1053_v42 = vadd.f32 %v3114_v40, %v3466_v3  ;;  %v1309_v43 = vadd.f32 %v3178_v41, %v3466_v3  ;;  %v1432_v52 = vmax.f32 %v1042_v38, 0.0 }
 0x12e   : > { %v1044_v46 = vpop.f32.mrf.mxu0  ;;  %v1300_v47 = vpop.f32.mrf.mxu1  ;;  %v1496_v53 = vmax.f32 %v1298_v39, 0.0 }
 0x12f   : > { %v1435_v48 = vmax.f32 %v1053_v42, 0.0  ;;  %v1499_v49 = vmax.f32 %v1309_v43, 0.0  ;;  %v1045_v50 = vadd.f32 %v3466_v3, %v1044_v46  ;;  %v1301_v51 = vadd.f32 %v3466_v3, %v1300_v47 }
 0x130   : > { %v3117_v54 = vpop.f32.mrf.mxu0  ;;  %v3181_v55 = vpop.f32.mrf.mxu1 }
 0x131   : > { %v2723_v56 = vpack.c.bf16 %v1435_v48, %v1434_v44  ;;  %v2883_v57 = vpack.c.bf16 %v1499_v49, %v1498_v45  ;;  %v1433_v58 = vmax.f32 %v1045_v50, 0.0  ;;  %v1497_v59 = vmax.f32 %v1301_v51, 0.0 }
 0x132   : > { %v1066_v60 = vadd.f32 %v3117_v54, %v3466_v3  ;;  %v1322_v61 = vadd.f32 %v3181_v55, %v3466_v3  ;;  %v1057_v62 = vpop.f32.mrf.mxu0  ;;  %v1313_v63 = vpop.f32.mrf.mxu1 }
 0x133   : > { %2955 = vst [vmem:[%s3481_s29 + $0xa8] sm:$0xff] %v2723_v56   ;;  %2987 = vst [vmem:[%s3481_s29 + $0x1a8] sm:$0xff] %v2883_v57   ;;  %v2718_v0 = vpack.c.bf16 %v1433_v58, %v1432_v52  ;;  %v2878_v1 = vpack.c.bf16 %v1497_v59, %v1496_v53  ;;  %v1058_v2 = vadd.f32 %v3466_v3, %v1057_v62 }
 0x134   : > { %v1314_v4 = vadd.f32 %v3466_v3, %v1313_v63  ;;  %v3118_v5 = vpop.f32.mrf.mxu0  ;;  %v3182_v6 = vpop.f32.mrf.mxu1  ;;  %v1438_v9 = vmax.f32 %v1066_v60, 0.0  ;;  %v1502_v10 = vmax.f32 %v1322_v61, 0.0 }
 0x135   : > { %2954 = vst [vmem:[%s3481_s29 + $0xa0] sm:$0xff] %v2718_v0   ;;  %2986 = vst [vmem:[%s3481_s29 + $0x1a0] sm:$0xff] %v2878_v1   ;;  %v1069_v7 = vadd.f32 %v3118_v5, %v3466_v3  ;;  %v1325_v8 = vadd.f32 %v3182_v6, %v3466_v3  ;;  %v1436_v17 = vmax.f32 %v1058_v2, 0.0 }
 0x136   : > { %v1060_v11 = vpop.f32.mrf.mxu0  ;;  %v1316_v12 = vpop.f32.mrf.mxu1  ;;  %v1500_v18 = vmax.f32 %v1314_v4, 0.0 }
 0x137   : > { %v1439_v13 = vmax.f32 %v1069_v7, 0.0  ;;  %v1503_v14 = vmax.f32 %v1325_v8, 0.0  ;;  %v1061_v15 = vadd.f32 %v3466_v3, %v1060_v11  ;;  %v1317_v16 = vadd.f32 %v3466_v3, %v1316_v12 }
 0x138   : > { %v3121_v19 = vpop.f32.mrf.mxu0  ;;  %v3185_v20 = vpop.f32.mrf.mxu1 }
 0x139   : > { %v2733_v21 = vpack.c.bf16 %v1439_v13, %v1438_v9  ;;  %v2893_v22 = vpack.c.bf16 %v1503_v14, %v1502_v10  ;;  %v1437_v23 = vmax.f32 %v1061_v15, 0.0  ;;  %v1501_v24 = vmax.f32 %v1317_v16, 0.0 }
 0x13a   : > { %v1082_v25 = vadd.f32 %v3121_v19, %v3466_v3  ;;  %v1338_v26 = vadd.f32 %v3185_v20, %v3466_v3  ;;  %v1073_v27 = vpop.f32.mrf.mxu0  ;;  %v1329_v28 = vpop.f32.mrf.mxu1 }
 0x13b   : > { %2957 = vst [vmem:[%s3481_s29 + $0xb8] sm:$0xff] %v2733_v21   ;;  %2989 = vst [vmem:[%s3481_s29 + $0x1b8] sm:$0xff] %v2893_v22   ;;  %v2728_v29 = vpack.c.bf16 %v1437_v23, %v1436_v17  ;;  %v2888_v30 = vpack.c.bf16 %v1501_v24, %v1500_v18  ;;  %v1074_v31 = vadd.f32 %v3466_v3, %v1073_v27 }
 0x13c   : > { %v1330_v32 = vadd.f32 %v3466_v3, %v1329_v28  ;;  %v3122_v33 = vpop.f32.mrf.mxu0  ;;  %v3186_v34 = vpop.f32.mrf.mxu1  ;;  %v1442_v37 = vmax.f32 %v1082_v25, 0.0  ;;  %v1506_v38 = vmax.f32 %v1338_v26, 0.0 }
 0x13d   : > { %2956 = vst [vmem:[%s3481_s29 + $0xb0] sm:$0xff] %v2728_v29   ;;  %2988 = vst [vmem:[%s3481_s29 + $0x1b0] sm:$0xff] %v2888_v30   ;;  %v1085_v35 = vadd.f32 %v3122_v33, %v3466_v3  ;;  %v1341_v36 = vadd.f32 %v3186_v34, %v3466_v3  ;;  %v1440_v45 = vmax.f32 %v1074_v31, 0.0 }
 0x13e   : > { %v1076_v39 = vpop.f32.mrf.mxu0  ;;  %v1332_v40 = vpop.f32.mrf.mxu1  ;;  %v1504_v46 = vmax.f32 %v1330_v32, 0.0 }
 0x13f   : > { %v1443_v41 = vmax.f32 %v1085_v35, 0.0  ;;  %v1507_v42 = vmax.f32 %v1341_v36, 0.0  ;;  %v1077_v43 = vadd.f32 %v3466_v3, %v1076_v39  ;;  %v1333_v44 = vadd.f32 %v3466_v3, %v1332_v40 }
 0x140   : > { %v3125_v47 = vpop.f32.mrf.mxu0  ;;  %v3189_v48 = vpop.f32.mrf.mxu1 }
 0x141   : > { %v2743_v49 = vpack.c.bf16 %v1443_v41, %v1442_v37  ;;  %v2903_v50 = vpack.c.bf16 %v1507_v42, %v1506_v38  ;;  %v1441_v51 = vmax.f32 %v1077_v43, 0.0  ;;  %v1505_v52 = vmax.f32 %v1333_v44, 0.0 }
 0x142   : > { %v1098_v53 = vadd.f32 %v3125_v47, %v3466_v3  ;;  %v1354_v54 = vadd.f32 %v3189_v48, %v3466_v3  ;;  %v1089_v55 = vpop.f32.mrf.mxu0  ;;  %v1345_v56 = vpop.f32.mrf.mxu1 }
 0x143   : > { %2959 = vst [vmem:[%s3481_s29 + $0xc8] sm:$0xff] %v2743_v49   ;;  %2991 = vst [vmem:[%s3481_s29 + $0x1c8] sm:$0xff] %v2903_v50   ;;  %v2738_v57 = vpack.c.bf16 %v1441_v51, %v1440_v45  ;;  %v2898_v58 = vpack.c.bf16 %v1505_v52, %v1504_v46  ;;  %v1090_v59 = vadd.f32 %v3466_v3, %v1089_v55 }
 0x144   : > { %v1346_v60 = vadd.f32 %v3466_v3, %v1345_v56  ;;  %v3126_v61 = vpop.f32.mrf.mxu0  ;;  %v3190_v62 = vpop.f32.mrf.mxu1  ;;  %v1446_v1 = vmax.f32 %v1098_v53, 0.0  ;;  %v1510_v2 = vmax.f32 %v1354_v54, 0.0 }
 0x145   : > { %2958 = vst [vmem:[%s3481_s29 + $0xc0] sm:$0xff] %v2738_v57   ;;  %2990 = vst [vmem:[%s3481_s29 + $0x1c0] sm:$0xff] %v2898_v58   ;;  %v1101_v63 = vadd.f32 %v3126_v61, %v3466_v3  ;;  %v1357_v0 = vadd.f32 %v3190_v62, %v3466_v3  ;;  %v1444_v10 = vmax.f32 %v1090_v59, 0.0 }
 0x146   : > { %v1092_v4 = vpop.f32.mrf.mxu0  ;;  %v1348_v5 = vpop.f32.mrf.mxu1  ;;  %v1508_v11 = vmax.f32 %v1346_v60, 0.0 }
 0x147   : > { %v1447_v6 = vmax.f32 %v1101_v63, 0.0  ;;  %v1511_v7 = vmax.f32 %v1357_v0, 0.0  ;;  %v1093_v8 = vadd.f32 %v3466_v3, %v1092_v4  ;;  %v1349_v9 = vadd.f32 %v3466_v3, %v1348_v5 }
 0x148   : > { %v3129_v12 = vpop.f32.mrf.mxu0  ;;  %v3193_v13 = vpop.f32.mrf.mxu1 }
 0x149   : > { %v2753_v14 = vpack.c.bf16 %v1447_v6, %v1446_v1  ;;  %v2913_v15 = vpack.c.bf16 %v1511_v7, %v1510_v2  ;;  %v1445_v16 = vmax.f32 %v1093_v8, 0.0  ;;  %v1509_v17 = vmax.f32 %v1349_v9, 0.0 }
 0x14a   : > { %v1114_v18 = vadd.f32 %v3129_v12, %v3466_v3  ;;  %v1370_v19 = vadd.f32 %v3193_v13, %v3466_v3  ;;  %v1105_v20 = vpop.f32.mrf.mxu0  ;;  %v1361_v21 = vpop.f32.mrf.mxu1 }
 0x14b   : > { %2961 = vst [vmem:[%s3481_s29 + $0xd8] sm:$0xff] %v2753_v14   ;;  %2993 = vst [vmem:[%s3481_s29 + $0x1d8] sm:$0xff] %v2913_v15   ;;  %v2748_v22 = vpack.c.bf16 %v1445_v16, %v1444_v10  ;;  %v2908_v23 = vpack.c.bf16 %v1509_v17, %v1508_v11  ;;  %v1106_v24 = vadd.f32 %v3466_v3, %v1105_v20 }
 0x14c   : > { %v1362_v25 = vadd.f32 %v3466_v3, %v1361_v21  ;;  %v3130_v26 = vpop.f32.mrf.mxu0  ;;  %v3194_v27 = vpop.f32.mrf.mxu1  ;;  %v1450_v30 = vmax.f32 %v1114_v18, 0.0  ;;  %v1514_v31 = vmax.f32 %v1370_v19, 0.0 }
 0x14d   : > { %2960 = vst [vmem:[%s3481_s29 + $0xd0] sm:$0xff] %v2748_v22   ;;  %2992 = vst [vmem:[%s3481_s29 + $0x1d0] sm:$0xff] %v2908_v23   ;;  %v1117_v28 = vadd.f32 %v3130_v26, %v3466_v3  ;;  %v1373_v29 = vadd.f32 %v3194_v27, %v3466_v3  ;;  %v1448_v38 = vmax.f32 %v1106_v24, 0.0 }
 0x14e   : > { %v1108_v32 = vpop.f32.mrf.mxu0  ;;  %v1364_v33 = vpop.f32.mrf.mxu1  ;;  %v1512_v39 = vmax.f32 %v1362_v25, 0.0 }
 0x14f   : > { %v1451_v34 = vmax.f32 %v1117_v28, 0.0  ;;  %v1515_v35 = vmax.f32 %v1373_v29, 0.0  ;;  %v1109_v36 = vadd.f32 %v3466_v3, %v1108_v32  ;;  %v1365_v37 = vadd.f32 %v3466_v3, %v1364_v33 }
 0x150   : > { %v3133_v40 = vpop.f32.mrf.mxu0  ;;  %v3197_v41 = vpop.f32.mrf.mxu1 }
 0x151   : > { %v2763_v42 = vpack.c.bf16 %v1451_v34, %v1450_v30  ;;  %v2923_v43 = vpack.c.bf16 %v1515_v35, %v1514_v31  ;;  %v1449_v44 = vmax.f32 %v1109_v36, 0.0  ;;  %v1513_v45 = vmax.f32 %v1365_v37, 0.0 }
 0x152   : > { %v1130_v46 = vadd.f32 %v3133_v40, %v3466_v3  ;;  %v1386_v47 = vadd.f32 %v3197_v41, %v3466_v3  ;;  %v1121_v48 = vpop.f32.mrf.mxu0  ;;  %v1377_v49 = vpop.f32.mrf.mxu1 }
 0x153   : > { %2963 = vst [vmem:[%s3481_s29 + $0xe8] sm:$0xff] %v2763_v42   ;;  %2995 = vst [vmem:[%s3481_s29 + $0x1e8] sm:$0xff] %v2923_v43   ;;  %v2758_v50 = vpack.c.bf16 %v1449_v44, %v1448_v38  ;;  %v2918_v51 = vpack.c.bf16 %v1513_v45, %v1512_v39  ;;  %v1122_v52 = vadd.f32 %v3466_v3, %v1121_v48 }
 0x154   : > { %v1378_v53 = vadd.f32 %v3466_v3, %v1377_v49  ;;  %v3134_v54 = vpop.f32.mrf.mxu0  ;;  %v3198_v55 = vpop.f32.mrf.mxu1  ;;  %v1454_v58 = vmax.f32 %v1130_v46, 0.0  ;;  %v1518_v59 = vmax.f32 %v1386_v47, 0.0 }
 0x155   : > { %2962 = vst [vmem:[%s3481_s29 + $0xe0] sm:$0xff] %v2758_v50   ;;  %2994 = vst [vmem:[%s3481_s29 + $0x1e0] sm:$0xff] %v2918_v51   ;;  %v1133_v56 = vadd.f32 %v3134_v54, %v3466_v3  ;;  %v1389_v57 = vadd.f32 %v3198_v55, %v3466_v3  ;;  %v1452_v2 = vmax.f32 %v1122_v52, 0.0 }
 0x156   : > { %v1124_v60 = vpop.f32.mrf.mxu0  ;;  %v1380_v61 = vpop.f32.mrf.mxu1  ;;  %v1516_v4 = vmax.f32 %v1378_v53, 0.0 }
 0x157   : > { %v1455_v62 = vmax.f32 %v1133_v56, 0.0  ;;  %v1519_v63 = vmax.f32 %v1389_v57, 0.0  ;;  %v1125_v0 = vadd.f32 %v3466_v3, %v1124_v60  ;;  %v1381_v1 = vadd.f32 %v3466_v3, %v1380_v61 }
 0x159   : > { %v2773_v5 = vpack.c.bf16 %v1455_v62, %v1454_v58  ;;  %v2933_v6 = vpack.c.bf16 %v1519_v63, %v1518_v59  ;;  %v1453_v7 = vmax.f32 %v1125_v0, 0.0  ;;  %v1517_v8 = vmax.f32 %v1381_v1, 0.0 }
 0x15b   : > { %2965 = vst [vmem:[%s3481_s29 + $0xf8] sm:$0xff] %v2773_v5   ;;  %2997 = vst [vmem:[%s3481_s29 + $0x1f8] sm:$0xff] %v2933_v6   ;;  %v2768_v9 = vpack.c.bf16 %v1453_v7, %v1452_v2  ;;  %v2928_v10 = vpack.c.bf16 %v1517_v8, %v1516_v4 }
 0x15d   : > { %2964 = vst [vmem:[%s3481_s29 + $0xf0] sm:$0xff] %v2768_v9   ;;  %2996 = vst [vmem:[%s3481_s29 + $0x1f0] sm:$0xff] %v2928_v10  }
 0x15e PF: > { %s13_s12 = sadd.s32 1, %s3286_s12  }
 0x15f   : > { %p10_p4 = scmp.ge.s32.totalorder %s13_s12, 4  }
 0x161   :  { %12 = sbr.rel (!%p10_p4) target bundleno = 1 (0x1), region = 62 }

// kernel: vae_forward.10
= control target key start
LH: loop header
LB: loop body
LE: loop exit
PB: predicated region body
PF: predicated region fallthrough
CT: control target
= control target key end

     0   :  { %v2718_v0 = vmov 0   ;;  %s3412_s1 = inlined_call_operand.vmem [shape: bf16[512,128], index: 1, kind: input, shape index: {}]   ;;  %s3413_s0 = inlined_call_operand.vmem [shape: bf16[512,512], index: 0, kind: input, shape index: {}]   ;;  %s3414_s2 = inlined_call_operand.vmem [shape: f32[1,128], index: 2, kind: input, shape index: {}]   ;;  %s3415_s3 = inlined_call_operand.vmem [shape: bf16[512,128], index: 3, kind: output, shape index: {}]  }
   0x1   :  { %1046 = vmatprep.subr.bf16.mxu0 %v2718_v0  ;;  %1335 = vmatprep.subr.bf16.mxu1 %v2718_v0  ;;  %v2493_v1 = vld [vmem:[%s3412_s1 + $0x38] sm:$0xff]   ;;  %v2495_v3 = vld [vmem:[%s3412_s1 + $0x30] sm:$0xff]   ;;  %v2497_v5 = vld [vmem:[%s3412_s1 + $0x28] sm:$0xff]  }
   0x2   :  { %v2494_v2 = vld [vmem:[%s3412_s1 + $0xb8] sm:$0xff]   ;;  %1047 = vmatpush1.bf16.msra.mxu0 %v2493_v1  ;;  %v2496_v4 = vld [vmem:[%s3412_s1 + $0xb0] sm:$0xff]   ;;  %v2498_v6 = vld [vmem:[%s3412_s1 + $0xa8] sm:$0xff]  }
   0x3   :  { %1336 = vmatpush1.bf16.msra.mxu1 %v2494_v2  ;;  %1048 = vmatprep.subr.bf16.mxu0 %v2718_v0  ;;  %v2499_v7 = vld [vmem:[%s3412_s1 + $0x20] sm:$0xff]   ;;  %v2501_v9 = vld [vmem:[%s3412_s1 + $0x18] sm:$0xff]   ;;  %v2503_v11 = vld [vmem:[%s3412_s1 + $0x10] sm:$0xff]  }
   0x4   :  { %1337 = vmatprep.subr.bf16.mxu1 %v2718_v0  ;;  %v2500_v8 = vld [vmem:[%s3412_s1 + $0xa0] sm:$0xff]   ;;  %v2502_v10 = vld [vmem:[%s3412_s1 + $0x98] sm:$0xff]   ;;  %v2504_v12 = vld [vmem:[%s3412_s1 + $0x90] sm:$0xff]  }
   0x5   :  { %v2505_v13 = vld [vmem:[%s3412_s1 + $0x8] sm:$0xff]   ;;  %v2507_v15 = vld [vmem:[%s3412_s1] sm:$0xff]   ;;  %v2509_v17 = vld [vmem:[%s3412_s1 + $0x78] sm:$0xff]  }
   0x6   :  { %1049 = vmatpush1.bf16.msra.mxu0 %v2495_v3  ;;  %v2506_v14 = vld [vmem:[%s3412_s1 + $0x88] sm:$0xff]   ;;  %v2508_v16 = vld [vmem:[%s3412_s1 + $0x80] sm:$0xff]   ;;  %v2510_v18 = vld [vmem:[%s3412_s1 + $0xf8] sm:$0xff]  }
   0x7   :  { %1338 = vmatpush1.bf16.msra.mxu1 %v2496_v4  ;;  %1050 = vmatprep.subr.bf16.mxu0 %v2718_v0  ;;  %v2527_v19 = vld [vmem:[%s3413_s0 + $0x4] ss:$16 sps:$4 sm:$0xff]   ;;  %v2530_v21 = vld [vmem:[%s3413_s0 + $0xc] ss:$16 sps:$4 sm:$0xff]   ;;  %v2525_v35 = vld [vmem:[%s3413_s0] ss:$16 sps:$4 sm:$0xff]  }
   0x8   :  { %1339 = vmatprep.subr.bf16.mxu1 %v2718_v0  ;;  %v2511_v20 = vld [vmem:[%s3412_s1 + $0x70] sm:$0xff]   ;;  %1078 = vmatprep.mubr.bf16.mxu0 %v2527_v19  ;;  %v2513_v23 = vld [vmem:[%s3412_s1 + $0x68] sm:$0xff]   ;;  %v2515_v25 = vld [vmem:[%s3412_s1 + $0x60] sm:$0xff]  }
   0x9   :  { %v2512_v22 = vld [vmem:[%s3412_s1 + $0xf0] sm:$0xff]   ;;  %1367 = vmatprep.mubr.bf16.mxu1 %v2530_v21  ;;  %v2514_v24 = vld [vmem:[%s3412_s1 + $0xe8] sm:$0xff]   ;;  %v2516_v26 = vld [vmem:[%s3412_s1 + $0xe0] sm:$0xff]  }
   0xa   :  { %1051 = vmatpush1.bf16.msra.mxu0 %v2497_v5  ;;  %v2517_v27 = vld [vmem:[%s3412_s1 + $0x58] sm:$0xff]   ;;  %v2519_v29 = vld [vmem:[%s3412_s1 + $0x50] sm:$0xff]   ;;  %v2521_v31 = vld [vmem:[%s3412_s1 + $0x48] sm:$0xff]  }
   0xb   :  { %1340 = vmatpush1.bf16.msra.mxu1 %v2498_v6  ;;  %1052 = vmatprep.subr.bf16.mxu0 %v2718_v0  ;;  %v2518_v28 = vld [vmem:[%s3412_s1 + $0xd8] sm:$0xff]   ;;  %v2520_v30 = vld [vmem:[%s3412_s1 + $0xd0] sm:$0xff]   ;;  %v2522_v32 = vld [vmem:[%s3412_s1 + $0xc8] sm:$0xff]  }
   0xc   :  { %1341 = vmatprep.subr.bf16.mxu1 %v2718_v0  ;;  %v2523_v33 = vld [vmem:[%s3412_s1 + $0x40] sm:$0xff]   ;;  %v2528_v36 = vld [vmem:[%s3413_s0 + $0x8] ss:$16 sps:$4 sm:$0xff]   ;;  %v2533_v38 = vld [vmem:[%s3413_s0 + $0x2c] ss:$16 sps:$4 sm:$0xff]  }
   0xd   :  { %v2524_v34 = vld [vmem:[%s3412_s1 + $0xc0] sm:$0xff]   ;;  %v2536_v40 = vld [vmem:[%s3413_s0 + $0x28] ss:$16 sps:$4 sm:$0xff]   ;;  %v2539_v42 = vld [vmem:[%s3413_s0 + $0x4c] ss:$16 sps:$4 sm:$0xff]  }
   0xe   :  { %1053 = vmatpush1.bf16.msra.mxu0 %v2499_v7  ;;  %v2531_v37 = vld [vmem:[%s3413_s0 + $0x24] ss:$16 sps:$4 sm:$0xff]   ;;  %v2535_v39 = vld [vmem:[%s3413_s0 + $0x20] ss:$16 sps:$4 sm:$0xff]   ;;  %v2542_v44 = vld [vmem:[%s3413_s0 + $0x48] ss:$16 sps:$4 sm:$0xff]  }
   0xf   :  { %1342 = vmatpush1.bf16.msra.mxu1 %v2500_v8  ;;  %1054 = vmatprep.subr.bf16.mxu0 %v2718_v0  ;;  %v2537_v41 = vld [vmem:[%s3413_s0 + $0x44] ss:$16 sps:$4 sm:$0xff]   ;;  %v2541_v43 = vld [vmem:[%s3413_s0 + $0x40] ss:$16 sps:$4 sm:$0xff]   ;;  %v2545_v46 = vld [vmem:[%s3413_s0 + $0x6c] ss:$16 sps:$4 sm:$0xff]  }
  0x10   :  { %1343 = vmatprep.subr.bf16.mxu1 %v2718_v0  ;;  %v2543_v45 = vld [vmem:[%s3413_s0 + $0x64] ss:$16 sps:$4 sm:$0xff]   ;;  %v2547_v47 = vld [vmem:[%s3413_s0 + $0x60] ss:$16 sps:$4 sm:$0xff]   ;;  %v2548_v48 = vld [vmem:[%s3413_s0 + $0x68] ss:$16 sps:$4 sm:$0xff]  }
  0x11   :  { %v2549_v49 = vld [vmem:[%s3413_s0 + $0x84] ss:$16 sps:$4 sm:$0xff]   ;;  %v2551_v50 = vld [vmem:[%s3413_s0 + $0x8c] ss:$16 sps:$4 sm:$0xff]   ;;  %v2553_v51 = vld [vmem:[%s3413_s0 + $0x80] ss:$16 sps:$4 sm:$0xff]  }
  0x12   :  { %1055 = vmatpush1.bf16.msra.mxu0 %v2501_v9  ;;  %v2554_v52 = vld [vmem:[%s3413_s0 + $0x88] ss:$16 sps:$4 sm:$0xff]   ;;  %v2555_v53 = vld [vmem:[%s3413_s0 + $0xa4] ss:$16 sps:$4 sm:$0xff]   ;;  %v2557_v54 = vld [vmem:[%s3413_s0 + $0xac] ss:$16 sps:$4 sm:$0xff]  }
  0x13   :  { %1344 = vmatpush1.bf16.msra.mxu1 %v2502_v10  ;;  %1056 = vmatprep.subr.bf16.mxu0 %v2718_v0  ;;  %v2559_v55 = vld [vmem:[%s3413_s0 + $0xa0] ss:$16 sps:$4 sm:$0xff]   ;;  %v2560_v56 = vld [vmem:[%s3413_s0 + $0xa8] ss:$16 sps:$4 sm:$0xff]   ;;  %v2561_v57 = vld [vmem:[%s3413_s0 + $0xc4] ss:$16 sps:$4 sm:$0xff]  }
  0x14   :  { %1345 = vmatprep.subr.bf16.mxu1 %v2718_v0  ;;  %v2563_v58 = vld [vmem:[%s3413_s0 + $0xcc] ss:$16 sps:$4 sm:$0xff]   ;;  %v2565_v59 = vld [vmem:[%s3413_s0 + $0xc0] ss:$16 sps:$4 sm:$0xff]   ;;  %v2566_v60 = vld [vmem:[%s3413_s0 + $0xc8] ss:$16 sps:$4 sm:$0xff]  }
  0x15   :  { %v2567_v61 = vld [vmem:[%s3413_s0 + $0xe4] ss:$16 sps:$4 sm:$0xff]   ;;  %v2569_v62 = vld [vmem:[%s3413_s0 + $0xec] ss:$16 sps:$4 sm:$0xff]   ;;  %v2571_v63 = vld [vmem:[%s3413_s0 + $0xe0] ss:$16 sps:$4 sm:$0xff]  }
  0x16   :  { %1057 = vmatpush1.bf16.msra.mxu0 %v2503_v11  ;;  %v2573_v1 = vld [vmem:[%s3413_s0 + $0x104] ss:$16 sps:$4 sm:$0xff]   ;;  %v2575_v2 = vld [vmem:[%s3413_s0 + $0x10c] ss:$16 sps:$4 sm:$0xff]   ;;  %v2577_v3 = vld [vmem:[%s3413_s0 + $0x100] ss:$16 sps:$4 sm:$0xff]  }
  0x17   :  { %1346 = vmatpush1.bf16.msra.mxu1 %v2504_v12  ;;  %1058 = vmatprep.subr.bf16.mxu0 %v2718_v0  ;;  %v2578_v4 = vld [vmem:[%s3413_s0 + $0x108] ss:$16 sps:$4 sm:$0xff]   ;;  %v2579_v5 = vld [vmem:[%s3413_s0 + $0x124] ss:$16 sps:$4 sm:$0xff]   ;;  %v2581_v6 = vld [vmem:[%s3413_s0 + $0x12c] ss:$16 sps:$4 sm:$0xff]  }
  0x18   :  { %1347 = vmatprep.subr.bf16.mxu1 %v2718_v0  ;;  %v2583_v7 = vld [vmem:[%s3413_s0 + $0x120] ss:$16 sps:$4 sm:$0xff]   ;;  %v2584_v8 = vld [vmem:[%s3413_s0 + $0x128] ss:$16 sps:$4 sm:$0xff]   ;;  %v2585_v9 = vld [vmem:[%s3413_s0 + $0x144] ss:$16 sps:$4 sm:$0xff]  }
  0x19   :  { %v2587_v10 = vld [vmem:[%s3413_s0 + $0x14c] ss:$16 sps:$4 sm:$0xff]   ;;  %v2589_v11 = vld [vmem:[%s3413_s0 + $0x140] ss:$16 sps:$4 sm:$0xff]   ;;  %v2590_v12 = vld [vmem:[%s3413_s0 + $0x148] ss:$16 sps:$4 sm:$0xff]  }
  0x1a   :  { %1059 = vmatpush1.bf16.msra.mxu0 %v2505_v13  ;;  %v2591_v13 = vld [vmem:[%s3413_s0 + $0x164] ss:$16 sps:$4 sm:$0xff]   ;;  %v2601_v19 = vld [vmem:[%s3413_s0 + $0x180] ss:$16 sps:$4 sm:$0xff]  }
  0x1b   :  { %1348 = vmatpush1.bf16.msra.mxu1 %v2506_v14  ;;  %1060 = vmatprep.subr.bf16.mxu0 %v2718_v0  ;;  %v2593_v14 = vld [vmem:[%s3413_s0 + $0x16c] ss:$16 sps:$4 sm:$0xff]   ;;  %v2603_v21 = vld [vmem:[%s3413_s0 + $0x1a4] ss:$16 sps:$4 sm:$0xff]  }
  0x1c   :  { %1349 = vmatprep.subr.bf16.mxu1 %v2718_v0 }
  0x1e   :  { %1061 = vmatpush1.bf16.msra.mxu0 %v2507_v15  ;;  %v2595_v15 = vld [vmem:[%s3413_s0 + $0x160] ss:$16 sps:$4 sm:$0xff]  }
  0x1f   :  { %1350 = vmatpush1.bf16.msra.mxu1 %v2508_v16  ;;  %1062 = vmatprep.subr.bf16.mxu0 %v2718_v0  ;;  %v2596_v16 = vld [vmem:[%s3413_s0 + $0x168] ss:$16 sps:$4 sm:$0xff]  }
  0x20   :  { %1351 = vmatprep.subr.bf16.mxu1 %v2718_v0 }
  0x22   :  { %1063 = vmatpush2.bf16.msra.mxu0 %v2509_v17  ;;  %v2597_v17 = vld [vmem:[%s3413_s0 + $0x184] ss:$16 sps:$4 sm:$0xff]  }
  0x23   :  { %1352 = vmatpush2.bf16.msra.mxu1 %v2510_v18  ;;  %1064 = vmatprep.subr.bf16.mxu0 %v2718_v0  ;;  %v2599_v18 = vld [vmem:[%s3413_s0 + $0x18c] ss:$16 sps:$4 sm:$0xff]  }
  0x24   :  { %1353 = vmatprep.subr.bf16.mxu1 %v2718_v0 }
  0x26   :  { %1065 = vmatpush2.bf16.msra.mxu0 %v2511_v20  ;;  %v2602_v20 = vld [vmem:[%s3413_s0 + $0x188] ss:$16 sps:$4 sm:$0xff]  }
  0x27   :  { %1354 = vmatpush2.bf16.msra.mxu1 %v2512_v22  ;;  %1066 = vmatprep.subr.bf16.mxu0 %v2718_v0  ;;  %v2605_v22 = vld [vmem:[%s3413_s0 + $0x1ac] ss:$16 sps:$4 sm:$0xff]  }
  0x28   :  { %1355 = vmatprep.subr.bf16.mxu1 %v2718_v0 }
  0x2a   :  { %1067 = vmatpush2.bf16.msra.mxu0 %v2513_v23  ;;  %v2607_v23 = vld [vmem:[%s3413_s0 + $0x1a0] ss:$16 sps:$4 sm:$0xff]  }
  0x2b   :  { %1356 = vmatpush2.bf16.msra.mxu1 %v2514_v24  ;;  %1068 = vmatprep.subr.bf16.mxu0 %v2718_v0  ;;  %v2608_v24 = vld [vmem:[%s3413_s0 + $0x1a8] ss:$16 sps:$4 sm:$0xff]  }
  0x2c   :  { %1357 = vmatprep.subr.bf16.mxu1 %v2718_v0 }
  0x2e   :  { %1069 = vmatpush2.bf16.msra.mxu0 %v2515_v25  ;;  %v2609_v25 = vld [vmem:[%s3413_s0 + $0x1c4] ss:$16 sps:$4 sm:$0xff]  }
  0x2f   :  { %1358 = vmatpush2.bf16.msra.mxu1 %v2516_v26  ;;  %1070 = vmatprep.subr.bf16.mxu0 %v2718_v0  ;;  %v2611_v26 = vld [vmem:[%s3413_s0 + $0x1cc] ss:$16 sps:$4 sm:$0xff]  }
  0x30   :  { %1359 = vmatprep.subr.bf16.mxu1 %v2718_v0 }
  0x32   :  { %1071 = vmatpush2.bf16.msra.mxu0 %v2517_v27  ;;  %v2613_v27 = vld [vmem:[%s3413_s0 + $0x1c0] ss:$16 sps:$4 sm:$0xff]  }
  0x33   :  { %1360 = vmatpush2.bf16.msra.mxu1 %v2518_v28  ;;  %1072 = vmatprep.subr.bf16.mxu0 %v2718_v0  ;;  %v2614_v28 = vld [vmem:[%s3413_s0 + $0x1c8] ss:$16 sps:$4 sm:$0xff]  }
  0x34   :  { %1361 = vmatprep.subr.bf16.mxu1 %v2718_v0 }
  0x36   :  { %1073 = vmatpush2.bf16.msra.mxu0 %v2519_v29  ;;  %v2615_v29 = vld [vmem:[%s3413_s0 + $0x1e4] ss:$16 sps:$4 sm:$0xff]  }
  0x37   :  { %1362 = vmatpush2.bf16.msra.mxu1 %v2520_v30  ;;  %1074 = vmatprep.subr.bf16.mxu0 %v2718_v0  ;;  %v2617_v30 = vld [vmem:[%s3413_s0 + $0x1ec] ss:$16 sps:$4 sm:$0xff]  }
  0x38   :  { %1363 = vmatprep.subr.bf16.mxu1 %v2718_v0 }
  0x3a   :  { %1075 = vmatpush2.bf16.msra.mxu0 %v2521_v31  ;;  %v2619_v31 = vld [vmem:[%s3413_s0 + $0x1e0] ss:$16 sps:$4 sm:$0xff]  }
  0x3b   :  { %1364 = vmatpush2.bf16.msra.mxu1 %v2522_v32  ;;  %1076 = vmatprep.subr.bf16.mxu0 %v2718_v0  ;;  %v2620_v32 = vld [vmem:[%s3413_s0 + $0x1e8] ss:$16 sps:$4 sm:$0xff]  }
  0x3c   :  { %1365 = vmatprep.subr.bf16.mxu1 %v2718_v0  ;;  %v2572_v0 = vld [vmem:[%s3413_s0 + $0xe8] ss:$16 sps:$4 sm:$0xff]  }
  0x3e   :  { %1077 = vmatpush2.bf16.msra.mxu0 %v2523_v33  ;;  %v2621_v33 = vld [vmem:[%s3413_s0 + $0x204] ss:$16 sps:$4 sm:$0xff]  }
  0x3f   :  { %1366 = vmatpush2.bf16.msra.mxu1 %v2524_v34  ;;  %v2623_v34 = vld [vmem:[%s3413_s0 + $0x20c] ss:$16 sps:$4 sm:$0xff]  }
  0x41   :  { %1079 = vmatmul.mubr.bf16.vlgmr.msra.gmra.mxu0 %v2525_v35  ;;  %v2625_v35 = vld [vmem:[%s3413_s0 + $0x200] ss:$16 sps:$4 sm:$0xff]  }
  0x42   :  { %1368 = vmatmul.mubr.bf16.vlgmr.msra.gmra.mxu1 %v2528_v36  ;;  %1086 = vmatprep.mubr.bf16.mxu0 %v2531_v37  ;;  %v2626_v36 = vld [vmem:[%s3413_s0 + $0x208] ss:$16 sps:$4 sm:$0xff]   ;;  %v2627_v37 = vld [vmem:[%s3413_s0 + $0x224] ss:$16 sps:$4 sm:$0xff]  }
  0x43   :  { %1375 = vmatprep.mubr.bf16.mxu1 %v2533_v38  ;;  %v2629_v38 = vld [vmem:[%s3413_s0 + $0x22c] ss:$16 sps:$4 sm:$0xff]  }
  0x49   :  { %1087 = vmatmul.mubr.bf16.gmra.mxu0 %v2535_v39  ;;  %v2631_v39 = vld [vmem:[%s3413_s0 + $0x220] ss:$16 sps:$4 sm:$0xff]  }
  0x4a   :  { %1376 = vmatmul.mubr.bf16.gmra.mxu1 %v2536_v40  ;;  %1094 = vmatprep.mubr.bf16.mxu0 %v2537_v41  ;;  %v2632_v40 = vld [vmem:[%s3413_s0 + $0x228] ss:$16 sps:$4 sm:$0xff]   ;;  %v2633_v41 = vld [vmem:[%s3413_s0 + $0x244] ss:$16 sps:$4 sm:$0xff]  }
  0x4b   :  { %1383 = vmatprep.mubr.bf16.mxu1 %v2539_v42  ;;  %v2635_v42 = vld [vmem:[%s3413_s0 + $0x24c] ss:$16 sps:$4 sm:$0xff]  }
  0x51   :  { %1095 = vmatmul.mubr.bf16.gmra.mxu0 %v2541_v43  ;;  %v2637_v43 = vld [vmem:[%s3413_s0 + $0x240] ss:$16 sps:$4 sm:$0xff]  }
  0x52   :  { %1384 = vmatmul.mubr.bf16.gmra.mxu1 %v2542_v44  ;;  %1102 = vmatprep.mubr.bf16.mxu0 %v2543_v45  ;;  %v2638_v44 = vld [vmem:[%s3413_s0 + $0x248] ss:$16 sps:$4 sm:$0xff]   ;;  %v2639_v45 = vld [vmem:[%s3413_s0 + $0x264] ss:$16 sps:$4 sm:$0xff]  }
  0x53   :  { %1391 = vmatprep.mubr.bf16.mxu1 %v2545_v46  ;;  %v2641_v46 = vld [vmem:[%s3413_s0 + $0x26c] ss:$16 sps:$4 sm:$0xff]  }
  0x59   :  { %1103 = vmatmul.mubr.bf16.gmra.mxu0 %v2547_v47  ;;  %v2643_v47 = vld [vmem:[%s3413_s0 + $0x260] ss:$16 sps:$4 sm:$0xff]  }
  0x5a   :  { %1392 = vmatmul.mubr.bf16.gmra.mxu1 %v2548_v48  ;;  %1110 = vmatprep.mubr.bf16.mxu0 %v2549_v49  ;;  %v2644_v48 = vld [vmem:[%s3413_s0 + $0x268] ss:$16 sps:$4 sm:$0xff]   ;;  %v2645_v49 = vld [vmem:[%s3413_s0 + $0x284] ss:$16 sps:$4 sm:$0xff]  }
  0x5b   :  { %1399 = vmatprep.mubr.bf16.mxu1 %v2551_v50  ;;  %v2647_v50 = vld [vmem:[%s3413_s0 + $0x28c] ss:$16 sps:$4 sm:$0xff]  }
  0x61   :  { %1111 = vmatmul.mubr.bf16.gmra.mxu0 %v2553_v51  ;;  %v2649_v51 = vld [vmem:[%s3413_s0 + $0x280] ss:$16 sps:$4 sm:$0xff]  }
  0x62   :  { %1400 = vmatmul.mubr.bf16.gmra.mxu1 %v2554_v52  ;;  %1118 = vmatprep.mubr.bf16.mxu0 %v2555_v53  ;;  %v2650_v52 = vld [vmem:[%s3413_s0 + $0x288] ss:$16 sps:$4 sm:$0xff]   ;;  %v2651_v53 = vld [vmem:[%s3413_s0 + $0x2a4] ss:$16 sps:$4 sm:$0xff]  }
  0x63   :  { %1407 = vmatprep.mubr.bf16.mxu1 %v2557_v54  ;;  %v2653_v54 = vld [vmem:[%s3413_s0 + $0x2ac] ss:$16 sps:$4 sm:$0xff]  }
  0x69   :  { %1119 = vmatmul.mubr.bf16.gmra.mxu0 %v2559_v55  ;;  %v2655_v55 = vld [vmem:[%s3413_s0 + $0x2a0] ss:$16 sps:$4 sm:$0xff]  }
  0x6a   :  { %1408 = vmatmul.mubr.bf16.gmra.mxu1 %v2560_v56  ;;  %1126 = vmatprep.mubr.bf16.mxu0 %v2561_v57  ;;  %v2656_v56 = vld [vmem:[%s3413_s0 + $0x2a8] ss:$16 sps:$4 sm:$0xff]   ;;  %v2657_v57 = vld [vmem:[%s3413_s0 + $0x2c4] ss:$16 sps:$4 sm:$0xff]  }
  0x6b   :  { %1415 = vmatprep.mubr.bf16.mxu1 %v2563_v58  ;;  %v2659_v58 = vld [vmem:[%s3413_s0 + $0x2cc] ss:$16 sps:$4 sm:$0xff]  }
  0x71   :  { %1127 = vmatmul.mubr.bf16.gmra.mxu0 %v2565_v59  ;;  %v2661_v59 = vld [vmem:[%s3413_s0 + $0x2c0] ss:$16 sps:$4 sm:$0xff]  }
  0x72   :  { %1416 = vmatmul.mubr.bf16.gmra.mxu1 %v2566_v60  ;;  %1134 = vmatprep.mubr.bf16.mxu0 %v2567_v61  ;;  %v2662_v60 = vld [vmem:[%s3413_s0 + $0x2c8] ss:$16 sps:$4 sm:$0xff]   ;;  %v2663_v61 = vld [vmem:[%s3413_s0 + $0x2e4] ss:$16 sps:$4 sm:$0xff]  }
  0x73   :  { %1423 = vmatprep.mubr.bf16.mxu1 %v2569_v62  ;;  %v2665_v62 = vld [vmem:[%s3413_s0 + $0x2ec] ss:$16 sps:$4 sm:$0xff]  }
  0x79   :  { %1135 = vmatmul.mubr.bf16.gmra.mxu0 %v2571_v63  ;;  %v2667_v63 = vld [vmem:[%s3413_s0 + $0x2e0] ss:$16 sps:$4 sm:$0xff]  }
  0x7a   :  { %1424 = vmatmul.mubr.bf16.gmra.mxu1 %v2572_v0  ;;  %1142 = vmatprep.mubr.bf16.mxu0 %v2573_v1  ;;  %v2668_v0 = vld [vmem:[%s3413_s0 + $0x2e8] ss:$16 sps:$4 sm:$0xff]   ;;  %v2669_v1 = vld [vmem:[%s3413_s0 + $0x304] ss:$16 sps:$4 sm:$0xff]  }
  0x7b   :  { %1431 = vmatprep.mubr.bf16.mxu1 %v2575_v2  ;;  %v2671_v2 = vld [vmem:[%s3413_s0 + $0x30c] ss:$16 sps:$4 sm:$0xff]  }
  0x81   :  { %1143 = vmatmul.mubr.bf16.gmra.mxu0 %v2577_v3  ;;  %v2673_v3 = vld [vmem:[%s3413_s0 + $0x300] ss:$16 sps:$4 sm:$0xff]  }
  0x82   :  { %1432 = vmatmul.mubr.bf16.gmra.mxu1 %v2578_v4  ;;  %1150 = vmatprep.mubr.bf16.mxu0 %v2579_v5  ;;  %v2674_v4 = vld [vmem:[%s3413_s0 + $0x308] ss:$16 sps:$4 sm:$0xff]   ;;  %v2675_v5 = vld [vmem:[%s3413_s0 + $0x324] ss:$16 sps:$4 sm:$0xff]  }
  0x83   :  { %1439 = vmatprep.mubr.bf16.mxu1 %v2581_v6  ;;  %v3173_v6 = vld [vmem:[%s3414_s2] ss:$0 sm:$0xff] }
  0x89   :  { %1151 = vmatmul.mubr.bf16.gmra.mxu0 %v2583_v7  ;;  %v2677_v7 = vld [vmem:[%s3413_s0 + $0x32c] ss:$16 sps:$4 sm:$0xff]  }
  0x8a   :  { %1440 = vmatmul.mubr.bf16.gmra.mxu1 %v2584_v8  ;;  %1158 = vmatprep.mubr.bf16.mxu0 %v2585_v9 }
  0x8b   :  { %1447 = vmatprep.mubr.bf16.mxu1 %v2587_v10 }
  0x91   :  { %1159 = vmatmul.mubr.bf16.gmra.mxu0 %v2589_v11 }
  0x92   :  { %1448 = vmatmul.mubr.bf16.gmra.mxu1 %v2590_v12  ;;  %1166 = vmatprep.mubr.bf16.mxu0 %v2591_v13 }
  0x93   :  { %1455 = vmatprep.mubr.bf16.mxu1 %v2593_v14  ;;  %v2679_v14 = vld [vmem:[%s3413_s0 + $0x320] ss:$16 sps:$4 sm:$0xff]  }
  0x99   :  { %1167 = vmatmul.mubr.bf16.gmra.mxu0 %v2595_v15 }
  0x9a   :  { %1456 = vmatmul.mubr.bf16.gmra.mxu1 %v2596_v16  ;;  %1174 = vmatprep.mubr.bf16.mxu0 %v2597_v17 }
  0x9b   :  { %1463 = vmatprep.mubr.bf16.mxu1 %v2599_v18  ;;  %v2680_v18 = vld [vmem:[%s3413_s0 + $0x328] ss:$16 sps:$4 sm:$0xff]  }
  0xa1   :  { %1175 = vmatmul.mubr.bf16.gmra.mxu0 %v2601_v19  ;;  %v2681_v19 = vld [vmem:[%s3413_s0 + $0x344] ss:$16 sps:$4 sm:$0xff]  }
  0xa2   :  { %1464 = vmatmul.mubr.bf16.gmra.mxu1 %v2602_v20  ;;  %1182 = vmatprep.mubr.bf16.mxu0 %v2603_v21  ;;  %v2683_v21 = vld [vmem:[%s3413_s0 + $0x34c] ss:$16 sps:$4 sm:$0xff]  }
  0xa3   :  { %1471 = vmatprep.mubr.bf16.mxu1 %v2605_v22 }
  0xa9   :  { %1183 = vmatmul.mubr.bf16.gmra.mxu0 %v2607_v23 }
  0xaa   :  { %1472 = vmatmul.mubr.bf16.gmra.mxu1 %v2608_v24  ;;  %1190 = vmatprep.mubr.bf16.mxu0 %v2609_v25 }
  0xab   :  { %1479 = vmatprep.mubr.bf16.mxu1 %v2611_v26 }
  0xb1   :  { %1191 = vmatmul.mubr.bf16.gmra.mxu0 %v2613_v27 }
  0xb2   :  { %1480 = vmatmul.mubr.bf16.gmra.mxu1 %v2614_v28  ;;  %1198 = vmatprep.mubr.bf16.mxu0 %v2615_v29 }
  0xb3   :  { %1487 = vmatprep.mubr.bf16.mxu1 %v2617_v30 }
  0xb9   :  { %1199 = vmatmul.mubr.bf16.gmra.mxu0 %v2619_v31 }
  0xba   :  { %1488 = vmatmul.mubr.bf16.gmra.mxu1 %v2620_v32  ;;  %1206 = vmatprep.mubr.bf16.mxu0 %v2621_v33  ;;  %v2685_v33 = vld [vmem:[%s3413_s0 + $0x340] ss:$16 sps:$4 sm:$0xff]  }
  0xbb   :  { %1495 = vmatprep.mubr.bf16.mxu1 %v2623_v34 }
  0xc1   :  { %1207 = vmatmul.mubr.bf16.gmra.mxu0 %v2625_v35 }
  0xc2   :  { %1496 = vmatmul.mubr.bf16.gmra.mxu1 %v2626_v36  ;;  %1214 = vmatprep.mubr.bf16.mxu0 %v2627_v37  ;;  %v2686_v37 = vld [vmem:[%s3413_s0 + $0x348] ss:$16 sps:$4 sm:$0xff]  }
  0xc3   :  { %1503 = vmatprep.mubr.bf16.mxu1 %v2629_v38  ;;  %v2687_v38 = vld [vmem:[%s3413_s0 + $0x364] ss:$16 sps:$4 sm:$0xff]  }
  0xc9   :  { %1215 = vmatmul.mubr.bf16.gmra.mxu0 %v2631_v39 }
  0xca   :  { %1504 = vmatmul.mubr.bf16.gmra.mxu1 %v2632_v40  ;;  %1222 = vmatprep.mubr.bf16.mxu0 %v2633_v41  ;;  %v2689_v40 = vld [vmem:[%s3413_s0 + $0x36c] ss:$16 sps:$4 sm:$0xff]  }
  0xcb   :  { %1511 = vmatprep.mubr.bf16.mxu1 %v2635_v42 }
  0xd1   :  { %1223 = vmatmul.mubr.bf16.gmra.mxu0 %v2637_v43 }
  0xd2   :  { %1512 = vmatmul.mubr.bf16.gmra.mxu1 %v2638_v44  ;;  %1230 = vmatprep.mubr.bf16.mxu0 %v2639_v45 }
  0xd3   :  { %1519 = vmatprep.mubr.bf16.mxu1 %v2641_v46 }
  0xd9   :  { %1231 = vmatmul.mubr.bf16.gmra.mxu0 %v2643_v47 }
  0xda   :  { %1520 = vmatmul.mubr.bf16.gmra.mxu1 %v2644_v48  ;;  %1238 = vmatprep.mubr.bf16.mxu0 %v2645_v49 }
  0xdb   :  { %1527 = vmatprep.mubr.bf16.mxu1 %v2647_v50 }
  0xe1   :  { %1239 = vmatmul.mubr.bf16.gmra.mxu0 %v2649_v51 }
  0xe2   :  { %1528 = vmatmul.mubr.bf16.gmra.mxu1 %v2650_v52  ;;  %1246 = vmatprep.mubr.bf16.mxu0 %v2651_v53  ;;  %v2691_v52 = vld [vmem:[%s3413_s0 + $0x360] ss:$16 sps:$4 sm:$0xff]  }
  0xe3   :  { %1535 = vmatprep.mubr.bf16.mxu1 %v2653_v54 }
  0xe9   :  { %1247 = vmatmul.mubr.bf16.gmra.mxu0 %v2655_v55 }
  0xea   :  { %1536 = vmatmul.mubr.bf16.gmra.mxu1 %v2656_v56  ;;  %1254 = vmatprep.mubr.bf16.mxu0 %v2657_v57  ;;  %v2692_v56 = vld [vmem:[%s3413_s0 + $0x368] ss:$16 sps:$4 sm:$0xff]   ;;  %v2695_v57 = vld [vmem:[%s3413_s0 + $0x384] ss:$16 sps:$4 sm:$0xff]  }
  0xeb   :  { %1543 = vmatprep.mubr.bf16.mxu1 %v2659_v58 }
  0xf1   :  { %1255 = vmatmul.mubr.bf16.gmra.mxu0 %v2661_v59  ;;  %v2698_v59 = vld [vmem:[%s3413_s0 + $0x38c] ss:$16 sps:$4 sm:$0xff]  }
  0xf2   :  { %1544 = vmatmul.mubr.bf16.gmra.mxu1 %v2662_v60  ;;  %1262 = vmatprep.mubr.bf16.mxu0 %v2663_v61 }
  0xf3   :  { %1551 = vmatprep.mubr.bf16.mxu1 %v2665_v62 }
  0xf9   :  { %1263 = vmatmul.mubr.bf16.gmra.mxu0 %v2667_v63 }
  0xfa   :  { %1552 = vmatmul.mubr.bf16.gmra.mxu1 %v2668_v0  ;;  %1270 = vmatprep.mubr.bf16.mxu0 %v2669_v1 }
  0xfb   :  { %1559 = vmatprep.mubr.bf16.mxu1 %v2671_v2 }
 0x101   :  { %v1080_v8 = vpop.f32.mrf.mxu0  ;;  %1271 = vmatmul.mubr.bf16.gmra.mxu0 %v2673_v3 }
 0x102   :  { %v1081_v9 = vadd.f32 %v3173_v6, %v1080_v8  ;;  %v1369_v10 = vpop.f32.mrf.mxu1  ;;  %1560 = vmatmul.mubr.bf16.gmra.mxu1 %v2674_v4  ;;  %1278 = vmatprep.mubr.bf16.mxu0 %v2675_v5  ;;  %v2693_v8 = vld [vmem:[%s3413_s0 + $0x380] ss:$16 sps:$4 sm:$0xff]  }
 0x103   :  { %v1082_v11 = vpop.f32.mrf.mxu0  ;;  %1567 = vmatprep.mubr.bf16.mxu1 %v2677_v7 }
 0x104   :  { %v1371_v12 = vpop.f32.mrf.mxu1  ;;  %v1370_v15 = vadd.f32 %v1369_v10, %v1081_v9 }
 0x105   :  { %v1083_v13 = vpop.f32.mrf.mxu0  ;;  %v2696_v12 = vld [vmem:[%s3413_s0 + $0x388] ss:$16 sps:$4 sm:$0xff]  }
 0x106   :  { %v1084_v16 = vadd.f32 %v3173_v6, %v1083_v13  ;;  %v1372_v17 = vpop.f32.mrf.mxu1  ;;  %v1624_v25 = vmax.f32 %v1370_v15, 0.0  ;;  %v2701_v13 = vld [vmem:[%s3413_s0 + $0x3a4] ss:$16 sps:$4 sm:$0xff]   ;;  %v2704_v15 = vld [vmem:[%s3413_s0 + $0x3ac] ss:$16 sps:$4 sm:$0xff]  }
 0x107   :  { %v1085_v20 = vpop.f32.mrf.mxu0 }
 0x108   :  { %v1373_v22 = vadd.f32 %v1372_v17, %v1084_v16  ;;  %v1374_v23 = vpop.f32.mrf.mxu1 }
 0x109   :  { %v1088_v24 = vpop.f32.mrf.mxu0  ;;  %1279 = vmatmul.mubr.bf16.gmra.mxu0 %v2679_v14 }
 0x10a   :  { %v1625_v26 = vmax.f32 %v1373_v22, 0.0  ;;  %v1089_v27 = vadd.f32 %v3173_v6, %v1088_v24  ;;  %v1377_v28 = vpop.f32.mrf.mxu1  ;;  %1568 = vmatmul.mubr.bf16.gmra.mxu1 %v2680_v18  ;;  %1286 = vmatprep.mubr.bf16.mxu0 %v2681_v19 }
 0x10b   :  { %v1090_v29 = vpop.f32.mrf.mxu0  ;;  %1575 = vmatprep.mubr.bf16.mxu1 %v2683_v21 }
 0x10c   :  { %v2304_v30 = vpack.c.bf16 %v1625_v26, %v1624_v25  ;;  %v1379_v31 = vpop.f32.mrf.mxu1  ;;  %v1378_v34 = vadd.f32 %v1377_v28, %v1089_v27  ;;  %v2699_v27 = vld [vmem:[%s3413_s0 + $0x3a0] ss:$16 sps:$4 sm:$0xff]  }
 0x10d   :  { %v1091_v32 = vpop.f32.mrf.mxu0  ;;  %v2702_v31 = vld [vmem:[%s3413_s0 + $0x3a8] ss:$16 sps:$4 sm:$0xff]  }
 0x10e   :  { %2305 = vst [vmem:[%s3415_s3] sm:$0xff] %v2304_v30   ;;  %v1092_v35 = vadd.f32 %v3173_v6, %v1091_v32  ;;  %v1380_v36 = vpop.f32.mrf.mxu1  ;;  %v1626_v44 = vmax.f32 %v1378_v34, 0.0  ;;  %v2707_v32 = vld [vmem:[%s3413_s0 + $0x3c4] ss:$16 sps:$4 sm:$0xff]   ;;  %v2710_v34 = vld [vmem:[%s3413_s0 + $0x3cc] ss:$16 sps:$4 sm:$0xff]  }
 0x10f   :  { %v1093_v39 = vpop.f32.mrf.mxu0 }
 0x110   :  { %v1381_v41 = vadd.f32 %v1380_v36, %v1092_v35  ;;  %v1382_v42 = vpop.f32.mrf.mxu1 }
 0x111   :  { %v1096_v43 = vpop.f32.mrf.mxu0  ;;  %1287 = vmatmul.mubr.bf16.gmra.mxu0 %v2685_v33 }
 0x112   :  { %v1627_v45 = vmax.f32 %v1381_v41, 0.0  ;;  %v1097_v46 = vadd.f32 %v3173_v6, %v1096_v43  ;;  %v1385_v47 = vpop.f32.mrf.mxu1  ;;  %1576 = vmatmul.mubr.bf16.gmra.mxu1 %v2686_v37  ;;  %1294 = vmatprep.mubr.bf16.mxu0 %v2687_v38 }
 0x113   :  { %v1098_v48 = vpop.f32.mrf.mxu0  ;;  %1583 = vmatprep.mubr.bf16.mxu1 %v2689_v40 }
 0x114   :  { %v2309_v49 = vpack.c.bf16 %v1627_v45, %v1626_v44  ;;  %v1387_v50 = vpop.f32.mrf.mxu1  ;;  %v1386_v53 = vadd.f32 %v1385_v47, %v1097_v46  ;;  %v2705_v46 = vld [vmem:[%s3413_s0 + $0x3c0] ss:$16 sps:$4 sm:$0xff]  }
 0x115   :  { %v1099_v51 = vpop.f32.mrf.mxu0  ;;  %v2708_v50 = vld [vmem:[%s3413_s0 + $0x3c8] ss:$16 sps:$4 sm:$0xff]  }
 0x116   :  { %2461 = vst [vmem:[%s3415_s3 + $0x8] sm:$0xff] %v2309_v49   ;;  %v1100_v54 = vadd.f32 %v3173_v6, %v1099_v51  ;;  %v1388_v55 = vpop.f32.mrf.mxu1  ;;  %v1628_v63 = vmax.f32 %v1386_v53, 0.0  ;;  %v2713_v51 = vld [vmem:[%s3413_s0 + $0x3e4] ss:$16 sps:$4 sm:$0xff]   ;;  %v2716_v53 = vld [vmem:[%s3413_s0 + $0x3ec] ss:$16 sps:$4 sm:$0xff]  }
 0x117   :  { %v1101_v58 = vpop.f32.mrf.mxu0 }
 0x118   :  { %v1389_v60 = vadd.f32 %v1388_v55, %v1100_v54  ;;  %v1390_v61 = vpop.f32.mrf.mxu1 }
 0x119   :  { %v1104_v62 = vpop.f32.mrf.mxu0  ;;  %1295 = vmatmul.mubr.bf16.gmra.mxu0 %v2691_v52 }
 0x11a   :  { %v1629_v0 = vmax.f32 %v1389_v60, 0.0  ;;  %v1105_v1 = vadd.f32 %v3173_v6, %v1104_v62  ;;  %v1393_v2 = vpop.f32.mrf.mxu1  ;;  %1584 = vmatmul.mubr.bf16.gmra.mxu1 %v2692_v56  ;;  %1302 = vmatprep.mubr.bf16.mxu0 %v2695_v57 }
 0x11b   :  { %v1106_v3 = vpop.f32.mrf.mxu0  ;;  %1591 = vmatprep.mubr.bf16.mxu1 %v2698_v59 }
 0x11c   :  { %v2314_v4 = vpack.c.bf16 %v1629_v0, %v1628_v63  ;;  %v1395_v5 = vpop.f32.mrf.mxu1  ;;  %v1394_v9 = vadd.f32 %v1393_v2, %v1105_v1  ;;  %v2711_v1 = vld [vmem:[%s3413_s0 + $0x3e0] ss:$16 sps:$4 sm:$0xff]  }
 0x11d   :  { %v1107_v7 = vpop.f32.mrf.mxu0  ;;  %v2714_v5 = vld [vmem:[%s3413_s0 + $0x3e8] ss:$16 sps:$4 sm:$0xff]  }
 0x11e   :  { %2462 = vst [vmem:[%s3415_s3 + $0x10] sm:$0xff] %v2314_v4   ;;  %v1108_v10 = vadd.f32 %v3173_v6, %v1107_v7  ;;  %v1396_v11 = vpop.f32.mrf.mxu1  ;;  %v1630_v19 = vmax.f32 %v1394_v9, 0.0 }
 0x11f   :  { %v1109_v14 = vpop.f32.mrf.mxu0 }
 0x120   :  { %v1397_v16 = vadd.f32 %v1396_v11, %v1108_v10  ;;  %v1398_v17 = vpop.f32.mrf.mxu1 }
 0x121   :  { %v1112_v18 = vpop.f32.mrf.mxu0  ;;  %1303 = vmatmul.mubr.bf16.gmra.mxu0 %v2693_v8 }
 0x122   :  { %v1631_v20 = vmax.f32 %v1397_v16, 0.0  ;;  %v1113_v21 = vadd.f32 %v3173_v6, %v1112_v18  ;;  %v1401_v22 = vpop.f32.mrf.mxu1  ;;  %1592 = vmatmul.mubr.bf16.gmra.mxu1 %v2696_v12  ;;  %1310 = vmatprep.mubr.bf16.mxu0 %v2701_v13 }
 0x123   :  { %v1114_v23 = vpop.f32.mrf.mxu0  ;;  %1599 = vmatprep.mubr.bf16.mxu1 %v2704_v15 }
 0x124   :  { %v2319_v24 = vpack.c.bf16 %v1631_v20, %v1630_v19  ;;  %v1403_v25 = vpop.f32.mrf.mxu1  ;;  %v1402_v28 = vadd.f32 %v1401_v22, %v1113_v21 }
 0x125   :  { %v1115_v26 = vpop.f32.mrf.mxu0 }
 0x126   :  { %2463 = vst [vmem:[%s3415_s3 + $0x18] sm:$0xff] %v2319_v24   ;;  %v1116_v29 = vadd.f32 %v3173_v6, %v1115_v26  ;;  %v1404_v30 = vpop.f32.mrf.mxu1  ;;  %v1632_v38 = vmax.f32 %v1402_v28, 0.0 }
 0x127   :  { %v1117_v33 = vpop.f32.mrf.mxu0 }
 0x128   :  { %v1405_v35 = vadd.f32 %v1404_v30, %v1116_v29  ;;  %v1406_v36 = vpop.f32.mrf.mxu1 }
 0x129   :  { %v1120_v37 = vpop.f32.mrf.mxu0  ;;  %1311 = vmatmul.mubr.bf16.gmra.mxu0 %v2699_v27 }
 0x12a   :  { %v1633_v39 = vmax.f32 %v1405_v35, 0.0  ;;  %v1121_v40 = vadd.f32 %v3173_v6, %v1120_v37  ;;  %v1409_v41 = vpop.f32.mrf.mxu1  ;;  %1600 = vmatmul.mubr.bf16.gmra.mxu1 %v2702_v31  ;;  %1318 = vmatprep.mubr.bf16.mxu0 %v2707_v32 }
 0x12b   :  { %v1122_v42 = vpop.f32.mrf.mxu0  ;;  %1607 = vmatprep.mubr.bf16.mxu1 %v2710_v34 }
 0x12c   :  { %v2324_v43 = vpack.c.bf16 %v1633_v39, %v1632_v38  ;;  %v1411_v44 = vpop.f32.mrf.mxu1  ;;  %v1410_v47 = vadd.f32 %v1409_v41, %v1121_v40 }
 0x12d   :  { %v1123_v45 = vpop.f32.mrf.mxu0 }
 0x12e   :  { %2464 = vst [vmem:[%s3415_s3 + $0x20] sm:$0xff] %v2324_v43   ;;  %v1124_v48 = vadd.f32 %v3173_v6, %v1123_v45  ;;  %v1412_v49 = vpop.f32.mrf.mxu1  ;;  %v1634_v57 = vmax.f32 %v1410_v47, 0.0 }
 0x12f   :  { %v1125_v52 = vpop.f32.mrf.mxu0 }
 0x130   :  { %v1413_v54 = vadd.f32 %v1412_v49, %v1124_v48  ;;  %v1414_v55 = vpop.f32.mrf.mxu1 }
 0x131   :  { %v1128_v56 = vpop.f32.mrf.mxu0  ;;  %1319 = vmatmul.mubr.bf16.gmra.mxu0 %v2705_v46 }
 0x132   :  { %v1635_v58 = vmax.f32 %v1413_v54, 0.0  ;;  %v1129_v59 = vadd.f32 %v3173_v6, %v1128_v56  ;;  %v1417_v60 = vpop.f32.mrf.mxu1  ;;  %1608 = vmatmul.mubr.bf16.gmra.mxu1 %v2708_v50  ;;  %1326 = vmatprep.mubr.bf16.mxu0 %v2713_v51 }
 0x133   :  { %v1130_v61 = vpop.f32.mrf.mxu0  ;;  %1615 = vmatprep.mubr.bf16.mxu1 %v2716_v53 }
 0x134   :  { %v2329_v62 = vpack.c.bf16 %v1635_v58, %v1634_v57  ;;  %v1419_v63 = vpop.f32.mrf.mxu1  ;;  %v1418_v2 = vadd.f32 %v1417_v60, %v1129_v59 }
 0x135   :  { %v1131_v0 = vpop.f32.mrf.mxu0 }
 0x136   :  { %2465 = vst [vmem:[%s3415_s3 + $0x28] sm:$0xff] %v2329_v62   ;;  %v1132_v3 = vadd.f32 %v3173_v6, %v1131_v0  ;;  %v1420_v4 = vpop.f32.mrf.mxu1  ;;  %v1636_v11 = vmax.f32 %v1418_v2, 0.0 }
 0x137   :  { %v1133_v7 = vpop.f32.mrf.mxu0 }
 0x138   :  { %v1421_v8 = vadd.f32 %v1420_v4, %v1132_v3  ;;  %v1422_v9 = vpop.f32.mrf.mxu1 }
 0x139   :  { %v1136_v10 = vpop.f32.mrf.mxu0  ;;  %1327 = vmatmul.mubr.bf16.gmra.mxu0 %v2711_v1 }
 0x13a   :  { %v1637_v12 = vmax.f32 %v1421_v8, 0.0  ;;  %v1137_v13 = vadd.f32 %v3173_v6, %v1136_v10  ;;  %v1425_v14 = vpop.f32.mrf.mxu1  ;;  %1616 = vmatmul.mubr.bf16.gmra.mxu1 %v2714_v5 }
 0x13b   :  { %v1138_v15 = vpop.f32.mrf.mxu0 }
 0x13c   :  { %v2334_v16 = vpack.c.bf16 %v1637_v12, %v1636_v11  ;;  %v1427_v17 = vpop.f32.mrf.mxu1  ;;  %v1426_v19 = vadd.f32 %v1425_v14, %v1137_v13 }
 0x13d   :  { %v1139_v18 = vpop.f32.mrf.mxu0 }
 0x13e   :  { %2466 = vst [vmem:[%s3415_s3 + $0x30] sm:$0xff] %v2334_v16   ;;  %v1140_v20 = vadd.f32 %v3173_v6, %v1139_v18  ;;  %v1428_v21 = vpop.f32.mrf.mxu1  ;;  %v1638_v26 = vmax.f32 %v1426_v19, 0.0 }
 0x13f   :  { %v1141_v22 = vpop.f32.mrf.mxu0 }
 0x140   :  { %v1429_v23 = vadd.f32 %v1428_v21, %v1140_v20  ;;  %v1430_v24 = vpop.f32.mrf.mxu1 }
 0x141   :  { %v1144_v25 = vpop.f32.mrf.mxu0 }
 0x142   :  { %v1639_v27 = vmax.f32 %v1429_v23, 0.0  ;;  %v1145_v28 = vadd.f32 %v3173_v6, %v1144_v25  ;;  %v1433_v29 = vpop.f32.mrf.mxu1 }
 0x143   :  { %v1146_v30 = vpop.f32.mrf.mxu0 }
 0x144   :  { %v2339_v31 = vpack.c.bf16 %v1639_v27, %v1638_v26  ;;  %v1435_v32 = vpop.f32.mrf.mxu1  ;;  %v1434_v34 = vadd.f32 %v1433_v29, %v1145_v28 }
 0x145   :  { %v1147_v33 = vpop.f32.mrf.mxu0 }
 0x146   :  { %2467 = vst [vmem:[%s3415_s3 + $0x38] sm:$0xff] %v2339_v31   ;;  %v1148_v35 = vadd.f32 %v3173_v6, %v1147_v33  ;;  %v1436_v36 = vpop.f32.mrf.mxu1  ;;  %v1640_v41 = vmax.f32 %v1434_v34, 0.0 }
 0x147   :  { %v1149_v37 = vpop.f32.mrf.mxu0 }
 0x148   :  { %v1437_v38 = vadd.f32 %v1436_v36, %v1148_v35  ;;  %v1438_v39 = vpop.f32.mrf.mxu1 }
 0x149   :  { %v1152_v40 = vpop.f32.mrf.mxu0 }
 0x14a   :  { %v1641_v42 = vmax.f32 %v1437_v38, 0.0  ;;  %v1153_v43 = vadd.f32 %v3173_v6, %v1152_v40  ;;  %v1441_v44 = vpop.f32.mrf.mxu1 }
 0x14b   :  { %v1154_v45 = vpop.f32.mrf.mxu0 }
 0x14c   :  { %v2344_v46 = vpack.c.bf16 %v1641_v42, %v1640_v41  ;;  %v1443_v47 = vpop.f32.mrf.mxu1  ;;  %v1442_v49 = vadd.f32 %v1441_v44, %v1153_v43 }
 0x14d   :  { %v1155_v48 = vpop.f32.mrf.mxu0 }
 0x14e   :  { %2468 = vst [vmem:[%s3415_s3 + $0x40] sm:$0xff] %v2344_v46   ;;  %v1156_v50 = vadd.f32 %v3173_v6, %v1155_v48  ;;  %v1444_v51 = vpop.f32.mrf.mxu1  ;;  %v1642_v56 = vmax.f32 %v1442_v49, 0.0 }
 0x14f   :  { %v1157_v52 = vpop.f32.mrf.mxu0 }
 0x150   :  { %v1445_v53 = vadd.f32 %v1444_v51, %v1156_v50  ;;  %v1446_v54 = vpop.f32.mrf.mxu1 }
 0x151   :  { %v1160_v55 = vpop.f32.mrf.mxu0 }
 0x152   :  { %v1643_v57 = vmax.f32 %v1445_v53, 0.0  ;;  %v1161_v58 = vadd.f32 %v3173_v6, %v1160_v55  ;;  %v1449_v59 = vpop.f32.mrf.mxu1 }
 0x153   :  { %v1162_v60 = vpop.f32.mrf.mxu0 }
 0x154   :  { %v2349_v61 = vpack.c.bf16 %v1643_v57, %v1642_v56  ;;  %v1451_v62 = vpop.f32.mrf.mxu1  ;;  %v1450_v0 = vadd.f32 %v1449_v59, %v1161_v58 }
 0x155   :  { %v1163_v63 = vpop.f32.mrf.mxu0 }
 0x156   :  { %2469 = vst [vmem:[%s3415_s3 + $0x48] sm:$0xff] %v2349_v61   ;;  %v1164_v1 = vadd.f32 %v3173_v6, %v1163_v63  ;;  %v1452_v2 = vpop.f32.mrf.mxu1  ;;  %v1644_v8 = vmax.f32 %v1450_v0, 0.0 }
 0x157   :  { %v1165_v3 = vpop.f32.mrf.mxu0 }
 0x158   :  { %v1453_v4 = vadd.f32 %v1452_v2, %v1164_v1  ;;  %v1454_v5 = vpop.f32.mrf.mxu1 }
 0x159   :  { %v1168_v7 = vpop.f32.mrf.mxu0 }
 0x15a   :  { %v1645_v9 = vmax.f32 %v1453_v4, 0.0  ;;  %v1169_v10 = vadd.f32 %v3173_v6, %v1168_v7  ;;  %v1457_v11 = vpop.f32.mrf.mxu1 }
 0x15b   :  { %v1170_v12 = vpop.f32.mrf.mxu0 }
 0x15c   :  { %v2354_v13 = vpack.c.bf16 %v1645_v9, %v1644_v8  ;;  %v1459_v14 = vpop.f32.mrf.mxu1  ;;  %v1458_v16 = vadd.f32 %v1457_v11, %v1169_v10 }
 0x15d   :  { %v1171_v15 = vpop.f32.mrf.mxu0 }
 0x15e   :  { %2470 = vst [vmem:[%s3415_s3 + $0x50] sm:$0xff] %v2354_v13   ;;  %v1172_v17 = vadd.f32 %v3173_v6, %v1171_v15  ;;  %v1460_v18 = vpop.f32.mrf.mxu1  ;;  %v1646_v23 = vmax.f32 %v1458_v16, 0.0 }
 0x15f   :  { %v1173_v19 = vpop.f32.mrf.mxu0 }
 0x160   :  { %v1461_v20 = vadd.f32 %v1460_v18, %v1172_v17  ;;  %v1462_v21 = vpop.f32.mrf.mxu1 }
 0x161   :  { %v1176_v22 = vpop.f32.mrf.mxu0 }
 0x162   :  { %v1647_v24 = vmax.f32 %v1461_v20, 0.0  ;;  %v1177_v25 = vadd.f32 %v3173_v6, %v1176_v22  ;;  %v1465_v26 = vpop.f32.mrf.mxu1 }
 0x163   :  { %v1178_v27 = vpop.f32.mrf.mxu0 }
 0x164   :  { %v2359_v28 = vpack.c.bf16 %v1647_v24, %v1646_v23  ;;  %v1467_v29 = vpop.f32.mrf.mxu1  ;;  %v1466_v31 = vadd.f32 %v1465_v26, %v1177_v25 }
 0x165   :  { %v1179_v30 = vpop.f32.mrf.mxu0 }
 0x166   :  { %2471 = vst [vmem:[%s3415_s3 + $0x58] sm:$0xff] %v2359_v28   ;;  %v1180_v32 = vadd.f32 %v3173_v6, %v1179_v30  ;;  %v1468_v33 = vpop.f32.mrf.mxu1  ;;  %v1648_v38 = vmax.f32 %v1466_v31, 0.0 }
 0x167   :  { %v1181_v34 = vpop.f32.mrf.mxu0 }
 0x168   :  { %v1469_v35 = vadd.f32 %v1468_v33, %v1180_v32  ;;  %v1470_v36 = vpop.f32.mrf.mxu1 }
 0x169   :  { %v1184_v37 = vpop.f32.mrf.mxu0 }
 0x16a   :  { %v1649_v39 = vmax.f32 %v1469_v35, 0.0  ;;  %v1185_v40 = vadd.f32 %v3173_v6, %v1184_v37  ;;  %v1473_v41 = vpop.f32.mrf.mxu1 }
 0x16b   :  { %v1186_v42 = vpop.f32.mrf.mxu0 }
 0x16c   :  { %v2364_v43 = vpack.c.bf16 %v1649_v39, %v1648_v38  ;;  %v1475_v44 = vpop.f32.mrf.mxu1  ;;  %v1474_v46 = vadd.f32 %v1473_v41, %v1185_v40 }
 0x16d   :  { %v1187_v45 = vpop.f32.mrf.mxu0 }
 0x16e   :  { %2472 = vst [vmem:[%s3415_s3 + $0x60] sm:$0xff] %v2364_v43   ;;  %v1188_v47 = vadd.f32 %v3173_v6, %v1187_v45  ;;  %v1476_v48 = vpop.f32.mrf.mxu1  ;;  %v1650_v53 = vmax.f32 %v1474_v46, 0.0 }
 0x16f   :  { %v1189_v49 = vpop.f32.mrf.mxu0 }
 0x170   :  { %v1477_v50 = vadd.f32 %v1476_v48, %v1188_v47  ;;  %v1478_v51 = vpop.f32.mrf.mxu1 }
 0x171   :  { %v1192_v52 = vpop.f32.mrf.mxu0 }
 0x172   :  { %v1651_v54 = vmax.f32 %v1477_v50, 0.0  ;;  %v1193_v55 = vadd.f32 %v3173_v6, %v1192_v52  ;;  %v1481_v56 = vpop.f32.mrf.mxu1 }
 0x173   :  { %v1194_v57 = vpop.f32.mrf.mxu0 }
 0x174   :  { %v2369_v58 = vpack.c.bf16 %v1651_v54, %v1650_v53  ;;  %v1483_v59 = vpop.f32.mrf.mxu1  ;;  %v1482_v61 = vadd.f32 %v1481_v56, %v1193_v55 }
 0x175   :  { %v1195_v60 = vpop.f32.mrf.mxu0 }
 0x176   :  { %2473 = vst [vmem:[%s3415_s3 + $0x68] sm:$0xff] %v2369_v58   ;;  %v1196_v62 = vadd.f32 %v3173_v6, %v1195_v60  ;;  %v1484_v63 = vpop.f32.mrf.mxu1  ;;  %v1652_v4 = vmax.f32 %v1482_v61, 0.0 }
 0x177   :  { %v1197_v0 = vpop.f32.mrf.mxu0 }
 0x178   :  { %v1485_v1 = vadd.f32 %v1484_v63, %v1196_v62  ;;  %v1486_v2 = vpop.f32.mrf.mxu1 }
 0x179   :  { %v1200_v3 = vpop.f32.mrf.mxu0 }
 0x17a   :  { %v1653_v5 = vmax.f32 %v1485_v1, 0.0  ;;  %v1201_v7 = vadd.f32 %v3173_v6, %v1200_v3  ;;  %v1489_v8 = vpop.f32.mrf.mxu1 }
 0x17b   :  { %v1202_v9 = vpop.f32.mrf.mxu0 }
 0x17c   :  { %v2374_v10 = vpack.c.bf16 %v1653_v5, %v1652_v4  ;;  %v1491_v11 = vpop.f32.mrf.mxu1  ;;  %v1490_v13 = vadd.f32 %v1489_v8, %v1201_v7 }
 0x17d   :  { %v1203_v12 = vpop.f32.mrf.mxu0 }
 0x17e   :  { %2474 = vst [vmem:[%s3415_s3 + $0x70] sm:$0xff] %v2374_v10   ;;  %v1204_v14 = vadd.f32 %v3173_v6, %v1203_v12  ;;  %v1492_v15 = vpop.f32.mrf.mxu1  ;;  %v1654_v20 = vmax.f32 %v1490_v13, 0.0 }
 0x17f   :  { %v1205_v16 = vpop.f32.mrf.mxu0 }
 0x180   :  { %v1493_v17 = vadd.f32 %v1492_v15, %v1204_v14  ;;  %v1494_v18 = vpop.f32.mrf.mxu1 }
 0x181   :  { %v1208_v19 = vpop.f32.mrf.mxu0 }
 0x182   :  { %v1655_v21 = vmax.f32 %v1493_v17, 0.0  ;;  %v1209_v22 = vadd.f32 %v3173_v6, %v1208_v19  ;;  %v1497_v23 = vpop.f32.mrf.mxu1 }
 0x183   :  { %v1210_v24 = vpop.f32.mrf.mxu0 }
 0x184   :  { %v2379_v25 = vpack.c.bf16 %v1655_v21, %v1654_v20  ;;  %v1499_v26 = vpop.f32.mrf.mxu1  ;;  %v1498_v28 = vadd.f32 %v1497_v23, %v1209_v22 }
 0x185   :  { %v1211_v27 = vpop.f32.mrf.mxu0 }
 0x186   :  { %2475 = vst [vmem:[%s3415_s3 + $0x78] sm:$0xff] %v2379_v25   ;;  %v1212_v29 = vadd.f32 %v3173_v6, %v1211_v27  ;;  %v1500_v30 = vpop.f32.mrf.mxu1  ;;  %v1656_v35 = vmax.f32 %v1498_v28, 0.0 }
 0x187   :  { %v1213_v31 = vpop.f32.mrf.mxu0 }
 0x188   :  { %v1501_v32 = vadd.f32 %v1500_v30, %v1212_v29  ;;  %v1502_v33 = vpop.f32.mrf.mxu1 }
 0x189   :  { %v1216_v34 = vpop.f32.mrf.mxu0 }
 0x18a   :  { %v1657_v36 = vmax.f32 %v1501_v32, 0.0  ;;  %v1217_v37 = vadd.f32 %v3173_v6, %v1216_v34  ;;  %v1505_v38 = vpop.f32.mrf.mxu1 }
 0x18b   :  { %v1218_v39 = vpop.f32.mrf.mxu0 }
 0x18c   :  { %v2384_v40 = vpack.c.bf16 %v1657_v36, %v1656_v35  ;;  %v1507_v41 = vpop.f32.mrf.mxu1  ;;  %v1506_v43 = vadd.f32 %v1505_v38, %v1217_v37 }
 0x18d   :  { %v1219_v42 = vpop.f32.mrf.mxu0 }
 0x18e   :  { %2476 = vst [vmem:[%s3415_s3 + $0x80] sm:$0xff] %v2384_v40   ;;  %v1220_v44 = vadd.f32 %v3173_v6, %v1219_v42  ;;  %v1508_v45 = vpop.f32.mrf.mxu1  ;;  %v1658_v50 = vmax.f32 %v1506_v43, 0.0 }
 0x18f   :  { %v1221_v46 = vpop.f32.mrf.mxu0 }
 0x190   :  { %v1509_v47 = vadd.f32 %v1508_v45, %v1220_v44  ;;  %v1510_v48 = vpop.f32.mrf.mxu1 }
 0x191   :  { %v1224_v49 = vpop.f32.mrf.mxu0 }
 0x192   :  { %v1659_v51 = vmax.f32 %v1509_v47, 0.0  ;;  %v1225_v52 = vadd.f32 %v3173_v6, %v1224_v49  ;;  %v1513_v53 = vpop.f32.mrf.mxu1 }
 0x193   :  { %v1226_v54 = vpop.f32.mrf.mxu0 }
 0x194   :  { %v2389_v55 = vpack.c.bf16 %v1659_v51, %v1658_v50  ;;  %v1515_v56 = vpop.f32.mrf.mxu1  ;;  %v1514_v58 = vadd.f32 %v1513_v53, %v1225_v52 }
 0x195   :  { %v1227_v57 = vpop.f32.mrf.mxu0 }
 0x196   :  { %2477 = vst [vmem:[%s3415_s3 + $0x88] sm:$0xff] %v2389_v55   ;;  %v1228_v59 = vadd.f32 %v3173_v6, %v1227_v57  ;;  %v1516_v60 = vpop.f32.mrf.mxu1  ;;  %v1660_v1 = vmax.f32 %v1514_v58, 0.0 }
 0x197   :  { %v1229_v61 = vpop.f32.mrf.mxu0 }
 0x198   :  { %v1517_v62 = vadd.f32 %v1516_v60, %v1228_v59  ;;  %v1518_v63 = vpop.f32.mrf.mxu1 }
 0x199   :  { %v1232_v0 = vpop.f32.mrf.mxu0 }
 0x19a   :  { %v1661_v2 = vmax.f32 %v1517_v62, 0.0  ;;  %v1233_v3 = vadd.f32 %v3173_v6, %v1232_v0  ;;  %v1521_v4 = vpop.f32.mrf.mxu1 }
 0x19b   :  { %v1234_v5 = vpop.f32.mrf.mxu0 }
 0x19c   :  { %v2394_v7 = vpack.c.bf16 %v1661_v2, %v1660_v1  ;;  %v1523_v8 = vpop.f32.mrf.mxu1  ;;  %v1522_v10 = vadd.f32 %v1521_v4, %v1233_v3 }
 0x19d   :  { %v1235_v9 = vpop.f32.mrf.mxu0 }
 0x19e   :  { %2478 = vst [vmem:[%s3415_s3 + $0x90] sm:$0xff] %v2394_v7   ;;  %v1236_v11 = vadd.f32 %v3173_v6, %v1235_v9  ;;  %v1524_v12 = vpop.f32.mrf.mxu1  ;;  %v1662_v17 = vmax.f32 %v1522_v10, 0.0 }
 0x19f   :  { %v1237_v13 = vpop.f32.mrf.mxu0 }
 0x1a0   :  { %v1525_v14 = vadd.f32 %v1524_v12, %v1236_v11  ;;  %v1526_v15 = vpop.f32.mrf.mxu1 }
 0x1a1   :  { %v1240_v16 = vpop.f32.mrf.mxu0 }
 0x1a2   :  { %v1663_v18 = vmax.f32 %v1525_v14, 0.0  ;;  %v1241_v19 = vadd.f32 %v3173_v6, %v1240_v16  ;;  %v1529_v20 = vpop.f32.mrf.mxu1 }
 0x1a3   :  { %v1242_v21 = vpop.f32.mrf.mxu0 }
 0x1a4   :  { %v2399_v22 = vpack.c.bf16 %v1663_v18, %v1662_v17  ;;  %v1531_v23 = vpop.f32.mrf.mxu1  ;;  %v1530_v25 = vadd.f32 %v1529_v20, %v1241_v19 }
 0x1a5   :  { %v1243_v24 = vpop.f32.mrf.mxu0 }
 0x1a6   :  { %2479 = vst [vmem:[%s3415_s3 + $0x98] sm:$0xff] %v2399_v22   ;;  %v1244_v26 = vadd.f32 %v3173_v6, %v1243_v24  ;;  %v1532_v27 = vpop.f32.mrf.mxu1  ;;  %v1664_v32 = vmax.f32 %v1530_v25, 0.0 }
 0x1a7   :  { %v1245_v28 = vpop.f32.mrf.mxu0 }
 0x1a8   :  { %v1533_v29 = vadd.f32 %v1532_v27, %v1244_v26  ;;  %v1534_v30 = vpop.f32.mrf.mxu1 }
 0x1a9   :  { %v1248_v31 = vpop.f32.mrf.mxu0 }
 0x1aa   :  { %v1665_v33 = vmax.f32 %v1533_v29, 0.0  ;;  %v1249_v34 = vadd.f32 %v3173_v6, %v1248_v31  ;;  %v1537_v35 = vpop.f32.mrf.mxu1 }
 0x1ab   :  { %v1250_v36 = vpop.f32.mrf.mxu0 }
 0x1ac   :  { %v2404_v37 = vpack.c.bf16 %v1665_v33, %v1664_v32  ;;  %v1539_v38 = vpop.f32.mrf.mxu1  ;;  %v1538_v40 = vadd.f32 %v1537_v35, %v1249_v34 }
 0x1ad   :  { %v1251_v39 = vpop.f32.mrf.mxu0 }
 0x1ae   :  { %2480 = vst [vmem:[%s3415_s3 + $0xa0] sm:$0xff] %v2404_v37   ;;  %v1252_v41 = vadd.f32 %v3173_v6, %v1251_v39  ;;  %v1540_v42 = vpop.f32.mrf.mxu1  ;;  %v1666_v47 = vmax.f32 %v1538_v40, 0.0 }
 0x1af   :  { %v1253_v43 = vpop.f32.mrf.mxu0 }
 0x1b0   :  { %v1541_v44 = vadd.f32 %v1540_v42, %v1252_v41  ;;  %v1542_v45 = vpop.f32.mrf.mxu1 }
 0x1b1   :  { %v1256_v46 = vpop.f32.mrf.mxu0 }
 0x1b2   :  { %v1667_v48 = vmax.f32 %v1541_v44, 0.0  ;;  %v1257_v49 = vadd.f32 %v3173_v6, %v1256_v46  ;;  %v1545_v50 = vpop.f32.mrf.mxu1 }
 0x1b3   :  { %v1258_v51 = vpop.f32.mrf.mxu0 }
 0x1b4   :  { %v2409_v52 = vpack.c.bf16 %v1667_v48, %v1666_v47  ;;  %v1547_v53 = vpop.f32.mrf.mxu1  ;;  %v1546_v55 = vadd.f32 %v1545_v50, %v1257_v49 }
 0x1b5   :  { %v1259_v54 = vpop.f32.mrf.mxu0 }
 0x1b6   :  { %2481 = vst [vmem:[%s3415_s3 + $0xa8] sm:$0xff] %v2409_v52   ;;  %v1260_v56 = vadd.f32 %v3173_v6, %v1259_v54  ;;  %v1548_v57 = vpop.f32.mrf.mxu1  ;;  %v1668_v62 = vmax.f32 %v1546_v55, 0.0 }
 0x1b7   :  { %v1261_v58 = vpop.f32.mrf.mxu0 }
 0x1b8   :  { %v1549_v59 = vadd.f32 %v1548_v57, %v1260_v56  ;;  %v1550_v60 = vpop.f32.mrf.mxu1 }
 0x1b9   :  { %v1264_v61 = vpop.f32.mrf.mxu0 }
 0x1ba   :  { %v1669_v63 = vmax.f32 %v1549_v59, 0.0  ;;  %v1265_v0 = vadd.f32 %v3173_v6, %v1264_v61  ;;  %v1553_v1 = vpop.f32.mrf.mxu1 }
 0x1bb   :  { %v1266_v2 = vpop.f32.mrf.mxu0 }
 0x1bc   :  { %v2414_v3 = vpack.c.bf16 %v1669_v63, %v1668_v62  ;;  %v1555_v4 = vpop.f32.mrf.mxu1  ;;  %v1554_v7 = vadd.f32 %v1553_v1, %v1265_v0 }
 0x1bd   :  { %v1267_v5 = vpop.f32.mrf.mxu0 }
 0x1be   :  { %2482 = vst [vmem:[%s3415_s3 + $0xb0] sm:$0xff] %v2414_v3   ;;  %v1268_v8 = vadd.f32 %v3173_v6, %v1267_v5  ;;  %v1556_v9 = vpop.f32.mrf.mxu1  ;;  %v1670_v14 = vmax.f32 %v1554_v7, 0.0 }
 0x1bf   :  { %v1269_v10 = vpop.f32.mrf.mxu0 }
 0x1c0   :  { %v1557_v11 = vadd.f32 %v1556_v9, %v1268_v8  ;;  %v1558_v12 = vpop.f32.mrf.mxu1 }
 0x1c1   :  { %v1272_v13 = vpop.f32.mrf.mxu0 }
 0x1c2   :  { %v1671_v15 = vmax.f32 %v1557_v11, 0.0  ;;  %v1273_v16 = vadd.f32 %v3173_v6, %v1272_v13  ;;  %v1561_v17 = vpop.f32.mrf.mxu1 }
 0x1c3   :  { %v1274_v18 = vpop.f32.mrf.mxu0 }
 0x1c4   :  { %v2419_v19 = vpack.c.bf16 %v1671_v15, %v1670_v14  ;;  %v1563_v20 = vpop.f32.mrf.mxu1  ;;  %v1562_v22 = vadd.f32 %v1561_v17, %v1273_v16 }
 0x1c5   :  { %v1275_v21 = vpop.f32.mrf.mxu0  ;;  %v2717_v20 = vld [vmem:[%s3414_s2] ss:$0 sm:$0xff] }
 0x1c6   :  { %2483 = vst [vmem:[%s3415_s3 + $0xb8] sm:$0xff] %v2419_v19   ;;  %v1276_v23 = vadd.f32 %v3173_v6, %v1275_v21  ;;  %v1564_v24 = vpop.f32.mrf.mxu1  ;;  %v1672_v29 = vmax.f32 %v1562_v22, 0.0 }
 0x1c7   :  { %v1277_v25 = vpop.f32.mrf.mxu0 }
 0x1c8   :  { %v1565_v26 = vadd.f32 %v1564_v24, %v1276_v23  ;;  %v1566_v27 = vpop.f32.mrf.mxu1 }
 0x1c9   :  { %v1280_v28 = vpop.f32.mrf.mxu0 }
 0x1ca   :  { %v1673_v30 = vmax.f32 %v1565_v26, 0.0  ;;  %v1281_v31 = vadd.f32 %v3173_v6, %v1280_v28  ;;  %v1569_v32 = vpop.f32.mrf.mxu1 }
 0x1cb   :  { %v1282_v33 = vpop.f32.mrf.mxu0 }
 0x1cc   :  { %v2424_v34 = vpack.c.bf16 %v1673_v30, %v1672_v29  ;;  %v1571_v35 = vpop.f32.mrf.mxu1  ;;  %v1570_v37 = vadd.f32 %v1569_v32, %v1281_v31 }
 0x1cd   :  { %v1283_v36 = vpop.f32.mrf.mxu0 }
 0x1ce   :  { %2484 = vst [vmem:[%s3415_s3 + $0xc0] sm:$0xff] %v2424_v34   ;;  %v1284_v38 = vadd.f32 %v3173_v6, %v1283_v36  ;;  %v1572_v39 = vpop.f32.mrf.mxu1  ;;  %v1674_v44 = vmax.f32 %v1570_v37, 0.0 }
 0x1cf   :  { %v1285_v40 = vpop.f32.mrf.mxu0 }
 0x1d0   :  { %v1573_v41 = vadd.f32 %v1572_v39, %v1284_v38  ;;  %v1574_v42 = vpop.f32.mrf.mxu1 }
 0x1d1   :  { %v1288_v43 = vpop.f32.mrf.mxu0 }
 0x1d2   :  { %v1675_v45 = vmax.f32 %v1573_v41, 0.0  ;;  %v1289_v46 = vadd.f32 %v3173_v6, %v1288_v43  ;;  %v1577_v47 = vpop.f32.mrf.mxu1 }
 0x1d3   :  { %v1290_v48 = vpop.f32.mrf.mxu0 }
 0x1d4   :  { %v2429_v49 = vpack.c.bf16 %v1675_v45, %v1674_v44  ;;  %v1579_v50 = vpop.f32.mrf.mxu1  ;;  %v1578_v52 = vadd.f32 %v1577_v47, %v1289_v46 }
 0x1d5   :  { %v1291_v51 = vpop.f32.mrf.mxu0 }
 0x1d6   :  { %2485 = vst [vmem:[%s3415_s3 + $0xc8] sm:$0xff] %v2429_v49   ;;  %v1292_v53 = vadd.f32 %v3173_v6, %v1291_v51  ;;  %v1580_v54 = vpop.f32.mrf.mxu1  ;;  %v1676_v59 = vmax.f32 %v1578_v52, 0.0 }
 0x1d7   :  { %v1293_v55 = vpop.f32.mrf.mxu0 }
 0x1d8   :  { %v1581_v56 = vadd.f32 %v1580_v54, %v1292_v53  ;;  %v1582_v57 = vpop.f32.mrf.mxu1 }
 0x1d9   :  { %v1296_v58 = vpop.f32.mrf.mxu0 }
 0x1da   :  { %v1677_v60 = vmax.f32 %v1581_v56, 0.0  ;;  %v1297_v61 = vadd.f32 %v3173_v6, %v1296_v58  ;;  %v1585_v62 = vpop.f32.mrf.mxu1 }
 0x1db   :  { %v1298_v63 = vpop.f32.mrf.mxu0 }
 0x1dc   :  { %v2434_v0 = vpack.c.bf16 %v1677_v60, %v1676_v59  ;;  %v1587_v1 = vpop.f32.mrf.mxu1  ;;  %v1586_v3 = vadd.f32 %v1585_v62, %v1297_v61 }
 0x1dd   :  { %v1299_v2 = vpop.f32.mrf.mxu0 }
 0x1de   :  { %2486 = vst [vmem:[%s3415_s3 + $0xd0] sm:$0xff] %v2434_v0   ;;  %v1300_v4 = vadd.f32 %v3173_v6, %v1299_v2  ;;  %v1588_v5 = vpop.f32.mrf.mxu1  ;;  %v1678_v11 = vmax.f32 %v1586_v3, 0.0 }
 0x1df   :  { %v1301_v7 = vpop.f32.mrf.mxu0 }
 0x1e0   :  { %v1589_v8 = vadd.f32 %v1588_v5, %v1300_v4  ;;  %v1590_v9 = vpop.f32.mrf.mxu1 }
 0x1e1   :  { %v1304_v10 = vpop.f32.mrf.mxu0 }
 0x1e2   :  { %v1679_v12 = vmax.f32 %v1589_v8, 0.0  ;;  %v1305_v13 = vadd.f32 %v3173_v6, %v1304_v10  ;;  %v1593_v14 = vpop.f32.mrf.mxu1 }
 0x1e3   :  { %v1306_v15 = vpop.f32.mrf.mxu0 }
 0x1e4   :  { %v2439_v16 = vpack.c.bf16 %v1679_v12, %v1678_v11  ;;  %v1595_v17 = vpop.f32.mrf.mxu1  ;;  %v1594_v19 = vadd.f32 %v1593_v14, %v1305_v13 }
 0x1e5   :  { %v1307_v18 = vpop.f32.mrf.mxu0 }
 0x1e6   :  { %2487 = vst [vmem:[%s3415_s3 + $0xd8] sm:$0xff] %v2439_v16   ;;  %v1308_v21 = vadd.f32 %v2717_v20, %v1307_v18  ;;  %v1596_v22 = vpop.f32.mrf.mxu1  ;;  %v1680_v26 = vmax.f32 %v1594_v19, 0.0 }
 0x1e7   :  { %v1309_v23 = vpop.f32.mrf.mxu0 }
 0x1e8   :  { %v1597_v24 = vadd.f32 %v1596_v22, %v1308_v21  ;;  %v1598_v25 = vpop.f32.mrf.mxu1 }
 0x1e9   :  { %v1312_v6 = vpop.f32.mrf.mxu0 }
 0x1ea   :  { %v1681_v27 = vmax.f32 %v1597_v24, 0.0  ;;  %v1313_v28 = vadd.f32 %v2717_v20, %v1312_v6  ;;  %v1601_v29 = vpop.f32.mrf.mxu1 }
 0x1eb   :  { %v1314_v30 = vpop.f32.mrf.mxu0 }
 0x1ec   :  { %v2444_v31 = vpack.c.bf16 %v1681_v27, %v1680_v26  ;;  %v1603_v32 = vpop.f32.mrf.mxu1  ;;  %v1602_v34 = vadd.f32 %v1601_v29, %v1313_v28 }
 0x1ed   :  { %v1315_v33 = vpop.f32.mrf.mxu0 }
 0x1ee   :  { %2488 = vst [vmem:[%s3415_s3 + $0xe0] sm:$0xff] %v2444_v31   ;;  %v1316_v35 = vadd.f32 %v2717_v20, %v1315_v33  ;;  %v1604_v36 = vpop.f32.mrf.mxu1  ;;  %v1682_v41 = vmax.f32 %v1602_v34, 0.0 }
 0x1ef   :  { %v1317_v37 = vpop.f32.mrf.mxu0 }
 0x1f0   :  { %v1605_v38 = vadd.f32 %v1604_v36, %v1316_v35  ;;  %v1606_v39 = vpop.f32.mrf.mxu1 }
 0x1f1   :  { %v1320_v40 = vpop.f32.mrf.mxu0 }
 0x1f2   :  { %v1683_v42 = vmax.f32 %v1605_v38, 0.0  ;;  %v1321_v43 = vadd.f32 %v2717_v20, %v1320_v40  ;;  %v1609_v44 = vpop.f32.mrf.mxu1 }
 0x1f3   :  { %v1322_v45 = vpop.f32.mrf.mxu0 }
 0x1f4   :  { %v2449_v46 = vpack.c.bf16 %v1683_v42, %v1682_v41  ;;  %v1611_v47 = vpop.f32.mrf.mxu1  ;;  %v1610_v49 = vadd.f32 %v1609_v44, %v1321_v43 }
 0x1f5   :  { %v1323_v48 = vpop.f32.mrf.mxu0 }
 0x1f6   :  { %2489 = vst [vmem:[%s3415_s3 + $0xe8] sm:$0xff] %v2449_v46   ;;  %v1324_v50 = vadd.f32 %v2717_v20, %v1323_v48  ;;  %v1612_v51 = vpop.f32.mrf.mxu1  ;;  %v1684_v56 = vmax.f32 %v1610_v49, 0.0 }
 0x1f7   :  { %v1325_v52 = vpop.f32.mrf.mxu0 }
 0x1f8   :  { %v1613_v53 = vadd.f32 %v1612_v51, %v1324_v50  ;;  %v1614_v54 = vpop.f32.mrf.mxu1 }
 0x1f9   :  { %v1328_v55 = vpop.f32.mrf.mxu0 }
 0x1fa   :  { %v1685_v57 = vmax.f32 %v1613_v53, 0.0  ;;  %v1329_v58 = vadd.f32 %v2717_v20, %v1328_v55  ;;  %v1617_v59 = vpop.f32.mrf.mxu1 }
 0x1fb   :  { %v1330_v60 = vpop.f32.mrf.mxu0 }
 0x1fc   :  { %v2454_v61 = vpack.c.bf16 %v1685_v57, %v1684_v56  ;;  %v1619_v62 = vpop.f32.mrf.mxu1  ;;  %v1618_v0 = vadd.f32 %v1617_v59, %v1329_v58 }
 0x1fd   :  { %v1331_v63 = vpop.f32.mrf.mxu0 }
 0x1fe   :  { %2490 = vst [vmem:[%s3415_s3 + $0xf0] sm:$0xff] %v2454_v61   ;;  %v1332_v1 = vadd.f32 %v2717_v20, %v1331_v63  ;;  %v1620_v2 = vpop.f32.mrf.mxu1  ;;  %v1686_v7 = vmax.f32 %v1618_v0, 0.0 }
 0x1ff   :  { %v1333_v3 = vpop.f32.mrf.mxu0 }
 0x200   :  { %v1621_v4 = vadd.f32 %v1620_v2, %v1332_v1  ;;  %v1622_v5 = vpop.f32.mrf.mxu1 }
 0x202   :  { %v1687_v8 = vmax.f32 %v1621_v4, 0.0 }
 0x204   :  { %v2459_v9 = vpack.c.bf16 %v1687_v8, %v1686_v7 }
 0x206   :  { %2491 = vst [vmem:[%s3415_s3 + $0xf8] sm:$0xff] %v2459_v9  }

// kernel: vae_forward.11
= control target key start
LH: loop header
LB: loop body
LE: loop exit
PB: predicated region body
PF: predicated region fallthrough
CT: control target
= control target key end

     0   :  { %s2503_s1 = inlined_call_operand.vmem [shape: bf16[1024,128], index: 1, kind: input, shape index: {}]   ;;  %s2504_s0 = inlined_call_operand.vmem [shape: bf16[128,1024], index: 0, kind: input, shape index: {}]   ;;  %s2505_s2 = inlined_call_operand.vmem [shape: f32[1,128], index: 2, kind: input, shape index: {}]   ;;  %s2506_s3 = inlined_call_operand.vmem [shape: bf16[128,128], index: 3, kind: output, shape index: {}]  }
   0x1   :  { %v1870_v0 = vld [vmem:[%s2503_s1 + $0x78] sm:$0xff]   ;;  %v1874_v4 = vld [vmem:[%s2503_s1 + $0x70] sm:$0xff]   ;;  %v1878_v8 = vld [vmem:[%s2503_s1 + $0x68] sm:$0xff]  }
   0x2   :  { %v1871_v1 = vld [vmem:[%s2503_s1 + $0xf8] sm:$0xff]   ;;  %1614 = vmatprep.subr.bf16.mxu0 %v1870_v0  ;;  %v1875_v5 = vld [vmem:[%s2503_s1 + $0xf0] sm:$0xff]   ;;  %v1879_v9 = vld [vmem:[%s2503_s1 + $0xe8] sm:$0xff]  }
   0x3   :  { %v1872_v2 = vld [vmem:[%s2503_s1 + $0x38] sm:$0xff]   ;;  %1678 = vmatprep.subr.bf16.mxu1 %v1871_v1  ;;  %v1876_v6 = vld [vmem:[%s2503_s1 + $0x30] sm:$0xff]   ;;  %v1880_v10 = vld [vmem:[%s2503_s1 + $0x28] sm:$0xff]  }
   0x4   :  { %v1873_v3 = vld [vmem:[%s2503_s1 + $0xb8] sm:$0xff]   ;;  %1615 = vmatpush3.bf16.msra.mxu0 %v1872_v2  ;;  %v1877_v7 = vld [vmem:[%s2503_s1 + $0xb0] sm:$0xff]   ;;  %v1881_v11 = vld [vmem:[%s2503_s1 + $0xa8] sm:$0xff]  }
   0x5   :  { %1679 = vmatpush3.bf16.msra.mxu1 %v1873_v3  ;;  %1616 = vmatprep.subr.bf16.mxu0 %v1874_v4  ;;  %v1882_v12 = vld [vmem:[%s2503_s1 + $0x60] sm:$0xff]   ;;  %v1886_v16 = vld [vmem:[%s2503_s1 + $0x58] sm:$0xff]   ;;  %v1890_v20 = vld [vmem:[%s2503_s1 + $0x50] sm:$0xff]  }
   0x6   :  { %1680 = vmatprep.subr.bf16.mxu1 %v1875_v5  ;;  %v1883_v13 = vld [vmem:[%s2503_s1 + $0xe0] sm:$0xff]   ;;  %v1887_v17 = vld [vmem:[%s2503_s1 + $0xd8] sm:$0xff]   ;;  %v1891_v21 = vld [vmem:[%s2503_s1 + $0xd0] sm:$0xff]  }
   0x7   :  { %v1884_v14 = vld [vmem:[%s2503_s1 + $0x20] sm:$0xff]   ;;  %v1888_v18 = vld [vmem:[%s2503_s1 + $0x18] sm:$0xff]   ;;  %v1892_v22 = vld [vmem:[%s2503_s1 + $0x10] sm:$0xff]  }
   0x8   :  { %1617 = vmatpush3.bf16.msra.mxu0 %v1876_v6  ;;  %v1885_v15 = vld [vmem:[%s2503_s1 + $0xa0] sm:$0xff]   ;;  %v1889_v19 = vld [vmem:[%s2503_s1 + $0x98] sm:$0xff]   ;;  %v1893_v23 = vld [vmem:[%s2503_s1 + $0x90] sm:$0xff]  }
   0x9   :  { %1681 = vmatpush3.bf16.msra.mxu1 %v1877_v7  ;;  %1618 = vmatprep.subr.bf16.mxu0 %v1878_v8  ;;  %v1894_v24 = vld [vmem:[%s2503_s1 + $0x48] sm:$0xff]   ;;  %v1898_v28 = vld [vmem:[%s2503_s1 + $0x40] sm:$0xff]   ;;  %v1902_v40 = vld [vmem:[%s2503_s1 + $0x178] sm:$0xff]  }
   0xa   :  { %1682 = vmatprep.subr.bf16.mxu1 %v1879_v9  ;;  %v1895_v25 = vld [vmem:[%s2503_s1 + $0xc8] sm:$0xff]   ;;  %v1899_v29 = vld [vmem:[%s2503_s1 + $0xc0] sm:$0xff]   ;;  %v1903_v41 = vld [vmem:[%s2503_s1 + $0x138] sm:$0xff]  }
   0xb   :  { %v1896_v26 = vld [vmem:[%s2503_s1 + $0x8] sm:$0xff]   ;;  %v1900_v30 = vld [vmem:[%s2503_s1] sm:$0xff]   ;;  %v1904_v42 = vld [vmem:[%s2503_s1 + $0x1f8] sm:$0xff]  }
   0xc   :  { %1619 = vmatpush3.bf16.msra.mxu0 %v1880_v10  ;;  %v1897_v27 = vld [vmem:[%s2503_s1 + $0x88] sm:$0xff]   ;;  %v1901_v31 = vld [vmem:[%s2503_s1 + $0x80] sm:$0xff]   ;;  %v1905_v43 = vld [vmem:[%s2503_s1 + $0x1b8] sm:$0xff]  }
   0xd   :  { %1683 = vmatpush3.bf16.msra.mxu1 %v1881_v11  ;;  %1620 = vmatprep.subr.bf16.mxu0 %v1882_v12  ;;  %v15_v32 = vld [vmem:[%s2504_s0] sm:$0xff]  ;;  %v16_v34 = vld [vmem:[%s2504_s0 + $0x8] sm:$0xff]  ;;  %v1906_v50 = vld [vmem:[%s2503_s1 + $0x170] sm:$0xff]  }
   0xe   :  { %1684 = vmatprep.subr.bf16.mxu1 %v1883_v13  ;;  %v19_v33 = vld [vmem:[%s2504_s0 + $0x20] sm:$0xff]  ;;  %v20_v37 = vld [vmem:[%s2504_s0 + $0x28] sm:$0xff]  ;;  %v1907_v52 = vld [vmem:[%s2503_s1 + $0x130] sm:$0xff]  }
   0xf   :  { %v1407_v35 = vcombine.low %v15_v32, %v19_v33  ;;  %v1408_v36 = vcombine.high %v15_v32, %v19_v33  ;;  %v1409_v38 = vcombine.low %v16_v34, %v20_v37  ;;  %v1410_v39 = vcombine.high %v16_v34, %v20_v37  ;;  %v23_v44 = vld [vmem:[%s2504_s0 + $0x40] sm:$0xff]  ;;  %v24_v47 = vld [vmem:[%s2504_s0 + $0x48] sm:$0xff]  ;;  %v1908_v54 = vld [vmem:[%s2503_s1 + $0x1f0] sm:$0xff]  }
  0x10   :  { %1621 = vmatpush3.bf16.msra.mxu0 %v1884_v14  ;;  %v27_v45 = vld [vmem:[%s2504_s0 + $0x60] sm:$0xff]  ;;  %v28_v48 = vld [vmem:[%s2504_s0 + $0x68] sm:$0xff]  ;;  %v1909_v55 = vld [vmem:[%s2503_s1 + $0x1b0] sm:$0xff]  }
  0x11   :  { %1685 = vmatpush3.bf16.msra.mxu1 %v1885_v15  ;;  %1622 = vmatprep.subr.bf16.mxu0 %v1886_v16  ;;  %v1416_v46 = vcombine.high %v23_v44, %v27_v45  ;;  %v1418_v49 = vcombine.high %v24_v47, %v28_v48  ;;  %v1415_v51 = vcombine.low %v23_v44, %v27_v45  ;;  %v31_v56 = vld [vmem:[%s2504_s0 + $0x80] sm:$0xff]  ;;  %v32_v58 = vld [vmem:[%s2504_s0 + $0x88] sm:$0xff]  ;;  %v1924_v32 = vld [vmem:[%s2503_s1 + $0x1d0] sm:$0xff]  }
  0x12   :  { %1686 = vmatprep.subr.bf16.mxu1 %v1887_v17  ;;  %950 = vmatprep.mubr.bf16.mxu0 %v1408_v36  ;;  %v1417_v53 = vcombine.low %v24_v47, %v28_v48  ;;  %v35_v57 = vld [vmem:[%s2504_s0 + $0xa0] sm:$0xff]  ;;  %v36_v59 = vld [vmem:[%s2504_s0 + $0xa8] sm:$0xff]  ;;  %v1925_v33 = vld [vmem:[%s2503_s1 + $0x190] sm:$0xff]  }
  0x13   :  { %1047 = vmatprep.mubr.bf16.mxu1 %v1410_v39  ;;  %v1424_v60 = vcombine.high %v31_v56, %v35_v57  ;;  %v1426_v61 = vcombine.high %v32_v58, %v36_v59  ;;  %v1910_v62 = vld [vmem:[%s2503_s1 + $0x168] sm:$0xff]   ;;  %v1423_v2 = vcombine.low %v31_v56, %v35_v57  ;;  %v39_v3 = vld [vmem:[%s2504_s0 + $0xc0] sm:$0xff]  ;;  %v1425_v6 = vcombine.low %v32_v58, %v36_v59 }
  0x14   :  { %1623 = vmatpush3.bf16.msra.mxu0 %v1888_v18  ;;  %v1911_v63 = vld [vmem:[%s2503_s1 + $0x128] sm:$0xff]   ;;  %v43_v4 = vld [vmem:[%s2504_s0 + $0xe0] sm:$0xff]  ;;  %v1918_v18 = vld [vmem:[%s2503_s1 + $0x158] sm:$0xff]  }
  0x15   :  { %1687 = vmatpush3.bf16.msra.mxu1 %v1889_v19  ;;  %1624 = vmatprep.subr.bf16.mxu0 %v1890_v20  ;;  %v1912_v0 = vld [vmem:[%s2503_s1 + $0x1e8] sm:$0xff]   ;;  %v1432_v7 = vcombine.high %v39_v3, %v43_v4  ;;  %v1914_v10 = vld [vmem:[%s2503_s1 + $0x160] sm:$0xff]   ;;  %v1431_v19 = vcombine.low %v39_v3, %v43_v4  ;;  %v1919_v20 = vld [vmem:[%s2503_s1 + $0x118] sm:$0xff]  }
  0x16   :  { %1688 = vmatprep.subr.bf16.mxu1 %v1891_v21  ;;  %v1913_v1 = vld [vmem:[%s2503_s1 + $0x1a8] sm:$0xff]   ;;  %v1915_v11 = vld [vmem:[%s2503_s1 + $0x120] sm:$0xff]  }
  0x17   :  { %v40_v5 = vld [vmem:[%s2504_s0 + $0xc8] sm:$0xff]  ;;  %v1916_v12 = vld [vmem:[%s2503_s1 + $0x1e0] sm:$0xff]  }
  0x18   :  { %1625 = vmatpush3.bf16.msra.mxu0 %v1892_v22  ;;  %v44_v8 = vld [vmem:[%s2504_s0 + $0xe8] sm:$0xff]  ;;  %v1917_v13 = vld [vmem:[%s2503_s1 + $0x1a0] sm:$0xff]  }
  0x19   :  { %1689 = vmatpush3.bf16.msra.mxu1 %v1893_v23  ;;  %1626 = vmatprep.subr.bf16.mxu0 %v1894_v24  ;;  %v1434_v9 = vcombine.high %v40_v5, %v44_v8  ;;  %v47_v14 = vld [vmem:[%s2504_s0 + $0x100] sm:$0xff]  ;;  %v48_v16 = vld [vmem:[%s2504_s0 + $0x108] sm:$0xff]  ;;  %v1433_v21 = vcombine.low %v40_v5, %v44_v8  ;;  %v1920_v23 = vld [vmem:[%s2503_s1 + $0x1d8] sm:$0xff]  }
  0x1a   :  { %1690 = vmatprep.subr.bf16.mxu1 %v1895_v25  ;;  %v51_v15 = vld [vmem:[%s2504_s0 + $0x120] sm:$0xff]  ;;  %v52_v17 = vld [vmem:[%s2504_s0 + $0x128] sm:$0xff]  ;;  %v1921_v25 = vld [vmem:[%s2503_s1 + $0x198] sm:$0xff]  }
  0x1b   :  { %v1440_v22 = vcombine.high %v47_v14, %v51_v15  ;;  %v1442_v24 = vcombine.high %v48_v16, %v52_v17  ;;  %v1439_v34 = vcombine.low %v47_v14, %v51_v15  ;;  %v1927_v39 = vld [vmem:[%s2503_s1 + $0x108] sm:$0xff]   ;;  %v1931_v48 = vld [vmem:[%s2503_s1 + $0x100] sm:$0xff]   ;;  %v26_v8 = vld [vmem:[%s2504_s0 + $0x58] sm:$0xff] }
  0x1c   :  { %1627 = vmatpush3.bf16.msra.mxu0 %v1896_v26  ;;  %v55_v26 = vld [vmem:[%s2504_s0 + $0x140] sm:$0xff]  ;;  %v64_v44 = vld [vmem:[%s2504_s0 + $0x188] sm:$0xff]  ;;  %v33_v14 = vld [vmem:[%s2504_s0 + $0x90] sm:$0xff] }
  0x1d   :  { %1691 = vmatpush3.bf16.msra.mxu1 %v1897_v27  ;;  %1628 = vmatprep.subr.bf16.mxu0 %v1898_v28  ;;  %v59_v27 = vld [vmem:[%s2504_s0 + $0x160] sm:$0xff]  ;;  %v1922_v28 = vld [vmem:[%s2503_s1 + $0x150] sm:$0xff]   ;;  %v68_v45 = vld [vmem:[%s2504_s0 + $0x1a8] sm:$0xff] }
  0x1e   :  { %1692 = vmatprep.subr.bf16.mxu1 %v1899_v29  ;;  %v56_v29 = vld [vmem:[%s2504_s0 + $0x148] sm:$0xff]  ;;  %v1448_v36 = vcombine.high %v55_v26, %v59_v27  ;;  %v1447_v47 = vcombine.low %v55_v26, %v59_v27  ;;  %v1457_v59 = vcombine.low %v64_v44, %v68_v45  ;;  %v37_v15 = vld [vmem:[%s2504_s0 + $0xb0] sm:$0xff] }
  0x1f   :  { %v72_v56 = vld [vmem:[%s2504_s0 + $0x1c8] sm:$0xff]  ;;  %v1427_v26 = vcombine.low %v33_v14, %v37_v15 }
  0x20   :  { %1629 = vmatpush3.bf16.msra.mxu0 %v1900_v30  ;;  %v60_v30 = vld [vmem:[%s2504_s0 + $0x168] sm:$0xff] }
  0x21   :  { %1693 = vmatpush3.bf16.msra.mxu1 %v1901_v31  ;;  %1742 = vmatprep.subr.bf16.mxu0 %v1902_v40  ;;  %v1923_v31 = vld [vmem:[%s2503_s1 + $0x110] sm:$0xff]   ;;  %v1450_v37 = vcombine.high %v56_v29, %v60_v30  ;;  %v1928_v40 = vld [vmem:[%s2503_s1 + $0x1c8] sm:$0xff]  }
  0x22   :  { %1806 = vmatprep.subr.bf16.mxu1 %v1904_v42  ;;  %v67_v42 = vld [vmem:[%s2504_s0 + $0x1a0] sm:$0xff]  ;;  %v76_v57 = vld [vmem:[%s2504_s0 + $0x1e8] sm:$0xff] }
  0x23   :  { %951 = vmatmul.mubr.bf16.vlgmr.msra.gmra.mxu0 %v1407_v35  ;;  %v1441_v35 = vcombine.low %v48_v16, %v52_v17  ;;  %v1465_v3 = vcombine.low %v72_v56, %v76_v57  ;;  %v34_v16 = vld [vmem:[%s2504_s0 + $0x98] sm:$0xff] }
  0x24   :  { %1048 = vmatmul.mubr.bf16.vlgmr.msra.gmra.mxu1 %v1409_v38  ;;  %1743 = vmatpush3.bf16.msra.mxu0 %v1903_v41  ;;  %v1926_v38 = vld [vmem:[%s2503_s1 + $0x148] sm:$0xff]   ;;  %v63_v41 = vld [vmem:[%s2504_s0 + $0x180] sm:$0xff]  ;;  %v38_v17 = vld [vmem:[%s2504_s0 + $0xb8] sm:$0xff] }
  0x25   :  { %1807 = vmatpush3.bf16.msra.mxu1 %v1905_v43  ;;  %958 = vmatprep.mubr.bf16.mxu0 %v1416_v46  ;;  %v1929_v43 = vld [vmem:[%s2503_s1 + $0x188] sm:$0xff]   ;;  %v1930_v46 = vld [vmem:[%s2503_s1 + $0x140] sm:$0xff]   ;;  %v1455_v58 = vcombine.low %v63_v41, %v67_v42  ;;  %v1429_v27 = vcombine.low %v34_v16, %v38_v17 }
  0x26   :  { %1055 = vmatprep.mubr.bf16.mxu1 %v1418_v49  ;;  %1744 = vmatprep.subr.bf16.mxu0 %v1906_v50  ;;  %v1449_v49 = vcombine.low %v56_v29, %v60_v30  ;;  %v1456_v50 = vcombine.high %v63_v41, %v67_v42  ;;  %v49_v30 = vld [vmem:[%s2504_s0 + $0x110] sm:$0xff]  ;;  %v62_v41 = vld [vmem:[%s2504_s0 + $0x178] sm:$0xff] }
  0x27   :  { %1808 = vmatprep.subr.bf16.mxu1 %v1908_v54  ;;  %v71_v54 = vld [vmem:[%s2504_s0 + $0x1c0] sm:$0xff] }
  0x28   :  { %1745 = vmatpush3.bf16.msra.mxu0 %v1907_v52  ;;  %v1458_v52 = vcombine.high %v64_v44, %v68_v45 }
  0x29   :  { %1809 = vmatpush3.bf16.msra.mxu1 %v1909_v55  ;;  %1746 = vmatprep.subr.bf16.mxu0 %v1910_v62  ;;  %v75_v55 = vld [vmem:[%s2504_s0 + $0x1e0] sm:$0xff]  ;;  %v17_v62 = vld [vmem:[%s2504_s0 + $0x10] sm:$0xff] }
  0x2a   :  { %1810 = vmatprep.subr.bf16.mxu1 %v1912_v0  ;;  %v18_v0 = vld [vmem:[%s2504_s0 + $0x18] sm:$0xff] }
  0x2b   :  { %959 = vmatmul.mubr.bf16.gmra.mxu0 %v1415_v51  ;;  %v1932_v51 = vld [vmem:[%s2503_s1 + $0x1c0] sm:$0xff]  }
  0x2c   :  { %1056 = vmatmul.mubr.bf16.gmra.mxu1 %v1417_v53  ;;  %966 = vmatprep.mubr.bf16.mxu0 %v1424_v60  ;;  %v1933_v53 = vld [vmem:[%s2503_s1 + $0x180] sm:$0xff]   ;;  %v1464_v60 = vcombine.high %v71_v54, %v75_v55 }
  0x2d   :  { %1063 = vmatprep.mubr.bf16.mxu1 %v1426_v61  ;;  %1747 = vmatpush3.bf16.msra.mxu0 %v1911_v63  ;;  %v1466_v61 = vcombine.high %v72_v56, %v76_v57  ;;  %v21_v63 = vld [vmem:[%s2504_s0 + $0x30] sm:$0xff]  ;;  %v74_v56 = vld [vmem:[%s2504_s0 + $0x1d8] sm:$0xff] }
  0x2e   :  { %1811 = vmatpush3.bf16.msra.mxu1 %v1913_v1  ;;  %1748 = vmatprep.subr.bf16.mxu0 %v1914_v10  ;;  %v22_v1 = vld [vmem:[%s2504_s0 + $0x38] sm:$0xff]  ;;  %v1412_v4 = vcombine.high %v17_v62, %v21_v63  ;;  %v1411_v10 = vcombine.low %v17_v62, %v21_v63 }
  0x2f   :  { %1812 = vmatprep.subr.bf16.mxu1 %v1916_v12  ;;  %v1414_v5 = vcombine.high %v18_v0, %v22_v1  ;;  %v78_v57 = vld [vmem:[%s2504_s0 + $0x1f8] sm:$0xff] }
  0x30   :  { %v1469_v63 = vcombine.low %v74_v56, %v78_v57 }
  0x31   :  { %1749 = vmatpush3.bf16.msra.mxu0 %v1915_v11  ;;  %v1413_v11 = vcombine.low %v18_v0, %v22_v1 }
  0x32   :  { %1813 = vmatpush3.bf16.msra.mxu1 %v1917_v13  ;;  %1750 = vmatprep.subr.bf16.mxu0 %v1918_v18 }
  0x33   :  { %967 = vmatmul.mubr.bf16.gmra.mxu0 %v1423_v2  ;;  %1814 = vmatprep.subr.bf16.mxu1 %v1920_v23  ;;  %v1463_v2 = vcombine.low %v71_v54, %v75_v55  ;;  %v45_v23 = vld [vmem:[%s2504_s0 + $0xf0] sm:$0xff] }
  0x34   :  { %1064 = vmatmul.mubr.bf16.gmra.mxu1 %v1425_v6  ;;  %974 = vmatprep.mubr.bf16.mxu0 %v1432_v7  ;;  %v25_v6 = vld [vmem:[%s2504_s0 + $0x50] sm:$0xff] }
  0x35   :  { %1071 = vmatprep.mubr.bf16.mxu1 %v1434_v9  ;;  %1751 = vmatpush3.bf16.msra.mxu0 %v1919_v20  ;;  %v29_v7 = vld [vmem:[%s2504_s0 + $0x70] sm:$0xff]  ;;  %v30_v9 = vld [vmem:[%s2504_s0 + $0x78] sm:$0xff]  ;;  %v1428_v20 = vcombine.high %v33_v14, %v37_v15 }
  0x36   :  { %1815 = vmatpush3.bf16.msra.mxu1 %v1921_v25  ;;  %1752 = vmatprep.subr.bf16.mxu0 %v1922_v28  ;;  %v1420_v12 = vcombine.high %v25_v6, %v29_v7  ;;  %v1422_v13 = vcombine.high %v26_v8, %v30_v9  ;;  %v1419_v18 = vcombine.low %v25_v6, %v29_v7  ;;  %v46_v25 = vld [vmem:[%s2504_s0 + $0xf8] sm:$0xff]  ;;  %v73_v54 = vld [vmem:[%s2504_s0 + $0x1d0] sm:$0xff] }
  0x37   :  { %1816 = vmatprep.subr.bf16.mxu1 %v1924_v32  ;;  %v50_v32 = vld [vmem:[%s2504_s0 + $0x118] sm:$0xff]  ;;  %v77_v55 = vld [vmem:[%s2504_s0 + $0x1f0] sm:$0xff] }
  0x38   :  { %v1467_v62 = vcombine.low %v73_v54, %v77_v55 }
  0x39   :  { %1753 = vmatpush3.bf16.msra.mxu0 %v1923_v31  ;;  %v53_v31 = vld [vmem:[%s2504_s0 + $0x130] sm:$0xff] }
  0x3a   :  { %1817 = vmatpush3.bf16.msra.mxu1 %v1925_v33  ;;  %1754 = vmatprep.subr.bf16.mxu0 %v1926_v38  ;;  %v54_v33 = vld [vmem:[%s2504_s0 + $0x138] sm:$0xff]  ;;  %v57_v38 = vld [vmem:[%s2504_s0 + $0x150] sm:$0xff]  ;;  %v1443_v42 = vcombine.low %v49_v30, %v53_v31 }
  0x3b   :  { %975 = vmatmul.mubr.bf16.gmra.mxu0 %v1431_v19  ;;  %1818 = vmatprep.subr.bf16.mxu1 %v1928_v40  ;;  %v1421_v19 = vcombine.low %v26_v8, %v30_v9  ;;  %v58_v40 = vld [vmem:[%s2504_s0 + $0x158] sm:$0xff] }
  0x3c   :  { %1072 = vmatmul.mubr.bf16.gmra.mxu1 %v1433_v21  ;;  %982 = vmatprep.mubr.bf16.mxu0 %v1440_v22  ;;  %v1430_v21 = vcombine.high %v34_v16, %v38_v17  ;;  %v41_v22 = vld [vmem:[%s2504_s0 + $0xd0] sm:$0xff]  ;;  %v1454_v45 = vcombine.high %v58_v40, %v62_v41 }
  0x3d   :  { %1079 = vmatprep.mubr.bf16.mxu1 %v1442_v24  ;;  %1755 = vmatpush3.bf16.msra.mxu0 %v1927_v39  ;;  %v42_v24 = vld [vmem:[%s2504_s0 + $0xd8] sm:$0xff]  ;;  %v1436_v28 = vcombine.high %v41_v22, %v45_v23  ;;  %v61_v39 = vld [vmem:[%s2504_s0 + $0x170] sm:$0xff] }
  0x3e   :  { %1819 = vmatpush3.bf16.msra.mxu1 %v1929_v43  ;;  %1756 = vmatprep.subr.bf16.mxu0 %v1930_v46  ;;  %v1438_v29 = vcombine.high %v42_v24, %v46_v25  ;;  %v1445_v43 = vcombine.low %v50_v32, %v54_v33  ;;  %v1452_v44 = vcombine.high %v57_v38, %v61_v39  ;;  %v65_v46 = vld [vmem:[%s2504_s0 + $0x190] sm:$0xff] }
  0x3f   :  { %1820 = vmatprep.subr.bf16.mxu1 %v1932_v51  ;;  %v1453_v51 = vcombine.low %v58_v40, %v62_v41 }
  0x41   :  { %1757 = vmatpush3.bf16.msra.mxu0 %v1931_v48  ;;  %v66_v48 = vld [vmem:[%s2504_s0 + $0x198] sm:$0xff] }
  0x42   :  { %1821 = vmatpush3.bf16.msra.mxu1 %v1933_v53 }
  0x43   :  { %983 = vmatmul.mubr.bf16.gmra.mxu0 %v1439_v34  ;;  %v1435_v34 = vcombine.low %v41_v22, %v45_v23 }
  0x44   :  { %1080 = vmatmul.mubr.bf16.gmra.mxu1 %v1441_v35  ;;  %990 = vmatprep.mubr.bf16.mxu0 %v1448_v36  ;;  %v1437_v35 = vcombine.low %v42_v24, %v46_v25  ;;  %v1444_v36 = vcombine.high %v49_v30, %v53_v31 }
  0x45   :  { %1087 = vmatprep.mubr.bf16.mxu1 %v1450_v37  ;;  %v1446_v37 = vcombine.high %v50_v32, %v54_v33 }
  0x4b   :  { %991 = vmatmul.mubr.bf16.gmra.mxu0 %v1447_v47  ;;  %v69_v47 = vld [vmem:[%s2504_s0 + $0x1b0] sm:$0xff] }
  0x4c   :  { %1088 = vmatmul.mubr.bf16.gmra.mxu1 %v1449_v49  ;;  %998 = vmatprep.mubr.bf16.mxu0 %v1456_v50  ;;  %v70_v49 = vld [vmem:[%s2504_s0 + $0x1b8] sm:$0xff]  ;;  %v1451_v50 = vcombine.low %v57_v38, %v61_v39 }
  0x4d   :  { %1095 = vmatprep.mubr.bf16.mxu1 %v1458_v52  ;;  %v1460_v52 = vcombine.high %v65_v46, %v69_v47  ;;  %v1462_v53 = vcombine.high %v66_v48, %v70_v49 }
  0x53   :  { %999 = vmatmul.mubr.bf16.gmra.mxu0 %v1455_v58  ;;  %v1459_v58 = vcombine.low %v65_v46, %v69_v47 }
  0x54   :  { %1096 = vmatmul.mubr.bf16.gmra.mxu1 %v1457_v59  ;;  %1006 = vmatprep.mubr.bf16.mxu0 %v1464_v60  ;;  %v1461_v59 = vcombine.low %v66_v48, %v70_v49  ;;  %v1468_v60 = vcombine.high %v73_v54, %v77_v55 }
  0x55   :  { %1103 = vmatprep.mubr.bf16.mxu1 %v1466_v61  ;;  %v1470_v61 = vcombine.high %v74_v56, %v78_v57 }
  0x5b   :  { %1007 = vmatmul.mubr.bf16.gmra.mxu0 %v1463_v2  ;;  %v2341_v2 = vld [vmem:[%s2505_s2] ss:$0 sm:$0xff] }
  0x5c   :  { %1104 = vmatmul.mubr.bf16.gmra.mxu1 %v1465_v3  ;;  %1144 = vmatprep.mubr.bf16.mxu0 %v1412_v4 }
  0x5d   :  { %1241 = vmatprep.mubr.bf16.mxu1 %v1414_v5 }
  0x63   :  { %1145 = vmatmul.mubr.bf16.vlgmr.msra.gmra.mxu0 %v1411_v10 }
  0x64   :  { %1242 = vmatmul.mubr.bf16.vlgmr.msra.gmra.mxu1 %v1413_v11  ;;  %1152 = vmatprep.mubr.bf16.mxu0 %v1420_v12 }
  0x65   :  { %1249 = vmatprep.mubr.bf16.mxu1 %v1422_v13 }
  0x6b   :  { %1153 = vmatmul.mubr.bf16.gmra.mxu0 %v1419_v18 }
  0x6c   :  { %1250 = vmatmul.mubr.bf16.gmra.mxu1 %v1421_v19  ;;  %1160 = vmatprep.mubr.bf16.mxu0 %v1428_v20 }
  0x6d   :  { %1257 = vmatprep.mubr.bf16.mxu1 %v1430_v21 }
  0x73   :  { %1161 = vmatmul.mubr.bf16.gmra.mxu0 %v1427_v26 }
  0x74   :  { %1258 = vmatmul.mubr.bf16.gmra.mxu1 %v1429_v27  ;;  %1168 = vmatprep.mubr.bf16.mxu0 %v1436_v28 }
  0x75   :  { %1265 = vmatprep.mubr.bf16.mxu1 %v1438_v29 }
  0x7b   :  { %1169 = vmatmul.mubr.bf16.gmra.mxu0 %v1435_v34 }
  0x7c   :  { %1266 = vmatmul.mubr.bf16.gmra.mxu1 %v1437_v35  ;;  %1176 = vmatprep.mubr.bf16.mxu0 %v1444_v36 }
  0x7d   :  { %1273 = vmatprep.mubr.bf16.mxu1 %v1446_v37 }
  0x83   :  { %1177 = vmatmul.mubr.bf16.gmra.mxu0 %v1443_v42 }
  0x84   :  { %1274 = vmatmul.mubr.bf16.gmra.mxu1 %v1445_v43  ;;  %1184 = vmatprep.mubr.bf16.mxu0 %v1452_v44 }
  0x85   :  { %1281 = vmatprep.mubr.bf16.mxu1 %v1454_v45 }
  0x8b   :  { %1185 = vmatmul.mubr.bf16.gmra.mxu0 %v1451_v50 }
  0x8c   :  { %1282 = vmatmul.mubr.bf16.gmra.mxu1 %v1453_v51  ;;  %1192 = vmatprep.mubr.bf16.mxu0 %v1460_v52 }
  0x8d   :  { %1289 = vmatprep.mubr.bf16.mxu1 %v1462_v53 }
  0x93   :  { %1193 = vmatmul.mubr.bf16.gmra.mxu0 %v1459_v58 }
  0x94   :  { %1290 = vmatmul.mubr.bf16.gmra.mxu1 %v1461_v59  ;;  %1200 = vmatprep.mubr.bf16.mxu0 %v1468_v60 }
  0x95   :  { %1297 = vmatprep.mubr.bf16.mxu1 %v1470_v61 }
  0x9b   :  { %1201 = vmatmul.mubr.bf16.gmra.mxu0 %v1467_v62 }
  0x9c   :  { %1298 = vmatmul.mubr.bf16.gmra.mxu1 %v1469_v63 }
  0xe3   :  { %v1630_v0 = vpop.f32.mrf.mxu0 }
  0xe4   :  { %v1694_v1 = vpop.f32.mrf.mxu1 }
  0xe5   :  { %v1631_v3 = vpop.f32.mrf.mxu0 }
  0xe6   :  { %v1632_v4 = vadd.f32 %v1631_v3, %v1630_v0  ;;  %v1695_v5 = vpop.f32.mrf.mxu1 }
  0xe7   :  { %v1696_v6 = vadd.f32 %v1695_v5, %v1694_v1  ;;  %v2343_v7 = vpop.f32.mrf.mxu0 }
  0xe8   :  { %v953_v8 = vadd.f32 %v1632_v4, %v2341_v2  ;;  %v2346_v9 = vpop.f32.mrf.mxu1 }
  0xe9   :  { %v2348_v10 = vpop.f32.mrf.mxu0 }
  0xea   :  { %v2350_v11 = vadd.f32 %v1696_v6, %v953_v8  ;;  %v2352_v12 = vpop.f32.mrf.mxu1 }
  0xeb   :  { %v1636_v13 = vpop.f32.mrf.mxu0 }
  0xec   :  { %v1700_v14 = vpop.f32.mrf.mxu1 }
  0xed   :  { %v1637_v15 = vpop.f32.mrf.mxu0 }
  0xee   :  { %v1638_v16 = vadd.f32 %v1637_v15, %v1636_v13  ;;  %v1701_v17 = vpop.f32.mrf.mxu1 }
  0xef   :  { %v1702_v18 = vadd.f32 %v1701_v17, %v1700_v14  ;;  %v2354_v19 = vpop.f32.mrf.mxu0 }
  0xf0   :  { %v961_v20 = vadd.f32 %v1638_v16, %v2341_v2  ;;  %v2357_v21 = vpop.f32.mrf.mxu1 }
  0xf1   :  { %v2359_v22 = vpop.f32.mrf.mxu0 }
  0xf2   :  { %v2361_v23 = vadd.f32 %v1702_v18, %v961_v20  ;;  %v2363_v24 = vpop.f32.mrf.mxu1 }
  0xf3   :  { %v1642_v25 = vpop.f32.mrf.mxu0 }
  0xf4   :  { %v1706_v26 = vpop.f32.mrf.mxu1 }
  0xf5   :  { %v1643_v27 = vpop.f32.mrf.mxu0 }
  0xf6   :  { %v1644_v28 = vadd.f32 %v1643_v27, %v1642_v25  ;;  %v1707_v29 = vpop.f32.mrf.mxu1 }
  0xf7   :  { %v1708_v30 = vadd.f32 %v1707_v29, %v1706_v26  ;;  %v2365_v31 = vpop.f32.mrf.mxu0 }
  0xf8   :  { %v969_v32 = vadd.f32 %v1644_v28, %v2341_v2  ;;  %v2368_v33 = vpop.f32.mrf.mxu1 }
  0xf9   :  { %v2370_v34 = vpop.f32.mrf.mxu0 }
  0xfa   :  { %v2372_v35 = vadd.f32 %v1708_v30, %v969_v32  ;;  %v2374_v36 = vpop.f32.mrf.mxu1 }
  0xfb   :  { %v1648_v37 = vpop.f32.mrf.mxu0 }
  0xfc   :  { %v1712_v38 = vpop.f32.mrf.mxu1 }
  0xfd   :  { %v1649_v39 = vpop.f32.mrf.mxu0 }
  0xfe   :  { %v1650_v40 = vadd.f32 %v1649_v39, %v1648_v37  ;;  %v1713_v41 = vpop.f32.mrf.mxu1 }
  0xff   :  { %v1714_v42 = vadd.f32 %v1713_v41, %v1712_v38  ;;  %v2376_v43 = vpop.f32.mrf.mxu0 }
 0x100   :  { %v977_v44 = vadd.f32 %v1650_v40, %v2341_v2  ;;  %v2379_v45 = vpop.f32.mrf.mxu1 }
 0x101   :  { %v2381_v46 = vpop.f32.mrf.mxu0 }
 0x102   :  { %v2383_v47 = vadd.f32 %v1714_v42, %v977_v44  ;;  %v2385_v48 = vpop.f32.mrf.mxu1 }
 0x103   :  { %v1654_v49 = vpop.f32.mrf.mxu0 }
 0x104   :  { %v1718_v50 = vpop.f32.mrf.mxu1 }
 0x105   :  { %v1655_v51 = vpop.f32.mrf.mxu0 }
 0x106   :  { %v1656_v52 = vadd.f32 %v1655_v51, %v1654_v49  ;;  %v1719_v53 = vpop.f32.mrf.mxu1 }
 0x107   :  { %v1720_v54 = vadd.f32 %v1719_v53, %v1718_v50  ;;  %v2387_v55 = vpop.f32.mrf.mxu0 }
 0x108   :  { %v985_v56 = vadd.f32 %v1656_v52, %v2341_v2  ;;  %v2390_v57 = vpop.f32.mrf.mxu1  ;;  %v1635_v52 = vadd.f32 %v2348_v10, %v2343_v7  ;;  %v1641_v10 = vadd.f32 %v2359_v22, %v2354_v19 }
 0x109   :  { %v2392_v58 = vpop.f32.mrf.mxu0 }
 0x10a   :  { %v2394_v59 = vadd.f32 %v1720_v54, %v985_v56  ;;  %v2396_v60 = vpop.f32.mrf.mxu1 }
 0x10b   :  { %v1660_v61 = vpop.f32.mrf.mxu0 }
 0x10c   :  { %v1724_v62 = vpop.f32.mrf.mxu1 }
 0x10d   :  { %v1661_v63 = vpop.f32.mrf.mxu0 }
 0x10e   :  { %v1662_v0 = vadd.f32 %v1661_v63, %v1660_v61  ;;  %v1725_v1 = vpop.f32.mrf.mxu1  ;;  %v956_v63 = vadd.f32 %v1635_v52, %v2341_v2  ;;  %v1705_v52 = vadd.f32 %v2363_v24, %v2357_v21 }
 0x10f   :  { %v1726_v3 = vadd.f32 %v1725_v1, %v1724_v62  ;;  %v2398_v4 = vpop.f32.mrf.mxu0 }
 0x110   :  { %v993_v5 = vadd.f32 %v1662_v0, %v2341_v2  ;;  %v2401_v6 = vpop.f32.mrf.mxu1 }
 0x111   :  { %v2403_v8 = vpop.f32.mrf.mxu0 }
 0x112   :  { %v2405_v13 = vadd.f32 %v1726_v3, %v993_v5  ;;  %v2407_v14 = vpop.f32.mrf.mxu1  ;;  %v1699_v5 = vadd.f32 %v2352_v12, %v2346_v9 }
 0x113   :  { %v1666_v15 = vpop.f32.mrf.mxu0 }
 0x114   :  { %v1730_v16 = vpop.f32.mrf.mxu1  ;;  %v1053_v7 = vadd.f32 %v1699_v5, %v956_v63 }
 0x115   :  { %v1667_v17 = vpop.f32.mrf.mxu0 }
 0x116   :  { %v1668_v18 = vadd.f32 %v1667_v17, %v1666_v15  ;;  %v1731_v20 = vpop.f32.mrf.mxu1 }
 0x117   :  { %v1732_v25 = vadd.f32 %v1731_v20, %v1730_v16  ;;  %v2409_v26 = vpop.f32.mrf.mxu0 }
 0x118   :  { %v1001_v27 = vadd.f32 %v1668_v18, %v2341_v2  ;;  %v2412_v28 = vpop.f32.mrf.mxu1 }
 0x119   :  { %v2414_v29 = vpop.f32.mrf.mxu0 }
 0x11a   :  { %v2416_v30 = vadd.f32 %v1732_v25, %v1001_v27  ;;  %v2418_v32 = vpop.f32.mrf.mxu1 }
 0x11b   :  { %v1672_v37 = vpop.f32.mrf.mxu0 }
 0x11c   :  { %v1736_v38 = vpop.f32.mrf.mxu1 }
 0x11d   :  { %v1673_v39 = vpop.f32.mrf.mxu0 }
 0x11e   :  { %v1674_v40 = vadd.f32 %v1673_v39, %v1672_v37  ;;  %v1737_v41 = vpop.f32.mrf.mxu1 }
 0x11f   :  { %v1738_v42 = vadd.f32 %v1737_v41, %v1736_v38  ;;  %v2420_v44 = vpop.f32.mrf.mxu0 }
 0x120   :  { %v1009_v49 = vadd.f32 %v1674_v40, %v2341_v2  ;;  %v2423_v50 = vpop.f32.mrf.mxu1 }
 0x121   :  { %v2425_v51 = vpop.f32.mrf.mxu0 }
 0x122   :  { %v2429_v53 = vadd.f32 %v1738_v42, %v1009_v49  ;;  %v2431_v54 = vpop.f32.mrf.mxu1  ;;  %v964_v42 = vadd.f32 %v1641_v10, %v2341_v2 }
 0x123   :  { %v1758_v56 = vpop.f32.mrf.mxu0 }
 0x124   :  { %v1822_v61 = vpop.f32.mrf.mxu1 }
 0x125   :  { %v1759_v62 = vpop.f32.mrf.mxu0 }
 0x126   :  { %v1760_v0 = vadd.f32 %v1759_v62, %v1758_v56  ;;  %v1823_v1 = vpop.f32.mrf.mxu1  ;;  %v1647_v62 = vadd.f32 %v2370_v34, %v2365_v31 }
 0x127   :  { %v1761_v3 = vpop.f32.mrf.mxu0  ;;  %v1824_v18 = vadd.f32 %v1823_v1, %v1822_v61 }
 0x128   :  { %v1147_v15 = vadd.f32 %v1760_v0, %v2350_v11  ;;  %v1825_v16 = vpop.f32.mrf.mxu1  ;;  %v1061_v0 = vadd.f32 %v1705_v52, %v964_v42  ;;  %v1653_v42 = vadd.f32 %v2381_v46, %v2376_v43  ;;  %v1717_v46 = vadd.f32 %v2385_v48, %v2379_v45 }
 0x129   :  { %v1762_v17 = vpop.f32.mrf.mxu0 }
 0x12a   :  { %v1763_v20 = vadd.f32 %v1762_v17, %v1761_v3  ;;  %v1826_v25 = vpop.f32.mrf.mxu1  ;;  %v1244_v37 = vadd.f32 %v1824_v18, %v1147_v15 }
 0x12b   :  { %v1764_v27 = vpop.f32.mrf.mxu0  ;;  %v1827_v39 = vadd.f32 %v1826_v25, %v1825_v16 }
 0x12c   :  { %v1150_v38 = vadd.f32 %v1763_v20, %v1053_v7  ;;  %v1828_v40 = vpop.f32.mrf.mxu1  ;;  %v1306_v56 = vmax.f32 %v1244_v37, 0.0  ;;  %v1711_v20 = vadd.f32 %v2374_v36, %v2368_v33 }
 0x12d   :  { %v1765_v41 = vpop.f32.mrf.mxu0 }
 0x12e   :  { %v1247_v9 = vadd.f32 %v1827_v39, %v1150_v38  ;;  %v1766_v12 = vadd.f32 %v1765_v41, %v1764_v27  ;;  %v1829_v11 = vpop.f32.mrf.mxu1 }
 0x12f   :  { %v1767_v49 = vpop.f32.mrf.mxu0  ;;  %v1830_v3 = vadd.f32 %v1829_v11, %v1828_v40 }
 0x130   :  { %v1307_v19 = vmax.f32 %v1247_v9, 0.0  ;;  %v1155_v22 = vadd.f32 %v1766_v12, %v2361_v23  ;;  %v1831_v61 = vpop.f32.mrf.mxu1  ;;  %v972_v23 = vadd.f32 %v1647_v62, %v2341_v2 }
 0x131   :  { %v1768_v63 = vpop.f32.mrf.mxu0 }
 0x132   :  { %v1570_v1 = vpack.c.bf16 %v1307_v19, %v1306_v56  ;;  %v1769_v5 = vadd.f32 %v1768_v63, %v1767_v49  ;;  %v1832_v15 = vpop.f32.mrf.mxu1  ;;  %v1252_v21 = vadd.f32 %v1830_v3, %v1155_v22  ;;  %v1069_v40 = vadd.f32 %v1711_v20, %v972_v23 }
 0x133   :  { %v1770_v16 = vpop.f32.mrf.mxu0  ;;  %v1833_v17 = vadd.f32 %v1832_v15, %v1831_v61  ;;  %v980_v22 = vadd.f32 %v1653_v42, %v2341_v2  ;;  %v1659_v15 = vadd.f32 %v2392_v58, %v2387_v55 }
 0x134   :  { %1571 = vst [vmem:[%s2506_s3] sm:$0xff] %v1570_v1   ;;  %v1158_v24 = vadd.f32 %v1769_v5, %v1061_v0  ;;  %v1834_v7 = vpop.f32.mrf.mxu1  ;;  %v1308_v27 = vmax.f32 %v1252_v21, 0.0 }
 0x135   :  { %v1771_v10 = vpop.f32.mrf.mxu0  ;;  %v1077_v21 = vadd.f32 %v1717_v46, %v980_v22 }
 0x136   :  { %v1255_v18 = vadd.f32 %v1833_v17, %v1158_v24  ;;  %v1772_v31 = vadd.f32 %v1771_v10, %v1770_v16  ;;  %v1835_v34 = vpop.f32.mrf.mxu1 }
 0x137   :  { %v1773_v25 = vpop.f32.mrf.mxu0  ;;  %v1836_v12 = vadd.f32 %v1835_v34, %v1834_v7 }
 0x138   :  { %v1309_v37 = vmax.f32 %v1255_v18, 0.0  ;;  %v1163_v38 = vadd.f32 %v1772_v31, %v2372_v35  ;;  %v1837_v39 = vpop.f32.mrf.mxu1 }
 0x139   :  { %v1774_v41 = vpop.f32.mrf.mxu0 }
 0x13a   :  { %v1575_v9 = vpack.c.bf16 %v1309_v37, %v1308_v27  ;;  %v1775_v11 = vadd.f32 %v1774_v41, %v1773_v25  ;;  %v1838_v49 = vpop.f32.mrf.mxu1  ;;  %v1260_v33 = vadd.f32 %v1836_v12, %v1163_v38  ;;  %v1723_v25 = vadd.f32 %v2396_v60, %v2390_v57 }
 0x13b   :  { %v1776_v52 = vpop.f32.mrf.mxu0  ;;  %v1839_v56 = vadd.f32 %v1838_v49, %v1837_v39 }
 0x13c   :  { %1607 = vst [vmem:[%s2506_s3 + $0x8] sm:$0xff] %v1575_v9   ;;  %v1166_v36 = vadd.f32 %v1775_v11, %v1069_v40  ;;  %v1840_v19 = vpop.f32.mrf.mxu1  ;;  %v1310_v0 = vmax.f32 %v1260_v33, 0.0  ;;  %v1665_v9 = vadd.f32 %v2403_v8, %v2398_v4  ;;  %v1729_v8 = vadd.f32 %v2407_v14, %v2401_v6 }
 0x13d   :  { %v1777_v35 = vpop.f32.mrf.mxu0 }
 0x13e   :  { %v1263_v61 = vadd.f32 %v1839_v56, %v1166_v36  ;;  %v1778_v62 = vadd.f32 %v1777_v35, %v1776_v52  ;;  %v1841_v63 = vpop.f32.mrf.mxu1 }
 0x13f   :  { %v1779_v43 = vpop.f32.mrf.mxu0  ;;  %v1842_v17 = vadd.f32 %v1841_v63, %v1840_v19  ;;  %v996_v19 = vadd.f32 %v1665_v9, %v2341_v2 }
 0x140   :  { %v1311_v1 = vmax.f32 %v1263_v61, 0.0  ;;  %v1171_v3 = vadd.f32 %v1778_v62, %v2383_v47  ;;  %v1843_v5 = vpop.f32.mrf.mxu1  ;;  %v988_v47 = vadd.f32 %v1659_v15, %v2341_v2 }
 0x141   :  { %v1780_v16 = vpop.f32.mrf.mxu0 }
 0x142   :  { %v1580_v24 = vpack.c.bf16 %v1311_v1, %v1310_v0  ;;  %v1781_v7 = vadd.f32 %v1780_v16, %v1779_v43  ;;  %v1844_v23 = vpop.f32.mrf.mxu1  ;;  %v1268_v45 = vadd.f32 %v1842_v17, %v1171_v3  ;;  %v1085_v41 = vadd.f32 %v1723_v25, %v988_v47 }
 0x143   :  { %v1782_v10 = vpop.f32.mrf.mxu0  ;;  %v1845_v18 = vadd.f32 %v1844_v23, %v1843_v5  ;;  %v1671_v0 = vadd.f32 %v2414_v29, %v2409_v26  ;;  %v1093_v3 = vadd.f32 %v1729_v8, %v996_v19 }
 0x144   :  { %1608 = vst [vmem:[%s2506_s3 + $0x10] sm:$0xff] %v1580_v24   ;;  %v1174_v48 = vadd.f32 %v1781_v7, %v1077_v21  ;;  %v1846_v31 = vpop.f32.mrf.mxu1  ;;  %v1312_v37 = vmax.f32 %v1268_v45, 0.0  ;;  %v1735_v45 = vadd.f32 %v2418_v32, %v2412_v28 }
 0x145   :  { %v1783_v34 = vpop.f32.mrf.mxu0 }
 0x146   :  { %v1271_v20 = vadd.f32 %v1845_v18, %v1174_v48  ;;  %v1784_v55 = vadd.f32 %v1783_v34, %v1782_v10  ;;  %v1847_v58 = vpop.f32.mrf.mxu1 }
 0x147   :  { %v1785_v27 = vpop.f32.mrf.mxu0  ;;  %v1848_v11 = vadd.f32 %v1847_v58, %v1846_v31  ;;  %v1677_v58 = vadd.f32 %v2425_v51, %v2420_v44  ;;  %v1741_v51 = vadd.f32 %v2431_v54, %v2423_v50 }
 0x148   :  { %v1313_v38 = vmax.f32 %v1271_v20, 0.0  ;;  %v1179_v39 = vadd.f32 %v1784_v55, %v2394_v59  ;;  %v1849_v40 = vpop.f32.mrf.mxu1 }
 0x149   :  { %v1786_v42 = vpop.f32.mrf.mxu0 }
 0x14a   :  { %v1585_v12 = vpack.c.bf16 %v1313_v38, %v1312_v37  ;;  %v1787_v49 = vadd.f32 %v1786_v42, %v1785_v27  ;;  %v1850_v52 = vpop.f32.mrf.mxu1  ;;  %v1276_v57 = vadd.f32 %v1848_v11, %v1179_v39  ;;  %v1012_v42 = vadd.f32 %v1677_v58, %v2341_v2 }
 0x14b   :  { %v1788_v33 = vpop.f32.mrf.mxu0  ;;  %v1851_v36 = vadd.f32 %v1850_v52, %v1849_v40 }
 0x14c   :  { %1609 = vst [vmem:[%s2506_s3 + $0x18] sm:$0xff] %v1585_v12   ;;  %v1182_v60 = vadd.f32 %v1787_v49, %v1085_v41  ;;  %v1852_v56 = vpop.f32.mrf.mxu1  ;;  %v1314_v62 = vmax.f32 %v1276_v57, 0.0 }
 0x14d   :  { %v1789_v59 = vpop.f32.mrf.mxu0 }
 0x14e   :  { %v1279_v35 = vadd.f32 %v1851_v36, %v1182_v60  ;;  %v1790_v22 = vadd.f32 %v1789_v59, %v1788_v33  ;;  %v1853_v61 = vpop.f32.mrf.mxu1  ;;  %v1109_v36 = vadd.f32 %v1741_v51, %v1012_v42 }
 0x14f   :  { %v1791_v4 = vpop.f32.mrf.mxu0  ;;  %v1854_v15 = vadd.f32 %v1853_v61, %v1852_v56 }
 0x150   :  { %v1315_v63 = vmax.f32 %v1279_v35, 0.0  ;;  %v1187_v43 = vadd.f32 %v1790_v22, %v2405_v13  ;;  %v1855_v46 = vpop.f32.mrf.mxu1  ;;  %v1004_v13 = vadd.f32 %v1671_v0, %v2341_v2 }
 0x151   :  { %v1792_v1 = vpop.f32.mrf.mxu0 }
 0x152   :  { %v1590_v5 = vpack.c.bf16 %v1315_v63, %v1314_v62  ;;  %v1793_v16 = vadd.f32 %v1792_v1, %v1791_v4  ;;  %v1856_v21 = vpop.f32.mrf.mxu1  ;;  %v1284_v6 = vadd.f32 %v1854_v15, %v1187_v43  ;;  %v1101_v20 = vadd.f32 %v1735_v45, %v1004_v13 }
 0x153   :  { %v1794_v24 = vpop.f32.mrf.mxu0  ;;  %v1857_v17 = vadd.f32 %v1856_v21, %v1855_v46 }
 0x154   :  { %1610 = vst [vmem:[%s2506_s3 + $0x20] sm:$0xff] %v1590_v5   ;;  %v1190_v14 = vadd.f32 %v1793_v16, %v1093_v3  ;;  %v1858_v7 = vpop.f32.mrf.mxu1  ;;  %v1316_v18 = vmax.f32 %v1284_v6, 0.0 }
 0x155   :  { %v1795_v23 = vpop.f32.mrf.mxu0 }
 0x156   :  { %v1287_v10 = vadd.f32 %v1857_v17, %v1190_v14  ;;  %v1796_v26 = vadd.f32 %v1795_v23, %v1794_v24  ;;  %v1859_v29 = vpop.f32.mrf.mxu1 }
 0x157   :  { %v1797_v48 = vpop.f32.mrf.mxu0  ;;  %v1860_v27 = vadd.f32 %v1859_v29, %v1858_v7 }
 0x158   :  { %v1317_v31 = vmax.f32 %v1287_v10, 0.0  ;;  %v1195_v47 = vadd.f32 %v1796_v26, %v2416_v30  ;;  %v1861_v34 = vpop.f32.mrf.mxu1 }
 0x159   :  { %v1798_v55 = vpop.f32.mrf.mxu0 }
 0x15a   :  { %v1595_v25 = vpack.c.bf16 %v1317_v31, %v1316_v18  ;;  %v1799_v37 = vadd.f32 %v1798_v55, %v1797_v48  ;;  %v1862_v38 = vpop.f32.mrf.mxu1  ;;  %v1292_v28 = vadd.f32 %v1860_v27, %v1195_v47 }
 0x15b   :  { %v1800_v39 = vpop.f32.mrf.mxu0  ;;  %v1863_v40 = vadd.f32 %v1862_v38, %v1861_v34 }
 0x15c   :  { %1611 = vst [vmem:[%s2506_s3 + $0x28] sm:$0xff] %v1595_v25   ;;  %v1198_v32 = vadd.f32 %v1799_v37, %v1101_v20  ;;  %v1864_v41 = vpop.f32.mrf.mxu1  ;;  %v1318_v49 = vmax.f32 %v1292_v28, 0.0 }
 0x15d   :  { %v1801_v30 = vpop.f32.mrf.mxu0 }
 0x15e   :  { %v1295_v9 = vadd.f32 %v1863_v40, %v1198_v32  ;;  %v1802_v12 = vadd.f32 %v1801_v30, %v1800_v39  ;;  %v1865_v11 = vpop.f32.mrf.mxu1 }
 0x15f   :  { %v1803_v44 = vpop.f32.mrf.mxu0  ;;  %v1866_v59 = vadd.f32 %v1865_v11, %v1864_v41 }
 0x160   :  { %v1319_v52 = vmax.f32 %v1295_v9, 0.0  ;;  %v1203_v33 = vadd.f32 %v1802_v12, %v2429_v53  ;;  %v1867_v57 = vpop.f32.mrf.mxu1 }
 0x161   :  { %v1804_v60 = vpop.f32.mrf.mxu0 }
 0x162   :  { %v1600_v56 = vpack.c.bf16 %v1319_v52, %v1318_v49  ;;  %v1805_v19 = vadd.f32 %v1804_v60, %v1803_v44  ;;  %v1868_v35 = vpop.f32.mrf.mxu1  ;;  %v1300_v2 = vadd.f32 %v1866_v59, %v1203_v33 }
 0x163   :  { %v1869_v61 = vadd.f32 %v1868_v35, %v1867_v57 }
 0x164   :  { %1612 = vst [vmem:[%s2506_s3 + $0x30] sm:$0xff] %v1600_v56   ;;  %v1206_v22 = vadd.f32 %v1805_v19, %v1109_v36  ;;  %v1320_v50 = vmax.f32 %v1300_v2, 0.0 }
 0x166   :  { %v1303_v4 = vadd.f32 %v1869_v61, %v1206_v22 }
 0x168   :  { %v1321_v54 = vmax.f32 %v1303_v4, 0.0 }
 0x16a   :  { %v1605_v8 = vpack.c.bf16 %v1321_v54, %v1320_v50 }
 0x16c   :  { %1613 = vst [vmem:[%s2506_s3 + $0x38] sm:$0xff] %v1605_v8  }

// kernel: vae_forward.12
= control target key start
LH: loop header
LB: loop body
LE: loop exit
PB: predicated region body
PF: predicated region fallthrough
CT: control target
= control target key end

     0   :  { %s3863_s1 = inlined_call_operand.vmem [shape: bf16[2048,256], index: 1, kind: input, shape index: {}]   ;;  %s3864_s0 = inlined_call_operand.vmem [shape: bf16[32,2048], index: 0, kind: input, shape index: {}]   ;;  %s3865_s2 = inlined_call_operand.vmem [shape: f32[1,256], index: 2, kind: input, shape index: {}]   ;;  %s3866_s3 = inlined_call_operand.vmem [shape: bf16[32,256], index: 3, kind: output, shape index: {}]  }
   0x1   :  { %v2514_v0 = vld [vmem:[%s3863_s1 + $0x74] ss:$8 sps:$4 sm:$0xff]   ;;  %v2518_v2 = vld [vmem:[%s3863_s1 + $0x70] ss:$8 sps:$4 sm:$0xff]   ;;  %v2520_v4 = vld [vmem:[%s3863_s1 + $0x64] ss:$8 sps:$4 sm:$0xff]  }
   0x2   :  { %v2516_v1 = vld [vmem:[%s3863_s1 + $0x174] ss:$8 sps:$4 sm:$0xff]   ;;  %1754 = vmatprep.subr.bf16.mxu0 %v2514_v0  ;;  %v2519_v3 = vld [vmem:[%s3863_s1 + $0x170] ss:$8 sps:$4 sm:$0xff]   ;;  %v2522_v5 = vld [vmem:[%s3863_s1 + $0x164] ss:$8 sps:$4 sm:$0xff]  }
   0x3   :  { %1807 = vmatprep.subr.bf16.mxu1 %v2516_v1  ;;  %1755 = vmatpush1.bf16.msra.mxu0 %v2518_v2  ;;  %v2524_v6 = vld [vmem:[%s3863_s1 + $0x60] ss:$8 sps:$4 sm:$0xff]   ;;  %v2526_v8 = vld [vmem:[%s3863_s1 + $0x54] ss:$8 sps:$4 sm:$0xff]   ;;  %v2530_v10 = vld [vmem:[%s3863_s1 + $0x50] ss:$8 sps:$4 sm:$0xff]  }
   0x4   :  { %1808 = vmatpush1.bf16.msra.mxu1 %v2519_v3  ;;  %1756 = vmatprep.subr.bf16.mxu0 %v2520_v4  ;;  %v2525_v7 = vld [vmem:[%s3863_s1 + $0x160] ss:$8 sps:$4 sm:$0xff]   ;;  %v2528_v9 = vld [vmem:[%s3863_s1 + $0x154] ss:$8 sps:$4 sm:$0xff]   ;;  %v2531_v11 = vld [vmem:[%s3863_s1 + $0x150] ss:$8 sps:$4 sm:$0xff]  }
   0x5   :  { %1809 = vmatprep.subr.bf16.mxu1 %v2522_v5  ;;  %v2532_v12 = vld [vmem:[%s3863_s1 + $0x44] ss:$8 sps:$4 sm:$0xff]   ;;  %v2536_v14 = vld [vmem:[%s3863_s1 + $0x40] ss:$8 sps:$4 sm:$0xff]   ;;  %v2538_v16 = vld [vmem:[%s3863_s1 + $0x34] ss:$8 sps:$4 sm:$0xff]  }
   0x6   :  { %v2534_v13 = vld [vmem:[%s3863_s1 + $0x144] ss:$8 sps:$4 sm:$0xff]   ;;  %v2537_v15 = vld [vmem:[%s3863_s1 + $0x140] ss:$8 sps:$4 sm:$0xff]   ;;  %v2540_v17 = vld [vmem:[%s3863_s1 + $0x134] ss:$8 sps:$4 sm:$0xff]  }
   0x7   :  { %1757 = vmatpush1.bf16.msra.mxu0 %v2524_v6  ;;  %v2542_v18 = vld [vmem:[%s3863_s1 + $0x30] ss:$8 sps:$4 sm:$0xff]   ;;  %v2544_v20 = vld [vmem:[%s3863_s1 + $0x24] ss:$8 sps:$4 sm:$0xff]   ;;  %v2548_v22 = vld [vmem:[%s3863_s1 + $0x20] ss:$8 sps:$4 sm:$0xff]  }
   0x8   :  { %1810 = vmatpush1.bf16.msra.mxu1 %v2525_v7  ;;  %1758 = vmatprep.subr.bf16.mxu0 %v2526_v8  ;;  %v2543_v19 = vld [vmem:[%s3863_s1 + $0x130] ss:$8 sps:$4 sm:$0xff]   ;;  %v2546_v21 = vld [vmem:[%s3863_s1 + $0x124] ss:$8 sps:$4 sm:$0xff]   ;;  %v2549_v23 = vld [vmem:[%s3863_s1 + $0x120] ss:$8 sps:$4 sm:$0xff]  }
   0x9   :  { %1811 = vmatprep.subr.bf16.mxu1 %v2528_v9  ;;  %v2550_v24 = vld [vmem:[%s3863_s1 + $0x14] ss:$8 sps:$4 sm:$0xff]   ;;  %v2554_v26 = vld [vmem:[%s3863_s1 + $0x10] ss:$8 sps:$4 sm:$0xff]   ;;  %v2556_v28 = vld [vmem:[%s3863_s1 + $0x4] ss:$8 sps:$4 sm:$0xff]  }
   0xa   :  { %v2552_v25 = vld [vmem:[%s3863_s1 + $0x114] ss:$8 sps:$4 sm:$0xff]   ;;  %v2555_v27 = vld [vmem:[%s3863_s1 + $0x110] ss:$8 sps:$4 sm:$0xff]   ;;  %v2558_v29 = vld [vmem:[%s3863_s1 + $0x104] ss:$8 sps:$4 sm:$0xff]  }
   0xb   :  { %1759 = vmatpush1.bf16.msra.mxu0 %v2530_v10  ;;  %v2560_v30 = vld [vmem:[%s3863_s1] ss:$8 sps:$4 sm:$0xff]   ;;  %v2562_v32 = vld [vmem:[%s3863_s1 + $0xf4] ss:$8 sps:$4 sm:$0xff]   ;;  %v2566_v34 = vld [vmem:[%s3863_s1 + $0xf0] ss:$8 sps:$4 sm:$0xff]  }
   0xc   :  { %1812 = vmatpush1.bf16.msra.mxu1 %v2531_v11  ;;  %1760 = vmatprep.subr.bf16.mxu0 %v2532_v12  ;;  %v2561_v31 = vld [vmem:[%s3863_s1 + $0x100] ss:$8 sps:$4 sm:$0xff]   ;;  %v2564_v33 = vld [vmem:[%s3863_s1 + $0x1f4] ss:$8 sps:$4 sm:$0xff]   ;;  %v2567_v35 = vld [vmem:[%s3863_s1 + $0x1f0] ss:$8 sps:$4 sm:$0xff]  }
   0xd   :  { %1813 = vmatprep.subr.bf16.mxu1 %v2534_v13  ;;  %v2568_v36 = vld [vmem:[%s3863_s1 + $0xe4] ss:$8 sps:$4 sm:$0xff]   ;;  %v2572_v38 = vld [vmem:[%s3863_s1 + $0xe0] ss:$8 sps:$4 sm:$0xff]   ;;  %v2574_v40 = vld [vmem:[%s3863_s1 + $0xd4] ss:$8 sps:$4 sm:$0xff]  }
   0xe   :  { %v2570_v37 = vld [vmem:[%s3863_s1 + $0x1e4] ss:$8 sps:$4 sm:$0xff]   ;;  %v2573_v39 = vld [vmem:[%s3863_s1 + $0x1e0] ss:$8 sps:$4 sm:$0xff]   ;;  %v2576_v41 = vld [vmem:[%s3863_s1 + $0x1d4] ss:$8 sps:$4 sm:$0xff]  }
   0xf   :  { %1761 = vmatpush1.bf16.msra.mxu0 %v2536_v14  ;;  %v2578_v42 = vld [vmem:[%s3863_s1 + $0xd0] ss:$8 sps:$4 sm:$0xff]   ;;  %v2580_v44 = vld [vmem:[%s3863_s1 + $0xc4] ss:$8 sps:$4 sm:$0xff]   ;;  %v2584_v46 = vld [vmem:[%s3863_s1 + $0xc0] ss:$8 sps:$4 sm:$0xff]  }
  0x10   :  { %1814 = vmatpush1.bf16.msra.mxu1 %v2537_v15  ;;  %1762 = vmatprep.subr.bf16.mxu0 %v2538_v16  ;;  %v2579_v43 = vld [vmem:[%s3863_s1 + $0x1d0] ss:$8 sps:$4 sm:$0xff]   ;;  %v2582_v45 = vld [vmem:[%s3863_s1 + $0x1c4] ss:$8 sps:$4 sm:$0xff]   ;;  %v2585_v47 = vld [vmem:[%s3863_s1 + $0x1c0] ss:$8 sps:$4 sm:$0xff]  }
  0x11   :  { %1815 = vmatprep.subr.bf16.mxu1 %v2540_v17  ;;  %v14_v48 = vld [vmem:[%s3864_s0] sm:$0xff]  ;;  %v15_v50 = vld [vmem:[%s3864_s0 + $0x8] sm:$0xff]  ;;  %v2586_v52 = vld [vmem:[%s3863_s1 + $0xb4] ss:$8 sps:$4 sm:$0xff]  }
  0x12   :  { %v22_v49 = vld [vmem:[%s3864_s0 + $0x40] sm:$0xff]  ;;  %v23_v51 = vld [vmem:[%s3864_s0 + $0x48] sm:$0xff]  ;;  %v2588_v54 = vld [vmem:[%s3863_s1 + $0x1b4] ss:$8 sps:$4 sm:$0xff]  }
  0x13   :  { %1763 = vmatpush1.bf16.msra.mxu0 %v2542_v18  ;;  %v2219_v53 = vcombine.high %v14_v48, %v22_v49  ;;  %v2221_v55 = vcombine.high %v15_v50, %v23_v51  ;;  %v2590_v56 = vld [vmem:[%s3863_s1 + $0xb0] ss:$8 sps:$4 sm:$0xff]   ;;  %v2592_v58 = vld [vmem:[%s3863_s1 + $0xa4] ss:$8 sps:$4 sm:$0xff]   ;;  %v2596_v60 = vld [vmem:[%s3863_s1 + $0xa0] ss:$8 sps:$4 sm:$0xff]   ;;  %v2218_v8 = vcombine.low %v14_v48, %v22_v49  ;;  %v2220_v9 = vcombine.low %v15_v50, %v23_v51 }
  0x14   :  { %1816 = vmatpush1.bf16.msra.mxu1 %v2543_v19  ;;  %1764 = vmatprep.subr.bf16.mxu0 %v2544_v20  ;;  %v2591_v57 = vld [vmem:[%s3863_s1 + $0x1b0] ss:$8 sps:$4 sm:$0xff]   ;;  %v2594_v59 = vld [vmem:[%s3863_s1 + $0x1a4] ss:$8 sps:$4 sm:$0xff]   ;;  %v2597_v61 = vld [vmem:[%s3863_s1 + $0x1a0] ss:$8 sps:$4 sm:$0xff]  }
  0x15   :  { %1817 = vmatprep.subr.bf16.mxu1 %v2546_v21  ;;  %1786 = vmatprep.mubr.bf16.mxu0 %v2219_v53  ;;  %v2598_v62 = vld [vmem:[%s3863_s1 + $0x94] ss:$8 sps:$4 sm:$0xff]   ;;  %v2602_v0 = vld [vmem:[%s3863_s1 + $0x90] ss:$8 sps:$4 sm:$0xff]   ;;  %v2604_v2 = vld [vmem:[%s3863_s1 + $0x84] ss:$8 sps:$4 sm:$0xff]  }
  0x16   :  { %1839 = vmatprep.mubr.bf16.mxu1 %v2221_v55  ;;  %v2600_v63 = vld [vmem:[%s3863_s1 + $0x194] ss:$8 sps:$4 sm:$0xff]   ;;  %v2603_v1 = vld [vmem:[%s3863_s1 + $0x190] ss:$8 sps:$4 sm:$0xff]   ;;  %v2606_v3 = vld [vmem:[%s3863_s1 + $0x184] ss:$8 sps:$4 sm:$0xff]  }
  0x17   :  { %1765 = vmatpush1.bf16.msra.mxu0 %v2548_v22  ;;  %v2608_v4 = vld [vmem:[%s3863_s1 + $0x80] ss:$8 sps:$4 sm:$0xff]   ;;  %v2612_v6 = vld [vmem:[%s3863_s1 + $0x274] ss:$8 sps:$4 sm:$0xff]   ;;  %v2610_v10 = vld [vmem:[%s3863_s1 + $0x270] ss:$8 sps:$4 sm:$0xff]  }
  0x18   :  { %1818 = vmatpush1.bf16.msra.mxu1 %v2549_v23  ;;  %1766 = vmatprep.subr.bf16.mxu0 %v2550_v24  ;;  %v2609_v5 = vld [vmem:[%s3863_s1 + $0x180] ss:$8 sps:$4 sm:$0xff]   ;;  %v2615_v7 = vld [vmem:[%s3863_s1 + $0x374] ss:$8 sps:$4 sm:$0xff]   ;;  %v2613_v11 = vld [vmem:[%s3863_s1 + $0x370] ss:$8 sps:$4 sm:$0xff]  }
  0x19   :  { %1819 = vmatprep.subr.bf16.mxu1 %v2552_v25  ;;  %v2618_v12 = vld [vmem:[%s3863_s1 + $0x264] ss:$8 sps:$4 sm:$0xff]   ;;  %v2616_v14 = vld [vmem:[%s3863_s1 + $0x260] ss:$8 sps:$4 sm:$0xff]   ;;  %v2624_v16 = vld [vmem:[%s3863_s1 + $0x254] ss:$8 sps:$4 sm:$0xff]  }
  0x1a   :  { %v2621_v13 = vld [vmem:[%s3863_s1 + $0x364] ss:$8 sps:$4 sm:$0xff]   ;;  %v2619_v15 = vld [vmem:[%s3863_s1 + $0x360] ss:$8 sps:$4 sm:$0xff]   ;;  %v2627_v17 = vld [vmem:[%s3863_s1 + $0x354] ss:$8 sps:$4 sm:$0xff]  }
  0x1b   :  { %1767 = vmatpush1.bf16.msra.mxu0 %v2554_v26  ;;  %v2622_v18 = vld [vmem:[%s3863_s1 + $0x250] ss:$8 sps:$4 sm:$0xff]   ;;  %v2630_v20 = vld [vmem:[%s3863_s1 + $0x244] ss:$8 sps:$4 sm:$0xff]   ;;  %v2628_v22 = vld [vmem:[%s3863_s1 + $0x240] ss:$8 sps:$4 sm:$0xff]  }
  0x1c   :  { %1820 = vmatpush1.bf16.msra.mxu1 %v2555_v27  ;;  %1768 = vmatprep.subr.bf16.mxu0 %v2556_v28  ;;  %v2625_v19 = vld [vmem:[%s3863_s1 + $0x350] ss:$8 sps:$4 sm:$0xff]   ;;  %v2633_v21 = vld [vmem:[%s3863_s1 + $0x344] ss:$8 sps:$4 sm:$0xff]   ;;  %v2631_v23 = vld [vmem:[%s3863_s1 + $0x340] ss:$8 sps:$4 sm:$0xff]  }
  0x1d   :  { %1821 = vmatprep.subr.bf16.mxu1 %v2558_v29  ;;  %v2636_v24 = vld [vmem:[%s3863_s1 + $0x234] ss:$8 sps:$4 sm:$0xff]   ;;  %v2634_v26 = vld [vmem:[%s3863_s1 + $0x230] ss:$8 sps:$4 sm:$0xff]   ;;  %v30_v28 = vld [vmem:[%s3864_s0 + $0x80] sm:$0xff] }
  0x1e   :  { %v2639_v25 = vld [vmem:[%s3863_s1 + $0x334] ss:$8 sps:$4 sm:$0xff]   ;;  %v2637_v27 = vld [vmem:[%s3863_s1 + $0x330] ss:$8 sps:$4 sm:$0xff]   ;;  %v38_v29 = vld [vmem:[%s3864_s0 + $0xc0] sm:$0xff] }
  0x1f   :  { %1769 = vmatpush1.bf16.msra.mxu0 %v2560_v30  ;;  %v31_v30 = vld [vmem:[%s3864_s0 + $0x88] sm:$0xff]  ;;  %v3237_v48 = vld [vmem:[%s3864_s0 + $0x18] sm:$0xff] }
  0x20   :  { %1822 = vmatpush1.bf16.msra.mxu1 %v2561_v31  ;;  %1770 = vmatprep.subr.bf16.mxu0 %v2562_v32  ;;  %v39_v31 = vld [vmem:[%s3864_s0 + $0xc8] sm:$0xff]  ;;  %v3244_v50 = vld [vmem:[%s3864_s0 + $0x58] sm:$0xff] }
  0x21   :  { %1823 = vmatprep.subr.bf16.mxu1 %v2564_v33  ;;  %v2642_v32 = vld [vmem:[%s3863_s1 + $0x224] ss:$8 sps:$4 sm:$0xff]   ;;  %v2235_v33 = vcombine.high %v30_v28, %v38_v29  ;;  %v2225_v51 = vcombine.high %v3237_v48, %v3244_v50  ;;  %v2655_v53 = vld [vmem:[%s3863_s1 + $0x300] ss:$8 sps:$4 sm:$0xff]   ;;  %v2663_v55 = vld [vmem:[%s3863_s1 + $0x3f4] ss:$8 sps:$4 sm:$0xff]  }
  0x23   :  { %1771 = vmatpush2.bf16.msra.mxu0 %v2566_v34  ;;  %v2234_v34 = vcombine.low %v30_v28, %v38_v29  ;;  %v2224_v29 = vcombine.low %v3237_v48, %v3244_v50  ;;  %v2726_v48 = vld [vmem:[%s3863_s1 + $0x444] ss:$8 sps:$4 sm:$0xff]  }
  0x24   :  { %1824 = vmatpush2.bf16.msra.mxu1 %v2567_v35  ;;  %1772 = vmatprep.subr.bf16.mxu0 %v2568_v36  ;;  %v2237_v35 = vcombine.high %v31_v30, %v39_v31  ;;  %v2645_v36 = vld [vmem:[%s3863_s1 + $0x324] ss:$8 sps:$4 sm:$0xff]  }
  0x25   :  { %1825 = vmatprep.subr.bf16.mxu1 %v2570_v37  ;;  %v2236_v37 = vcombine.low %v31_v30, %v39_v31  ;;  %v33_v30 = vld [vmem:[%s3864_s0 + $0x98] sm:$0xff] }
  0x26   :  { %v41_v31 = vld [vmem:[%s3864_s0 + $0xd8] sm:$0xff] }
  0x27   :  { %1773 = vmatpush2.bf16.msra.mxu0 %v2572_v38  ;;  %v2640_v38 = vld [vmem:[%s3863_s1 + $0x220] ss:$8 sps:$4 sm:$0xff]  }
  0x28   :  { %1826 = vmatpush2.bf16.msra.mxu1 %v2573_v39  ;;  %1774 = vmatprep.subr.bf16.mxu0 %v2574_v40  ;;  %v2643_v39 = vld [vmem:[%s3863_s1 + $0x320] ss:$8 sps:$4 sm:$0xff]   ;;  %v2648_v40 = vld [vmem:[%s3863_s1 + $0x214] ss:$8 sps:$4 sm:$0xff]  }
  0x29   :  { %1827 = vmatprep.subr.bf16.mxu1 %v2576_v41  ;;  %v2651_v41 = vld [vmem:[%s3863_s1 + $0x314] ss:$8 sps:$4 sm:$0xff]  }
  0x2b   :  { %1775 = vmatpush2.bf16.msra.mxu0 %v2578_v42  ;;  %v2646_v42 = vld [vmem:[%s3863_s1 + $0x210] ss:$8 sps:$4 sm:$0xff]  }
  0x2c   :  { %1828 = vmatpush2.bf16.msra.mxu1 %v2579_v43  ;;  %1776 = vmatprep.subr.bf16.mxu0 %v2580_v44  ;;  %v2649_v43 = vld [vmem:[%s3863_s1 + $0x310] ss:$8 sps:$4 sm:$0xff]   ;;  %v2654_v44 = vld [vmem:[%s3863_s1 + $0x204] ss:$8 sps:$4 sm:$0xff]  }
  0x2d   :  { %1829 = vmatprep.subr.bf16.mxu1 %v2582_v45  ;;  %v2657_v45 = vld [vmem:[%s3863_s1 + $0x304] ss:$8 sps:$4 sm:$0xff]  }
  0x2f   :  { %1777 = vmatpush2.bf16.msra.mxu0 %v2584_v46  ;;  %v3227_v46 = vld [vmem:[%s3864_s0 + $0x10] sm:$0xff] }
  0x30   :  { %1830 = vmatpush2.bf16.msra.mxu1 %v2585_v47  ;;  %1778 = vmatprep.subr.bf16.mxu0 %v2586_v52  ;;  %v3232_v47 = vld [vmem:[%s3864_s0 + $0x50] sm:$0xff]  ;;  %v2652_v52 = vld [vmem:[%s3863_s1 + $0x200] ss:$8 sps:$4 sm:$0xff]  }
  0x31   :  { %1831 = vmatprep.subr.bf16.mxu1 %v2588_v54  ;;  %v2223_v49 = vcombine.high %v3227_v46, %v3232_v47  ;;  %v2660_v54 = vld [vmem:[%s3863_s1 + $0x2f4] ss:$8 sps:$4 sm:$0xff]   ;;  %v2222_v28 = vcombine.low %v3227_v46, %v3232_v47  ;;  %v3415_v46 = vld [vmem:[%s3864_s0 + $0x28] sm:$0xff] }
  0x32   :  { %v3420_v47 = vld [vmem:[%s3864_s0 + $0x68] sm:$0xff] }
  0x33   :  { %1779 = vmatpush2.bf16.msra.mxu0 %v2590_v56  ;;  %v2658_v56 = vld [vmem:[%s3863_s1 + $0x2f0] ss:$8 sps:$4 sm:$0xff]  }
  0x34   :  { %1832 = vmatpush2.bf16.msra.mxu1 %v2591_v57  ;;  %1780 = vmatprep.subr.bf16.mxu0 %v2592_v58  ;;  %v2661_v57 = vld [vmem:[%s3863_s1 + $0x3f0] ss:$8 sps:$4 sm:$0xff]   ;;  %v2666_v58 = vld [vmem:[%s3863_s1 + $0x2e4] ss:$8 sps:$4 sm:$0xff]  }
  0x35   :  { %1833 = vmatprep.subr.bf16.mxu1 %v2594_v59  ;;  %v2669_v59 = vld [vmem:[%s3863_s1 + $0x3e4] ss:$8 sps:$4 sm:$0xff]  }
  0x37   :  { %1781 = vmatpush2.bf16.msra.mxu0 %v2596_v60  ;;  %v2664_v60 = vld [vmem:[%s3863_s1 + $0x2e0] ss:$8 sps:$4 sm:$0xff]  }
  0x38   :  { %1834 = vmatpush2.bf16.msra.mxu1 %v2597_v61  ;;  %1782 = vmatprep.subr.bf16.mxu0 %v2598_v62  ;;  %v2667_v61 = vld [vmem:[%s3863_s1 + $0x3e0] ss:$8 sps:$4 sm:$0xff]   ;;  %v2672_v62 = vld [vmem:[%s3863_s1 + $0x2d4] ss:$8 sps:$4 sm:$0xff]  }
  0x39   :  { %1835 = vmatprep.subr.bf16.mxu1 %v2600_v63  ;;  %v2675_v63 = vld [vmem:[%s3863_s1 + $0x3d4] ss:$8 sps:$4 sm:$0xff]  }
  0x3b   :  { %1783 = vmatpush2.bf16.msra.mxu0 %v2602_v0  ;;  %v2670_v0 = vld [vmem:[%s3863_s1 + $0x2d0] ss:$8 sps:$4 sm:$0xff]  }
  0x3c   :  { %1836 = vmatpush2.bf16.msra.mxu1 %v2603_v1  ;;  %1784 = vmatprep.subr.bf16.mxu0 %v2604_v2  ;;  %v2673_v1 = vld [vmem:[%s3863_s1 + $0x3d0] ss:$8 sps:$4 sm:$0xff]   ;;  %v2678_v2 = vld [vmem:[%s3863_s1 + $0x2c4] ss:$8 sps:$4 sm:$0xff]  }
  0x3d   :  { %1837 = vmatprep.subr.bf16.mxu1 %v2606_v3  ;;  %v2681_v3 = vld [vmem:[%s3863_s1 + $0x3c4] ss:$8 sps:$4 sm:$0xff]  }
  0x3f   :  { %1785 = vmatpush2.bf16.msra.mxu0 %v2608_v4  ;;  %v2676_v4 = vld [vmem:[%s3863_s1 + $0x2c0] ss:$8 sps:$4 sm:$0xff]  }
  0x40   :  { %1838 = vmatpush2.bf16.msra.mxu1 %v2609_v5  ;;  %1860 = vmatprep.subr.bf16.mxu0 %v2612_v6  ;;  %v2679_v5 = vld [vmem:[%s3863_s1 + $0x3c0] ss:$8 sps:$4 sm:$0xff]   ;;  %v2684_v6 = vld [vmem:[%s3863_s1 + $0x2b4] ss:$8 sps:$4 sm:$0xff]  }
  0x41   :  { %1913 = vmatprep.subr.bf16.mxu1 %v2615_v7  ;;  %v2687_v7 = vld [vmem:[%s3863_s1 + $0x3b4] ss:$8 sps:$4 sm:$0xff]  }
  0x42   :  { %1787 = vmatmul.mubr.bf16.vlgmr.msra.gmra.mxu0 %v2218_v8  ;;  %v2682_v8 = vld [vmem:[%s3863_s1 + $0x2b0] ss:$8 sps:$4 sm:$0xff]  }
  0x43   :  { %1840 = vmatmul.mubr.bf16.vlgmr.msra.gmra.mxu1 %v2220_v9  ;;  %1861 = vmatpush1.bf16.msra.mxu0 %v2610_v10  ;;  %v2685_v9 = vld [vmem:[%s3863_s1 + $0x3b0] ss:$8 sps:$4 sm:$0xff]   ;;  %v2690_v10 = vld [vmem:[%s3863_s1 + $0x2a4] ss:$8 sps:$4 sm:$0xff]  }
  0x44   :  { %1914 = vmatpush1.bf16.msra.mxu1 %v2613_v11  ;;  %1862 = vmatprep.subr.bf16.mxu0 %v2618_v12  ;;  %v2693_v11 = vld [vmem:[%s3863_s1 + $0x3a4] ss:$8 sps:$4 sm:$0xff]   ;;  %v2688_v12 = vld [vmem:[%s3863_s1 + $0x2a0] ss:$8 sps:$4 sm:$0xff]  }
  0x45   :  { %1915 = vmatprep.subr.bf16.mxu1 %v2621_v13  ;;  %1796 = vmatprep.mubr.bf16.mxu0 %v2235_v33  ;;  %v2691_v13 = vld [vmem:[%s3863_s1 + $0x3a0] ss:$8 sps:$4 sm:$0xff]   ;;  %v2717_v33 = vld [vmem:[%s3863_s1 + $0x564] ss:$8 sps:$4 sm:$0xff]  }
  0x46   :  { %1849 = vmatprep.mubr.bf16.mxu1 %v2237_v35  ;;  %v2241_v35 = vcombine.high %v33_v30, %v41_v31 }
  0x47   :  { %1863 = vmatpush1.bf16.msra.mxu0 %v2616_v14  ;;  %v2696_v14 = vld [vmem:[%s3863_s1 + $0x294] ss:$8 sps:$4 sm:$0xff]  }
  0x48   :  { %1916 = vmatpush1.bf16.msra.mxu1 %v2619_v15  ;;  %1864 = vmatprep.subr.bf16.mxu0 %v2624_v16  ;;  %v2699_v15 = vld [vmem:[%s3863_s1 + $0x394] ss:$8 sps:$4 sm:$0xff]   ;;  %v2694_v16 = vld [vmem:[%s3863_s1 + $0x290] ss:$8 sps:$4 sm:$0xff]  }
  0x49   :  { %1917 = vmatprep.subr.bf16.mxu1 %v2627_v17  ;;  %v2697_v17 = vld [vmem:[%s3863_s1 + $0x390] ss:$8 sps:$4 sm:$0xff]  }
  0x4a   :  { %1797 = vmatmul.mubr.bf16.gmra.mxu0 %v2234_v34 }
  0x4b   :  { %1865 = vmatpush1.bf16.msra.mxu0 %v2622_v18  ;;  %1850 = vmatmul.mubr.bf16.gmra.mxu1 %v2236_v37  ;;  %v2702_v18 = vld [vmem:[%s3863_s1 + $0x284] ss:$8 sps:$4 sm:$0xff]   ;;  %v2715_v37 = vld [vmem:[%s3863_s1 + $0x560] ss:$8 sps:$4 sm:$0xff]  }
  0x4c   :  { %1918 = vmatpush1.bf16.msra.mxu1 %v2625_v19  ;;  %1866 = vmatprep.subr.bf16.mxu0 %v2630_v20  ;;  %v2705_v19 = vld [vmem:[%s3863_s1 + $0x384] ss:$8 sps:$4 sm:$0xff]   ;;  %v2700_v20 = vld [vmem:[%s3863_s1 + $0x280] ss:$8 sps:$4 sm:$0xff]  }
  0x4d   :  { %1919 = vmatprep.subr.bf16.mxu1 %v2633_v21  ;;  %1892 = vmatprep.mubr.bf16.mxu0 %v2223_v49  ;;  %v2703_v21 = vld [vmem:[%s3863_s1 + $0x380] ss:$8 sps:$4 sm:$0xff]   ;;  %v2729_v49 = vld [vmem:[%s3863_s1 + $0x544] ss:$8 sps:$4 sm:$0xff]  }
  0x4e   :  { %1945 = vmatprep.mubr.bf16.mxu1 %v2225_v51  ;;  %v2229_v51 = vcombine.high %v3415_v46, %v3420_v47 }
  0x4f   :  { %1867 = vmatpush1.bf16.msra.mxu0 %v2628_v22  ;;  %v2708_v22 = vld [vmem:[%s3863_s1 + $0x474] ss:$8 sps:$4 sm:$0xff]  }
  0x50   :  { %1920 = vmatpush1.bf16.msra.mxu1 %v2631_v23  ;;  %1868 = vmatprep.subr.bf16.mxu0 %v2636_v24  ;;  %v2711_v23 = vld [vmem:[%s3863_s1 + $0x574] ss:$8 sps:$4 sm:$0xff]   ;;  %v2706_v24 = vld [vmem:[%s3863_s1 + $0x470] ss:$8 sps:$4 sm:$0xff]  }
  0x51   :  { %1921 = vmatprep.subr.bf16.mxu1 %v2639_v25  ;;  %v2709_v25 = vld [vmem:[%s3863_s1 + $0x570] ss:$8 sps:$4 sm:$0xff]  }
  0x53   :  { %1869 = vmatpush1.bf16.msra.mxu0 %v2634_v26  ;;  %v32_v26 = vld [vmem:[%s3864_s0 + $0x90] sm:$0xff] }
  0x54   :  { %1922 = vmatpush1.bf16.msra.mxu1 %v2637_v27  ;;  %1870 = vmatprep.subr.bf16.mxu0 %v2642_v32  ;;  %v40_v27 = vld [vmem:[%s3864_s0 + $0xd0] sm:$0xff]  ;;  %v2714_v32 = vld [vmem:[%s3863_s1 + $0x464] ss:$8 sps:$4 sm:$0xff]  }
  0x55   :  { %1923 = vmatprep.subr.bf16.mxu1 %v2645_v36  ;;  %v2239_v34 = vcombine.high %v32_v26, %v40_v27  ;;  %v2712_v36 = vld [vmem:[%s3863_s1 + $0x460] ss:$8 sps:$4 sm:$0xff]  }
  0x57   :  { %1871 = vmatpush1.bf16.msra.mxu0 %v2640_v38  ;;  %v2720_v38 = vld [vmem:[%s3863_s1 + $0x454] ss:$8 sps:$4 sm:$0xff]  }
  0x58   :  { %1924 = vmatpush1.bf16.msra.mxu1 %v2643_v39  ;;  %1872 = vmatprep.subr.bf16.mxu0 %v2648_v40  ;;  %v2723_v39 = vld [vmem:[%s3863_s1 + $0x554] ss:$8 sps:$4 sm:$0xff]   ;;  %v2718_v40 = vld [vmem:[%s3863_s1 + $0x450] ss:$8 sps:$4 sm:$0xff]  }
  0x59   :  { %1925 = vmatprep.subr.bf16.mxu1 %v2651_v41  ;;  %v2721_v41 = vld [vmem:[%s3863_s1 + $0x550] ss:$8 sps:$4 sm:$0xff]  }
  0x5b   :  { %1873 = vmatpush1.bf16.msra.mxu0 %v2646_v42  ;;  %v3405_v42 = vld [vmem:[%s3864_s0 + $0x20] sm:$0xff] }
  0x5c   :  { %1926 = vmatpush1.bf16.msra.mxu1 %v2649_v43  ;;  %1874 = vmatprep.subr.bf16.mxu0 %v2654_v44  ;;  %v3410_v43 = vld [vmem:[%s3864_s0 + $0x60] sm:$0xff]  ;;  %v2238_v44 = vcombine.low %v32_v26, %v40_v27 }
  0x5d   :  { %1927 = vmatprep.subr.bf16.mxu1 %v2657_v45  ;;  %v2240_v45 = vcombine.low %v33_v30, %v41_v31  ;;  %v2227_v50 = vcombine.high %v3405_v42, %v3410_v43  ;;  %v2786_v26 = vld [vmem:[%s3863_s1 + $0x4a4] ss:$8 sps:$4 sm:$0xff]   ;;  %v2792_v30 = vld [vmem:[%s3863_s1 + $0x494] ss:$8 sps:$4 sm:$0xff]  }
  0x5e   :  { %v2789_v27 = vld [vmem:[%s3863_s1 + $0x5a4] ss:$8 sps:$4 sm:$0xff]   ;;  %v2795_v31 = vld [vmem:[%s3863_s1 + $0x594] ss:$8 sps:$4 sm:$0xff]  }
  0x5f   :  { %1875 = vmatpush1.bf16.msra.mxu0 %v2652_v52  ;;  %v2724_v52 = vld [vmem:[%s3863_s1 + $0x440] ss:$8 sps:$4 sm:$0xff]  }
  0x60   :  { %1928 = vmatpush1.bf16.msra.mxu1 %v2655_v53  ;;  %1876 = vmatprep.subr.bf16.mxu0 %v2660_v54  ;;  %v2727_v53 = vld [vmem:[%s3863_s1 + $0x540] ss:$8 sps:$4 sm:$0xff]   ;;  %v2732_v54 = vld [vmem:[%s3863_s1 + $0x434] ss:$8 sps:$4 sm:$0xff]  }
  0x61   :  { %1929 = vmatprep.subr.bf16.mxu1 %v2663_v55  ;;  %v2735_v55 = vld [vmem:[%s3863_s1 + $0x534] ss:$8 sps:$4 sm:$0xff]  }
  0x63   :  { %1877 = vmatpush2.bf16.msra.mxu0 %v2658_v56  ;;  %v2730_v56 = vld [vmem:[%s3863_s1 + $0x430] ss:$8 sps:$4 sm:$0xff]  }
  0x64   :  { %1930 = vmatpush2.bf16.msra.mxu1 %v2661_v57  ;;  %1878 = vmatprep.subr.bf16.mxu0 %v2666_v58  ;;  %v2733_v57 = vld [vmem:[%s3863_s1 + $0x530] ss:$8 sps:$4 sm:$0xff]   ;;  %v2738_v58 = vld [vmem:[%s3863_s1 + $0x424] ss:$8 sps:$4 sm:$0xff]  }
  0x65   :  { %1931 = vmatprep.subr.bf16.mxu1 %v2669_v59  ;;  %v2741_v59 = vld [vmem:[%s3863_s1 + $0x524] ss:$8 sps:$4 sm:$0xff]  }
  0x67   :  { %1879 = vmatpush2.bf16.msra.mxu0 %v2664_v60  ;;  %v2736_v60 = vld [vmem:[%s3863_s1 + $0x420] ss:$8 sps:$4 sm:$0xff]  }
  0x68   :  { %1932 = vmatpush2.bf16.msra.mxu1 %v2667_v61  ;;  %1880 = vmatprep.subr.bf16.mxu0 %v2672_v62  ;;  %v2739_v61 = vld [vmem:[%s3863_s1 + $0x520] ss:$8 sps:$4 sm:$0xff]   ;;  %v2744_v62 = vld [vmem:[%s3863_s1 + $0x414] ss:$8 sps:$4 sm:$0xff]  }
  0x69   :  { %1933 = vmatprep.subr.bf16.mxu1 %v2675_v63  ;;  %v2747_v63 = vld [vmem:[%s3863_s1 + $0x514] ss:$8 sps:$4 sm:$0xff]  }
  0x6b   :  { %1881 = vmatpush2.bf16.msra.mxu0 %v2670_v0  ;;  %v2742_v0 = vld [vmem:[%s3863_s1 + $0x410] ss:$8 sps:$4 sm:$0xff]  }
  0x6c   :  { %1934 = vmatpush2.bf16.msra.mxu1 %v2673_v1  ;;  %1882 = vmatprep.subr.bf16.mxu0 %v2678_v2  ;;  %v2745_v1 = vld [vmem:[%s3863_s1 + $0x510] ss:$8 sps:$4 sm:$0xff]   ;;  %v2750_v2 = vld [vmem:[%s3863_s1 + $0x404] ss:$8 sps:$4 sm:$0xff]  }
  0x6d   :  { %1935 = vmatprep.subr.bf16.mxu1 %v2681_v3  ;;  %v2753_v3 = vld [vmem:[%s3863_s1 + $0x504] ss:$8 sps:$4 sm:$0xff]  }
  0x6f   :  { %1883 = vmatpush2.bf16.msra.mxu0 %v2676_v4  ;;  %v2748_v4 = vld [vmem:[%s3863_s1 + $0x400] ss:$8 sps:$4 sm:$0xff]  }
  0x70   :  { %1936 = vmatpush2.bf16.msra.mxu1 %v2679_v5  ;;  %1884 = vmatprep.subr.bf16.mxu0 %v2684_v6  ;;  %v2751_v5 = vld [vmem:[%s3863_s1 + $0x500] ss:$8 sps:$4 sm:$0xff]   ;;  %v2756_v6 = vld [vmem:[%s3863_s1 + $0x4f4] ss:$8 sps:$4 sm:$0xff]  }
  0x71   :  { %1937 = vmatprep.subr.bf16.mxu1 %v2687_v7  ;;  %v2759_v7 = vld [vmem:[%s3863_s1 + $0x5f4] ss:$8 sps:$4 sm:$0xff]  }
  0x73   :  { %1885 = vmatpush2.bf16.msra.mxu0 %v2682_v8  ;;  %v2754_v8 = vld [vmem:[%s3863_s1 + $0x4f0] ss:$8 sps:$4 sm:$0xff]  }
  0x74   :  { %1938 = vmatpush2.bf16.msra.mxu1 %v2685_v9  ;;  %1886 = vmatprep.subr.bf16.mxu0 %v2690_v10  ;;  %v2757_v9 = vld [vmem:[%s3863_s1 + $0x5f0] ss:$8 sps:$4 sm:$0xff]   ;;  %v2762_v10 = vld [vmem:[%s3863_s1 + $0x4e4] ss:$8 sps:$4 sm:$0xff]  }
  0x75   :  { %1939 = vmatprep.subr.bf16.mxu1 %v2693_v11  ;;  %v2765_v11 = vld [vmem:[%s3863_s1 + $0x5e4] ss:$8 sps:$4 sm:$0xff]  }
  0x77   :  { %1887 = vmatpush2.bf16.msra.mxu0 %v2688_v12  ;;  %v2760_v12 = vld [vmem:[%s3863_s1 + $0x4e0] ss:$8 sps:$4 sm:$0xff]  }
  0x78   :  { %1940 = vmatpush2.bf16.msra.mxu1 %v2691_v13  ;;  %1888 = vmatprep.subr.bf16.mxu0 %v2696_v14  ;;  %v2763_v13 = vld [vmem:[%s3863_s1 + $0x5e0] ss:$8 sps:$4 sm:$0xff]   ;;  %v2768_v14 = vld [vmem:[%s3863_s1 + $0x4d4] ss:$8 sps:$4 sm:$0xff]  }
  0x79   :  { %1941 = vmatprep.subr.bf16.mxu1 %v2699_v15  ;;  %v2771_v15 = vld [vmem:[%s3863_s1 + $0x5d4] ss:$8 sps:$4 sm:$0xff]  }
  0x7b   :  { %1889 = vmatpush2.bf16.msra.mxu0 %v2694_v16  ;;  %v2766_v16 = vld [vmem:[%s3863_s1 + $0x4d0] ss:$8 sps:$4 sm:$0xff]  }
  0x7c   :  { %1942 = vmatpush2.bf16.msra.mxu1 %v2697_v17  ;;  %1890 = vmatprep.subr.bf16.mxu0 %v2702_v18  ;;  %v2769_v17 = vld [vmem:[%s3863_s1 + $0x5d0] ss:$8 sps:$4 sm:$0xff]   ;;  %v2774_v18 = vld [vmem:[%s3863_s1 + $0x4c4] ss:$8 sps:$4 sm:$0xff]  }
  0x7d   :  { %1943 = vmatprep.subr.bf16.mxu1 %v2705_v19  ;;  %v2777_v19 = vld [vmem:[%s3863_s1 + $0x5c4] ss:$8 sps:$4 sm:$0xff]  }
  0x7f   :  { %1891 = vmatpush2.bf16.msra.mxu0 %v2700_v20  ;;  %v2772_v20 = vld [vmem:[%s3863_s1 + $0x4c0] ss:$8 sps:$4 sm:$0xff]  }
  0x80   :  { %1944 = vmatpush2.bf16.msra.mxu1 %v2703_v21  ;;  %1966 = vmatprep.subr.bf16.mxu0 %v2708_v22  ;;  %v2775_v21 = vld [vmem:[%s3863_s1 + $0x5c0] ss:$8 sps:$4 sm:$0xff]   ;;  %v2780_v22 = vld [vmem:[%s3863_s1 + $0x4b4] ss:$8 sps:$4 sm:$0xff]  }
  0x81   :  { %2019 = vmatprep.subr.bf16.mxu1 %v2711_v23  ;;  %v2783_v23 = vld [vmem:[%s3863_s1 + $0x5b4] ss:$8 sps:$4 sm:$0xff]  }
  0x82   :  { %1893 = vmatmul.mubr.bf16.vlgmr.msra.gmra.mxu0 %v2222_v28  ;;  %v2784_v28 = vld [vmem:[%s3863_s1 + $0x4a0] ss:$8 sps:$4 sm:$0xff]  }
  0x83   :  { %1946 = vmatmul.mubr.bf16.vlgmr.msra.gmra.mxu1 %v2224_v29  ;;  %1967 = vmatpush1.bf16.msra.mxu0 %v2706_v24  ;;  %v2778_v24 = vld [vmem:[%s3863_s1 + $0x4b0] ss:$8 sps:$4 sm:$0xff]   ;;  %v2787_v29 = vld [vmem:[%s3863_s1 + $0x5a0] ss:$8 sps:$4 sm:$0xff]  }
  0x84   :  { %2020 = vmatpush1.bf16.msra.mxu1 %v2709_v25  ;;  %1968 = vmatprep.subr.bf16.mxu0 %v2714_v32  ;;  %v2781_v25 = vld [vmem:[%s3863_s1 + $0x5b0] ss:$8 sps:$4 sm:$0xff]  }
  0x85   :  { %2021 = vmatprep.subr.bf16.mxu1 %v2717_v33  ;;  %1902 = vmatprep.mubr.bf16.mxu0 %v2239_v34  ;;  %v2790_v32 = vld [vmem:[%s3863_s1 + $0x490] ss:$8 sps:$4 sm:$0xff]   ;;  %v2798_v34 = vld [vmem:[%s3863_s1 + $0x484] ss:$8 sps:$4 sm:$0xff]  }
  0x86   :  { %1955 = vmatprep.mubr.bf16.mxu1 %v2241_v35  ;;  %v2793_v33 = vld [vmem:[%s3863_s1 + $0x590] ss:$8 sps:$4 sm:$0xff]   ;;  %v2801_v35 = vld [vmem:[%s3863_s1 + $0x584] ss:$8 sps:$4 sm:$0xff]  }
  0x87   :  { %1969 = vmatpush1.bf16.msra.mxu0 %v2712_v36  ;;  %v2796_v36 = vld [vmem:[%s3863_s1 + $0x480] ss:$8 sps:$4 sm:$0xff]  }
  0x88   :  { %2022 = vmatpush1.bf16.msra.mxu1 %v2715_v37  ;;  %1970 = vmatprep.subr.bf16.mxu0 %v2720_v38  ;;  %v2799_v37 = vld [vmem:[%s3863_s1 + $0x580] ss:$8 sps:$4 sm:$0xff]   ;;  %v2804_v38 = vld [vmem:[%s3863_s1 + $0x674] ss:$8 sps:$4 sm:$0xff]  }
  0x89   :  { %2023 = vmatprep.subr.bf16.mxu1 %v2723_v39  ;;  %v2807_v39 = vld [vmem:[%s3863_s1 + $0x774] ss:$8 sps:$4 sm:$0xff]  }
  0x8a   :  { %1903 = vmatmul.mubr.bf16.gmra.mxu0 %v2238_v44  ;;  %v2228_v44 = vcombine.low %v3415_v46, %v3420_v47  ;;  %v2810_v46 = vld [vmem:[%s3863_s1 + $0x664] ss:$8 sps:$4 sm:$0xff]  }
  0x8b   :  { %1956 = vmatmul.mubr.bf16.gmra.mxu1 %v2240_v45  ;;  %1971 = vmatpush1.bf16.msra.mxu0 %v2718_v40  ;;  %v34_v40 = vld [vmem:[%s3864_s0 + $0xa0] sm:$0xff] }
  0x8c   :  { %2024 = vmatpush1.bf16.msra.mxu1 %v2721_v41  ;;  %1972 = vmatprep.subr.bf16.mxu0 %v2726_v48  ;;  %v2226_v41 = vcombine.low %v3405_v42, %v3410_v43  ;;  %v42_v45 = vld [vmem:[%s3864_s0 + $0xe0] sm:$0xff]  ;;  %v35_v48 = vld [vmem:[%s3864_s0 + $0xa8] sm:$0xff]  ;;  %v2802_v42 = vld [vmem:[%s3863_s1 + $0x670] ss:$8 sps:$4 sm:$0xff]  }
  0x8d   :  { %2025 = vmatprep.subr.bf16.mxu1 %v2729_v49  ;;  %1998 = vmatprep.mubr.bf16.mxu0 %v2227_v50  ;;  %v43_v49 = vld [vmem:[%s3864_s0 + $0xe8] sm:$0xff]  ;;  %v2805_v43 = vld [vmem:[%s3863_s1 + $0x770] ss:$8 sps:$4 sm:$0xff]   ;;  %v2243_v50 = vcombine.high %v34_v40, %v42_v45 }
  0x8e   :  { %2051 = vmatprep.mubr.bf16.mxu1 %v2229_v51  ;;  %v2813_v47 = vld [vmem:[%s3863_s1 + $0x764] ss:$8 sps:$4 sm:$0xff]   ;;  %v2245_v51 = vcombine.high %v35_v48, %v43_v49 }
  0x8f   :  { %1973 = vmatpush1.bf16.msra.mxu0 %v2724_v52  ;;  %v2808_v52 = vld [vmem:[%s3863_s1 + $0x660] ss:$8 sps:$4 sm:$0xff]  }
  0x90   :  { %2026 = vmatpush1.bf16.msra.mxu1 %v2727_v53  ;;  %1974 = vmatprep.subr.bf16.mxu0 %v2732_v54  ;;  %v2811_v53 = vld [vmem:[%s3863_s1 + $0x760] ss:$8 sps:$4 sm:$0xff]   ;;  %v2816_v54 = vld [vmem:[%s3863_s1 + $0x654] ss:$8 sps:$4 sm:$0xff]  }
  0x91   :  { %2027 = vmatprep.subr.bf16.mxu1 %v2735_v55  ;;  %v2819_v55 = vld [vmem:[%s3863_s1 + $0x754] ss:$8 sps:$4 sm:$0xff]  }
  0x93   :  { %1975 = vmatpush1.bf16.msra.mxu0 %v2730_v56  ;;  %v3631_v56 = vld [vmem:[%s3864_s0 + $0x30] sm:$0xff] }
  0x94   :  { %2028 = vmatpush1.bf16.msra.mxu1 %v2733_v57  ;;  %1976 = vmatprep.subr.bf16.mxu0 %v2738_v58  ;;  %v2242_v57 = vcombine.low %v34_v40, %v42_v45  ;;  %v2244_v58 = vcombine.low %v35_v48, %v43_v49  ;;  %v2874_v40 = vld [vmem:[%s3863_s1 + $0x6b0] ss:$8 sps:$4 sm:$0xff]   ;;  %v2885_v45 = vld [vmem:[%s3863_s1 + $0x7a4] ss:$8 sps:$4 sm:$0xff]   ;;  %v2880_v48 = vld [vmem:[%s3863_s1 + $0x6a0] ss:$8 sps:$4 sm:$0xff]  }
  0x95   :  { %2029 = vmatprep.subr.bf16.mxu1 %v2741_v59  ;;  %v3636_v59 = vld [vmem:[%s3864_s0 + $0x70] sm:$0xff]  ;;  %v2883_v49 = vld [vmem:[%s3863_s1 + $0x7a0] ss:$8 sps:$4 sm:$0xff]  }
  0x97   :  { %1977 = vmatpush1.bf16.msra.mxu0 %v2736_v60  ;;  %v3641_v60 = vld [vmem:[%s3864_s0 + $0x38] sm:$0xff] }
  0x98   :  { %2030 = vmatpush1.bf16.msra.mxu1 %v2739_v61  ;;  %1978 = vmatprep.subr.bf16.mxu0 %v2744_v62  ;;  %v3646_v61 = vld [vmem:[%s3864_s0 + $0x78] sm:$0xff] }
  0x99   :  { %2031 = vmatprep.subr.bf16.mxu1 %v2747_v63  ;;  %v2814_v62 = vld [vmem:[%s3863_s1 + $0x650] ss:$8 sps:$4 sm:$0xff]  }
  0x9a   :  { %v2817_v63 = vld [vmem:[%s3863_s1 + $0x750] ss:$8 sps:$4 sm:$0xff]  }
  0x9b   :  { %1979 = vmatpush1.bf16.msra.mxu0 %v2742_v0  ;;  %v2822_v0 = vld [vmem:[%s3863_s1 + $0x644] ss:$8 sps:$4 sm:$0xff]  }
  0x9c   :  { %2032 = vmatpush1.bf16.msra.mxu1 %v2745_v1  ;;  %1980 = vmatprep.subr.bf16.mxu0 %v2750_v2  ;;  %v2825_v1 = vld [vmem:[%s3863_s1 + $0x744] ss:$8 sps:$4 sm:$0xff]   ;;  %v2231_v2 = vcombine.high %v3631_v56, %v3636_v59 }
  0x9d   :  { %2033 = vmatprep.subr.bf16.mxu1 %v2753_v3  ;;  %v2233_v3 = vcombine.high %v3641_v60, %v3646_v61 }
  0x9f   :  { %1981 = vmatpush1.bf16.msra.mxu0 %v2748_v4  ;;  %v2820_v4 = vld [vmem:[%s3863_s1 + $0x640] ss:$8 sps:$4 sm:$0xff]  }
  0xa0   :  { %2034 = vmatpush1.bf16.msra.mxu1 %v2751_v5  ;;  %1982 = vmatprep.subr.bf16.mxu0 %v2756_v6  ;;  %v2823_v5 = vld [vmem:[%s3863_s1 + $0x740] ss:$8 sps:$4 sm:$0xff]   ;;  %v2828_v6 = vld [vmem:[%s3863_s1 + $0x634] ss:$8 sps:$4 sm:$0xff]  }
  0xa1   :  { %2035 = vmatprep.subr.bf16.mxu1 %v2759_v7  ;;  %v2831_v7 = vld [vmem:[%s3863_s1 + $0x734] ss:$8 sps:$4 sm:$0xff]  }
  0xa3   :  { %1983 = vmatpush2.bf16.msra.mxu0 %v2754_v8  ;;  %v2826_v8 = vld [vmem:[%s3863_s1 + $0x630] ss:$8 sps:$4 sm:$0xff]  }
  0xa4   :  { %2036 = vmatpush2.bf16.msra.mxu1 %v2757_v9  ;;  %1984 = vmatprep.subr.bf16.mxu0 %v2762_v10  ;;  %v2829_v9 = vld [vmem:[%s3863_s1 + $0x730] ss:$8 sps:$4 sm:$0xff]   ;;  %v2834_v10 = vld [vmem:[%s3863_s1 + $0x624] ss:$8 sps:$4 sm:$0xff]  }
  0xa5   :  { %2037 = vmatprep.subr.bf16.mxu1 %v2765_v11  ;;  %v2837_v11 = vld [vmem:[%s3863_s1 + $0x724] ss:$8 sps:$4 sm:$0xff]  }
  0xa7   :  { %1985 = vmatpush2.bf16.msra.mxu0 %v2760_v12  ;;  %v2832_v12 = vld [vmem:[%s3863_s1 + $0x620] ss:$8 sps:$4 sm:$0xff]  }
  0xa8   :  { %2038 = vmatpush2.bf16.msra.mxu1 %v2763_v13  ;;  %1986 = vmatprep.subr.bf16.mxu0 %v2768_v14  ;;  %v2835_v13 = vld [vmem:[%s3863_s1 + $0x720] ss:$8 sps:$4 sm:$0xff]   ;;  %v2840_v14 = vld [vmem:[%s3863_s1 + $0x614] ss:$8 sps:$4 sm:$0xff]  }
  0xa9   :  { %2039 = vmatprep.subr.bf16.mxu1 %v2771_v15  ;;  %v2843_v15 = vld [vmem:[%s3863_s1 + $0x714] ss:$8 sps:$4 sm:$0xff]  }
  0xab   :  { %1987 = vmatpush2.bf16.msra.mxu0 %v2766_v16  ;;  %v2838_v16 = vld [vmem:[%s3863_s1 + $0x610] ss:$8 sps:$4 sm:$0xff]  }
  0xac   :  { %2040 = vmatpush2.bf16.msra.mxu1 %v2769_v17  ;;  %1988 = vmatprep.subr.bf16.mxu0 %v2774_v18  ;;  %v2841_v17 = vld [vmem:[%s3863_s1 + $0x710] ss:$8 sps:$4 sm:$0xff]   ;;  %v2846_v18 = vld [vmem:[%s3863_s1 + $0x604] ss:$8 sps:$4 sm:$0xff]  }
  0xad   :  { %2041 = vmatprep.subr.bf16.mxu1 %v2777_v19  ;;  %v2849_v19 = vld [vmem:[%s3863_s1 + $0x704] ss:$8 sps:$4 sm:$0xff]  }
  0xaf   :  { %1989 = vmatpush2.bf16.msra.mxu0 %v2772_v20  ;;  %v2844_v20 = vld [vmem:[%s3863_s1 + $0x600] ss:$8 sps:$4 sm:$0xff]  }
  0xb0   :  { %2042 = vmatpush2.bf16.msra.mxu1 %v2775_v21  ;;  %1990 = vmatprep.subr.bf16.mxu0 %v2780_v22  ;;  %v2847_v21 = vld [vmem:[%s3863_s1 + $0x700] ss:$8 sps:$4 sm:$0xff]   ;;  %v2852_v22 = vld [vmem:[%s3863_s1 + $0x6f4] ss:$8 sps:$4 sm:$0xff]  }
  0xb1   :  { %2043 = vmatprep.subr.bf16.mxu1 %v2783_v23  ;;  %v2855_v23 = vld [vmem:[%s3863_s1 + $0x7f4] ss:$8 sps:$4 sm:$0xff]  }
  0xb3   :  { %1991 = vmatpush2.bf16.msra.mxu0 %v2778_v24  ;;  %v2850_v24 = vld [vmem:[%s3863_s1 + $0x6f0] ss:$8 sps:$4 sm:$0xff]  }
  0xb4   :  { %2044 = vmatpush2.bf16.msra.mxu1 %v2781_v25  ;;  %1992 = vmatprep.subr.bf16.mxu0 %v2786_v26  ;;  %v2853_v25 = vld [vmem:[%s3863_s1 + $0x7f0] ss:$8 sps:$4 sm:$0xff]   ;;  %v2858_v26 = vld [vmem:[%s3863_s1 + $0x6e4] ss:$8 sps:$4 sm:$0xff]  }
  0xb5   :  { %2045 = vmatprep.subr.bf16.mxu1 %v2789_v27  ;;  %v2861_v27 = vld [vmem:[%s3863_s1 + $0x7e4] ss:$8 sps:$4 sm:$0xff]  }
  0xb7   :  { %1993 = vmatpush2.bf16.msra.mxu0 %v2784_v28  ;;  %v2856_v28 = vld [vmem:[%s3863_s1 + $0x6e0] ss:$8 sps:$4 sm:$0xff]  }
  0xb8   :  { %2046 = vmatpush2.bf16.msra.mxu1 %v2787_v29  ;;  %1994 = vmatprep.subr.bf16.mxu0 %v2792_v30  ;;  %v2859_v29 = vld [vmem:[%s3863_s1 + $0x7e0] ss:$8 sps:$4 sm:$0xff]   ;;  %v2864_v30 = vld [vmem:[%s3863_s1 + $0x6d4] ss:$8 sps:$4 sm:$0xff]  }
  0xb9   :  { %2047 = vmatprep.subr.bf16.mxu1 %v2795_v31  ;;  %v2867_v31 = vld [vmem:[%s3863_s1 + $0x7d4] ss:$8 sps:$4 sm:$0xff]  }
  0xbb   :  { %1995 = vmatpush2.bf16.msra.mxu0 %v2790_v32  ;;  %v2862_v32 = vld [vmem:[%s3863_s1 + $0x6d0] ss:$8 sps:$4 sm:$0xff]  }
  0xbc   :  { %2048 = vmatpush2.bf16.msra.mxu1 %v2793_v33  ;;  %1996 = vmatprep.subr.bf16.mxu0 %v2798_v34  ;;  %v2865_v33 = vld [vmem:[%s3863_s1 + $0x7d0] ss:$8 sps:$4 sm:$0xff]   ;;  %v2870_v34 = vld [vmem:[%s3863_s1 + $0x6c4] ss:$8 sps:$4 sm:$0xff]  }
  0xbd   :  { %2049 = vmatprep.subr.bf16.mxu1 %v2801_v35  ;;  %v2873_v35 = vld [vmem:[%s3863_s1 + $0x7c4] ss:$8 sps:$4 sm:$0xff]  }
  0xbf   :  { %1997 = vmatpush2.bf16.msra.mxu0 %v2796_v36  ;;  %v2868_v36 = vld [vmem:[%s3863_s1 + $0x6c0] ss:$8 sps:$4 sm:$0xff]  }
  0xc0   :  { %2050 = vmatpush2.bf16.msra.mxu1 %v2799_v37  ;;  %2072 = vmatprep.subr.bf16.mxu0 %v2804_v38  ;;  %v2871_v37 = vld [vmem:[%s3863_s1 + $0x7c0] ss:$8 sps:$4 sm:$0xff]   ;;  %v2876_v38 = vld [vmem:[%s3863_s1 + $0x6b4] ss:$8 sps:$4 sm:$0xff]  }
  0xc1   :  { %2125 = vmatprep.subr.bf16.mxu1 %v2807_v39  ;;  %v2879_v39 = vld [vmem:[%s3863_s1 + $0x7b4] ss:$8 sps:$4 sm:$0xff]  }
  0xc2   :  { %1999 = vmatmul.mubr.bf16.vlgmr.msra.gmra.mxu0 %v2226_v41  ;;  %v2877_v41 = vld [vmem:[%s3863_s1 + $0x7b0] ss:$8 sps:$4 sm:$0xff]  }
  0xc3   :  { %2052 = vmatmul.mubr.bf16.vlgmr.msra.gmra.mxu1 %v2228_v44  ;;  %2073 = vmatpush1.bf16.msra.mxu0 %v2802_v42  ;;  %v2882_v44 = vld [vmem:[%s3863_s1 + $0x6a4] ss:$8 sps:$4 sm:$0xff]   ;;  %v2888_v42 = vld [vmem:[%s3863_s1 + $0x694] ss:$8 sps:$4 sm:$0xff]  }
  0xc4   :  { %2126 = vmatpush1.bf16.msra.mxu1 %v2805_v43  ;;  %2074 = vmatprep.subr.bf16.mxu0 %v2810_v46  ;;  %v2891_v43 = vld [vmem:[%s3863_s1 + $0x794] ss:$8 sps:$4 sm:$0xff]   ;;  %v2886_v46 = vld [vmem:[%s3863_s1 + $0x690] ss:$8 sps:$4 sm:$0xff]  }
  0xc5   :  { %2127 = vmatprep.subr.bf16.mxu1 %v2813_v47  ;;  %2008 = vmatprep.mubr.bf16.mxu0 %v2243_v50  ;;  %v2889_v47 = vld [vmem:[%s3863_s1 + $0x790] ss:$8 sps:$4 sm:$0xff]   ;;  %v2894_v50 = vld [vmem:[%s3863_s1 + $0x684] ss:$8 sps:$4 sm:$0xff]  }
  0xc6   :  { %2061 = vmatprep.mubr.bf16.mxu1 %v2245_v51  ;;  %v2897_v51 = vld [vmem:[%s3863_s1 + $0x784] ss:$8 sps:$4 sm:$0xff]  }
  0xc7   :  { %2075 = vmatpush1.bf16.msra.mxu0 %v2808_v52  ;;  %v2892_v52 = vld [vmem:[%s3863_s1 + $0x680] ss:$8 sps:$4 sm:$0xff]  }
  0xc8   :  { %2128 = vmatpush1.bf16.msra.mxu1 %v2811_v53  ;;  %2076 = vmatprep.subr.bf16.mxu0 %v2816_v54  ;;  %v2895_v53 = vld [vmem:[%s3863_s1 + $0x780] ss:$8 sps:$4 sm:$0xff]   ;;  %v36_v54 = vld [vmem:[%s3864_s0 + $0xb0] sm:$0xff] }
  0xc9   :  { %2129 = vmatprep.subr.bf16.mxu1 %v2819_v55  ;;  %v44_v55 = vld [vmem:[%s3864_s0 + $0xf0] sm:$0xff] }
  0xca   :  { %2009 = vmatmul.mubr.bf16.gmra.mxu0 %v2242_v57  ;;  %v37_v57 = vld [vmem:[%s3864_s0 + $0xb8] sm:$0xff] }
  0xcb   :  { %2062 = vmatmul.mubr.bf16.gmra.mxu1 %v2244_v58  ;;  %2077 = vmatpush1.bf16.msra.mxu0 %v2814_v62  ;;  %v45_v58 = vld [vmem:[%s3864_s0 + $0xf8] sm:$0xff]  ;;  %v2230_v62 = vcombine.low %v3631_v56, %v3636_v59 }
  0xcc   :  { %2130 = vmatpush1.bf16.msra.mxu1 %v2817_v63  ;;  %2078 = vmatprep.subr.bf16.mxu0 %v2822_v0  ;;  %v2232_v63 = vcombine.low %v3641_v60, %v3646_v61  ;;  %v2247_v0 = vcombine.high %v36_v54, %v44_v55 }
  0xcd   :  { %2131 = vmatprep.subr.bf16.mxu1 %v2825_v1  ;;  %2104 = vmatprep.mubr.bf16.mxu0 %v2231_v2  ;;  %v2249_v1 = vcombine.high %v37_v57, %v45_v58  ;;  %v2246_v2 = vcombine.low %v36_v54, %v44_v55 }
  0xce   :  { %2157 = vmatprep.mubr.bf16.mxu1 %v2233_v3  ;;  %v2248_v3 = vcombine.low %v37_v57, %v45_v58 }
  0xcf   :  { %2079 = vmatpush1.bf16.msra.mxu0 %v2820_v4 }
  0xd0   :  { %2132 = vmatpush1.bf16.msra.mxu1 %v2823_v5  ;;  %2080 = vmatprep.subr.bf16.mxu0 %v2828_v6 }
  0xd1   :  { %2133 = vmatprep.subr.bf16.mxu1 %v2831_v7 }
  0xd3   :  { %2081 = vmatpush1.bf16.msra.mxu0 %v2826_v8 }
  0xd4   :  { %2134 = vmatpush1.bf16.msra.mxu1 %v2829_v9  ;;  %2082 = vmatprep.subr.bf16.mxu0 %v2834_v10 }
  0xd5   :  { %2135 = vmatprep.subr.bf16.mxu1 %v2837_v11 }
  0xd7   :  { %2083 = vmatpush1.bf16.msra.mxu0 %v2832_v12 }
  0xd8   :  { %2136 = vmatpush1.bf16.msra.mxu1 %v2835_v13  ;;  %2084 = vmatprep.subr.bf16.mxu0 %v2840_v14 }
  0xd9   :  { %2137 = vmatprep.subr.bf16.mxu1 %v2843_v15 }
  0xdb   :  { %2085 = vmatpush1.bf16.msra.mxu0 %v2838_v16 }
  0xdc   :  { %2138 = vmatpush1.bf16.msra.mxu1 %v2841_v17  ;;  %2086 = vmatprep.subr.bf16.mxu0 %v2846_v18 }
  0xdd   :  { %2139 = vmatprep.subr.bf16.mxu1 %v2849_v19 }
  0xdf   :  { %2087 = vmatpush1.bf16.msra.mxu0 %v2844_v20 }
  0xe0   :  { %2140 = vmatpush1.bf16.msra.mxu1 %v2847_v21  ;;  %2088 = vmatprep.subr.bf16.mxu0 %v2852_v22 }
  0xe1   :  { %2141 = vmatprep.subr.bf16.mxu1 %v2855_v23 }
  0xe3   :  { %2089 = vmatpush2.bf16.msra.mxu0 %v2850_v24 }
  0xe4   :  { %2142 = vmatpush2.bf16.msra.mxu1 %v2853_v25  ;;  %2090 = vmatprep.subr.bf16.mxu0 %v2858_v26 }
  0xe5   :  { %2143 = vmatprep.subr.bf16.mxu1 %v2861_v27 }
  0xe7   :  { %2091 = vmatpush2.bf16.msra.mxu0 %v2856_v28 }
  0xe8   :  { %2144 = vmatpush2.bf16.msra.mxu1 %v2859_v29  ;;  %2092 = vmatprep.subr.bf16.mxu0 %v2864_v30  ;;  %v304_v30 = vlaneseq }
  0xe9   :  { %2145 = vmatprep.subr.bf16.mxu1 %v2867_v31 }
  0xeb   :  { %2093 = vmatpush2.bf16.msra.mxu0 %v2862_v32 }
  0xec   :  { %2146 = vmatpush2.bf16.msra.mxu1 %v2865_v33  ;;  %2094 = vmatprep.subr.bf16.mxu0 %v2870_v34  ;;  %v305_v34 = vshrl.u32 %v304_v30, 7 }
  0xed   :  { %2147 = vmatprep.subr.bf16.mxu1 %v2873_v35 }
  0xef   :  { %2095 = vmatpush2.bf16.msra.mxu0 %v2868_v36 }
  0xf0   :  { %2148 = vmatpush2.bf16.msra.mxu1 %v2871_v37  ;;  %2096 = vmatprep.subr.bf16.mxu0 %v2876_v38  ;;  %v306_v37 = vsub.s32 0, %v305_v34  ;;  %v302_v38 = vld [vmem:[%s3865_s2] sm:$0x3] }
  0xf1   :  { %2149 = vmatprep.subr.bf16.mxu1 %v2879_v39 }
  0xf3   :  { %2097 = vmatpush2.bf16.msra.mxu0 %v2874_v40  ;;  %v310_v40 = vsub.s32 1, %v305_v34 }
  0xf4   :  { %2150 = vmatpush2.bf16.msra.mxu1 %v2877_v41  ;;  %2098 = vmatprep.subr.bf16.mxu0 %v2882_v44  ;;  %v307_v44 = vrot.slane %v302_v38, %v306_v37 }
  0xf5   :  { %2151 = vmatprep.subr.bf16.mxu1 %v2885_v45 }
  0xf7   :  { %2099 = vmatpush2.bf16.msra.mxu0 %v2880_v48  ;;  %v311_v48 = vrot.slane %v302_v38, %v310_v40 }
  0xf8   :  { %2152 = vmatpush2.bf16.msra.mxu1 %v2883_v49  ;;  %2100 = vmatprep.subr.bf16.mxu0 %v2888_v42 }
  0xf9   :  { %2153 = vmatprep.subr.bf16.mxu1 %v2891_v43 }
  0xfb   :  { %2101 = vmatpush2.bf16.msra.mxu0 %v2886_v46 }
  0xfc   :  { %2154 = vmatpush2.bf16.msra.mxu1 %v2889_v47  ;;  %2102 = vmatprep.subr.bf16.mxu0 %v2894_v50 }
  0xfd   :  { %2155 = vmatprep.subr.bf16.mxu1 %v2897_v51 }
  0xff   :  { %2103 = vmatpush2.bf16.msra.mxu0 %v2892_v52 }
 0x100   :  { %2156 = vmatpush2.bf16.msra.mxu1 %v2895_v53 }
 0x102   :  { %2105 = vmatmul.mubr.bf16.vlgmr.msra.gmra.mxu0 %v2230_v62  ;;  %v1788_v4 = vpop.f32.mrf.mxu0 }
 0x103   :  { %2158 = vmatmul.mubr.bf16.vlgmr.msra.gmra.mxu1 %v2232_v63  ;;  %2114 = vmatprep.mubr.bf16.mxu0 %v2247_v0  ;;  %v1841_v5 = vpop.f32.mrf.mxu1  ;;  %v1789_v42 = vadd.f32 %v1788_v4, %v307_v44 }
 0x104   :  { %2167 = vmatprep.mubr.bf16.mxu1 %v2249_v1  ;;  %v1790_v6 = vpop.f32.mrf.mxu0 }
 0x105   :  { %v1843_v7 = vpop.f32.mrf.mxu1  ;;  %v1791_v46 = vadd.f32 %v1790_v6, %v311_v48  ;;  %v1842_v51 = vadd.f32 %v1841_v5, %v1789_v42 }
 0x106   :  { %v1792_v56 = vpop.f32.mrf.mxu0 }
 0x107   :  { %v1845_v59 = vpop.f32.mrf.mxu1  ;;  %v1793_v52 = vadd.f32 %v1792_v56, %v307_v44  ;;  %v1844_v53 = vadd.f32 %v1843_v7, %v1791_v46 }
 0x108   :  { %v1794_v8 = vpop.f32.mrf.mxu0 }
 0x109   :  { %v1847_v61 = vpop.f32.mrf.mxu1  ;;  %v1795_v54 = vadd.f32 %v1794_v8, %v311_v48  ;;  %v1846_v63 = vadd.f32 %v1845_v59, %v1793_v52 }
 0x10a   :  { %2115 = vmatmul.mubr.bf16.gmra.mxu0 %v2246_v2  ;;  %v1798_v60 = vpop.f32.mrf.mxu0 }
 0x10b   :  { %2168 = vmatmul.mubr.bf16.gmra.mxu1 %v2248_v3  ;;  %v1851_v10 = vpop.f32.mrf.mxu1  ;;  %v1799_v57 = vadd.f32 %v1798_v60, %v307_v44  ;;  %v1848_v2 = vadd.f32 %v1847_v61, %v1795_v54 }
 0x10c   :  { %v1800_v9 = vpop.f32.mrf.mxu0 }
 0x10d   :  { %v1853_v12 = vpop.f32.mrf.mxu1  ;;  %v1801_v1 = vadd.f32 %v1800_v9, %v311_v48  ;;  %v1852_v34 = vadd.f32 %v1851_v10, %v1799_v57 }
 0x10e   :  { %v1802_v11 = vpop.f32.mrf.mxu0 }
 0x10f   :  { %v3830_v14 = vpop.f32.mrf.mxu1  ;;  %v1803_v4 = vadd.f32 %v1802_v11, %v307_v44  ;;  %v1854_v56 = vadd.f32 %v1853_v12, %v1801_v1 }
 0x110   :  { %v1804_v13 = vpop.f32.mrf.mxu0 }
 0x111   :  { %v3832_v16 = vpop.f32.mrf.mxu1  ;;  %v1805_v7 = vadd.f32 %v1804_v13, %v311_v48  ;;  %v1856_v42 = vadd.f32 %v3830_v14, %v1803_v4 }
 0x113   :  { %v1858_v10 = vadd.f32 %v3832_v16, %v1805_v7 }
 0x142   :  { %v1894_v15 = vpop.f32.mrf.mxu0 }
 0x143   :  { %v1947_v17 = vpop.f32.mrf.mxu1  ;;  %v1895_v55 = vadd.f32 %v1894_v15, %v1842_v51 }
 0x144   :  { %v1896_v18 = vpop.f32.mrf.mxu0 }
 0x145   :  { %v1949_v19 = vpop.f32.mrf.mxu1  ;;  %v1897_v0 = vadd.f32 %v1896_v18, %v1844_v53  ;;  %v1948_v3 = vadd.f32 %v1947_v17, %v1895_v55 }
 0x146   :  { %v1898_v20 = vpop.f32.mrf.mxu0 }
 0x147   :  { %v1951_v21 = vpop.f32.mrf.mxu1  ;;  %v1899_v30 = vadd.f32 %v1898_v20, %v1846_v63  ;;  %v1950_v38 = vadd.f32 %v1949_v19, %v1897_v0 }
 0x148   :  { %v1900_v22 = vpop.f32.mrf.mxu0 }
 0x149   :  { %v1953_v23 = vpop.f32.mrf.mxu1  ;;  %v1901_v40 = vadd.f32 %v1900_v22, %v1848_v2  ;;  %v1952_v15 = vadd.f32 %v1951_v21, %v1899_v30 }
 0x14a   :  { %v1904_v24 = vpop.f32.mrf.mxu0 }
 0x14b   :  { %v1957_v25 = vpop.f32.mrf.mxu1  ;;  %v1905_v8 = vadd.f32 %v1904_v24, %v1852_v34  ;;  %v1954_v61 = vadd.f32 %v1953_v23, %v1901_v40 }
 0x14c   :  { %v1906_v26 = vpop.f32.mrf.mxu0 }
 0x14d   :  { %v3834_v27 = vpop.f32.mrf.mxu1  ;;  %v1907_v59 = vadd.f32 %v1906_v26, %v1854_v56  ;;  %v1958_v11 = vadd.f32 %v1957_v25, %v1905_v8 }
 0x14e   :  { %v1908_v28 = vpop.f32.mrf.mxu0 }
 0x14f   :  { %v3836_v29 = vpop.f32.mrf.mxu1  ;;  %v1909_v44 = vadd.f32 %v1908_v28, %v1856_v42  ;;  %v1960_v21 = vadd.f32 %v3834_v27, %v1907_v59 }
 0x150   :  { %v3838_v31 = vpop.f32.mrf.mxu0 }
 0x151   :  { %v3840_v32 = vpop.f32.mrf.mxu1  ;;  %v1911_v24 = vadd.f32 %v3838_v31, %v1858_v10 }
 0x182   :  { %v2000_v33 = vpop.f32.mrf.mxu0 }
 0x183   :  { %v2053_v35 = vpop.f32.mrf.mxu1  ;;  %v2001_v5 = vadd.f32 %v2000_v33, %v1948_v3 }
 0x184   :  { %v2002_v36 = vpop.f32.mrf.mxu0 }
 0x185   :  { %v2055_v39 = vpop.f32.mrf.mxu1  ;;  %v2003_v60 = vadd.f32 %v2002_v36, %v1950_v38  ;;  %v2054_v17 = vadd.f32 %v2053_v35, %v2001_v5 }
 0x186   :  { %v2004_v41 = vpop.f32.mrf.mxu0 }
 0x187   :  { %v2057_v45 = vpop.f32.mrf.mxu1  ;;  %v2005_v20 = vadd.f32 %v2004_v41, %v1952_v15  ;;  %v2056_v33 = vadd.f32 %v2055_v39, %v2003_v60  ;;  %v1962_v41 = vadd.f32 %v3836_v29, %v1909_v44 }
 0x188   :  { %v2006_v49 = vpop.f32.mrf.mxu0 }
 0x189   :  { %v2059_v43 = vpop.f32.mrf.mxu1  ;;  %v2007_v12 = vadd.f32 %v2006_v49, %v1954_v61  ;;  %v2058_v48 = vadd.f32 %v2057_v45, %v2005_v20  ;;  %v1964_v49 = vadd.f32 %v3840_v32, %v1911_v24 }
 0x18a   :  { %v2010_v47 = vpop.f32.mrf.mxu0 }
 0x18b   :  { %v2063_v50 = vpop.f32.mrf.mxu1  ;;  %v2011_v14 = vadd.f32 %v2010_v47, %v1958_v11  ;;  %v2060_v46 = vadd.f32 %v2059_v43, %v2007_v12 }
 0x18c   :  { %v2012_v58 = vpop.f32.mrf.mxu0 }
 0x18d   :  { %v2065_v62 = vpop.f32.mrf.mxu1  ;;  %v2013_v16 = vadd.f32 %v2012_v58, %v1960_v21  ;;  %v2064_v52 = vadd.f32 %v2063_v50, %v2011_v14 }
 0x18e   :  { %v2014_v37 = vpop.f32.mrf.mxu0 }
 0x18f   :  { %v2067_v6 = vpop.f32.mrf.mxu1  ;;  %v2015_v27 = vadd.f32 %v2014_v37, %v1962_v41  ;;  %v2066_v57 = vadd.f32 %v2065_v62, %v2013_v16 }
 0x190   :  { %v2016_v18 = vpop.f32.mrf.mxu0 }
 0x191   :  { %v2069_v9 = vpop.f32.mrf.mxu1  ;;  %v2017_v29 = vadd.f32 %v2016_v18, %v1964_v49  ;;  %v2068_v43 = vadd.f32 %v2067_v6, %v2015_v27 }
 0x193   :  { %v2070_v62 = vadd.f32 %v2069_v9, %v2017_v29 }
 0x1c2   :  { %v2106_v19 = vpop.f32.mrf.mxu0 }
 0x1c3   :  { %v2159_v22 = vpop.f32.mrf.mxu1  ;;  %v2107_v13 = vadd.f32 %v2106_v19, %v2054_v17 }
 0x1c4   :  { %v2108_v26 = vpop.f32.mrf.mxu0 }
 0x1c5   :  { %v2161_v36 = vpop.f32.mrf.mxu1  ;;  %v2160_v23 = vadd.f32 %v2159_v22, %v2107_v13  ;;  %v2109_v35 = vadd.f32 %v2108_v26, %v2056_v33 }
 0x1c6   :  { %v2110_v25 = vpop.f32.mrf.mxu0 }
 0x1c7   :  { %v2163_v28 = vpop.f32.mrf.mxu1  ;;  %v2162_v51 = vadd.f32 %v2161_v36, %v2109_v35  ;;  %v2111_v39 = vadd.f32 %v2110_v25, %v2058_v48  ;;  %v2178_v47 = vmax.f32 %v2160_v23, 0.0 }
 0x1c8   :  { %v2112_v53 = vpop.f32.mrf.mxu0 }
 0x1c9   :  { %v2165_v31 = vpop.f32.mrf.mxu1  ;;  %v2179_v54 = vmax.f32 %v2162_v51, 0.0  ;;  %v2164_v55 = vadd.f32 %v2163_v28, %v2111_v39  ;;  %v2113_v45 = vadd.f32 %v2112_v53, %v2060_v46 }
 0x1ca   :  { %v2116_v63 = vpop.f32.mrf.mxu0 }
 0x1cb   :  { %v2169_v0 = vpop.f32.mrf.mxu1  ;;  %v2510_v58 = vpack.c.bf16 %v2179_v54, %v2178_v47  ;;  %v2166_v1 = vadd.f32 %v2165_v31, %v2113_v45  ;;  %v2117_v2 = vadd.f32 %v2116_v63, %v2064_v52  ;;  %v2180_v32 = vmax.f32 %v2164_v55, 0.0 }
 0x1cc   :  { %v2118_v3 = vpop.f32.mrf.mxu0 }
 0x1cd   :  { %v2171_v30 = vpop.f32.mrf.mxu1  ;;  %2210 = vst [vmem:[%s3866_s3] sm:$0xff] %v2510_v58  ;;  %v2181_v50 = vmax.f32 %v2166_v1, 0.0  ;;  %v2170_v34 = vadd.f32 %v2169_v0, %v2117_v2  ;;  %v2119_v4 = vadd.f32 %v2118_v3, %v2066_v57 }
 0x1ce   :  { %v2120_v37 = vpop.f32.mrf.mxu0 }
 0x1cf   :  { %v2173_v38 = vpop.f32.mrf.mxu1  ;;  %v2511_v40 = vpack.c.bf16 %v2181_v50, %v2180_v32  ;;  %v2172_v5 = vadd.f32 %v2171_v30, %v2119_v4  ;;  %v2121_v56 = vadd.f32 %v2120_v37, %v2068_v43  ;;  %v2182_v6 = vmax.f32 %v2170_v34, 0.0 }
 0x1d0   :  { %v2122_v7 = vpop.f32.mrf.mxu0 }
 0x1d1   :  { %2211 = vst [vmem:[%s3866_s3 + $0x8] sm:$0xff] %v2511_v40  ;;  %v2183_v8 = vmax.f32 %v2172_v5, 0.0  ;;  %v2174_v15 = vadd.f32 %v2173_v38, %v2121_v56  ;;  %v2123_v60 = vadd.f32 %v2122_v7, %v2070_v62  ;;  %v2175_v42 = vpop.f32.mrf.mxu1 }
 0x1d3   :  { %v2512_v59 = vpack.c.bf16 %v2183_v8, %v2182_v6  ;;  %v2176_v18 = vadd.f32 %v2175_v42, %v2123_v60  ;;  %v2184_v9 = vmax.f32 %v2174_v15, 0.0 }
 0x1d5   :  { %2212 = vst [vmem:[%s3866_s3 + $0x10] sm:$0xff] %v2512_v59  ;;  %v2185_v61 = vmax.f32 %v2176_v18, 0.0 }
 0x1d7   :  { %v2513_v17 = vpack.c.bf16 %v2185_v61, %v2184_v9 }
 0x1d9   :  { %2213 = vst [vmem:[%s3866_s3 + $0x18] sm:$0xff] %v2513_v17 }

// kernel: vae_forward.13
= control target key start
LH: loop header
LB: loop body
LE: loop exit
PB: predicated region body
PF: predicated region fallthrough
CT: control target
= control target key end

     0   :  { %14 = vsyncpa [#allocation3], 0  ;;  %v560_v28 = vlaneseq  ;;  %v5506_v36 = vmov 1966171168   ;;  %s6745_s0 = inlined_call_operand.vmem [shape: bf16[2,4096], index: 0, kind: input, shape index: {}]   ;;  %s6746_s1 = inlined_call_operand.vmem [shape: bf16[4096,64], index: 1, kind: input, shape index: {}]   ;;  %s6747_s2 = inlined_call_operand.vmem [shape: f32[1,64], index: 2, kind: input, shape index: {}]   ;;  %s6748_s3 = inlined_call_operand.vmem [shape: f32[2,32], index: 3, kind: input, shape index: {}]   ;;  %s6749_s4 = inlined_call_operand.vmem [shape: bf16[32,4096], index: 4, kind: input, shape index: {}]   ;;  %s6750_s5 = inlined_call_operand.vmem [shape: f32[1,4096], index: 5, kind: input, shape index: {}]   ;;  %s6751_s6 = inlined_call_operand.hbm [shape: f32[2,32], index: 6, kind: output, shape index: {0}]   ;;  %s6752_s7 = inlined_call_operand.hbm [shape: f32[2,32], index: 7, kind: output, shape index: {1}]   ;;  %s6753_s8 = inlined_call_operand.vmem [shape: bf16[2,4096], index: 8, kind: output, shape index: {2}]  }
   0x1   :  { %v5200_v0 = vld [vmem:[%s6746_s1 + $0x78] sm:$0xff]   ;;  %v5204_v4 = vld [vmem:[%s6746_s1 + $0x70] sm:$0xff]   ;;  %v5208_v8 = vld [vmem:[%s6746_s1 + $0x68] sm:$0xff]   ;;  %v558_v37 = vunpack.c.l.s4 %v5506_v36 }
   0x2   :  { %v5201_v1 = vld [vmem:[%s6746_s1 + $0xf8] sm:$0xff]   ;;  %4843 = vmatprep.subr.bf16.mxu0 %v5200_v0  ;;  %v5205_v5 = vld [vmem:[%s6746_s1 + $0xf0] sm:$0xff]   ;;  %v5209_v9 = vld [vmem:[%s6746_s1 + $0xe8] sm:$0xff]   ;;  %v5652_v33 = vshrl.u32 %v560_v28, 7 }
   0x3   :  { %v5202_v2 = vld [vmem:[%s6746_s1 + $0x38] sm:$0xff]   ;;  %4865 = vmatprep.subr.bf16.mxu1 %v5201_v1  ;;  %v5206_v6 = vld [vmem:[%s6746_s1 + $0x30] sm:$0xff]   ;;  %v5210_v10 = vld [vmem:[%s6746_s1 + $0x28] sm:$0xff]   ;;  %v559_v40 = vunpack.c.0.s8 %v558_v37 }
   0x4   :  { %v5203_v3 = vld [vmem:[%s6746_s1 + $0xb8] sm:$0xff]   ;;  %4844 = vmatpush3.bf16.msra.mxu0 %v5202_v2  ;;  %v5207_v7 = vld [vmem:[%s6746_s1 + $0xb0] sm:$0xff]   ;;  %v5211_v11 = vld [vmem:[%s6746_s1 + $0xa8] sm:$0xff]  }
   0x5   :  { %4866 = vmatpush3.bf16.msra.mxu1 %v5203_v3  ;;  %4845 = vmatprep.subr.bf16.mxu0 %v5204_v4  ;;  %v5212_v12 = vld [vmem:[%s6746_s1 + $0x60] sm:$0xff]   ;;  %v5216_v16 = vld [vmem:[%s6746_s1 + $0x58] sm:$0xff]   ;;  %v5220_v20 = vld [vmem:[%s6746_s1 + $0x50] sm:$0xff]   ;;  %v5664_v41 = vsub.s32 %v559_v40, %v5652_v33 }
   0x6   :  { %4867 = vmatprep.subr.bf16.mxu1 %v5205_v5  ;;  %v5213_v13 = vld [vmem:[%s6746_s1 + $0xe0] sm:$0xff]   ;;  %v5217_v17 = vld [vmem:[%s6746_s1 + $0xd8] sm:$0xff]   ;;  %v5221_v21 = vld [vmem:[%s6746_s1 + $0xd0] sm:$0xff]  }
   0x7   :  { %v5214_v14 = vld [vmem:[%s6746_s1 + $0x20] sm:$0xff]   ;;  %v5218_v18 = vld [vmem:[%s6746_s1 + $0x18] sm:$0xff]   ;;  %v5222_v22 = vld [vmem:[%s6746_s1 + $0x10] sm:$0xff]  }
   0x8   :  { %4846 = vmatpush3.bf16.msra.mxu0 %v5206_v6  ;;  %v5215_v15 = vld [vmem:[%s6746_s1 + $0xa0] sm:$0xff]   ;;  %v5219_v19 = vld [vmem:[%s6746_s1 + $0x98] sm:$0xff]   ;;  %v5223_v23 = vld [vmem:[%s6746_s1 + $0x90] sm:$0xff]  }
   0x9   :  { %4868 = vmatpush3.bf16.msra.mxu1 %v5207_v7  ;;  %4847 = vmatprep.subr.bf16.mxu0 %v5208_v8  ;;  %v5224_v24 = vld [vmem:[%s6746_s1 + $0x48] sm:$0xff]   ;;  %v5228_v29 = vld [vmem:[%s6746_s1 + $0x40] sm:$0xff]   ;;  %v5233_v35 = vld [vmem:[%s6746_s1 + $0x178] sm:$0xff]  }
   0xa   :  { %4869 = vmatprep.subr.bf16.mxu1 %v5209_v9  ;;  %v5225_v25 = vld [vmem:[%s6746_s1 + $0xc8] sm:$0xff]   ;;  %v5229_v30 = vld [vmem:[%s6746_s1 + $0xc0] sm:$0xff]   ;;  %v5234_v38 = vld [vmem:[%s6746_s1 + $0x1f8] sm:$0xff]  }
   0xb   :  { %v5226_v26 = vld [vmem:[%s6746_s1 + $0x8] sm:$0xff]   ;;  %v5230_v31 = vld [vmem:[%s6746_s1] sm:$0xff]   ;;  %v5235_v47 = vld [vmem:[%s6746_s1 + $0x138] sm:$0xff]  }
   0xc   :  { %4848 = vmatpush3.bf16.msra.mxu0 %v5210_v10  ;;  %v5227_v27 = vld [vmem:[%s6746_s1 + $0x88] sm:$0xff]   ;;  %v5231_v32 = vld [vmem:[%s6746_s1 + $0x80] sm:$0xff]   ;;  %v5236_v49 = vld [vmem:[%s6746_s1 + $0x1b8] sm:$0xff]  }
   0xd   :  { %4870 = vmatpush3.bf16.msra.mxu1 %v5211_v11  ;;  %4849 = vmatprep.subr.bf16.mxu0 %v5212_v12  ;;  %v29_v34 = vld [vmem:[%s6745_s0] sm:$0xff]  ;;  %v5237_v52 = vld [vmem:[%s6746_s1 + $0x170] sm:$0xff]   ;;  %v5241_v58 = vld [vmem:[%s6746_s1 + $0x168] sm:$0xff]  }
   0xe   :  { %4871 = vmatprep.subr.bf16.mxu1 %v5213_v13  ;;  %v556_v39 = vcombine.high %v29_v34, %v29_v34  ;;  %v563_v42 = vrot.slane %v29_v34, %v5664_v41  ;;  %v5238_v54 = vld [vmem:[%s6746_s1 + $0x1f0] sm:$0xff]   ;;  %v5242_v59 = vld [vmem:[%s6746_s1 + $0x1e8] sm:$0xff]   ;;  %v5245_v62 = vld [vmem:[%s6746_s1 + $0x160] sm:$0xff]  }
   0xf   :  { %v5239_v55 = vld [vmem:[%s6746_s1 + $0x130] sm:$0xff]   ;;  %v5243_v60 = vld [vmem:[%s6746_s1 + $0x128] sm:$0xff]   ;;  %v5246_v63 = vld [vmem:[%s6746_s1 + $0x1e0] sm:$0xff]  }
  0x10   :  { %4850 = vmatpush3.bf16.msra.mxu0 %v5214_v14  ;;  %v5668_v43 = vrot.slane %v556_v39, %v5664_v41  ;;  %v571_v44 = vcombine.high %v563_v42, %v563_v42  ;;  %v579_v45 = vrot.slane %v563_v42, %v5664_v41  ;;  %v5240_v57 = vld [vmem:[%s6746_s1 + $0x1b0] sm:$0xff]   ;;  %v5244_v61 = vld [vmem:[%s6746_s1 + $0x1a8] sm:$0xff]   ;;  %v5247_v0 = vld [vmem:[%s6746_s1 + $0x120] sm:$0xff]  }
  0x11   :  { %4872 = vmatpush3.bf16.msra.mxu1 %v5215_v15  ;;  %4851 = vmatprep.subr.bf16.mxu0 %v5216_v16  ;;  %v5248_v1 = vld [vmem:[%s6746_s1 + $0x1a0] sm:$0xff]   ;;  %v5249_v2 = vld [vmem:[%s6746_s1 + $0x158] sm:$0xff]   ;;  %v5253_v6 = vld [vmem:[%s6746_s1 + $0x150] sm:$0xff]  }
  0x12   :  { %4873 = vmatprep.subr.bf16.mxu1 %v5217_v17  ;;  %v572_v46 = vcombine.high %v5668_v43, %v5668_v43  ;;  %v593_v48 = vrot.slane %v571_v44, %v5664_v41  ;;  %v601_v51 = vcombine.high %v579_v45, %v579_v45  ;;  %v5250_v3 = vld [vmem:[%s6746_s1 + $0x1d8] sm:$0xff]   ;;  %v5254_v7 = vld [vmem:[%s6746_s1 + $0x1d0] sm:$0xff]   ;;  %v5257_v10 = vld [vmem:[%s6746_s1 + $0x148] sm:$0xff]  }
  0x13   :  { %v5251_v4 = vld [vmem:[%s6746_s1 + $0x118] sm:$0xff]   ;;  %v5255_v8 = vld [vmem:[%s6746_s1 + $0x110] sm:$0xff]   ;;  %v5258_v11 = vld [vmem:[%s6746_s1 + $0x1c8] sm:$0xff]  }
  0x14   :  { %4852 = vmatpush3.bf16.msra.mxu0 %v5218_v18  ;;  %v600_v50 = vrot.slane %v572_v46, %v5664_v41  ;;  %2352 = vmatprep.mubr.bf16.mxu0 %v593_v48  ;;  %v603_v53 = vcombine.high %v593_v48, %v593_v48  ;;  %v5252_v5 = vld [vmem:[%s6746_s1 + $0x198] sm:$0xff]   ;;  %v5256_v9 = vld [vmem:[%s6746_s1 + $0x190] sm:$0xff]   ;;  %v5259_v12 = vld [vmem:[%s6746_s1 + $0x108] sm:$0xff]   ;;  %v586_v18 = vrot.slane %v5668_v43, %v5664_v41 }
  0x15   :  { %4874 = vmatpush3.bf16.msra.mxu1 %v5219_v19  ;;  %4853 = vmatprep.subr.bf16.mxu0 %v5220_v20  ;;  %v5260_v13 = vld [vmem:[%s6746_s1 + $0x188] sm:$0xff]   ;;  %v5261_v14 = vld [vmem:[%s6746_s1 + $0x140] sm:$0xff]   ;;  %v5265_v19 = vld [vmem:[%s6746_s1 + $0x278] sm:$0xff]  }
  0x16   :  { %4875 = vmatprep.subr.bf16.mxu1 %v5221_v21  ;;  %v604_v56 = vcombine.high %v600_v50, %v600_v50  ;;  %2392 = vmatprep.mubr.bf16.mxu1 %v603_v53  ;;  %v5262_v15 = vld [vmem:[%s6746_s1 + $0x1c0] sm:$0xff]   ;;  %v5266_v20 = vld [vmem:[%s6746_s1 + $0x2f8] sm:$0xff]   ;;  %v5273_v28 = vld [vmem:[%s6746_s1 + $0x268] sm:$0xff]  }
  0x17   :  { %v5263_v16 = vld [vmem:[%s6746_s1 + $0x100] sm:$0xff]   ;;  %v5267_v21 = vld [vmem:[%s6746_s1 + $0x238] sm:$0xff]   ;;  %v5285_v42 = vld [vmem:[%s6746_s1 + $0x250] sm:$0xff]  }
  0x18   :  { %4854 = vmatpush3.bf16.msra.mxu0 %v5222_v22  ;;  %v5264_v17 = vld [vmem:[%s6746_s1 + $0x180] sm:$0xff]   ;;  %v5268_v22 = vld [vmem:[%s6746_s1 + $0x2b8] sm:$0xff]   ;;  %v5286_v43 = vld [vmem:[%s6746_s1 + $0x2d0] sm:$0xff]  }
  0x19   :  { %4876 = vmatpush3.bf16.msra.mxu1 %v5223_v23  ;;  %4855 = vmatprep.subr.bf16.mxu0 %v5224_v24  ;;  %v602_v23 = vcombine.high %v586_v18, %v586_v18  ;;  %v5269_v24 = vld [vmem:[%s6746_s1 + $0x270] sm:$0xff]   ;;  %v5278_v34 = vld [vmem:[%s6746_s1 + $0x2e0] sm:$0xff]   ;;  %v5281_v37 = vld [vmem:[%s6746_s1 + $0x258] sm:$0xff]  }
  0x1a   :  { %4877 = vmatprep.subr.bf16.mxu1 %v5225_v25  ;;  %v5270_v25 = vld [vmem:[%s6746_s1 + $0x2f0] sm:$0xff]   ;;  %v5280_v36 = vld [vmem:[%s6746_s1 + $0x2a0] sm:$0xff]   ;;  %v5283_v39 = vld [vmem:[%s6746_s1 + $0x218] sm:$0xff]  }
  0x1b   :  { %v5284_v40 = vld [vmem:[%s6746_s1 + $0x298] sm:$0xff]   ;;  %v5287_v44 = vld [vmem:[%s6746_s1 + $0x210] sm:$0xff]   ;;  %v5289_v46 = vld [vmem:[%s6746_s1 + $0x248] sm:$0xff]  }
  0x1c   :  { %4856 = vmatpush3.bf16.msra.mxu0 %v5226_v26  ;;  %v5271_v26 = vld [vmem:[%s6746_s1 + $0x230] sm:$0xff]   ;;  %v5290_v48 = vld [vmem:[%s6746_s1 + $0x2c8] sm:$0xff]  }
  0x1d   :  { %4878 = vmatpush3.bf16.msra.mxu1 %v5227_v27  ;;  %4857 = vmatprep.subr.bf16.mxu0 %v5228_v29  ;;  %v5272_v27 = vld [vmem:[%s6746_s1 + $0x2b0] sm:$0xff]   ;;  %v5274_v29 = vld [vmem:[%s6746_s1 + $0x2e8] sm:$0xff]  }
  0x1e   :  { %4879 = vmatprep.subr.bf16.mxu1 %v5229_v30  ;;  %v5275_v30 = vld [vmem:[%s6746_s1 + $0x228] sm:$0xff]  }
  0x20   :  { %4858 = vmatpush3.bf16.msra.mxu0 %v5230_v31  ;;  %v5276_v31 = vld [vmem:[%s6746_s1 + $0x2a8] sm:$0xff]  }
  0x21   :  { %4880 = vmatpush3.bf16.msra.mxu1 %v5231_v32  ;;  %4887 = vmatprep.subr.bf16.mxu0 %v5233_v35  ;;  %v5277_v32 = vld [vmem:[%s6746_s1 + $0x260] sm:$0xff]  }
  0x22   :  { %4909 = vmatprep.subr.bf16.mxu1 %v5234_v38  ;;  %v5279_v35 = vld [vmem:[%s6746_s1 + $0x220] sm:$0xff]   ;;  %v5282_v38 = vld [vmem:[%s6746_s1 + $0x2d8] sm:$0xff]  }
  0x23   :  { %2353 = vmatmul.mubr.bf16.vlgmr.msra.gmra.mxu0 %v579_v45  ;;  %v5288_v45 = vld [vmem:[%s6746_s1 + $0x290] sm:$0xff]  }
  0x24   :  { %4888 = vmatpush3.bf16.msra.mxu0 %v5235_v47  ;;  %2393 = vmatmul.mubr.bf16.vlgmr.msra.gmra.mxu1 %v601_v51  ;;  %v30_v47 = vld [vmem:[%s6745_s0 + $0x8] sm:$0xff] }
  0x25   :  { %4889 = vmatprep.subr.bf16.mxu0 %v5237_v52  ;;  %4910 = vmatpush3.bf16.msra.mxu1 %v5236_v49  ;;  %v612_v49 = vrot.slane %v30_v47, %v5664_v41  ;;  %v5291_v51 = vld [vmem:[%s6746_s1 + $0x208] sm:$0xff]  }
  0x26   :  { %2432 = vmatprep.mubr.bf16.mxu0 %v600_v50  ;;  %4911 = vmatprep.subr.bf16.mxu1 %v5238_v54  ;;  %v605_v50 = vcombine.high %v30_v47, %v30_v47  ;;  %v5292_v52 = vld [vmem:[%s6746_s1 + $0x288] sm:$0xff]  }
  0x27   :  { %2472 = vmatprep.mubr.bf16.mxu1 %v604_v56  ;;  %v620_v53 = vcombine.high %v612_v49, %v612_v49  ;;  %v5294_v56 = vld [vmem:[%s6746_s1 + $0x2c0] sm:$0xff]   ;;  %v5339_v47 = vld [vmem:[%s6746_s1 + $0x4e8] sm:$0xff]  }
  0x28   :  { %4890 = vmatpush3.bf16.msra.mxu0 %v5239_v55  ;;  %v5856_v54 = vrot.slane %v605_v50, %v5664_v41  ;;  %v5293_v55 = vld [vmem:[%s6746_s1 + $0x240] sm:$0xff]  }
  0x29   :  { %4891 = vmatprep.subr.bf16.mxu0 %v5241_v58  ;;  %4912 = vmatpush3.bf16.msra.mxu1 %v5240_v57  ;;  %v642_v57 = vrot.slane %v620_v53, %v5664_v41  ;;  %v5342_v50 = vld [vmem:[%s6746_s1 + $0x460] sm:$0xff]  }
  0x2a   :  { %4913 = vmatprep.subr.bf16.mxu1 %v5242_v59  ;;  %v621_v58 = vcombine.high %v5856_v54, %v5856_v54  ;;  %v5295_v59 = vld [vmem:[%s6746_s1 + $0x200] sm:$0xff]  }
  0x2b   :  { %v5345_v53 = vld [vmem:[%s6746_s1 + $0x4a0] sm:$0xff]  }
  0x2c   :  { %4892 = vmatpush3.bf16.msra.mxu0 %v5243_v60  ;;  %v5296_v60 = vld [vmem:[%s6746_s1 + $0x280] sm:$0xff]  }
  0x2d   :  { %4893 = vmatprep.subr.bf16.mxu0 %v5245_v62  ;;  %4914 = vmatpush3.bf16.msra.mxu1 %v5244_v61  ;;  %v652_v61 = vcombine.high %v642_v57, %v642_v57  ;;  %v628_v62 = vrot.slane %v612_v49, %v5664_v41  ;;  %v5341_v49 = vld [vmem:[%s6746_s1 + $0x4a8] sm:$0xff]  }
  0x2e   :  { %4915 = vmatprep.subr.bf16.mxu1 %v5246_v63  ;;  %v5297_v63 = vld [vmem:[%s6746_s1 + $0x378] sm:$0xff]  }
  0x30   :  { %4894 = vmatpush3.bf16.msra.mxu0 %v5247_v0  ;;  %v5298_v0 = vld [vmem:[%s6746_s1 + $0x3f8] sm:$0xff]  }
  0x31   :  { %4895 = vmatprep.subr.bf16.mxu0 %v5249_v2  ;;  %4916 = vmatpush3.bf16.msra.mxu1 %v5248_v1  ;;  %v649_v1 = vrot.slane %v621_v58, %v5664_v41  ;;  %v5299_v2 = vld [vmem:[%s6746_s1 + $0x338] sm:$0xff]   ;;  %v5350_v58 = vld [vmem:[%s6746_s1 + $0x450] sm:$0xff]  }
  0x32   :  { %4917 = vmatprep.subr.bf16.mxu1 %v5250_v3  ;;  %v5300_v3 = vld [vmem:[%s6746_s1 + $0x3b8] sm:$0xff]  }
  0x34   :  { %4896 = vmatpush3.bf16.msra.mxu0 %v5251_v4  ;;  %v650_v4 = vcombine.high %v628_v62, %v628_v62 }
  0x35   :  { %4897 = vmatprep.subr.bf16.mxu0 %v5253_v6  ;;  %4918 = vmatpush3.bf16.msra.mxu1 %v5252_v5  ;;  %v5301_v5 = vld [vmem:[%s6746_s1 + $0x370] sm:$0xff]  }
  0x36   :  { %4919 = vmatprep.subr.bf16.mxu1 %v5254_v7  ;;  %v5302_v6 = vld [vmem:[%s6746_s1 + $0x3f0] sm:$0xff]   ;;  %v653_v7 = vcombine.high %v649_v1, %v649_v1 }
  0x38   :  { %4898 = vmatpush3.bf16.msra.mxu0 %v5255_v8  ;;  %v5303_v8 = vld [vmem:[%s6746_s1 + $0x330] sm:$0xff]  }
  0x39   :  { %4899 = vmatprep.subr.bf16.mxu0 %v5257_v10  ;;  %4920 = vmatpush3.bf16.msra.mxu1 %v5256_v9  ;;  %v5304_v9 = vld [vmem:[%s6746_s1 + $0x3b0] sm:$0xff]   ;;  %v5305_v10 = vld [vmem:[%s6746_s1 + $0x368] sm:$0xff]  }
  0x3a   :  { %4921 = vmatprep.subr.bf16.mxu1 %v5258_v11  ;;  %v5306_v11 = vld [vmem:[%s6746_s1 + $0x3e8] sm:$0xff]  }
  0x3c   :  { %4900 = vmatpush3.bf16.msra.mxu0 %v5259_v12  ;;  %v5307_v12 = vld [vmem:[%s6746_s1 + $0x328] sm:$0xff]  }
  0x3d   :  { %4901 = vmatprep.subr.bf16.mxu0 %v5261_v14  ;;  %4922 = vmatpush3.bf16.msra.mxu1 %v5260_v13  ;;  %v5308_v13 = vld [vmem:[%s6746_s1 + $0x3a8] sm:$0xff]   ;;  %v5309_v14 = vld [vmem:[%s6746_s1 + $0x360] sm:$0xff]  }
  0x3e   :  { %4923 = vmatprep.subr.bf16.mxu1 %v5262_v15  ;;  %v5310_v15 = vld [vmem:[%s6746_s1 + $0x3e0] sm:$0xff]  }
  0x40   :  { %4902 = vmatpush3.bf16.msra.mxu0 %v5263_v16  ;;  %v5311_v16 = vld [vmem:[%s6746_s1 + $0x320] sm:$0xff]  }
  0x41   :  { %4931 = vmatprep.subr.bf16.mxu0 %v5265_v19  ;;  %4924 = vmatpush3.bf16.msra.mxu1 %v5264_v17  ;;  %v5312_v17 = vld [vmem:[%s6746_s1 + $0x3a0] sm:$0xff]   ;;  %v5314_v19 = vld [vmem:[%s6746_s1 + $0x3d8] sm:$0xff]  }
  0x42   :  { %4953 = vmatprep.subr.bf16.mxu1 %v5266_v20  ;;  %v5315_v20 = vld [vmem:[%s6746_s1 + $0x318] sm:$0xff]  }
  0x43   :  { %2433 = vmatmul.mubr.bf16.vlgmr.msra.gmra.mxu0 %v586_v18  ;;  %v5313_v18 = vld [vmem:[%s6746_s1 + $0x358] sm:$0xff]  }
  0x44   :  { %4932 = vmatpush3.bf16.msra.mxu0 %v5267_v21  ;;  %2473 = vmatmul.mubr.bf16.vlgmr.msra.gmra.mxu1 %v602_v23  ;;  %v5316_v21 = vld [vmem:[%s6746_s1 + $0x398] sm:$0xff]   ;;  %v5318_v23 = vld [vmem:[%s6746_s1 + $0x3d0] sm:$0xff]  }
  0x45   :  { %4933 = vmatprep.subr.bf16.mxu0 %v5269_v24  ;;  %4954 = vmatpush3.bf16.msra.mxu1 %v5268_v22  ;;  %v5317_v22 = vld [vmem:[%s6746_s1 + $0x350] sm:$0xff]  }
  0x46   :  { %4955 = vmatprep.subr.bf16.mxu1 %v5270_v25  ;;  %2512 = vmatprep.mubr.bf16.mxu0 %v642_v57  ;;  %v5319_v24 = vld [vmem:[%s6746_s1 + $0x310] sm:$0xff]   ;;  %v5349_v57 = vld [vmem:[%s6746_s1 + $0x498] sm:$0xff]  }
  0x47   :  { %2552 = vmatprep.mubr.bf16.mxu1 %v652_v61  ;;  %v5320_v25 = vld [vmem:[%s6746_s1 + $0x390] sm:$0xff]  }
  0x48   :  { %4934 = vmatpush3.bf16.msra.mxu0 %v5271_v26  ;;  %v5321_v26 = vld [vmem:[%s6746_s1 + $0x348] sm:$0xff]   ;;  %v5353_v61 = vld [vmem:[%s6746_s1 + $0x490] sm:$0xff]  }
  0x49   :  { %4935 = vmatprep.subr.bf16.mxu0 %v5273_v28  ;;  %4956 = vmatpush3.bf16.msra.mxu1 %v5272_v27  ;;  %v5322_v27 = vld [vmem:[%s6746_s1 + $0x3c8] sm:$0xff]  }
  0x4a   :  { %4957 = vmatprep.subr.bf16.mxu1 %v5274_v29  ;;  %v5323_v28 = vld [vmem:[%s6746_s1 + $0x308] sm:$0xff]  }
  0x4b   :  { %v5324_v29 = vld [vmem:[%s6746_s1 + $0x388] sm:$0xff]  }
  0x4c   :  { %4936 = vmatpush3.bf16.msra.mxu0 %v5275_v30  ;;  %v5325_v30 = vld [vmem:[%s6746_s1 + $0x340] sm:$0xff]  }
  0x4d   :  { %4937 = vmatprep.subr.bf16.mxu0 %v5277_v32  ;;  %4958 = vmatpush3.bf16.msra.mxu1 %v5276_v31  ;;  %v5326_v31 = vld [vmem:[%s6746_s1 + $0x3c0] sm:$0xff]  }
  0x4e   :  { %4959 = vmatprep.subr.bf16.mxu1 %v5278_v34  ;;  %v5327_v32 = vld [vmem:[%s6746_s1 + $0x300] sm:$0xff]  }
  0x4f   :  { %v5328_v34 = vld [vmem:[%s6746_s1 + $0x380] sm:$0xff]  }
  0x50   :  { %4938 = vmatpush3.bf16.msra.mxu0 %v5279_v35  ;;  %v635_v35 = vrot.slane %v5856_v54, %v5664_v41  ;;  %v5346_v54 = vld [vmem:[%s6746_s1 + $0x458] sm:$0xff]  }
  0x51   :  { %4939 = vmatprep.subr.bf16.mxu0 %v5281_v37  ;;  %4960 = vmatpush3.bf16.msra.mxu1 %v5280_v36  ;;  %v5330_v36 = vld [vmem:[%s6746_s1 + $0x478] sm:$0xff]  }
  0x52   :  { %4961 = vmatprep.subr.bf16.mxu1 %v5282_v38  ;;  %v5331_v37 = vld [vmem:[%s6746_s1 + $0x4f8] sm:$0xff]  }
  0x53   :  { %v5332_v38 = vld [vmem:[%s6746_s1 + $0x438] sm:$0xff]  }
  0x54   :  { %4940 = vmatpush3.bf16.msra.mxu0 %v5283_v39  ;;  %v5333_v39 = vld [vmem:[%s6746_s1 + $0x4b8] sm:$0xff]  }
  0x55   :  { %4941 = vmatprep.subr.bf16.mxu0 %v5285_v42  ;;  %4962 = vmatpush3.bf16.msra.mxu1 %v5284_v40  ;;  %v651_v40 = vcombine.high %v635_v35, %v635_v35  ;;  %v5334_v42 = vld [vmem:[%s6746_s1 + $0x470] sm:$0xff]  }
  0x56   :  { %4963 = vmatprep.subr.bf16.mxu1 %v5286_v43  ;;  %v5335_v43 = vld [vmem:[%s6746_s1 + $0x4f0] sm:$0xff]  }
  0x58   :  { %4942 = vmatpush3.bf16.msra.mxu0 %v5287_v44  ;;  %v5336_v44 = vld [vmem:[%s6746_s1 + $0x430] sm:$0xff]  }
  0x59   :  { %4943 = vmatprep.subr.bf16.mxu0 %v5289_v46  ;;  %4964 = vmatpush3.bf16.msra.mxu1 %v5288_v45  ;;  %v5337_v45 = vld [vmem:[%s6746_s1 + $0x4b0] sm:$0xff]   ;;  %v5338_v46 = vld [vmem:[%s6746_s1 + $0x468] sm:$0xff]  }
  0x5a   :  { %4965 = vmatprep.subr.bf16.mxu1 %v5290_v48  ;;  %v5340_v48 = vld [vmem:[%s6746_s1 + $0x428] sm:$0xff]  }
  0x5c   :  { %4944 = vmatpush3.bf16.msra.mxu0 %v5291_v51  ;;  %v5343_v51 = vld [vmem:[%s6746_s1 + $0x4e0] sm:$0xff]  }
  0x5d   :  { %4945 = vmatprep.subr.bf16.mxu0 %v5293_v55  ;;  %4966 = vmatpush3.bf16.msra.mxu1 %v5292_v52  ;;  %v5344_v52 = vld [vmem:[%s6746_s1 + $0x420] sm:$0xff]   ;;  %v5347_v55 = vld [vmem:[%s6746_s1 + $0x4d8] sm:$0xff]  }
  0x5e   :  { %4967 = vmatprep.subr.bf16.mxu1 %v5294_v56  ;;  %v5348_v56 = vld [vmem:[%s6746_s1 + $0x418] sm:$0xff]  }
  0x60   :  { %4946 = vmatpush3.bf16.msra.mxu0 %v5295_v59  ;;  %v5351_v59 = vld [vmem:[%s6746_s1 + $0x4d0] sm:$0xff]  }
  0x61   :  { %4975 = vmatprep.subr.bf16.mxu0 %v5297_v63  ;;  %4968 = vmatpush3.bf16.msra.mxu1 %v5296_v60  ;;  %v5352_v60 = vld [vmem:[%s6746_s1 + $0x410] sm:$0xff]  }
  0x62   :  { %4997 = vmatprep.subr.bf16.mxu1 %v5298_v0  ;;  %v31_v63 = vld [vmem:[%s6745_s0 + $0x10] sm:$0xff]  ;;  %v5355_v0 = vld [vmem:[%s6746_s1 + $0x4c8] sm:$0xff]  }
  0x63   :  { %2513 = vmatmul.mubr.bf16.vlgmr.msra.gmra.mxu0 %v628_v62  ;;  %v5354_v62 = vld [vmem:[%s6746_s1 + $0x448] sm:$0xff]  }
  0x64   :  { %4976 = vmatpush3.bf16.msra.mxu0 %v5299_v2  ;;  %2592 = vmatprep.mubr.bf16.mxu0 %v649_v1  ;;  %v661_v1 = vrot.slane %v31_v63, %v5664_v41  ;;  %v654_v2 = vcombine.high %v31_v63, %v31_v63  ;;  %v5404_v63 = vld [vmem:[%s6746_s1 + $0x6e8] sm:$0xff]  }
  0x65   :  { %2553 = vmatmul.mubr.bf16.vlgmr.msra.gmra.mxu1 %v650_v4  ;;  %4977 = vmatprep.subr.bf16.mxu0 %v5301_v5  ;;  %v5357_v4 = vld [vmem:[%s6746_s1 + $0x488] sm:$0xff]  }
  0x66   :  { %4998 = vmatpush3.bf16.msra.mxu1 %v5300_v3  ;;  %2632 = vmatprep.mubr.bf16.mxu1 %v653_v7  ;;  %v5356_v3 = vld [vmem:[%s6746_s1 + $0x408] sm:$0xff]   ;;  %v669_v5 = vcombine.high %v661_v1, %v661_v1  ;;  %v5358_v7 = vld [vmem:[%s6746_s1 + $0x440] sm:$0xff]  }
  0x67   :  { %4999 = vmatprep.subr.bf16.mxu1 %v5302_v6  ;;  %v6062_v6 = vrot.slane %v654_v2, %v5664_v41  ;;  %v5407_v2 = vld [vmem:[%s6746_s1 + $0x660] sm:$0xff]  }
  0x68   :  { %4978 = vmatpush3.bf16.msra.mxu0 %v5303_v8  ;;  %v5359_v8 = vld [vmem:[%s6746_s1 + $0x4c0] sm:$0xff]  }
  0x69   :  { %4979 = vmatprep.subr.bf16.mxu0 %v5305_v10  ;;  %v670_v10 = vcombine.high %v6062_v6, %v6062_v6 }
  0x6a   :  { %5000 = vmatpush3.bf16.msra.mxu1 %v5304_v9  ;;  %v691_v9 = vrot.slane %v669_v5, %v5664_v41  ;;  %v5410_v5 = vld [vmem:[%s6746_s1 + $0x6a0] sm:$0xff]  }
  0x6b   :  { %5001 = vmatprep.subr.bf16.mxu1 %v5306_v11  ;;  %v5360_v11 = vld [vmem:[%s6746_s1 + $0x400] sm:$0xff]  }
  0x6c   :  { %4980 = vmatpush3.bf16.msra.mxu0 %v5307_v12  ;;  %v5361_v12 = vld [vmem:[%s6746_s1 + $0x480] sm:$0xff]  }
  0x6d   :  { %4981 = vmatprep.subr.bf16.mxu0 %v5309_v14  ;;  %v677_v14 = vrot.slane %v661_v1, %v5664_v41  ;;  %v5406_v1 = vld [vmem:[%s6746_s1 + $0x6a8] sm:$0xff]  }
  0x6e   :  { %5002 = vmatpush3.bf16.msra.mxu1 %v5308_v13  ;;  %v701_v13 = vcombine.high %v691_v9, %v691_v9 }
  0x6f   :  { %5003 = vmatprep.subr.bf16.mxu1 %v5310_v15  ;;  %v5362_v15 = vld [vmem:[%s6746_s1 + $0x578] sm:$0xff]  }
  0x70   :  { %4982 = vmatpush3.bf16.msra.mxu0 %v5311_v16  ;;  %v5363_v16 = vld [vmem:[%s6746_s1 + $0x5f8] sm:$0xff]  }
  0x71   :  { %4983 = vmatprep.subr.bf16.mxu0 %v5313_v18  ;;  %v5364_v18 = vld [vmem:[%s6746_s1 + $0x538] sm:$0xff]  }
  0x72   :  { %5004 = vmatpush3.bf16.msra.mxu1 %v5312_v17  ;;  %v698_v17 = vrot.slane %v670_v10, %v5664_v41  ;;  %v5415_v10 = vld [vmem:[%s6746_s1 + $0x650] sm:$0xff]  }
  0x73   :  { %5005 = vmatprep.subr.bf16.mxu1 %v5314_v19  ;;  %v5365_v19 = vld [vmem:[%s6746_s1 + $0x5b8] sm:$0xff]  }
  0x74   :  { %4984 = vmatpush3.bf16.msra.mxu0 %v5315_v20  ;;  %v699_v20 = vcombine.high %v677_v14, %v677_v14 }
  0x75   :  { %4985 = vmatprep.subr.bf16.mxu0 %v5317_v22  ;;  %v5367_v22 = vld [vmem:[%s6746_s1 + $0x5f0] sm:$0xff]  }
  0x76   :  { %5006 = vmatpush3.bf16.msra.mxu1 %v5316_v21  ;;  %v5366_v21 = vld [vmem:[%s6746_s1 + $0x570] sm:$0xff]  }
  0x77   :  { %5007 = vmatprep.subr.bf16.mxu1 %v5318_v23  ;;  %v702_v23 = vcombine.high %v698_v17, %v698_v17 }
  0x78   :  { %4986 = vmatpush3.bf16.msra.mxu0 %v5319_v24  ;;  %v5368_v24 = vld [vmem:[%s6746_s1 + $0x530] sm:$0xff]  }
  0x79   :  { %4987 = vmatprep.subr.bf16.mxu0 %v5321_v26  ;;  %v5370_v26 = vld [vmem:[%s6746_s1 + $0x568] sm:$0xff]  }
  0x7a   :  { %5008 = vmatpush3.bf16.msra.mxu1 %v5320_v25  ;;  %v5369_v25 = vld [vmem:[%s6746_s1 + $0x5b0] sm:$0xff]  }
  0x7b   :  { %5009 = vmatprep.subr.bf16.mxu1 %v5322_v27  ;;  %v5371_v27 = vld [vmem:[%s6746_s1 + $0x5e8] sm:$0xff]  }
  0x7c   :  { %4988 = vmatpush3.bf16.msra.mxu0 %v5323_v28  ;;  %v5372_v28 = vld [vmem:[%s6746_s1 + $0x528] sm:$0xff]  }
  0x7d   :  { %4989 = vmatprep.subr.bf16.mxu0 %v5325_v30  ;;  %v5374_v30 = vld [vmem:[%s6746_s1 + $0x560] sm:$0xff]  }
  0x7e   :  { %5010 = vmatpush3.bf16.msra.mxu1 %v5324_v29  ;;  %v5373_v29 = vld [vmem:[%s6746_s1 + $0x5a8] sm:$0xff]  }
  0x7f   :  { %5011 = vmatprep.subr.bf16.mxu1 %v5326_v31  ;;  %v5375_v31 = vld [vmem:[%s6746_s1 + $0x5e0] sm:$0xff]  }
  0x80   :  { %4990 = vmatpush3.bf16.msra.mxu0 %v5327_v32  ;;  %v5376_v32 = vld [vmem:[%s6746_s1 + $0x520] sm:$0xff]  }
  0x81   :  { %5019 = vmatprep.subr.bf16.mxu0 %v5330_v36  ;;  %v5379_v36 = vld [vmem:[%s6746_s1 + $0x5d8] sm:$0xff]  }
  0x82   :  { %5012 = vmatpush3.bf16.msra.mxu1 %v5328_v34  ;;  %v5377_v34 = vld [vmem:[%s6746_s1 + $0x5a0] sm:$0xff]  }
  0x83   :  { %2593 = vmatmul.mubr.bf16.vlgmr.msra.gmra.mxu0 %v635_v35  ;;  %5041 = vmatprep.subr.bf16.mxu1 %v5331_v37  ;;  %v5378_v35 = vld [vmem:[%s6746_s1 + $0x558] sm:$0xff]  }
  0x84   :  { %5020 = vmatpush3.bf16.msra.mxu0 %v5332_v38  ;;  %2672 = vmatprep.mubr.bf16.mxu0 %v691_v9  ;;  %v5380_v37 = vld [vmem:[%s6746_s1 + $0x518] sm:$0xff]  }
  0x85   :  { %2633 = vmatmul.mubr.bf16.vlgmr.msra.gmra.mxu1 %v651_v40  ;;  %5021 = vmatprep.subr.bf16.mxu0 %v5334_v42  ;;  %v5381_v38 = vld [vmem:[%s6746_s1 + $0x598] sm:$0xff]   ;;  %v5383_v40 = vld [vmem:[%s6746_s1 + $0x5d0] sm:$0xff]  }
  0x86   :  { %5042 = vmatpush3.bf16.msra.mxu1 %v5333_v39  ;;  %2712 = vmatprep.mubr.bf16.mxu1 %v701_v13  ;;  %v5382_v39 = vld [vmem:[%s6746_s1 + $0x550] sm:$0xff]   ;;  %v5414_v9 = vld [vmem:[%s6746_s1 + $0x698] sm:$0xff]  }
  0x87   :  { %5043 = vmatprep.subr.bf16.mxu1 %v5335_v43  ;;  %v5384_v42 = vld [vmem:[%s6746_s1 + $0x510] sm:$0xff]  }
  0x88   :  { %5022 = vmatpush3.bf16.msra.mxu0 %v5336_v44  ;;  %v5385_v43 = vld [vmem:[%s6746_s1 + $0x590] sm:$0xff]   ;;  %v5386_v44 = vld [vmem:[%s6746_s1 + $0x548] sm:$0xff]  }
  0x89   :  { %5023 = vmatprep.subr.bf16.mxu0 %v5338_v46  ;;  %v5388_v46 = vld [vmem:[%s6746_s1 + $0x508] sm:$0xff]   ;;  %v5418_v13 = vld [vmem:[%s6746_s1 + $0x690] sm:$0xff]  }
  0x8a   :  { %5044 = vmatpush3.bf16.msra.mxu1 %v5337_v45  ;;  %v5387_v45 = vld [vmem:[%s6746_s1 + $0x5c8] sm:$0xff]  }
  0x8b   :  { %5045 = vmatprep.subr.bf16.mxu1 %v5339_v47  ;;  %v5389_v47 = vld [vmem:[%s6746_s1 + $0x588] sm:$0xff]  }
  0x8c   :  { %5024 = vmatpush3.bf16.msra.mxu0 %v5340_v48  ;;  %v5390_v48 = vld [vmem:[%s6746_s1 + $0x540] sm:$0xff]  }
  0x8d   :  { %5025 = vmatprep.subr.bf16.mxu0 %v5342_v50  ;;  %v5392_v50 = vld [vmem:[%s6746_s1 + $0x500] sm:$0xff]  }
  0x8e   :  { %5046 = vmatpush3.bf16.msra.mxu1 %v5341_v49  ;;  %v5391_v49 = vld [vmem:[%s6746_s1 + $0x5c0] sm:$0xff]  }
  0x8f   :  { %5047 = vmatprep.subr.bf16.mxu1 %v5343_v51  ;;  %v5393_v51 = vld [vmem:[%s6746_s1 + $0x580] sm:$0xff]  }
  0x90   :  { %5026 = vmatpush3.bf16.msra.mxu0 %v5344_v52  ;;  %v684_v52 = vrot.slane %v6062_v6, %v5664_v41  ;;  %v5411_v6 = vld [vmem:[%s6746_s1 + $0x658] sm:$0xff]  }
  0x91   :  { %5027 = vmatprep.subr.bf16.mxu0 %v5346_v54  ;;  %v5396_v54 = vld [vmem:[%s6746_s1 + $0x6f8] sm:$0xff]  }
  0x92   :  { %5048 = vmatpush3.bf16.msra.mxu1 %v5345_v53  ;;  %v5395_v53 = vld [vmem:[%s6746_s1 + $0x678] sm:$0xff]  }
  0x93   :  { %5049 = vmatprep.subr.bf16.mxu1 %v5347_v55  ;;  %v5397_v55 = vld [vmem:[%s6746_s1 + $0x638] sm:$0xff]  }
  0x94   :  { %5028 = vmatpush3.bf16.msra.mxu0 %v5348_v56  ;;  %v5398_v56 = vld [vmem:[%s6746_s1 + $0x6b8] sm:$0xff]  }
  0x95   :  { %5029 = vmatprep.subr.bf16.mxu0 %v5350_v58  ;;  %v5399_v58 = vld [vmem:[%s6746_s1 + $0x670] sm:$0xff]  }
  0x96   :  { %5050 = vmatpush3.bf16.msra.mxu1 %v5349_v57  ;;  %v700_v57 = vcombine.high %v684_v52, %v684_v52 }
  0x97   :  { %5051 = vmatprep.subr.bf16.mxu1 %v5351_v59  ;;  %v5400_v59 = vld [vmem:[%s6746_s1 + $0x6f0] sm:$0xff]  }
  0x98   :  { %5030 = vmatpush3.bf16.msra.mxu0 %v5352_v60  ;;  %v5401_v60 = vld [vmem:[%s6746_s1 + $0x630] sm:$0xff]  }
  0x99   :  { %5031 = vmatprep.subr.bf16.mxu0 %v5354_v62  ;;  %v5403_v62 = vld [vmem:[%s6746_s1 + $0x668] sm:$0xff]  }
  0x9a   :  { %5052 = vmatpush3.bf16.msra.mxu1 %v5353_v61  ;;  %v5402_v61 = vld [vmem:[%s6746_s1 + $0x6b0] sm:$0xff]  }
  0x9b   :  { %5053 = vmatprep.subr.bf16.mxu1 %v5355_v0  ;;  %v5405_v0 = vld [vmem:[%s6746_s1 + $0x628] sm:$0xff]  }
  0x9c   :  { %5032 = vmatpush3.bf16.msra.mxu0 %v5356_v3  ;;  %v5408_v3 = vld [vmem:[%s6746_s1 + $0x6e0] sm:$0xff]  }
  0x9d   :  { %5033 = vmatprep.subr.bf16.mxu0 %v5358_v7  ;;  %v5412_v7 = vld [vmem:[%s6746_s1 + $0x6d8] sm:$0xff]  }
  0x9e   :  { %5054 = vmatpush3.bf16.msra.mxu1 %v5357_v4  ;;  %v5409_v4 = vld [vmem:[%s6746_s1 + $0x620] sm:$0xff]  }
  0x9f   :  { %5055 = vmatprep.subr.bf16.mxu1 %v5359_v8  ;;  %v5413_v8 = vld [vmem:[%s6746_s1 + $0x618] sm:$0xff]  }
  0xa0   :  { %5034 = vmatpush3.bf16.msra.mxu0 %v5360_v11  ;;  %v5416_v11 = vld [vmem:[%s6746_s1 + $0x6d0] sm:$0xff]  }
  0xa1   :  { %5063 = vmatprep.subr.bf16.mxu0 %v5362_v15  ;;  %v32_v15 = vld [vmem:[%s6745_s0 + $0x18] sm:$0xff] }
  0xa2   :  { %5056 = vmatpush3.bf16.msra.mxu1 %v5361_v12  ;;  %v5417_v12 = vld [vmem:[%s6746_s1 + $0x610] sm:$0xff]  }
  0xa3   :  { %2673 = vmatmul.mubr.bf16.vlgmr.msra.gmra.mxu0 %v677_v14  ;;  %5085 = vmatprep.subr.bf16.mxu1 %v5363_v16  ;;  %v5419_v14 = vld [vmem:[%s6746_s1 + $0x648] sm:$0xff]  }
  0xa4   :  { %5064 = vmatpush3.bf16.msra.mxu0 %v5364_v18  ;;  %2752 = vmatprep.mubr.bf16.mxu0 %v698_v17  ;;  %v5420_v16 = vld [vmem:[%s6746_s1 + $0x6c8] sm:$0xff]   ;;  %v710_v17 = vrot.slane %v32_v15, %v5664_v41  ;;  %v703_v18 = vcombine.high %v32_v15, %v32_v15 }
  0xa5   :  { %2713 = vmatmul.mubr.bf16.vlgmr.msra.gmra.mxu1 %v699_v20  ;;  %5065 = vmatprep.subr.bf16.mxu0 %v5366_v21  ;;  %v5423_v20 = vld [vmem:[%s6746_s1 + $0x640] sm:$0xff]  }
  0xa6   :  { %5086 = vmatpush3.bf16.msra.mxu1 %v5365_v19  ;;  %2792 = vmatprep.mubr.bf16.mxu1 %v702_v23  ;;  %v5421_v19 = vld [vmem:[%s6746_s1 + $0x608] sm:$0xff]   ;;  %v718_v21 = vcombine.high %v710_v17, %v710_v17 }
  0xa7   :  { %5087 = vmatprep.subr.bf16.mxu1 %v5367_v22  ;;  %v6268_v22 = vrot.slane %v703_v18, %v5664_v41  ;;  %v5422_v23 = vld [vmem:[%s6746_s1 + $0x688] sm:$0xff]  }
  0xa8   :  { %5066 = vmatpush3.bf16.msra.mxu0 %v5368_v24  ;;  %v5424_v24 = vld [vmem:[%s6746_s1 + $0x6c0] sm:$0xff]  }
  0xa9   :  { %5067 = vmatprep.subr.bf16.mxu0 %v5370_v26  ;;  %v719_v26 = vcombine.high %v6268_v22, %v6268_v22 }
  0xaa   :  { %5088 = vmatpush3.bf16.msra.mxu1 %v5369_v25  ;;  %v740_v25 = vrot.slane %v718_v21, %v5664_v41 }
  0xab   :  { %5089 = vmatprep.subr.bf16.mxu1 %v5371_v27  ;;  %v5425_v27 = vld [vmem:[%s6746_s1 + $0x600] sm:$0xff]  }
  0xac   :  { %5068 = vmatpush3.bf16.msra.mxu0 %v5372_v28  ;;  %v750_v28 = vcombine.high %v740_v25, %v740_v25 }
  0xad   :  { %5069 = vmatprep.subr.bf16.mxu0 %v5374_v30  ;;  %v5427_v30 = vld [vmem:[%s6746_s1 + $0x778] sm:$0xff]  }
  0xae   :  { %5090 = vmatpush3.bf16.msra.mxu1 %v5373_v29  ;;  %v726_v29 = vrot.slane %v710_v17, %v5664_v41 }
  0xaf   :  { %5091 = vmatprep.subr.bf16.mxu1 %v5375_v31  ;;  %v5426_v31 = vld [vmem:[%s6746_s1 + $0x680] sm:$0xff]  }
  0xb0   :  { %5070 = vmatpush3.bf16.msra.mxu0 %v5376_v32  ;;  %v747_v32 = vrot.slane %v719_v26, %v5664_v41 }
  0xb1   :  { %5071 = vmatprep.subr.bf16.mxu0 %v5378_v35  ;;  %v5429_v35 = vld [vmem:[%s6746_s1 + $0x738] sm:$0xff]  }
  0xb2   :  { %5092 = vmatpush3.bf16.msra.mxu1 %v5377_v34  ;;  %v5428_v34 = vld [vmem:[%s6746_s1 + $0x7f8] sm:$0xff]  }
  0xb3   :  { %5093 = vmatprep.subr.bf16.mxu1 %v5379_v36  ;;  %v748_v36 = vcombine.high %v726_v29, %v726_v29 }
  0xb4   :  { %5072 = vmatpush3.bf16.msra.mxu0 %v5380_v37  ;;  %v5431_v37 = vld [vmem:[%s6746_s1 + $0x770] sm:$0xff]  }
  0xb5   :  { %5073 = vmatprep.subr.bf16.mxu0 %v5382_v39  ;;  %v751_v39 = vcombine.high %v747_v32, %v747_v32 }
  0xb6   :  { %5094 = vmatpush3.bf16.msra.mxu1 %v5381_v38  ;;  %v5430_v38 = vld [vmem:[%s6746_s1 + $0x7b8] sm:$0xff]  }
  0xb7   :  { %5095 = vmatprep.subr.bf16.mxu1 %v5383_v40 }
  0xb8   :  { %5074 = vmatpush3.bf16.msra.mxu0 %v5384_v42  ;;  %v4490_v42 = vld [vmem:[%s6747_s2] ss:$0 sm:$0xff] }
  0xb9   :  { %5075 = vmatprep.subr.bf16.mxu0 %v5386_v44  ;;  %v5433_v44 = vld [vmem:[%s6746_s1 + $0x730] sm:$0xff]  }
  0xba   :  { %5096 = vmatpush3.bf16.msra.mxu1 %v5385_v43  ;;  %v5432_v43 = vld [vmem:[%s6746_s1 + $0x7f0] sm:$0xff]  }
  0xbb   :  { %5097 = vmatprep.subr.bf16.mxu1 %v5387_v45 }
  0xbc   :  { %5076 = vmatpush3.bf16.msra.mxu0 %v5388_v46 }
  0xbd   :  { %5077 = vmatprep.subr.bf16.mxu0 %v5390_v48 }
  0xbe   :  { %5098 = vmatpush3.bf16.msra.mxu1 %v5389_v47  ;;  %v5435_v47 = vld [vmem:[%s6746_s1 + $0x768] sm:$0xff]  }
  0xbf   :  { %5099 = vmatprep.subr.bf16.mxu1 %v5391_v49  ;;  %v5434_v49 = vld [vmem:[%s6746_s1 + $0x7b0] sm:$0xff]  }
  0xc0   :  { %5078 = vmatpush3.bf16.msra.mxu0 %v5392_v50 }
  0xc1   :  { %5107 = vmatprep.subr.bf16.mxu0 %v5395_v53 }
  0xc2   :  { %5100 = vmatpush3.bf16.msra.mxu1 %v5393_v51 }
  0xc3   :  { %2753 = vmatmul.mubr.bf16.vlgmr.msra.gmra.mxu0 %v684_v52  ;;  %5129 = vmatprep.subr.bf16.mxu1 %v5396_v54  ;;  %v5436_v52 = vld [vmem:[%s6746_s1 + $0x7e8] sm:$0xff]  }
  0xc4   :  { %5108 = vmatpush3.bf16.msra.mxu0 %v5397_v55  ;;  %2832 = vmatprep.mubr.bf16.mxu0 %v740_v25  ;;  %v5437_v55 = vld [vmem:[%s6746_s1 + $0x728] sm:$0xff]  }
  0xc5   :  { %2793 = vmatmul.mubr.bf16.vlgmr.msra.gmra.mxu1 %v700_v57  ;;  %5109 = vmatprep.subr.bf16.mxu0 %v5399_v58  ;;  %v5439_v58 = vld [vmem:[%s6746_s1 + $0x760] sm:$0xff]  }
  0xc6   :  { %5130 = vmatpush3.bf16.msra.mxu1 %v5398_v56  ;;  %2872 = vmatprep.mubr.bf16.mxu1 %v750_v28 }
  0xc7   :  { %5131 = vmatprep.subr.bf16.mxu1 %v5400_v59 }
  0xc8   :  { %5110 = vmatpush3.bf16.msra.mxu0 %v5401_v60  ;;  %v5438_v60 = vld [vmem:[%s6746_s1 + $0x7a8] sm:$0xff]  }
  0xc9   :  { %5111 = vmatprep.subr.bf16.mxu0 %v5403_v62  ;;  %v5440_v62 = vld [vmem:[%s6746_s1 + $0x7e0] sm:$0xff]  }
  0xca   :  { %5132 = vmatpush3.bf16.msra.mxu1 %v5402_v61 }
  0xcb   :  { %5133 = vmatprep.subr.bf16.mxu1 %v5404_v63  ;;  %v5441_v63 = vld [vmem:[%s6746_s1 + $0x720] sm:$0xff]  }
  0xcc   :  { %5112 = vmatpush3.bf16.msra.mxu0 %v5405_v0  ;;  %v5443_v0 = vld [vmem:[%s6746_s1 + $0x758] sm:$0xff]  }
  0xcd   :  { %5113 = vmatprep.subr.bf16.mxu0 %v5407_v2  ;;  %v5444_v2 = vld [vmem:[%s6746_s1 + $0x7d8] sm:$0xff]  }
  0xce   :  { %5134 = vmatpush3.bf16.msra.mxu1 %v5406_v1  ;;  %v5442_v1 = vld [vmem:[%s6746_s1 + $0x7a0] sm:$0xff]  }
  0xcf   :  { %5135 = vmatprep.subr.bf16.mxu1 %v5408_v3  ;;  %v5445_v3 = vld [vmem:[%s6746_s1 + $0x718] sm:$0xff]  }
  0xd0   :  { %5114 = vmatpush3.bf16.msra.mxu0 %v5409_v4  ;;  %v5447_v4 = vld [vmem:[%s6746_s1 + $0x750] sm:$0xff]  }
  0xd1   :  { %5115 = vmatprep.subr.bf16.mxu0 %v5411_v6  ;;  %v5448_v6 = vld [vmem:[%s6746_s1 + $0x7d0] sm:$0xff]  }
  0xd2   :  { %5136 = vmatpush3.bf16.msra.mxu1 %v5410_v5  ;;  %v5446_v5 = vld [vmem:[%s6746_s1 + $0x798] sm:$0xff]  }
  0xd3   :  { %5137 = vmatprep.subr.bf16.mxu1 %v5412_v7  ;;  %v5449_v7 = vld [vmem:[%s6746_s1 + $0x710] sm:$0xff]  }
  0xd4   :  { %5116 = vmatpush3.bf16.msra.mxu0 %v5413_v8  ;;  %v5451_v8 = vld [vmem:[%s6746_s1 + $0x748] sm:$0xff]  }
  0xd5   :  { %5117 = vmatprep.subr.bf16.mxu0 %v5415_v10 }
  0xd6   :  { %5138 = vmatpush3.bf16.msra.mxu1 %v5414_v9  ;;  %v5450_v9 = vld [vmem:[%s6746_s1 + $0x790] sm:$0xff]  }
  0xd7   :  { %5139 = vmatprep.subr.bf16.mxu1 %v5416_v11 }
  0xd8   :  { %5118 = vmatpush3.bf16.msra.mxu0 %v5417_v12 }
  0xd9   :  { %5119 = vmatprep.subr.bf16.mxu0 %v5419_v14 }
  0xda   :  { %5140 = vmatpush3.bf16.msra.mxu1 %v5418_v13 }
  0xdb   :  { %5141 = vmatprep.subr.bf16.mxu1 %v5420_v16 }
  0xdc   :  { %5120 = vmatpush3.bf16.msra.mxu0 %v5421_v19 }
  0xdd   :  { %5121 = vmatprep.subr.bf16.mxu0 %v5423_v20 }
  0xde   :  { %5142 = vmatpush3.bf16.msra.mxu1 %v5422_v23 }
  0xdf   :  { %5143 = vmatprep.subr.bf16.mxu1 %v5424_v24 }
  0xe0   :  { %5122 = vmatpush3.bf16.msra.mxu0 %v5425_v27 }
  0xe1   :  { %5151 = vmatprep.subr.bf16.mxu0 %v5427_v30 }
  0xe2   :  { %5144 = vmatpush3.bf16.msra.mxu1 %v5426_v31 }
  0xe3   :  { %v4859_v40 = vpop.f32.mrf.mxu0  ;;  %2833 = vmatmul.mubr.bf16.vlgmr.msra.gmra.mxu0 %v726_v29  ;;  %5173 = vmatprep.subr.bf16.mxu1 %v5428_v34 }
  0xe4   :  { %5152 = vmatpush3.bf16.msra.mxu0 %v5429_v35  ;;  %2912 = vmatprep.mubr.bf16.mxu0 %v747_v32  ;;  %v4881_v45 = vpop.f32.mrf.mxu1 }
  0xe5   :  { %2873 = vmatmul.mubr.bf16.vlgmr.msra.gmra.mxu1 %v748_v36  ;;  %v4860_v46 = vpop.f32.mrf.mxu0  ;;  %5153 = vmatprep.subr.bf16.mxu0 %v5431_v37 }
  0xe6   :  { %5174 = vmatpush3.bf16.msra.mxu1 %v5430_v38  ;;  %v4861_v48 = vadd.f32 %v4860_v46, %v4859_v40  ;;  %2952 = vmatprep.mubr.bf16.mxu1 %v751_v39  ;;  %v4882_v50 = vpop.f32.mrf.mxu1 }
  0xe7   :  { %v4862_v51 = vpop.f32.mrf.mxu0  ;;  %5175 = vmatprep.subr.bf16.mxu1 %v5432_v43  ;;  %v4883_v54 = vadd.f32 %v4882_v50, %v4881_v45 }
  0xe8   :  { %v2355_v53 = vadd.f32 %v4861_v48, %v4490_v42  ;;  %5154 = vmatpush3.bf16.msra.mxu0 %v5433_v44  ;;  %v4884_v56 = vpop.f32.mrf.mxu1 }
  0xe9   :  { %v4863_v57 = vpop.f32.mrf.mxu0  ;;  %5155 = vmatprep.subr.bf16.mxu0 %v5435_v47 }
  0xea   :  { %v2395_v59 = vadd.f32 %v4883_v54, %v2355_v53  ;;  %5176 = vmatpush3.bf16.msra.mxu1 %v5434_v49  ;;  %v4885_v61 = vpop.f32.mrf.mxu1 }
  0xeb   :  { %5177 = vmatprep.subr.bf16.mxu1 %v5436_v52 }
  0xec   :  { %5156 = vmatpush3.bf16.msra.mxu0 %v5437_v55 }
  0xed   :  { %5157 = vmatprep.subr.bf16.mxu0 %v5439_v58 }
  0xee   :  { %5178 = vmatpush3.bf16.msra.mxu1 %v5438_v60 }
  0xef   :  { %5179 = vmatprep.subr.bf16.mxu1 %v5440_v62 }
  0xf0   :  { %5158 = vmatpush3.bf16.msra.mxu0 %v5441_v63 }
  0xf1   :  { %5159 = vmatprep.subr.bf16.mxu0 %v5443_v0 }
  0xf2   :  { %5180 = vmatpush3.bf16.msra.mxu1 %v5442_v1 }
  0xf3   :  { %5181 = vmatprep.subr.bf16.mxu1 %v5444_v2 }
  0xf4   :  { %5160 = vmatpush3.bf16.msra.mxu0 %v5445_v3 }
  0xf5   :  { %5161 = vmatprep.subr.bf16.mxu0 %v5447_v4 }
  0xf6   :  { %5182 = vmatpush3.bf16.msra.mxu1 %v5446_v5 }
  0xf7   :  { %15 = vsyncpa [#allocation5], 0  ;;  %5183 = vmatprep.subr.bf16.mxu1 %v5448_v6  ;;  %v5452_v10 = vld [vmem:[%s6746_s1 + $0x7c8] sm:$0xff]   ;;  %v5455_v12 = vld [vmem:[%s6746_s1 + $0x740] sm:$0xff]   ;;  %v733_v16 = vrot.slane %v6268_v22, %v5664_v41  ;;  %vm4183_vm0 = vcmask 254976   ;;  %s5508_s14 = smov 96  }
  0xf8   :  { %5162 = vmatpush3.bf16.msra.mxu0 %v5449_v7  ;;  %v5453_v11 = vld [vmem:[%s6746_s1 + $0x708] sm:$0xff]   ;;  %v5456_v14 = vld [vmem:[%s6746_s1 + $0x7c0] sm:$0xff]   ;;  %vm3523_vm1 = vcmask 261120   ;;  %s5510_s16 = smov [#allocation4]  }
  0xf9   :  { %5163 = vmatprep.subr.bf16.mxu0 %v5451_v8  ;;  %v5454_v13 = vld [vmem:[%s6746_s1 + $0x788] sm:$0xff]   ;;  %v5457_v15 = vld [vmem:[%s6746_s1 + $0x700] sm:$0xff]   ;;  %v749_v18 = vcombine.high %v733_v16, %v733_v16  ;;  %s4474_s17 = sshll.u32 %s5510_s16, 4  ;;  %s4475_s17 = int_to_ptr.vmem [resolvable:$true] %s4474_s17 }
  0xfa   :  { %5184 = vmatpush3.bf16.msra.mxu1 %v5450_v9  ;;  %v5458_v17 = vld [vmem:[%s6746_s1 + $0x780] sm:$0xff]   ;;  %v3020_v63 = vld [vmem:[%s6749_s4 + $0x188] sm:$0xff] }
  0xfb   :  { %5185 = vmatprep.subr.bf16.mxu1 %v5452_v10  ;;  %v3003_v57 = vld [vmem:[%s6749_s4 + $0x100] sm:$0xff] }
  0xfc   :  { %5164 = vmatpush3.bf16.msra.mxu0 %v5453_v11  ;;  %v3019_v58 = vld [vmem:[%s6749_s4 + $0x180] sm:$0xff] }
  0xfd   :  { %5165 = vmatprep.subr.bf16.mxu0 %v5455_v12  ;;  %v4779_v61 = vcombine.low %v3003_v57, %v3019_v58  ;;  %v4780_v62 = vcombine.high %v3003_v57, %v3019_v58  ;;  %v2988_v57 = vld [vmem:[%s6749_s4 + $0x88] sm:$0xff] }
  0xfe   :  { %5186 = vmatpush3.bf16.msra.mxu1 %v5454_v13 }
  0xff   :  { %5187 = vmatprep.subr.bf16.mxu1 %v5456_v14 }
 0x100   :  { %5166 = vmatpush3.bf16.msra.mxu0 %v5457_v15 }
 0x101   :  { %3539 = vmatprep.subr.bf16.mxu0 %v4780_v62  ;;  %v3021_v62 = vld [vmem:[%s6749_s4 + $0x190] sm:$0xff] }
 0x102   :  { %5188 = vmatpush3.bf16.msra.mxu1 %v5458_v17 }
 0x103   :  { %v4903_v19 = vpop.f32.mrf.mxu0  ;;  %2913 = vmatmul.mubr.bf16.vlgmr.msra.gmra.mxu0 %v733_v16 }
 0x104   :  { %v4925_v20 = vpop.f32.mrf.mxu1  ;;  %3540 = vmatpush1.bf16.msra.mxu0 %v4779_v61  ;;  %v3005_v61 = vld [vmem:[%s6749_s4 + $0x110] sm:$0xff] }
 0x105   :  { %2953 = vmatmul.mubr.bf16.vlgmr.msra.gmra.mxu1 %v749_v18  ;;  %v4904_v21 = vpop.f32.mrf.mxu0 }
 0x106   :  { %v4905_v23 = vadd.f32 %v4904_v21, %v4903_v19  ;;  %v4926_v24 = vpop.f32.mrf.mxu1 }
 0x107   :  { %v4906_v25 = vpop.f32.mrf.mxu0  ;;  %v4927_v27 = vadd.f32 %v4926_v24, %v4925_v20 }
 0x108   :  { %v2435_v26 = vadd.f32 %v4905_v23, %v2395_v59  ;;  %v4928_v22 = vpop.f32.mrf.mxu1  ;;  %v3004_v59 = vld [vmem:[%s6749_s4 + $0x108] sm:$0xff] }
 0x109   :  { %v4907_v28 = vpop.f32.mrf.mxu0  ;;  %v4781_v0 = vcombine.low %v3004_v59, %v3020_v63  ;;  %v4782_v1 = vcombine.high %v3004_v59, %v3020_v63  ;;  %v3006_v63 = vld [vmem:[%s6749_s4 + $0x118] sm:$0xff] }
 0x10a   :  { %v2475_v29 = vadd.f32 %v4927_v27, %v2435_v26  ;;  %v4929_v30 = vpop.f32.mrf.mxu1 }
 0x10b   :  { %3580 = vmatprep.subr.bf16.mxu1 %v4782_v1  ;;  %v4784_v1 = vcombine.high %v3005_v61, %v3021_v62 }
 0x10c   :  { %3581 = vmatpush1.bf16.msra.mxu1 %v4781_v0  ;;  %v4783_v0 = vcombine.low %v3005_v61, %v3021_v62  ;;  %v2979_v61 = vld [vmem:[%s6749_s4 + $0x40] sm:$0xff] }
 0x10d   :  { %v2995_v62 = vld [vmem:[%s6749_s4 + $0xc0] sm:$0xff] }
 0x123   :  { %v4947_v31 = vpop.f32.mrf.mxu0 }
 0x125   :  { %v4969_v32 = vpop.f32.mrf.mxu1  ;;  %v4948_v34 = vpop.f32.mrf.mxu0 }
 0x126   :  { %v4949_v35 = vadd.f32 %v4948_v34, %v4947_v31 }
 0x127   :  { %v4970_v36 = vpop.f32.mrf.mxu1  ;;  %v4950_v37 = vpop.f32.mrf.mxu0 }
 0x128   :  { %v2515_v38 = vadd.f32 %v4949_v35, %v2475_v29  ;;  %v4971_v39 = vadd.f32 %v4970_v36, %v4969_v32 }
 0x129   :  { %v4972_v40 = vpop.f32.mrf.mxu1  ;;  %v4951_v42 = vpop.f32.mrf.mxu0 }
 0x12a   :  { %v2555_v43 = vadd.f32 %v4971_v39, %v2515_v38 }
 0x12b   :  { %v4973_v44 = vpop.f32.mrf.mxu1 }
 0x143   :  { %v4991_v45 = vpop.f32.mrf.mxu0 }
 0x145   :  { %v5013_v46 = vpop.f32.mrf.mxu1  ;;  %v4992_v47 = vpop.f32.mrf.mxu0 }
 0x146   :  { %v4993_v48 = vadd.f32 %v4992_v47, %v4991_v45 }
 0x147   :  { %v5014_v49 = vpop.f32.mrf.mxu1  ;;  %v4994_v50 = vpop.f32.mrf.mxu0 }
 0x148   :  { %v2595_v51 = vadd.f32 %v4993_v48, %v2555_v43  ;;  %v5015_v52 = vadd.f32 %v5014_v49, %v5013_v46 }
 0x149   :  { %v5016_v53 = vpop.f32.mrf.mxu1  ;;  %v4995_v54 = vpop.f32.mrf.mxu0 }
 0x14a   :  { %v2635_v55 = vadd.f32 %v5015_v52, %v2595_v51  ;;  %v2971_v53 = vld [vmem:[%s6749_s4] sm:$0xff] }
 0x14b   :  { %v5017_v56 = vpop.f32.mrf.mxu1  ;;  %v2987_v54 = vld [vmem:[%s6749_s4 + $0x80] sm:$0xff] }
 0x14c   :  { %v4748_v56 = vcombine.high %v2971_v53, %v2987_v54  ;;  %v4747_v58 = vcombine.low %v2971_v53, %v2987_v54  ;;  %v3011_v53 = vld [vmem:[%s6749_s4 + $0x140] sm:$0xff] }
 0x14d   :  { %v3027_v54 = vld [vmem:[%s6749_s4 + $0x1c0] sm:$0xff] }
 0x14e   :  { %3541 = vmatprep.subr.bf16.mxu0 %v4748_v56  ;;  %v3028_v56 = vld [vmem:[%s6749_s4 + $0x1c8] sm:$0xff] }
 0x14f   :  { %3542 = vmatpush1.bf16.msra.mxu0 %v4747_v58 }
 0x150   :  { %3621 = vmatprep.subr.bf16.mxu0 %v4784_v1  ;;  %v4795_v1 = vcombine.low %v3011_v53, %v3027_v54 }
 0x163   :  { %v5035_v60 = vpop.f32.mrf.mxu0 }
 0x165   :  { %v5057_v2 = vpop.f32.mrf.mxu1  ;;  %v5036_v3 = vpop.f32.mrf.mxu0 }
 0x166   :  { %v5037_v4 = vadd.f32 %v5036_v3, %v5035_v60  ;;  %v5507_v3 = vmov 0  }
 0x167   :  { %v5058_v5 = vpop.f32.mrf.mxu1  ;;  %v5038_v6 = vpop.f32.mrf.mxu0  ;;  %3559 = vmatprep.mubr.bf16.mxu0 %v5507_v3  ;;  %3600 = vmatprep.mubr.bf16.mxu1 %v5507_v3 }
 0x168   :  { %v2675_v7 = vadd.f32 %v5037_v4, %v2635_v55  ;;  %v5059_v8 = vadd.f32 %v5058_v5, %v5057_v2  ;;  %v2972_v55 = vld [vmem:[%s6749_s4 + $0x8] sm:$0xff]  ;;  %v3022_v2 = vld [vmem:[%s6749_s4 + $0x198] sm:$0xff] }
 0x169   :  { %v5060_v9 = vpop.f32.mrf.mxu1  ;;  %v5039_v10 = vpop.f32.mrf.mxu0  ;;  %v4749_v59 = vcombine.low %v2972_v55, %v2988_v57  ;;  %v4750_v60 = vcombine.high %v2972_v55, %v2988_v57  ;;  %v4785_v4 = vcombine.low %v3006_v63, %v3022_v2  ;;  %v4786_v5 = vcombine.high %v3006_v63, %v3022_v2  ;;  %v3012_v55 = vld [vmem:[%s6749_s4 + $0x148] sm:$0xff] }
 0x16a   :  { %v2715_v11 = vadd.f32 %v5059_v8, %v2675_v7  ;;  %v2960_v7 = vld [vmem:[%s6748_s3] sm:$0x3]  ;;  %v2973_v10 = vld [vmem:[%s6749_s4 + $0x10] sm:$0xff]  ;;  %v2980_v63 = vld [vmem:[%s6749_s4 + $0x48] sm:$0xff]  ;;  %v4797_v2 = vcombine.low %v3012_v55, %v3028_v56 }
 0x16b   :  { %v5061_v12 = vpop.f32.mrf.mxu1  ;;  %3582 = vmatprep.subr.bf16.mxu1 %v4750_v60  ;;  %v4798_v60 = vcombine.high %v3012_v55, %v3028_v56 }
 0x16c   :  { %3583 = vmatpush1.bf16.msra.mxu1 %v4749_v59  ;;  %v2974_v12 = vld [vmem:[%s6749_s4 + $0x18] sm:$0xff]  ;;  %v4796_v59 = vcombine.high %v3011_v53, %v3027_v54 }
 0x16d   :  { %3662 = vmatprep.subr.bf16.mxu1 %v4786_v5 }
 0x183   :  { %v5079_v13 = vpop.f32.mrf.mxu0 }
 0x185   :  { %v5101_v14 = vpop.f32.mrf.mxu1  ;;  %v5080_v15 = vpop.f32.mrf.mxu0 }
 0x186   :  { %v5081_v29 = vadd.f32 %v5080_v15, %v5079_v13  ;;  %v2990_v13 = vld [vmem:[%s6749_s4 + $0x98] sm:$0xff] }
 0x187   :  { %v5102_v16 = vpop.f32.mrf.mxu1  ;;  %v5082_v17 = vpop.f32.mrf.mxu0 }
 0x188   :  { %v2755_v30 = vadd.f32 %v5081_v29, %v2715_v11  ;;  %v5103_v31 = vadd.f32 %v5102_v16, %v5101_v14  ;;  %v2989_v11 = vld [vmem:[%s6749_s4 + $0x90] sm:$0xff]  ;;  %v2976_v29 = vld [vmem:[%s6749_s4 + $0x28] sm:$0xff] }
 0x189   :  { %v5104_v18 = vpop.f32.mrf.mxu1  ;;  %v5083_v19 = vpop.f32.mrf.mxu0  ;;  %v4752_v17 = vcombine.high %v2973_v10, %v2989_v11 }
 0x18a   :  { %v2795_v34 = vadd.f32 %v5103_v31, %v2755_v30  ;;  %v4754_v18 = vcombine.high %v2974_v12, %v2990_v13  ;;  %v3007_v19 = vld [vmem:[%s6749_s4 + $0x120] sm:$0xff]  ;;  %v2992_v30 = vld [vmem:[%s6749_s4 + $0xa8] sm:$0xff] }
 0x18b   :  { %v5105_v20 = vpop.f32.mrf.mxu1 }
 0x18c   :  { %v3023_v20 = vld [vmem:[%s6749_s4 + $0x1a0] sm:$0xff] }
 0x18d   :  { %v4787_v31 = vcombine.low %v3007_v19, %v3023_v20 }
 0x1a3   :  { %v5123_v21 = vpop.f32.mrf.mxu0 }
 0x1a5   :  { %v5145_v23 = vpop.f32.mrf.mxu1  ;;  %v5124_v24 = vpop.f32.mrf.mxu0 }
 0x1a6   :  { %v5125_v32 = vadd.f32 %v5124_v24, %v5123_v21  ;;  %v3008_v21 = vld [vmem:[%s6749_s4 + $0x128] sm:$0xff]  ;;  %v4751_v24 = vcombine.low %v2973_v10, %v2989_v11  ;;  %v4763_v10 = vcombine.low %v2979_v61, %v2995_v62 }
 0x1a7   :  { %v5146_v25 = vpop.f32.mrf.mxu1  ;;  %v5126_v26 = vpop.f32.mrf.mxu0 }
 0x1a8   :  { %v2835_v35 = vadd.f32 %v5125_v32, %v2795_v34  ;;  %v5147_v36 = vadd.f32 %v5146_v25, %v5145_v23  ;;  %v3024_v23 = vld [vmem:[%s6749_s4 + $0x1a8] sm:$0xff]  ;;  %v4753_v25 = vcombine.low %v2974_v12, %v2990_v13  ;;  %v4788_v26 = vcombine.high %v3007_v19, %v3023_v20 }
 0x1a9   :  { %v5148_v27 = vpop.f32.mrf.mxu1  ;;  %v5127_v22 = vpop.f32.mrf.mxu0  ;;  %v4789_v32 = vcombine.low %v3008_v21, %v3024_v23 }
 0x1aa   :  { %v2875_v40 = vadd.f32 %v5147_v36, %v2835_v35  ;;  %v4790_v27 = vcombine.high %v3008_v21, %v3024_v23  ;;  %v2975_v22 = vld [vmem:[%s6749_s4 + $0x20] sm:$0xff]  ;;  %v4758_v35 = vcombine.high %v2976_v29, %v2992_v30  ;;  %v3009_v36 = vld [vmem:[%s6749_s4 + $0x130] sm:$0xff] }
 0x1ab   :  { %v5149_v28 = vpop.f32.mrf.mxu1 }
 0x1ac   :  { %v2991_v28 = vld [vmem:[%s6749_s4 + $0xa0] sm:$0xff] }
 0x1ad   :  { %v4756_v34 = vcombine.high %v2975_v22, %v2991_v28 }
 0x1c3   :  { %v5167_v37 = vpop.f32.mrf.mxu0 }
 0x1c5   :  { %v5189_v38 = vpop.f32.mrf.mxu1  ;;  %v5168_v39 = vpop.f32.mrf.mxu0 }
 0x1c6   :  { %v5169_v42 = vadd.f32 %v5168_v39, %v5167_v37  ;;  %v3025_v37 = vld [vmem:[%s6749_s4 + $0x1b0] sm:$0xff]  ;;  %v3026_v39 = vld [vmem:[%s6749_s4 + $0x1b8] sm:$0xff] }
 0x1c7   :  { %v5190_v43 = vpop.f32.mrf.mxu1  ;;  %v5170_v44 = vpop.f32.mrf.mxu0 }
 0x1c8   :  { %v2915_v45 = vadd.f32 %v5169_v42, %v2875_v40  ;;  %v5191_v46 = vadd.f32 %v5190_v43, %v5189_v38  ;;  %v3010_v38 = vld [vmem:[%s6749_s4 + $0x138] sm:$0xff]  ;;  %v4755_v40 = vcombine.low %v2975_v22, %v2991_v28  ;;  %v4757_v42 = vcombine.low %v2976_v29, %v2992_v30 }
 0x1c9   :  { %v5192_v47 = vpop.f32.mrf.mxu1  ;;  %v5171_v48 = vpop.f32.mrf.mxu0  ;;  %v4792_v43 = vcombine.high %v3009_v36, %v3025_v37  ;;  %v4794_v44 = vcombine.high %v3010_v38, %v3026_v39 }
 0x1ca   :  { %v2955_v49 = vadd.f32 %v5191_v46, %v2915_v45  ;;  %v2977_v45 = vld [vmem:[%s6749_s4 + $0x30] sm:$0xff]  ;;  %v2978_v47 = vld [vmem:[%s6749_s4 + $0x38] sm:$0xff] }
 0x1cb   :  { %v5193_v50 = vpop.f32.mrf.mxu1  ;;  %v2993_v46 = vld [vmem:[%s6749_s4 + $0xb0] sm:$0xff]  ;;  %v2994_v48 = vld [vmem:[%s6749_s4 + $0xb8] sm:$0xff] }
 0x1cc   :  { %v2961_v51 = vmul.f32 0.5, %v2955_v49  ;;  %4184 = vst.msk [vmem:[#allocation2] sm:$0x3] %vm4183_vm0, %v2955_v49  ;;  %v4793_v50 = vcombine.low %v3010_v38, %v3026_v39  ;;  %v4759_v57 = vcombine.low %v2977_v45, %v2993_v46  ;;  %v4761_v58 = vcombine.low %v2978_v47, %v2994_v48 }
 0x1ce   :  { %v2962_v52 = vmul.f32 1.442695, %v2961_v51  ;;  %v4760_v51 = vcombine.high %v2977_v45, %v2993_v46 }
 0x1d0   :  { %5460 = vpow2.f32 %v2962_v52  ;;  %v4762_v52 = vcombine.high %v2978_v47, %v2994_v48 }
 0x1dd   :  { %v5461_v6 = vpop.eup %5460 }
 0x1de   :  { %2965 = vrot.lane.b32.xlu0 %v5461_v6, %s5508_s14  ;;  %v3013_v6 = vld [vmem:[%s6749_s4 + $0x150] sm:$0xff] }
 0x1e2   :  { %4186 = vrot.lane.b32.xlu0 %v2955_v49, %s5508_s14 }
 0x250   :  { %v2966_v8 = vpop.permute.xlu0 %2965 }
 0x251   :  { %v2968_v9 = vmul.f32 %v2966_v8, %v2960_v7  ;;  %v3029_v7 = vld [vmem:[%s6749_s4 + $0x1d0] sm:$0xff]  ;;  %v3014_v8 = vld [vmem:[%s6749_s4 + $0x158] sm:$0xff] }
 0x252   :  { %v4800_v12 = vcombine.high %v3013_v6, %v3029_v7  ;;  %v4799_v19 = vcombine.low %v3013_v6, %v3029_v7 }
 0x253   :  { %v2969_v14 = vadd.f32 %v2968_v9, %v2955_v49  ;;  %v4791_v49 = vcombine.low %v3009_v36, %v3025_v37  ;;  %v3030_v9 = vld [vmem:[%s6749_s4 + $0x1d8] sm:$0xff] }
 0x254   :  { %v4187_v15 = vpop.permute.xlu0 %4186  ;;  %v4802_v13 = vcombine.high %v3014_v8, %v3030_v9  ;;  %v4801_v20 = vcombine.low %v3014_v8, %v3030_v9 }
 0x255   :  { %v6442_v16 = vpack.c.bf16 %v2969_v14, %v2969_v14  ;;  %4189 = vst.msk [vmem:[#allocation4] sm:$0x3] %vm4183_vm0, %v4187_v15  ;;  %v2981_v14 = vld [vmem:[%s6749_s4 + $0x50] sm:$0xff] }
 0x256   :  { %v2997_v15 = vld [vmem:[%s6749_s4 + $0xd0] sm:$0xff] }
 0x257   :  { %4811 = vmatmul.mubr.msk.bf16.vlgmr.msra.gmra.mxu0 %vm3523_vm1, %v6442_v16  ;;  %4812 = vmatmul.mubr.msk.bf16.vlgmr.msra.gmra.mxu1 %vm3523_vm1, %v6442_v16  ;;  %v4768_v21 = vcombine.high %v2981_v14, %v2997_v15  ;;  %v4767_v22 = vcombine.low %v2981_v14, %v2997_v15 }
 0x258   :  { %3622 = vmatpush1.bf16.msra.mxu0 %v4783_v0  ;;  %3663 = vmatpush1.bf16.msra.mxu1 %v4785_v4  ;;  %v2996_v0 = vld [vmem:[%s6749_s4 + $0xc8] sm:$0xff]  ;;  %v4764_v4 = vcombine.high %v2979_v61, %v2995_v62 }
 0x259   :  { %3623 = vmatprep.subr.bf16.mxu0 %v4752_v17  ;;  %3664 = vmatprep.subr.bf16.mxu1 %v4754_v18  ;;  %v4766_v5 = vcombine.high %v2980_v63, %v2996_v0  ;;  %v4765_v11 = vcombine.low %v2980_v63, %v2996_v0  ;;  %v2982_v17 = vld [vmem:[%s6749_s4 + $0x58] sm:$0xff] }
 0x25a   :  { %3641 = vmatprep.mubr.bf16.mxu0 %v5507_v3  ;;  %3682 = vmatprep.mubr.bf16.mxu1 %v5507_v3  ;;  %v2998_v18 = vld [vmem:[%s6749_s4 + $0xd8] sm:$0xff] }
 0x25b   :  { %v4770_v23 = vcombine.high %v2982_v17, %v2998_v18  ;;  %v4769_v28 = vcombine.low %v2982_v17, %v2998_v18 }
 0x25c   :  { %3624 = vmatpush1.bf16.msra.mxu0 %v4751_v24  ;;  %3665 = vmatpush1.bf16.msra.mxu1 %v4753_v25  ;;  %v3015_v24 = vld [vmem:[%s6749_s4 + $0x160] sm:$0xff] }
 0x25d   :  { %3703 = vmatprep.subr.bf16.mxu0 %v4788_v26  ;;  %3744 = vmatprep.subr.bf16.mxu1 %v4790_v27  ;;  %v3031_v25 = vld [vmem:[%s6749_s4 + $0x1e0] sm:$0xff]  ;;  %v3016_v26 = vld [vmem:[%s6749_s4 + $0x168] sm:$0xff] }
 0x25e   :  { %v3032_v27 = vld [vmem:[%s6749_s4 + $0x1e8] sm:$0xff]  ;;  %v4804_v29 = vcombine.high %v3015_v24, %v3031_v25  ;;  %v4803_v36 = vcombine.low %v3015_v24, %v3031_v25 }
 0x25f   :  { %4813 = vmatmul.mubr.msk.bf16.vlgmr.msra.gmra.mxu0 %vm3523_vm1, %v6442_v16  ;;  %4814 = vmatmul.mubr.msk.bf16.vlgmr.msra.gmra.mxu1 %vm3523_vm1, %v6442_v16  ;;  %v4806_v30 = vcombine.high %v3016_v26, %v3032_v27  ;;  %v4805_v37 = vcombine.low %v3016_v26, %v3032_v27 }
 0x260   :  { %3704 = vmatpush1.bf16.msra.mxu0 %v4787_v31  ;;  %3745 = vmatpush1.bf16.msra.mxu1 %v4789_v32  ;;  %v2983_v31 = vld [vmem:[%s6749_s4 + $0x60] sm:$0xff] }
 0x261   :  { %3705 = vmatprep.subr.bf16.mxu0 %v4756_v34  ;;  %3746 = vmatprep.subr.bf16.mxu1 %v4758_v35  ;;  %v2999_v32 = vld [vmem:[%s6749_s4 + $0xe0] sm:$0xff]  ;;  %v2984_v34 = vld [vmem:[%s6749_s4 + $0x68] sm:$0xff] }
 0x262   :  { %3723 = vmatprep.mubr.bf16.mxu0 %v5507_v3  ;;  %3764 = vmatprep.mubr.bf16.mxu1 %v5507_v3  ;;  %v3000_v35 = vld [vmem:[%s6749_s4 + $0xe8] sm:$0xff]  ;;  %v4772_v38 = vcombine.high %v2983_v31, %v2999_v32  ;;  %v4771_v45 = vcombine.low %v2983_v31, %v2999_v32 }
 0x263   :  { %v4774_v39 = vcombine.high %v2984_v34, %v3000_v35  ;;  %v4773_v46 = vcombine.low %v2984_v34, %v3000_v35 }
 0x264   :  { %3706 = vmatpush1.bf16.msra.mxu0 %v4755_v40  ;;  %3747 = vmatpush1.bf16.msra.mxu1 %v4757_v42  ;;  %v3017_v40 = vld [vmem:[%s6749_s4 + $0x170] sm:$0xff] }
 0x265   :  { %3785 = vmatprep.subr.bf16.mxu0 %v4792_v43  ;;  %3826 = vmatprep.subr.bf16.mxu1 %v4794_v44  ;;  %v3033_v42 = vld [vmem:[%s6749_s4 + $0x1f0] sm:$0xff]  ;;  %v3018_v43 = vld [vmem:[%s6749_s4 + $0x178] sm:$0xff] }
 0x266   :  { %v3034_v44 = vld [vmem:[%s6749_s4 + $0x1f8] sm:$0xff]  ;;  %v4808_v47 = vcombine.high %v3017_v40, %v3033_v42  ;;  %v4807_v53 = vcombine.low %v3017_v40, %v3033_v42 }
 0x267   :  { %4815 = vmatmul.mubr.msk.bf16.vlgmr.msra.gmra.mxu0 %vm3523_vm1, %v6442_v16  ;;  %4816 = vmatmul.mubr.msk.bf16.vlgmr.msra.gmra.mxu1 %vm3523_vm1, %v6442_v16  ;;  %v4810_v48 = vcombine.high %v3018_v43, %v3034_v44  ;;  %v4809_v54 = vcombine.low %v3018_v43, %v3034_v44 }
 0x268   :  { %3786 = vmatpush1.bf16.msra.mxu0 %v4791_v49  ;;  %3827 = vmatpush1.bf16.msra.mxu1 %v4793_v50  ;;  %v2985_v49 = vld [vmem:[%s6749_s4 + $0x70] sm:$0xff] }
 0x269   :  { %3787 = vmatprep.subr.bf16.mxu0 %v4760_v51  ;;  %3828 = vmatprep.subr.bf16.mxu1 %v4762_v52  ;;  %v3001_v50 = vld [vmem:[%s6749_s4 + $0xf0] sm:$0xff]  ;;  %v2986_v51 = vld [vmem:[%s6749_s4 + $0x78] sm:$0xff] }
 0x26a   :  { %3805 = vmatprep.mubr.bf16.mxu0 %v5507_v3  ;;  %3846 = vmatprep.mubr.bf16.mxu1 %v5507_v3  ;;  %v3002_v52 = vld [vmem:[%s6749_s4 + $0xf8] sm:$0xff]  ;;  %v4776_v55 = vcombine.high %v2985_v49, %v3001_v50  ;;  %s5509_s4 = smov [#allocation2]  }
 0x26b   :  { %v4778_v56 = vcombine.high %v2986_v51, %v3002_v52  ;;  %s4464_s15 = sshll.u32 %s5509_s4, 4  ;;  %s4465_s15 = int_to_ptr.vmem [resolvable:$true] %s4464_s15 }
 0x26c   :  { %3788 = vmatpush1.bf16.msra.mxu0 %v4759_v57  ;;  %3829 = vmatpush1.bf16.msra.mxu1 %v4761_v58  ;;  %v4775_v57 = vcombine.low %v2985_v49, %v3001_v50  ;;  %v4777_v58 = vcombine.low %v2986_v51, %v3002_v52  ;;  %s5462_s18 = scalar_lea.vmem %s4465_s15, 32  ;;  %p5467_p1 = scmp.lt.s32.totalorder %s4465_s15, %s4465_s15 }
 0x26d   :  { %3867 = vmatprep.subr.bf16.mxu0 %v4796_v59  ;;  %3908 = vmatprep.subr.bf16.mxu1 %v4798_v60  ;;  %p5463_p0 = scmp.ne.s32.totalorder %s4465_s15, %s5462_s18  ;;  %p5468_p2 = scmp.lt.s32.totalorder %s5462_s18, %s5462_s18 }
 0x26f   :  { %4817 = vmatmul.mubr.msk.bf16.vlgmr.msra.gmra.mxu0 %vm3523_vm1, %v6442_v16  ;;  %4818 = vmatmul.mubr.msk.bf16.vlgmr.msra.gmra.mxu1 %vm3523_vm1, %v6442_v16  ;;  %p5469_p3 = por %p5468_p2, %p5467_p1 }
 0x270   :  { %3868 = vmatpush1.bf16.msra.mxu0 %v4795_v1  ;;  %3909 = vmatpush1.bf16.msra.mxu1 %v4797_v2 }
 0x271   :  { %3869 = vmatprep.subr.bf16.mxu0 %v4764_v4  ;;  %3910 = vmatprep.subr.bf16.mxu1 %v4766_v5  ;;  %p5470_p4 = pnand %p5469_p3, %p5463_p0 }
 0x272   :  { %3887 = vmatprep.mubr.bf16.mxu0 %v5507_v3  ;;  %3928 = vmatprep.mubr.bf16.mxu1 %v5507_v3 }
 0x274   :  { %3870 = vmatpush1.bf16.msra.mxu0 %v4763_v10  ;;  %3911 = vmatpush1.bf16.msra.mxu1 %v4765_v11 }
 0x275   :  { %3949 = vmatprep.subr.bf16.mxu0 %v4800_v12  ;;  %3990 = vmatprep.subr.bf16.mxu1 %v4802_v13 }
 0x277   :  { %4819 = vmatmul.mubr.msk.bf16.vlgmr.msra.gmra.mxu0 %vm3523_vm1, %v6442_v16  ;;  %4820 = vmatmul.mubr.msk.bf16.vlgmr.msra.gmra.mxu1 %vm3523_vm1, %v6442_v16 }
 0x278   :  { %3950 = vmatpush1.bf16.msra.mxu0 %v4799_v19  ;;  %3991 = vmatpush1.bf16.msra.mxu1 %v4801_v20 }
 0x279   :  { %3951 = vmatprep.subr.bf16.mxu0 %v4768_v21  ;;  %3992 = vmatprep.subr.bf16.mxu1 %v4770_v23 }
 0x27a   :  { %3969 = vmatprep.mubr.bf16.mxu0 %v5507_v3  ;;  %4010 = vmatprep.mubr.bf16.mxu1 %v5507_v3 }
 0x27c   :  { %3952 = vmatpush1.bf16.msra.mxu0 %v4767_v22  ;;  %3993 = vmatpush1.bf16.msra.mxu1 %v4769_v28 }
 0x27d   :  { %4031 = vmatprep.subr.bf16.mxu0 %v4804_v29  ;;  %4072 = vmatprep.subr.bf16.mxu1 %v4806_v30 }
 0x27f   :  { %4821 = vmatmul.mubr.msk.bf16.vlgmr.msra.gmra.mxu0 %vm3523_vm1, %v6442_v16  ;;  %4822 = vmatmul.mubr.msk.bf16.vlgmr.msra.gmra.mxu1 %vm3523_vm1, %v6442_v16 }
 0x280   :  { %4032 = vmatpush1.bf16.msra.mxu0 %v4803_v36  ;;  %4073 = vmatpush1.bf16.msra.mxu1 %v4805_v37 }
 0x281   :  { %4033 = vmatprep.subr.bf16.mxu0 %v4772_v38  ;;  %4074 = vmatprep.subr.bf16.mxu1 %v4774_v39 }
 0x282   :  { %4051 = vmatprep.mubr.bf16.mxu0 %v5507_v3  ;;  %4092 = vmatprep.mubr.bf16.mxu1 %v5507_v3 }
 0x284   :  { %4034 = vmatpush1.bf16.msra.mxu0 %v4771_v45  ;;  %4075 = vmatpush1.bf16.msra.mxu1 %v4773_v46 }
 0x285   :  { %4113 = vmatprep.subr.bf16.mxu0 %v4808_v47  ;;  %4154 = vmatprep.subr.bf16.mxu1 %v4810_v48 }
 0x287   :  { %4823 = vmatmul.mubr.msk.bf16.vlgmr.msra.gmra.mxu0 %vm3523_vm1, %v6442_v16  ;;  %4824 = vmatmul.mubr.msk.bf16.vlgmr.msra.gmra.mxu1 %vm3523_vm1, %v6442_v16 }
 0x288   :  { %4114 = vmatpush1.bf16.msra.mxu0 %v4807_v53  ;;  %4155 = vmatpush1.bf16.msra.mxu1 %v4809_v54 }
 0x289   :  { %4115 = vmatprep.subr.bf16.mxu0 %v4776_v55  ;;  %4156 = vmatprep.subr.bf16.mxu1 %v4778_v56 }
 0x28a   :  { %4133 = vmatprep.mubr.bf16.mxu0 %v5507_v3  ;;  %4174 = vmatprep.mubr.bf16.mxu1 %v5507_v3 }
 0x28c   :  { %4116 = vmatpush1.bf16.msra.mxu0 %v4775_v57  ;;  %4157 = vmatpush1.bf16.msra.mxu1 %v4777_v58 }
 0x28f   :  { %4825 = vmatmul.mubr.msk.bf16.vlgmr.msra.gmra.mxu0 %vm3523_vm1, %v6442_v16  ;;  %4826 = vmatmul.mubr.msk.bf16.vlgmr.msra.gmra.mxu1 %vm3523_vm1, %v6442_v16 }
 0x290   :  { %5473 = shalt.err (!%p5470_p4)
}
 0x291   :  { %4467 = dma.vmem_to_hbm [thread:$0]  %s4465_s15, 32, %s6751_s6, [#allocation3]  }
 0x292   :  { %s5482_s21 = scalar_lea.vmem %s4475_s17, 32  ;;  %p5487_p6 = scmp.lt.s32.totalorder %s4475_s17, %s4475_s17 }
 0x293   :  { %p5483_p5 = scmp.ne.s32.totalorder %s4475_s17, %s5482_s21  ;;  %p5488_p7 = scmp.lt.s32.totalorder %s5482_s21, %s5482_s21 }
 0x295   :  { %p5489_p8 = por %p5488_p7, %p5487_p6 }
 0x297   :  { %p5490_p9 = pnand %p5489_p8, %p5483_p5 }
 0x299   :  { %5493 = shalt.err (!%p5490_p9)
}
 0x29a   :  { %4477 = dma.vmem_to_hbm [thread:$0]  %s4475_s17, 32, %s6752_s7, [#allocation5]   ;;  %v6642_v3 = vsub.s32 1, %v5652_v33  ;;  %v6645_v16 = vsub.s32 3, %v5652_v33  ;;  %v6648_v59 = vsub.s32 0, %v5652_v33  ;;  %v6651_v60 = vsub.s32 2, %v5652_v33 }
 0x29b   :  { %v3035_v61 = vld [vmem:[%s6750_s5] sm:$0xff]  ;;  %v6661_v7 = vsub.s32 4, %v5652_v33  ;;  %v6664_v8 = vsub.s32 6, %v5652_v33  ;;  %v6667_v11 = vsub.s32 5, %v5652_v33  ;;  %v6670_v12 = vsub.s32 7, %v5652_v33  ;;  %v3036_v40 = vld [vmem:[%s6750_s5 + $0x8] sm:$0xff] }
 0x29c   :  { %v3050_v62 = vrot.slane %v3035_v61, %v6642_v3  ;;  %v3058_v63 = vrot.slane %v3035_v61, %v6645_v16  ;;  %v3046_v0 = vrot.slane %v3035_v61, %v6648_v59  ;;  %v3054_v2 = vrot.slane %v3035_v61, %v6651_v60 }
 0x29d   :  { %v3062_v23 = vrot.slane %v3035_v61, %v6661_v7  ;;  %v3070_v24 = vrot.slane %v3035_v61, %v6664_v8  ;;  %v3066_v25 = vrot.slane %v3035_v61, %v6667_v11  ;;  %v3074_v26 = vrot.slane %v3035_v61, %v6670_v12 }
 0x29e   :  { %v3082_v44 = vrot.slane %v3036_v40, %v6642_v3  ;;  %v3090_v48 = vrot.slane %v3036_v40, %v6645_v16  ;;  %v3078_v49 = vrot.slane %v3036_v40, %v6648_v59  ;;  %v3086_v51 = vrot.slane %v3036_v40, %v6651_v60 }
 0x317   :  { %v3561_v1 = vpop.f32.mrf.mxu0  ;;  %v3602_v4 = vpop.f32.mrf.mxu1 }
 0x318   :  { %v3562_v13 = vadd.f32 %v3561_v1, %v3046_v0  ;;  %v3603_v14 = vadd.f32 %v3602_v4, %v3054_v2 }
 0x319   :  { %v3563_v5 = vpop.f32.mrf.mxu0  ;;  %v3604_v6 = vpop.f32.mrf.mxu1 }
 0x31a   :  { %v3564_v9 = vadd.f32 %v3563_v5, %v3050_v62  ;;  %v3605_v10 = vadd.f32 %v3604_v6, %v3058_v63 }
 0x31b   :  { %v3565_v15 = vpop.f32.mrf.mxu0  ;;  %v3606_v17 = vpop.f32.mrf.mxu1 }
 0x31c   :  { %v4827_v18 = vpack.c.bf16 %v3564_v9, %v3562_v13  ;;  %v4828_v19 = vpack.c.bf16 %v3605_v10, %v3603_v14  ;;  %v3094_v10 = vrot.slane %v3036_v40, %v6661_v7  ;;  %v3102_v13 = vrot.slane %v3036_v40, %v6664_v8 }
 0x31d   :  { %v3566_v20 = vpop.f32.mrf.mxu0  ;;  %v3607_v21 = vpop.f32.mrf.mxu1  ;;  %v3098_v14 = vrot.slane %v3036_v40, %v6667_v11  ;;  %v3106_v15 = vrot.slane %v3036_v40, %v6670_v12 }
 0x31e   :  { %v4264_v33 = vrot.slane %v4827_v18, %v5664_v41  ;;  %v4271_v28 = vrot.slane %v4828_v19, %v5664_v41 }
 0x31f   :  { %v3643_v27 = vpop.f32.mrf.mxu0  ;;  %v3684_v22 = vpop.f32.mrf.mxu1 }
 0x320   :  { %v3644_v31 = vadd.f32 %v3643_v27, %v3062_v23  ;;  %v3685_v32 = vadd.f32 %v3684_v22, %v3070_v24  ;;  %v4286_v45 = vcombine.low %v4264_v33, %v4271_v28 }
 0x321   :  { %v3645_v29 = vpop.f32.mrf.mxu0  ;;  %v3686_v30 = vpop.f32.mrf.mxu1 }
 0x322   :  { %v3646_v34 = vadd.f32 %v3645_v29, %v3066_v25  ;;  %v3687_v35 = vadd.f32 %v3686_v30, %v3074_v26  ;;  %v4294_v56 = vrot.slane %v4286_v45, %v5664_v41  ;;  %v3037_v30 = vld [vmem:[%s6750_s5 + $0x10] sm:$0xff] }
 0x323   :  { %v3647_v36 = vpop.f32.mrf.mxu0  ;;  %v3688_v37 = vpop.f32.mrf.mxu1 }
 0x324   :  { %v4829_v38 = vpack.c.bf16 %v3646_v34, %v3644_v31  ;;  %v4830_v39 = vpack.c.bf16 %v3687_v35, %v3685_v32  ;;  %v3114_v34 = vrot.slane %v3037_v30, %v6642_v3 }
 0x325   :  { %v3648_v42 = vpop.f32.mrf.mxu0  ;;  %v3689_v43 = vpop.f32.mrf.mxu1 }
 0x326   :  { %v4278_v46 = vrot.slane %v4829_v38, %v5664_v41  ;;  %v4285_v47 = vrot.slane %v4830_v39, %v5664_v41  ;;  %v3122_v38 = vrot.slane %v3037_v30, %v6645_v16  ;;  %v3110_v39 = vrot.slane %v3037_v30, %v6648_v59 }
 0x327   :  { %v3725_v50 = vpop.f32.mrf.mxu0  ;;  %v3766_v52 = vpop.f32.mrf.mxu1  ;;  %v3118_v42 = vrot.slane %v3037_v30, %v6651_v60 }
 0x328   :  { %v4287_v53 = vcombine.low %v4278_v46, %v4285_v47  ;;  %v3726_v62 = vadd.f32 %v3725_v50, %v3078_v49  ;;  %v3767_v63 = vadd.f32 %v3766_v52, %v3086_v51 }
 0x329   :  { %v3727_v54 = vpop.f32.mrf.mxu0  ;;  %v3768_v55 = vpop.f32.mrf.mxu1 }
 0x32a   :  { %v4301_v57 = vrot.slane %v4287_v53, %v5664_v41  ;;  %v3728_v58 = vadd.f32 %v3727_v54, %v3082_v44  ;;  %v3769_v61 = vadd.f32 %v3768_v55, %v3090_v48 }
 0x32b   :  { %v3729_v0 = vpop.f32.mrf.mxu0  ;;  %v3770_v1 = vpop.f32.mrf.mxu1 }
 0x32c   :  { %v4302_v2 = vcombine.low %v4294_v56, %v4301_v57  ;;  %v4831_v4 = vpack.c.bf16 %v3728_v58, %v3726_v62  ;;  %v4832_v5 = vpack.c.bf16 %v3769_v61, %v3767_v63  ;;  %v3126_v62 = vrot.slane %v3037_v30, %v6661_v7 }
 0x32d   :  { %v3730_v6 = vpop.f32.mrf.mxu0  ;;  %v3771_v9 = vpop.f32.mrf.mxu1  ;;  %v3134_v63 = vrot.slane %v3037_v30, %v6664_v8  ;;  %v3130_v0 = vrot.slane %v3037_v30, %v6667_v11  ;;  %v3138_v1 = vrot.slane %v3037_v30, %v6670_v12 }
 0x32e   :  { %4454 = vst [vmem:[%s6753_s8] sm:$0xff] %v4302_v2  ;;  %v4313_v19 = vrot.slane %v4831_v4, %v5664_v41  ;;  %v4320_v20 = vrot.slane %v4832_v5, %v5664_v41 }
 0x32f   :  { %v3807_v17 = vpop.f32.mrf.mxu0  ;;  %v3848_v18 = vpop.f32.mrf.mxu1 }
 0x330   :  { %v3808_v24 = vadd.f32 %v3807_v17, %v3094_v10  ;;  %v3849_v25 = vadd.f32 %v3848_v18, %v3102_v13  ;;  %v4335_v35 = vcombine.low %v4313_v19, %v4320_v20 }
 0x331   :  { %v3809_v21 = vpop.f32.mrf.mxu0  ;;  %v3850_v23 = vpop.f32.mrf.mxu1 }
 0x332   :  { %v3810_v26 = vadd.f32 %v3809_v21, %v3098_v14  ;;  %v3851_v27 = vadd.f32 %v3850_v23, %v3106_v15  ;;  %v4343_v47 = vrot.slane %v4335_v35, %v5664_v41  ;;  %v3038_v23 = vld [vmem:[%s6750_s5 + $0x18] sm:$0xff] }
 0x333   :  { %v3811_v22 = vpop.f32.mrf.mxu0  ;;  %v3852_v33 = vpop.f32.mrf.mxu1 }
 0x334   :  { %v4833_v28 = vpack.c.bf16 %v3810_v26, %v3808_v24  ;;  %v4834_v29 = vpack.c.bf16 %v3851_v27, %v3849_v25  ;;  %v3146_v26 = vrot.slane %v3038_v23, %v6642_v3 }
 0x335   :  { %v3812_v31 = vpop.f32.mrf.mxu0  ;;  %v3853_v32 = vpop.f32.mrf.mxu1 }
 0x336   :  { %v4327_v36 = vrot.slane %v4833_v28, %v5664_v41  ;;  %v4334_v37 = vrot.slane %v4834_v29, %v5664_v41  ;;  %v3154_v28 = vrot.slane %v3038_v23, %v6645_v16  ;;  %v3142_v29 = vrot.slane %v3038_v23, %v6648_v59 }
 0x337   :  { %v3889_v40 = vpop.f32.mrf.mxu0  ;;  %v3930_v43 = vpop.f32.mrf.mxu1  ;;  %v3150_v31 = vrot.slane %v3038_v23, %v6651_v60  ;;  %v3158_v60 = vrot.slane %v3038_v23, %v6661_v7 }
 0x338   :  { %v4336_v44 = vcombine.low %v4327_v36, %v4334_v37  ;;  %v3890_v51 = vadd.f32 %v3889_v40, %v3110_v39  ;;  %v3931_v52 = vadd.f32 %v3930_v43, %v3118_v42 }
 0x339   :  { %v3891_v45 = vpop.f32.mrf.mxu0  ;;  %v3932_v46 = vpop.f32.mrf.mxu1 }
 0x33a   :  { %v4350_v48 = vrot.slane %v4336_v44, %v5664_v41  ;;  %v3892_v49 = vadd.f32 %v3891_v45, %v3114_v34  ;;  %v3933_v50 = vadd.f32 %v3932_v46, %v3122_v38 }
 0x33b   :  { %v3893_v53 = vpop.f32.mrf.mxu0  ;;  %v3934_v54 = vpop.f32.mrf.mxu1 }
 0x33c   :  { %v4351_v55 = vcombine.low %v4343_v47, %v4350_v48  ;;  %v4835_v56 = vpack.c.bf16 %v3892_v49, %v3890_v51  ;;  %v4836_v57 = vpack.c.bf16 %v3933_v50, %v3931_v52  ;;  %v3166_v48 = vrot.slane %v3038_v23, %v6664_v8 }
 0x33d   :  { %v3894_v58 = vpop.f32.mrf.mxu0  ;;  %v3935_v61 = vpop.f32.mrf.mxu1  ;;  %v3162_v49 = vrot.slane %v3038_v23, %v6667_v11  ;;  %v3170_v50 = vrot.slane %v3038_v23, %v6670_v12 }
 0x33e   :  { %4455 = vst [vmem:[%s6753_s8 + $0x8] sm:$0xff] %v4351_v55  ;;  %v4362_v5 = vrot.slane %v4835_v56, %v5664_v41  ;;  %v4369_v6 = vrot.slane %v4836_v57, %v5664_v41 }
 0x33f   :  { %v3971_v2 = vpop.f32.mrf.mxu0  ;;  %v4012_v4 = vpop.f32.mrf.mxu1 }
 0x340   :  { %v3972_v13 = vadd.f32 %v3971_v2, %v3126_v62  ;;  %v4013_v14 = vadd.f32 %v4012_v4, %v3134_v63  ;;  %v4384_v27 = vcombine.low %v4362_v5, %v4369_v6 }
 0x341   :  { %v3973_v9 = vpop.f32.mrf.mxu0  ;;  %v4014_v10 = vpop.f32.mrf.mxu1 }
 0x342   :  { %v3974_v15 = vadd.f32 %v3973_v9, %v3130_v0  ;;  %v4015_v17 = vadd.f32 %v4014_v10, %v3138_v1  ;;  %v4392_v37 = vrot.slane %v4384_v27, %v5664_v41 }
 0x343   :  { %v3975_v18 = vpop.f32.mrf.mxu0  ;;  %v4016_v19 = vpop.f32.mrf.mxu1 }
 0x344   :  { %v4837_v20 = vpack.c.bf16 %v3974_v15, %v3972_v13  ;;  %v4838_v21 = vpack.c.bf16 %v4015_v17, %v4013_v14 }
 0x345   :  { %v3976_v24 = vpop.f32.mrf.mxu0  ;;  %v4017_v25 = vpop.f32.mrf.mxu1 }
 0x346   :  { %v4376_v22 = vrot.slane %v4837_v20, %v5664_v41  ;;  %v4383_v33 = vrot.slane %v4838_v21, %v5664_v41 }
 0x347   :  { %v4053_v30 = vpop.f32.mrf.mxu0  ;;  %v4094_v32 = vpop.f32.mrf.mxu1 }
 0x348   :  { %v4385_v34 = vcombine.low %v4376_v22, %v4383_v33  ;;  %v4054_v40 = vadd.f32 %v4053_v30, %v3142_v29  ;;  %v4095_v42 = vadd.f32 %v4094_v32, %v3150_v31 }
 0x349   :  { %v4055_v35 = vpop.f32.mrf.mxu0  ;;  %v4096_v36 = vpop.f32.mrf.mxu1 }
 0x34a   :  { %v4399_v3 = vrot.slane %v4385_v34, %v5664_v41  ;;  %v4056_v38 = vadd.f32 %v4055_v35, %v3146_v26  ;;  %v4097_v39 = vadd.f32 %v4096_v36, %v3154_v28 }
 0x34b   :  { %v4057_v43 = vpop.f32.mrf.mxu0  ;;  %v4098_v44 = vpop.f32.mrf.mxu1 }
 0x34c   :  { %v4400_v16 = vcombine.low %v4392_v37, %v4399_v3  ;;  %v4839_v45 = vpack.c.bf16 %v4056_v38, %v4054_v40  ;;  %v4840_v59 = vpack.c.bf16 %v4097_v39, %v4095_v42 }
 0x34d   :  { %v4058_v46 = vpop.f32.mrf.mxu0  ;;  %v4099_v47 = vpop.f32.mrf.mxu1 }
 0x34e   :  { %4456 = vst [vmem:[%s6753_s8 + $0x10] sm:$0xff] %v4400_v16  ;;  %v4411_v53 = vrot.slane %v4839_v45, %v5664_v41  ;;  %v4418_v54 = vrot.slane %v4840_v59, %v5664_v41 }
 0x34f   :  { %v4135_v51 = vpop.f32.mrf.mxu0  ;;  %v4176_v52 = vpop.f32.mrf.mxu1 }
 0x350   :  { %v4136_v57 = vadd.f32 %v4135_v51, %v3158_v60  ;;  %v4177_v58 = vadd.f32 %v4176_v52, %v3166_v48  ;;  %v4433_v2 = vcombine.low %v4411_v53, %v4418_v54 }
 0x351   :  { %v4137_v55 = vpop.f32.mrf.mxu0  ;;  %v4178_v56 = vpop.f32.mrf.mxu1 }
 0x352   :  { %v4138_v61 = vadd.f32 %v4137_v55, %v3162_v49  ;;  %v4179_v62 = vadd.f32 %v4178_v56, %v3170_v50  ;;  %v4441_v6 = vrot.slane %v4433_v2, %v5664_v41 }
 0x353   :  { %v4139_v63 = vpop.f32.mrf.mxu0  ;;  %v4180_v7 = vpop.f32.mrf.mxu1 }
 0x354   :  { %v4841_v0 = vpack.c.bf16 %v4138_v61, %v4136_v57  ;;  %v4842_v8 = vpack.c.bf16 %v4179_v62, %v4177_v58 }
 0x355   :  { %v4140_v1 = vpop.f32.mrf.mxu0  ;;  %v4181_v11 = vpop.f32.mrf.mxu1 }
 0x356   :  { %v4425_v12 = vrot.slane %v4841_v0, %v5664_v41  ;;  %v4432_v4 = vrot.slane %v4842_v8, %v5664_v41 }
 0x358   :  { %v4434_v5 = vcombine.low %v4425_v12, %v4432_v4 }
 0x35a   :  { %v4448_v9 = vrot.slane %v4434_v5, %v5664_v41 }
 0x35c   :  { %v4449_v10 = vcombine.low %v4441_v6, %v4448_v9 }
 0x35e   :  { %4457 = vst [vmem:[%s6753_s8 + $0x18] sm:$0xff] %v4449_v10 }
 0x35f   :  { %5502 = dma.done.wait [#allocation3], 32  }
 0x360   :  { %5503 = vsyncadd [#allocation3], 4294967264 }
 0x361   :  { %5504 = dma.done.wait [#allocation5], 32  }
 0x362   :  { %5505 = vsyncadd [#allocation5], 4294967264 }
 0x363   :  { %4488 = vsyncpa [#allocation3], 1 }
 0x364   :  { %4489 = vsyncpa [#allocation5], 1 }

// kernel: vae_forward.14
= control target key start
LH: loop header
LB: loop body
LE: loop exit
PB: predicated region body
PF: predicated region fallthrough
CT: control target
= control target key end

     0   :  { %s1531_s12 = smov 0   ;;  %s1533_s13 = smov 0   ;;  %s1659_s0 = inlined_call_operand.vmem [shape: bf16[4,32,1024], index: 0, kind: input, shape index: {}]   ;;  %s1660_s1 = inlined_call_operand.vmem [shape: bf16[4,1024,128], index: 1, kind: input, shape index: {}]   ;;  %s1661_s2 = inlined_call_operand.vmem [shape: f32[1,1,128], index: 2, kind: input, shape index: {}]   ;;  %s1662_s3 = inlined_call_operand.vmem [shape: bf16[4,32,128], index: 3, kind: output, shape index: {}]  }
   0x1   :  { %s1535_s14 = smov 0  }
   0x2 LB: > { %s25_s15 = sadd.s32 1, %s1505_s13  ;;  %p1175_p0 = scmp.ge.s32.totalorder %s1509_s14, 1  ;;  %s1509_s14 = sphi %s1535_s14, %s13_s14   ;;  %s1505_s13 = sphi %s1533_s13, %s1664_s13   ;;  %s1501_s12 = sphi %s1531_s12, %s1663_s12  }
   0x3   : > { %p27_p1 = scmp.ge.s32.totalorder %s25_s15, 4  ;;  %p169_p2 = scmp.lt.s32.totalorder %s1509_s14, 5 }
   0x5   : > { %s1666_s15 = smov (%p27_p1, %s25_s15), 0  ;;  %p170_p3 = pnand %p1175_p0, %p169_p2 }
   0x6   : > { %p208_p4 = scmp.lt.s32.totalorder (!%p170_p3), %s1501_s12, 3 }
   0x7   : > { %173 = sbr.rel (%p170_p3) target bundleno = 299 (0x12b), region = 32 }
   0xc   : > { %s1668_s12 = smov (!%p208_p4, %s1501_s12), 3 }
   0xd   : > { %s1270_s16 = sshll.u32 %s1668_s12, 9  ;;  %s1269_s20 = sshll.u32 %s1668_s12, 7 }
   0xe   : > { %s1555_s19 = scalar_lea.vmem %s1660_s1, %s1270_s16  ;;  %s1591_s23 = scalar_lea.vmem %s1659_s0, %s1269_s20 }
   0xf   : > { %v1423_v0 = vld [vmem:[%s1555_s19 + $0x78] sm:$0xff]   ;;  %v1427_v4 = vld [vmem:[%s1555_s19 + $0x70] sm:$0xff]   ;;  %v1431_v8 = vld [vmem:[%s1555_s19 + $0x68] sm:$0xff]   ;;  %s1271_s26 = sshll.u32 %s1668_s12, 4 }
  0x10   : > { %v1424_v1 = vld [vmem:[%s1555_s19 + $0xf8] sm:$0xff]   ;;  %1287 = vmatprep.subr.bf16.mxu0 %v1423_v0  ;;  %v1428_v5 = vld [vmem:[%s1555_s19 + $0xf0] sm:$0xff]   ;;  %v1432_v9 = vld [vmem:[%s1555_s19 + $0xe8] sm:$0xff]   ;;  %s231_s29 = scalar_lea.vmem %s1662_s3, %s1271_s26 }
  0x11   : > { %v1425_v2 = vld [vmem:[%s1555_s19 + $0x38] sm:$0xff]   ;;  %1315 = vmatprep.subr.bf16.mxu1 %v1424_v1  ;;  %v1429_v6 = vld [vmem:[%s1555_s19 + $0x30] sm:$0xff]   ;;  %v1433_v10 = vld [vmem:[%s1555_s19 + $0x28] sm:$0xff]  }
  0x12   : > { %v1426_v3 = vld [vmem:[%s1555_s19 + $0xb8] sm:$0xff]   ;;  %1288 = vmatpush3.bf16.msra.mxu0 %v1425_v2  ;;  %v1430_v7 = vld [vmem:[%s1555_s19 + $0xb0] sm:$0xff]   ;;  %v1434_v11 = vld [vmem:[%s1555_s19 + $0xa8] sm:$0xff]  }
  0x13   : > { %1316 = vmatpush3.bf16.msra.mxu1 %v1426_v3  ;;  %1289 = vmatprep.subr.bf16.mxu0 %v1427_v4  ;;  %v1435_v12 = vld [vmem:[%s1555_s19 + $0x60] sm:$0xff]   ;;  %v1439_v16 = vld [vmem:[%s1555_s19 + $0x58] sm:$0xff]   ;;  %v1443_v20 = vld [vmem:[%s1555_s19 + $0x50] sm:$0xff]  }
  0x14   : > { %1317 = vmatprep.subr.bf16.mxu1 %v1428_v5  ;;  %v1436_v13 = vld [vmem:[%s1555_s19 + $0xe0] sm:$0xff]   ;;  %v1440_v17 = vld [vmem:[%s1555_s19 + $0xd8] sm:$0xff]   ;;  %v1444_v21 = vld [vmem:[%s1555_s19 + $0xd0] sm:$0xff]  }
  0x15   : > { %v1437_v14 = vld [vmem:[%s1555_s19 + $0x20] sm:$0xff]   ;;  %v1441_v18 = vld [vmem:[%s1555_s19 + $0x18] sm:$0xff]   ;;  %v1445_v22 = vld [vmem:[%s1555_s19 + $0x10] sm:$0xff]  }
  0x16   : > { %1290 = vmatpush3.bf16.msra.mxu0 %v1429_v6  ;;  %v1438_v15 = vld [vmem:[%s1555_s19 + $0xa0] sm:$0xff]   ;;  %v1442_v19 = vld [vmem:[%s1555_s19 + $0x98] sm:$0xff]   ;;  %v1446_v23 = vld [vmem:[%s1555_s19 + $0x90] sm:$0xff]  }
  0x17   : > { %1318 = vmatpush3.bf16.msra.mxu1 %v1430_v7  ;;  %1291 = vmatprep.subr.bf16.mxu0 %v1431_v8  ;;  %v1447_v24 = vld [vmem:[%s1555_s19 + $0x48] sm:$0xff]   ;;  %v1451_v28 = vld [vmem:[%s1555_s19 + $0x40] sm:$0xff]   ;;  %v1455_v40 = vld [vmem:[%s1555_s19 + $0x178] sm:$0xff]  }
  0x18   : > { %1319 = vmatprep.subr.bf16.mxu1 %v1432_v9  ;;  %v1448_v25 = vld [vmem:[%s1555_s19 + $0xc8] sm:$0xff]   ;;  %v1452_v29 = vld [vmem:[%s1555_s19 + $0xc0] sm:$0xff]   ;;  %v1456_v41 = vld [vmem:[%s1555_s19 + $0x1f8] sm:$0xff]  }
  0x19   : > { %v1449_v26 = vld [vmem:[%s1555_s19 + $0x8] sm:$0xff]   ;;  %v1453_v30 = vld [vmem:[%s1555_s19] sm:$0xff]   ;;  %v1457_v42 = vld [vmem:[%s1555_s19 + $0x138] sm:$0xff]  }
  0x1a   : > { %1292 = vmatpush3.bf16.msra.mxu0 %v1433_v10  ;;  %v1450_v27 = vld [vmem:[%s1555_s19 + $0x88] sm:$0xff]   ;;  %v1454_v31 = vld [vmem:[%s1555_s19 + $0x80] sm:$0xff]   ;;  %v1458_v43 = vld [vmem:[%s1555_s19 + $0x1b8] sm:$0xff]  }
  0x1b   : > { %1320 = vmatpush3.bf16.msra.mxu1 %v1434_v11  ;;  %1293 = vmatprep.subr.bf16.mxu0 %v1435_v12  ;;  %v234_v32 = vld [vmem:[%s1591_s23] sm:$0xff]  ;;  %v235_v34 = vld [vmem:[%s1591_s23 + $0x8] sm:$0xff]  ;;  %v1459_v44 = vld [vmem:[%s1555_s19 + $0x170] sm:$0xff]  }
  0x1c   : > { %1321 = vmatprep.subr.bf16.mxu1 %v1436_v13  ;;  %v238_v33 = vld [vmem:[%s1591_s23 + $0x20] sm:$0xff]  ;;  %v239_v37 = vld [vmem:[%s1591_s23 + $0x28] sm:$0xff]  ;;  %v1460_v45 = vld [vmem:[%s1555_s19 + $0x1f0] sm:$0xff]  }
  0x1d   : > { %v1183_v35 = vcombine.low %v234_v32, %v238_v33  ;;  %v1184_v36 = vcombine.high %v234_v32, %v238_v33  ;;  %v1185_v38 = vcombine.low %v235_v34, %v239_v37  ;;  %v1186_v39 = vcombine.high %v235_v34, %v239_v37  ;;  %v1461_v46 = vld [vmem:[%s1555_s19 + $0x130] sm:$0xff]   ;;  %v1463_v48 = vld [vmem:[%s1555_s19 + $0x168] sm:$0xff]   ;;  %v1467_v52 = vld [vmem:[%s1555_s19 + $0x160] sm:$0xff]  }
  0x1e   : > { %1294 = vmatpush3.bf16.msra.mxu0 %v1437_v14  ;;  %v1462_v47 = vld [vmem:[%s1555_s19 + $0x1b0] sm:$0xff]   ;;  %v1464_v49 = vld [vmem:[%s1555_s19 + $0x1e8] sm:$0xff]   ;;  %v1468_v53 = vld [vmem:[%s1555_s19 + $0x1e0] sm:$0xff]  }
  0x1f   : > { %1322 = vmatpush3.bf16.msra.mxu1 %v1438_v15  ;;  %1295 = vmatprep.subr.bf16.mxu0 %v1439_v16  ;;  %v1465_v50 = vld [vmem:[%s1555_s19 + $0x128] sm:$0xff]   ;;  %v1469_v54 = vld [vmem:[%s1555_s19 + $0x120] sm:$0xff]   ;;  %v1471_v56 = vld [vmem:[%s1555_s19 + $0x158] sm:$0xff]  }
  0x20   : > { %1323 = vmatprep.subr.bf16.mxu1 %v1440_v17  ;;  %881 = vmatprep.mubr.bf16.mxu0 %v1184_v36  ;;  %v1466_v51 = vld [vmem:[%s1555_s19 + $0x1a8] sm:$0xff]   ;;  %v1470_v55 = vld [vmem:[%s1555_s19 + $0x1a0] sm:$0xff]   ;;  %v1472_v57 = vld [vmem:[%s1555_s19 + $0x1d8] sm:$0xff]  }
  0x21   : > { %930 = vmatprep.mubr.bf16.mxu1 %v1186_v39  ;;  %v242_v58 = vld [vmem:[%s1591_s23 + $0x40] sm:$0xff]  ;;  %v1473_v61 = vld [vmem:[%s1555_s19 + $0x118] sm:$0xff]   ;;  %v243_v0 = vld [vmem:[%s1591_s23 + $0x48] sm:$0xff] }
  0x22   : > { %1296 = vmatpush3.bf16.msra.mxu0 %v1441_v18  ;;  %v246_v59 = vld [vmem:[%s1591_s23 + $0x60] sm:$0xff]  ;;  %v1474_v63 = vld [vmem:[%s1555_s19 + $0x198] sm:$0xff]   ;;  %v247_v1 = vld [vmem:[%s1591_s23 + $0x68] sm:$0xff] }
  0x23   : > { %1324 = vmatpush3.bf16.msra.mxu1 %v1442_v19  ;;  %1297 = vmatprep.subr.bf16.mxu0 %v1443_v20  ;;  %v1192_v60 = vcombine.high %v242_v58, %v246_v59  ;;  %v1191_v62 = vcombine.low %v242_v58, %v246_v59  ;;  %v1194_v2 = vcombine.high %v243_v0, %v247_v1  ;;  %v1475_v4 = vld [vmem:[%s1555_s19 + $0x150] sm:$0xff]   ;;  %v1479_v8 = vld [vmem:[%s1555_s19 + $0x148] sm:$0xff]   ;;  %v1483_v12 = vld [vmem:[%s1555_s19 + $0x140] sm:$0xff]  }
  0x24   : > { %1325 = vmatprep.subr.bf16.mxu1 %v1444_v21  ;;  %v1193_v3 = vcombine.low %v243_v0, %v247_v1  ;;  %v1476_v5 = vld [vmem:[%s1555_s19 + $0x1d0] sm:$0xff]   ;;  %v1480_v9 = vld [vmem:[%s1555_s19 + $0x1c8] sm:$0xff]   ;;  %v1484_v13 = vld [vmem:[%s1555_s19 + $0x1c0] sm:$0xff]  }
  0x25   : > { %v1477_v6 = vld [vmem:[%s1555_s19 + $0x110] sm:$0xff]   ;;  %v1481_v10 = vld [vmem:[%s1555_s19 + $0x108] sm:$0xff]   ;;  %v1485_v14 = vld [vmem:[%s1555_s19 + $0x100] sm:$0xff]  }
  0x26   : > { %1298 = vmatpush3.bf16.msra.mxu0 %v1445_v22  ;;  %v1478_v7 = vld [vmem:[%s1555_s19 + $0x190] sm:$0xff]   ;;  %v1482_v11 = vld [vmem:[%s1555_s19 + $0x188] sm:$0xff]   ;;  %v1486_v15 = vld [vmem:[%s1555_s19 + $0x180] sm:$0xff]  }
  0x27   : > { %1326 = vmatpush3.bf16.msra.mxu1 %v1446_v23  ;;  %1299 = vmatprep.subr.bf16.mxu0 %v1447_v24  ;;  %v236_v16 = vld [vmem:[%s1591_s23 + $0x10] sm:$0xff]  ;;  %v237_v18 = vld [vmem:[%s1591_s23 + $0x18] sm:$0xff] }
  0x28   : > { %1327 = vmatprep.subr.bf16.mxu1 %v1448_v25  ;;  %v240_v17 = vld [vmem:[%s1591_s23 + $0x30] sm:$0xff]  ;;  %v241_v19 = vld [vmem:[%s1591_s23 + $0x38] sm:$0xff] }
  0x29   : > { %v1187_v20 = vcombine.low %v236_v16, %v240_v17  ;;  %v1188_v21 = vcombine.high %v236_v16, %v240_v17  ;;  %v1189_v22 = vcombine.low %v237_v18, %v241_v19  ;;  %v1190_v23 = vcombine.high %v237_v18, %v241_v19  ;;  %v244_v24 = vld [vmem:[%s1591_s23 + $0x50] sm:$0xff] }
  0x2a   : > { %1300 = vmatpush3.bf16.msra.mxu0 %v1449_v26  ;;  %v248_v25 = vld [vmem:[%s1591_s23 + $0x70] sm:$0xff]  ;;  %v245_v26 = vld [vmem:[%s1591_s23 + $0x58] sm:$0xff] }
  0x2b   : > { %1328 = vmatpush3.bf16.msra.mxu1 %v1450_v27  ;;  %1301 = vmatprep.subr.bf16.mxu0 %v1451_v28  ;;  %v1196_v27 = vcombine.high %v244_v24, %v248_v25  ;;  %v249_v28 = vld [vmem:[%s1591_s23 + $0x78] sm:$0xff] }
  0x2c   : > { %1329 = vmatprep.subr.bf16.mxu1 %v1452_v29  ;;  %v1198_v29 = vcombine.high %v245_v26, %v249_v28 }
  0x2e   : > { %1302 = vmatpush3.bf16.msra.mxu0 %v1453_v30  ;;  %v1195_v30 = vcombine.low %v244_v24, %v248_v25 }
  0x2f   : > { %1330 = vmatpush3.bf16.msra.mxu1 %v1454_v31  ;;  %1343 = vmatprep.subr.bf16.mxu0 %v1455_v40  ;;  %v1197_v31 = vcombine.low %v245_v26, %v249_v28 }
  0x30   : > { %1371 = vmatprep.subr.bf16.mxu1 %v1456_v41 }
  0x31   : > { %882 = vmatmul.mubr.bf16.vlgmr.msra.gmra.mxu0 %v1183_v35 }
  0x32   : > { %931 = vmatmul.mubr.bf16.vlgmr.msra.gmra.mxu1 %v1185_v38  ;;  %1344 = vmatpush3.bf16.msra.mxu0 %v1457_v42 }
  0x33   : > { %1372 = vmatpush3.bf16.msra.mxu1 %v1458_v43  ;;  %1345 = vmatprep.subr.bf16.mxu0 %v1459_v44 }
  0x34   : > { %1373 = vmatprep.subr.bf16.mxu1 %v1460_v45  ;;  %889 = vmatprep.mubr.bf16.mxu0 %v1192_v60 }
  0x35   : > { %938 = vmatprep.mubr.bf16.mxu1 %v1194_v2 }
  0x36   : > { %1346 = vmatpush3.bf16.msra.mxu0 %v1461_v46 }
  0x37   : > { %1374 = vmatpush3.bf16.msra.mxu1 %v1462_v47  ;;  %1347 = vmatprep.subr.bf16.mxu0 %v1463_v48  ;;  %v1182_v47 = vld [vmem:[%s1661_s2] ss:$0 sm:$0xff] }
  0x38   : > { %1375 = vmatprep.subr.bf16.mxu1 %v1464_v49 }
  0x39   : > { %890 = vmatmul.mubr.bf16.gmra.mxu0 %v1191_v62 }
  0x3a   : > { %1348 = vmatpush3.bf16.msra.mxu0 %v1465_v50  ;;  %939 = vmatmul.mubr.bf16.gmra.mxu1 %v1193_v3 }
  0x3b   : > { %1376 = vmatpush3.bf16.msra.mxu1 %v1466_v51  ;;  %1349 = vmatprep.subr.bf16.mxu0 %v1467_v52 }
  0x3c   : > { %1377 = vmatprep.subr.bf16.mxu1 %v1468_v53  ;;  %979 = vmatprep.mubr.bf16.mxu0 %v1188_v21 }
  0x3d   : > { %1028 = vmatprep.mubr.bf16.mxu1 %v1190_v23 }
  0x3e   : > { %1350 = vmatpush3.bf16.msra.mxu0 %v1469_v54 }
  0x3f   : > { %1378 = vmatpush3.bf16.msra.mxu1 %v1470_v55  ;;  %1351 = vmatprep.subr.bf16.mxu0 %v1471_v56 }
  0x40   : > { %1379 = vmatprep.subr.bf16.mxu1 %v1472_v57 }
  0x42   : > { %1352 = vmatpush3.bf16.msra.mxu0 %v1473_v61 }
  0x43   : > { %1380 = vmatpush3.bf16.msra.mxu1 %v1474_v63  ;;  %1353 = vmatprep.subr.bf16.mxu0 %v1475_v4 }
  0x44   : > { %1381 = vmatprep.subr.bf16.mxu1 %v1476_v5 }
  0x46   : > { %1354 = vmatpush3.bf16.msra.mxu0 %v1477_v6 }
  0x47   : > { %1382 = vmatpush3.bf16.msra.mxu1 %v1478_v7  ;;  %1355 = vmatprep.subr.bf16.mxu0 %v1479_v8 }
  0x48   : > { %1383 = vmatprep.subr.bf16.mxu1 %v1480_v9 }
  0x4a   : > { %1356 = vmatpush3.bf16.msra.mxu0 %v1481_v10 }
  0x4b   : > { %1384 = vmatpush3.bf16.msra.mxu1 %v1482_v11  ;;  %1357 = vmatprep.subr.bf16.mxu0 %v1483_v12 }
  0x4c   : > { %1385 = vmatprep.subr.bf16.mxu1 %v1484_v13 }
  0x4e   : > { %1358 = vmatpush3.bf16.msra.mxu0 %v1485_v14 }
  0x4f   : > { %1386 = vmatpush3.bf16.msra.mxu1 %v1486_v15 }
  0x51   : > { %980 = vmatmul.mubr.bf16.vlgmr.msra.gmra.mxu0 %v1187_v20 }
  0x52   : > { %1029 = vmatmul.mubr.bf16.vlgmr.msra.gmra.mxu1 %v1189_v22  ;;  %987 = vmatprep.mubr.bf16.mxu0 %v1196_v27 }
  0x53   : > { %1036 = vmatprep.mubr.bf16.mxu1 %v1198_v29 }
  0x59   : > { %988 = vmatmul.mubr.bf16.gmra.mxu0 %v1195_v30 }
  0x5a   : > { %1037 = vmatmul.mubr.bf16.gmra.mxu1 %v1197_v31 }
  0xf1   : > { %v1303_v32 = vpop.f32.mrf.mxu0 }
  0xf2   : > { %v1331_v33 = vpop.f32.mrf.mxu1 }
  0xf3   : > { %v1304_v34 = vpop.f32.mrf.mxu0 }
  0xf4   : > { %v1332_v35 = vpop.f32.mrf.mxu1  ;;  %v1305_v46 = vadd.f32 %v1304_v34, %v1303_v32 }
  0xf5   : > { %v1306_v36 = vpop.f32.mrf.mxu0  ;;  %v1333_v51 = vadd.f32 %v1332_v35, %v1331_v33 }
  0xf6   : > { %v1334_v37 = vpop.f32.mrf.mxu1  ;;  %v884_v50 = vadd.f32 %v1305_v46, %v1182_v47 }
  0xf7   : > { %v1307_v38 = vpop.f32.mrf.mxu0 }
  0xf8   : > { %v1335_v39 = vpop.f32.mrf.mxu1  ;;  %v1308_v52 = vadd.f32 %v1307_v38, %v1306_v36  ;;  %v933_v58 = vadd.f32 %v1333_v51, %v884_v50 }
  0xf9   : > { %v1309_v40 = vpop.f32.mrf.mxu0  ;;  %v1336_v63 = vadd.f32 %v1335_v39, %v1334_v37 }
  0xfa   : > { %v1337_v41 = vpop.f32.mrf.mxu1  ;;  %v887_v59 = vadd.f32 %v1308_v52, %v1182_v47 }
  0xfb   : > { %v1310_v42 = vpop.f32.mrf.mxu0 }
  0xfc   : > { %v1338_v43 = vpop.f32.mrf.mxu1  ;;  %v1311_v55 = vadd.f32 %v1310_v42, %v1309_v40  ;;  %v936_v5 = vadd.f32 %v1336_v63, %v887_v59 }
  0xfd   : > { %v1312_v44 = vpop.f32.mrf.mxu0  ;;  %v1339_v2 = vadd.f32 %v1338_v43, %v1337_v41 }
  0xfe   : > { %v1340_v45 = vpop.f32.mrf.mxu1  ;;  %v892_v1 = vadd.f32 %v1311_v55, %v1182_v47 }
  0xff   : > { %v1313_v48 = vpop.f32.mrf.mxu0 }
 0x100   : > { %v1341_v49 = vpop.f32.mrf.mxu1  ;;  %v1314_v6 = vadd.f32 %v1313_v48, %v1312_v44  ;;  %v941_v14 = vadd.f32 %v1339_v2, %v892_v1 }
 0x101   : > { %v1342_v18 = vadd.f32 %v1341_v49, %v1340_v45 }
 0x102   : > { %v895_v17 = vadd.f32 %v1314_v6, %v1182_v47 }
 0x104   : > { %v944_v28 = vadd.f32 %v1342_v18, %v895_v17 }
 0x111   : > { %v1359_v53 = vpop.f32.mrf.mxu0 }
 0x112   : > { %v1387_v54 = vpop.f32.mrf.mxu1 }
 0x113   : > { %v1360_v56 = vpop.f32.mrf.mxu0 }
 0x114   : > { %v1388_v57 = vpop.f32.mrf.mxu1  ;;  %v1361_v60 = vadd.f32 %v1360_v56, %v1359_v53 }
 0x115   : > { %v1362_v61 = vpop.f32.mrf.mxu0  ;;  %v1389_v7 = vadd.f32 %v1388_v57, %v1387_v54 }
 0x116   : > { %v1390_v62 = vpop.f32.mrf.mxu1  ;;  %v982_v0 = vadd.f32 %v1361_v60, %v933_v58 }
 0x117   : > { %v1363_v3 = vpop.f32.mrf.mxu0 }
 0x118   : > { %v1391_v4 = vpop.f32.mrf.mxu1  ;;  %v1364_v8 = vadd.f32 %v1363_v3, %v1362_v61  ;;  %v1031_v11 = vadd.f32 %v1389_v7, %v982_v0 }
 0x119   : > { %v1365_v9 = vpop.f32.mrf.mxu0  ;;  %v1392_v13 = vadd.f32 %v1391_v4, %v1390_v62 }
 0x11a   : > { %v1393_v10 = vpop.f32.mrf.mxu1  ;;  %v985_v12 = vadd.f32 %v1364_v8, %v936_v5  ;;  %v1045_v23 = vmax.f32 %v1031_v11, 0.0 }
 0x11b   : > { %v1366_v15 = vpop.f32.mrf.mxu0 }
 0x11c   : > { %v1394_v16 = vpop.f32.mrf.mxu1  ;;  %v1034_v19 = vadd.f32 %v1392_v13, %v985_v12  ;;  %v1367_v20 = vadd.f32 %v1366_v15, %v1365_v9 }
 0x11d   : > { %v1368_v21 = vpop.f32.mrf.mxu0  ;;  %v1395_v30 = vadd.f32 %v1394_v16, %v1393_v10 }
 0x11e   : > { %v1396_v22 = vpop.f32.mrf.mxu1  ;;  %v1046_v24 = vmax.f32 %v1034_v19, 0.0  ;;  %v990_v25 = vadd.f32 %v1367_v20, %v941_v14 }
 0x11f   : > { %v1369_v26 = vpop.f32.mrf.mxu0 }
 0x120   : > { %v1397_v27 = vpop.f32.mrf.mxu1  ;;  %v1279_v29 = vpack.c.bf16 %v1046_v24, %v1045_v23  ;;  %v1370_v31 = vadd.f32 %v1369_v26, %v1368_v21  ;;  %v1039_v32 = vadd.f32 %v1395_v30, %v990_v25 }
 0x121   : > { %v1398_v34 = vadd.f32 %v1397_v27, %v1396_v22 }
 0x122   : > { %1280 = vst [vmem:[%s231_s29] sm:$0xff] %v1279_v29   ;;  %v993_v33 = vadd.f32 %v1370_v31, %v944_v28  ;;  %v1047_v36 = vmax.f32 %v1039_v32, 0.0 }
 0x124   : > { %v1042_v35 = vadd.f32 %v1398_v34, %v993_v33 }
 0x126   : > { %v1048_v37 = vmax.f32 %v1042_v35, 0.0 }
 0x128   : > { %v1284_v38 = vpack.c.bf16 %v1048_v37, %v1047_v36 }
 0x12a   : > { %1286 = vst [vmem:[%s231_s29 + $0x8] sm:$0xff] %v1284_v38  }
 0x12b PF: > { %s13_s14 = sadd.s32 1, %s1509_s14   ;;  %s1663_s12 = smov %s1505_s13 }
 0x12c   : > { %p10_p5 = scmp.ge.s32.totalorder %s13_s14, 6   ;;  %s1664_s13 = smov %s1666_s15 }
 0x12e   :  { %12 = sbr.rel (!%p10_p5) target bundleno = 2 (0x2), region = 65 }

// kernel: vae_forward.15
= control target key start
LH: loop header
LB: loop body
LE: loop exit
PB: predicated region body
PF: predicated region fallthrough
CT: control target
= control target key end

     0   :  { %s1517_s12 = smov 0   ;;  %s1519_s13 = smov 0   ;;  %s1660_s0 = inlined_call_operand.vmem [shape: bf16[4,128,512], index: 0, kind: input, shape index: {}]   ;;  %s1661_s1 = inlined_call_operand.vmem [shape: bf16[4,512,128], index: 1, kind: input, shape index: {}]   ;;  %s1662_s2 = inlined_call_operand.vmem [shape: f32[1,1,128], index: 2, kind: input, shape index: {}]   ;;  %s1663_s3 = inlined_call_operand.vmem [shape: bf16[4,128,128], index: 3, kind: output, shape index: {}]  }
   0x1   :  { %s1521_s14 = smov 0  }
   0x2 LB: > { %s25_s15 = sadd.s32 1, %s1491_s13  ;;  %p1085_p0 = scmp.ge.s32.totalorder %s1495_s14, 1  ;;  %s1495_s14 = sphi %s1521_s14, %s13_s14   ;;  %s1491_s13 = sphi %s1519_s13, %s1665_s13   ;;  %s1487_s12 = sphi %s1517_s12, %s1664_s12  }
   0x3   : > { %p27_p1 = scmp.ge.s32.totalorder %s25_s15, 4  ;;  %p169_p2 = scmp.lt.s32.totalorder %s1495_s14, 5 }
   0x5   : > { %s1667_s15 = smov (%p27_p1, %s25_s15), 0  ;;  %p170_p3 = pnand %p1085_p0, %p169_p2 }
   0x6   : > { %p208_p4 = scmp.lt.s32.totalorder (!%p170_p3), %s1487_s12, 3 }
   0x7   : > { %173 = sbr.rel (%p170_p3) target bundleno = 315 (0x13b), region = 32 }
   0xc   : > { %s1669_s12 = smov (!%p208_p4, %s1487_s12), 3 }
   0xd   : > { %s1175_s16 = sshll.u32 %s1669_s12, 8  ;;  %s1177_s25 = sshll.u32 %s1669_s12, 6 }
   0xe   : > { %s1543_s19 = scalar_lea.vmem %s1661_s1, %s1175_s16  ;;  %s1580_s22 = scalar_lea.vmem %s1660_s0, %s1175_s16 }
   0xf   : > { %v1393_v0 = vld [vmem:[%s1543_s19 + $0x78] sm:$0xff]   ;;  %v1397_v4 = vld [vmem:[%s1543_s19 + $0x70] sm:$0xff]   ;;  %v1401_v8 = vld [vmem:[%s1543_s19 + $0x68] sm:$0xff]   ;;  %s1628_s28 = scalar_lea.vmem %s1663_s3, %s1177_s25 }
  0x10   : > { %v1394_v1 = vld [vmem:[%s1543_s19 + $0xf8] sm:$0xff]   ;;  %1241 = vmatprep.subr.bf16.mxu0 %v1393_v0  ;;  %v1398_v5 = vld [vmem:[%s1543_s19 + $0xf0] sm:$0xff]   ;;  %v1402_v9 = vld [vmem:[%s1543_s19 + $0xe8] sm:$0xff]  }
  0x11   : > { %v1395_v2 = vld [vmem:[%s1543_s19 + $0x38] sm:$0xff]   ;;  %1305 = vmatprep.subr.bf16.mxu1 %v1394_v1  ;;  %v1399_v6 = vld [vmem:[%s1543_s19 + $0x30] sm:$0xff]   ;;  %v1403_v10 = vld [vmem:[%s1543_s19 + $0x28] sm:$0xff]  }
  0x12   : > { %v1396_v3 = vld [vmem:[%s1543_s19 + $0xb8] sm:$0xff]   ;;  %1242 = vmatpush3.bf16.msra.mxu0 %v1395_v2  ;;  %v1400_v7 = vld [vmem:[%s1543_s19 + $0xb0] sm:$0xff]   ;;  %v1404_v11 = vld [vmem:[%s1543_s19 + $0xa8] sm:$0xff]  }
  0x13   : > { %1306 = vmatpush3.bf16.msra.mxu1 %v1396_v3  ;;  %1243 = vmatprep.subr.bf16.mxu0 %v1397_v4  ;;  %v1405_v12 = vld [vmem:[%s1543_s19 + $0x60] sm:$0xff]   ;;  %v1409_v16 = vld [vmem:[%s1543_s19 + $0x58] sm:$0xff]   ;;  %v1413_v20 = vld [vmem:[%s1543_s19 + $0x50] sm:$0xff]  }
  0x14   : > { %1307 = vmatprep.subr.bf16.mxu1 %v1398_v5  ;;  %v1406_v13 = vld [vmem:[%s1543_s19 + $0xe0] sm:$0xff]   ;;  %v1410_v17 = vld [vmem:[%s1543_s19 + $0xd8] sm:$0xff]   ;;  %v1414_v21 = vld [vmem:[%s1543_s19 + $0xd0] sm:$0xff]  }
  0x15   : > { %v1407_v14 = vld [vmem:[%s1543_s19 + $0x20] sm:$0xff]   ;;  %v1411_v18 = vld [vmem:[%s1543_s19 + $0x18] sm:$0xff]   ;;  %v1415_v22 = vld [vmem:[%s1543_s19 + $0x10] sm:$0xff]  }
  0x16   : > { %1244 = vmatpush3.bf16.msra.mxu0 %v1399_v6  ;;  %v1408_v15 = vld [vmem:[%s1543_s19 + $0xa0] sm:$0xff]   ;;  %v1412_v19 = vld [vmem:[%s1543_s19 + $0x98] sm:$0xff]   ;;  %v1416_v23 = vld [vmem:[%s1543_s19 + $0x90] sm:$0xff]  }
  0x17   : > { %1308 = vmatpush3.bf16.msra.mxu1 %v1400_v7  ;;  %1245 = vmatprep.subr.bf16.mxu0 %v1401_v8  ;;  %v1417_v24 = vld [vmem:[%s1543_s19 + $0x48] sm:$0xff]   ;;  %v1421_v28 = vld [vmem:[%s1543_s19 + $0x40] sm:$0xff]  }
  0x18   : > { %1309 = vmatprep.subr.bf16.mxu1 %v1402_v9  ;;  %v1418_v25 = vld [vmem:[%s1543_s19 + $0xc8] sm:$0xff]   ;;  %v1422_v29 = vld [vmem:[%s1543_s19 + $0xc0] sm:$0xff]  }
  0x19   : > { %v1419_v26 = vld [vmem:[%s1543_s19 + $0x8] sm:$0xff]   ;;  %v1423_v30 = vld [vmem:[%s1543_s19] sm:$0xff]  }
  0x1a   : > { %1246 = vmatpush3.bf16.msra.mxu0 %v1403_v10  ;;  %v1420_v27 = vld [vmem:[%s1543_s19 + $0x88] sm:$0xff]   ;;  %v1424_v31 = vld [vmem:[%s1543_s19 + $0x80] sm:$0xff]  }
  0x1b   : > { %1310 = vmatpush3.bf16.msra.mxu1 %v1404_v11  ;;  %1247 = vmatprep.subr.bf16.mxu0 %v1405_v12  ;;  %v1425_v32 = vld [vmem:[%s1580_s22] ss:$16 sps:$4 sm:$0xff]   ;;  %v1427_v33 = vld [vmem:[%s1580_s22 + $0x4] ss:$16 sps:$4 sm:$0xff]   ;;  %v1428_v34 = vld [vmem:[%s1580_s22 + $0x8] ss:$16 sps:$4 sm:$0xff]  }
  0x1c   : > { %1311 = vmatprep.subr.bf16.mxu1 %v1406_v13  ;;  %v1430_v35 = vld [vmem:[%s1580_s22 + $0xc] ss:$16 sps:$4 sm:$0xff]   ;;  %721 = vmatprep.mubr.bf16.mxu0 %v1427_v33  ;;  %v1431_v36 = vld [vmem:[%s1580_s22 + $0x24] ss:$16 sps:$4 sm:$0xff]   ;;  %v1435_v38 = vld [vmem:[%s1580_s22 + $0x20] ss:$16 sps:$4 sm:$0xff]  }
  0x1d   : > { %818 = vmatprep.mubr.bf16.mxu1 %v1430_v35  ;;  %v1433_v37 = vld [vmem:[%s1580_s22 + $0x2c] ss:$16 sps:$4 sm:$0xff]   ;;  %v1436_v39 = vld [vmem:[%s1580_s22 + $0x28] ss:$16 sps:$4 sm:$0xff]   ;;  %v1437_v40 = vld [vmem:[%s1580_s22 + $0x44] ss:$16 sps:$4 sm:$0xff]  }
  0x1e   : > { %1248 = vmatpush3.bf16.msra.mxu0 %v1407_v14  ;;  %v1439_v41 = vld [vmem:[%s1580_s22 + $0x4c] ss:$16 sps:$4 sm:$0xff]   ;;  %v1441_v42 = vld [vmem:[%s1580_s22 + $0x40] ss:$16 sps:$4 sm:$0xff]   ;;  %v1442_v43 = vld [vmem:[%s1580_s22 + $0x48] ss:$16 sps:$4 sm:$0xff]  }
  0x1f   : > { %1312 = vmatpush3.bf16.msra.mxu1 %v1408_v15  ;;  %1249 = vmatprep.subr.bf16.mxu0 %v1409_v16  ;;  %v1443_v44 = vld [vmem:[%s1580_s22 + $0x64] ss:$16 sps:$4 sm:$0xff]   ;;  %v1445_v45 = vld [vmem:[%s1580_s22 + $0x6c] ss:$16 sps:$4 sm:$0xff]   ;;  %v1447_v46 = vld [vmem:[%s1580_s22 + $0x60] ss:$16 sps:$4 sm:$0xff]  }
  0x20   : > { %1313 = vmatprep.subr.bf16.mxu1 %v1410_v17  ;;  %v1448_v47 = vld [vmem:[%s1580_s22 + $0x68] ss:$16 sps:$4 sm:$0xff]   ;;  %v1449_v48 = vld [vmem:[%s1580_s22 + $0x84] ss:$16 sps:$4 sm:$0xff]   ;;  %v1451_v49 = vld [vmem:[%s1580_s22 + $0x8c] ss:$16 sps:$4 sm:$0xff]  }
  0x21   : > { %v1453_v50 = vld [vmem:[%s1580_s22 + $0x80] ss:$16 sps:$4 sm:$0xff]   ;;  %v1454_v51 = vld [vmem:[%s1580_s22 + $0x88] ss:$16 sps:$4 sm:$0xff]   ;;  %v1455_v52 = vld [vmem:[%s1580_s22 + $0xa4] ss:$16 sps:$4 sm:$0xff]  }
  0x22   : > { %1250 = vmatpush3.bf16.msra.mxu0 %v1411_v18  ;;  %v1457_v53 = vld [vmem:[%s1580_s22 + $0xac] ss:$16 sps:$4 sm:$0xff]   ;;  %v1459_v54 = vld [vmem:[%s1580_s22 + $0xa0] ss:$16 sps:$4 sm:$0xff]   ;;  %v1460_v55 = vld [vmem:[%s1580_s22 + $0xa8] ss:$16 sps:$4 sm:$0xff]  }
  0x23   : > { %1314 = vmatpush3.bf16.msra.mxu1 %v1412_v19  ;;  %1251 = vmatprep.subr.bf16.mxu0 %v1413_v20  ;;  %v1461_v56 = vld [vmem:[%s1580_s22 + $0xc4] ss:$16 sps:$4 sm:$0xff]   ;;  %v1463_v57 = vld [vmem:[%s1580_s22 + $0xcc] ss:$16 sps:$4 sm:$0xff]   ;;  %v1465_v58 = vld [vmem:[%s1580_s22 + $0xc0] ss:$16 sps:$4 sm:$0xff]  }
  0x24   : > { %1315 = vmatprep.subr.bf16.mxu1 %v1414_v21  ;;  %v1466_v59 = vld [vmem:[%s1580_s22 + $0xc8] ss:$16 sps:$4 sm:$0xff]   ;;  %v1467_v60 = vld [vmem:[%s1580_s22 + $0xe4] ss:$16 sps:$4 sm:$0xff]   ;;  %v1469_v61 = vld [vmem:[%s1580_s22 + $0xec] ss:$16 sps:$4 sm:$0xff]  }
  0x25   : > { %v1471_v62 = vld [vmem:[%s1580_s22 + $0xe0] ss:$16 sps:$4 sm:$0xff]   ;;  %v1472_v63 = vld [vmem:[%s1580_s22 + $0xe8] ss:$16 sps:$4 sm:$0xff]  }
  0x26   : > { %1252 = vmatpush3.bf16.msra.mxu0 %v1415_v22  ;;  %v1619_v2 = vld [vmem:[%s1662_s2] ss:$0 sm:$0xff] }
  0x27   : > { %1316 = vmatpush3.bf16.msra.mxu1 %v1416_v23  ;;  %1253 = vmatprep.subr.bf16.mxu0 %v1417_v24 }
  0x28   : > { %1317 = vmatprep.subr.bf16.mxu1 %v1418_v25 }
  0x2a   : > { %1254 = vmatpush3.bf16.msra.mxu0 %v1419_v26 }
  0x2b   : > { %1318 = vmatpush3.bf16.msra.mxu1 %v1420_v27  ;;  %1255 = vmatprep.subr.bf16.mxu0 %v1421_v28 }
  0x2c   : > { %1319 = vmatprep.subr.bf16.mxu1 %v1422_v29 }
  0x2e   : > { %1256 = vmatpush3.bf16.msra.mxu0 %v1423_v30 }
  0x2f   : > { %1320 = vmatpush3.bf16.msra.mxu1 %v1424_v31 }
  0x31   : > { %722 = vmatmul.mubr.bf16.vlgmr.msra.gmra.mxu0 %v1425_v32 }
  0x32   : > { %819 = vmatmul.mubr.bf16.vlgmr.msra.gmra.mxu1 %v1428_v34  ;;  %729 = vmatprep.mubr.bf16.mxu0 %v1431_v36 }
  0x33   : > { %826 = vmatprep.mubr.bf16.mxu1 %v1433_v37 }
  0x39   : > { %730 = vmatmul.mubr.bf16.gmra.mxu0 %v1435_v38 }
  0x3a   : > { %827 = vmatmul.mubr.bf16.gmra.mxu1 %v1436_v39  ;;  %737 = vmatprep.mubr.bf16.mxu0 %v1437_v40 }
  0x3b   : > { %834 = vmatprep.mubr.bf16.mxu1 %v1439_v41 }
  0x41   : > { %738 = vmatmul.mubr.bf16.gmra.mxu0 %v1441_v42 }
  0x42   : > { %835 = vmatmul.mubr.bf16.gmra.mxu1 %v1442_v43  ;;  %745 = vmatprep.mubr.bf16.mxu0 %v1443_v44 }
  0x43   : > { %842 = vmatprep.mubr.bf16.mxu1 %v1445_v45 }
  0x49   : > { %746 = vmatmul.mubr.bf16.gmra.mxu0 %v1447_v46 }
  0x4a   : > { %843 = vmatmul.mubr.bf16.gmra.mxu1 %v1448_v47  ;;  %753 = vmatprep.mubr.bf16.mxu0 %v1449_v48 }
  0x4b   : > { %850 = vmatprep.mubr.bf16.mxu1 %v1451_v49 }
  0x51   : > { %754 = vmatmul.mubr.bf16.gmra.mxu0 %v1453_v50 }
  0x52   : > { %851 = vmatmul.mubr.bf16.gmra.mxu1 %v1454_v51  ;;  %761 = vmatprep.mubr.bf16.mxu0 %v1455_v52 }
  0x53   : > { %858 = vmatprep.mubr.bf16.mxu1 %v1457_v53 }
  0x59   : > { %762 = vmatmul.mubr.bf16.gmra.mxu0 %v1459_v54 }
  0x5a   : > { %859 = vmatmul.mubr.bf16.gmra.mxu1 %v1460_v55  ;;  %769 = vmatprep.mubr.bf16.mxu0 %v1461_v56 }
  0x5b   : > { %866 = vmatprep.mubr.bf16.mxu1 %v1463_v57 }
  0x61   : > { %770 = vmatmul.mubr.bf16.gmra.mxu0 %v1465_v58 }
  0x62   : > { %867 = vmatmul.mubr.bf16.gmra.mxu1 %v1466_v59  ;;  %777 = vmatprep.mubr.bf16.mxu0 %v1467_v60 }
  0x63   : > { %874 = vmatprep.mubr.bf16.mxu1 %v1469_v61 }
  0x69   : > { %778 = vmatmul.mubr.bf16.gmra.mxu0 %v1471_v62 }
  0x6a   : > { %875 = vmatmul.mubr.bf16.gmra.mxu1 %v1472_v63 }
  0xf1   : > { %v1257_v0 = vpop.f32.mrf.mxu0 }
  0xf2   : > { %v1321_v1 = vpop.f32.mrf.mxu1 }
  0xf3   : > { %v1258_v3 = vpop.f32.mrf.mxu0 }
  0xf4   : > { %v1259_v4 = vadd.f32 %v1258_v3, %v1257_v0  ;;  %v1322_v5 = vpop.f32.mrf.mxu1 }
  0xf5   : > { %v1260_v6 = vpop.f32.mrf.mxu0  ;;  %v1323_v10 = vadd.f32 %v1322_v5, %v1321_v1 }
  0xf6   : > { %v724_v7 = vadd.f32 %v1259_v4, %v1619_v2  ;;  %v1324_v8 = vpop.f32.mrf.mxu1 }
  0xf7   : > { %v1261_v9 = vpop.f32.mrf.mxu0 }
  0xf8   : > { %v1262_v11 = vadd.f32 %v1261_v9, %v1260_v6  ;;  %v1325_v12 = vpop.f32.mrf.mxu1  ;;  %v821_v14 = vadd.f32 %v1323_v10, %v724_v7 }
  0xf9   : > { %v1263_v13 = vpop.f32.mrf.mxu0  ;;  %v1326_v16 = vadd.f32 %v1325_v12, %v1324_v8 }
  0xfa   : > { %v727_v15 = vadd.f32 %v1262_v11, %v1619_v2  ;;  %v1327_v17 = vpop.f32.mrf.mxu1  ;;  %v883_v23 = vmax.f32 %v821_v14, 0.0 }
  0xfb   : > { %v1264_v18 = vpop.f32.mrf.mxu0 }
  0xfc   : > { %v824_v19 = vadd.f32 %v1326_v16, %v727_v15  ;;  %v1265_v20 = vadd.f32 %v1264_v18, %v1263_v13  ;;  %v1328_v21 = vpop.f32.mrf.mxu1 }
  0xfd   : > { %v1266_v22 = vpop.f32.mrf.mxu0  ;;  %v1329_v29 = vadd.f32 %v1328_v21, %v1327_v17 }
  0xfe   : > { %v884_v24 = vmax.f32 %v824_v19, 0.0  ;;  %v732_v25 = vadd.f32 %v1265_v20, %v1619_v2  ;;  %v1330_v26 = vpop.f32.mrf.mxu1 }
  0xff   : > { %v1267_v27 = vpop.f32.mrf.mxu0 }
 0x100   : > { %v1197_v28 = vpack.c.bf16 %v884_v24, %v883_v23  ;;  %v1268_v30 = vadd.f32 %v1267_v27, %v1266_v22  ;;  %v1331_v31 = vpop.f32.mrf.mxu1  ;;  %v829_v33 = vadd.f32 %v1329_v29, %v732_v25 }
 0x101   : > { %v1269_v32 = vpop.f32.mrf.mxu0  ;;  %v1332_v35 = vadd.f32 %v1331_v31, %v1330_v26 }
 0x102   : > { %1198 = vst [vmem:[%s1628_s28] sm:$0xff] %v1197_v28   ;;  %v735_v34 = vadd.f32 %v1268_v30, %v1619_v2  ;;  %v1333_v36 = vpop.f32.mrf.mxu1  ;;  %v885_v42 = vmax.f32 %v829_v33, 0.0 }
 0x103   : > { %v1270_v37 = vpop.f32.mrf.mxu0 }
 0x104   : > { %v832_v38 = vadd.f32 %v1332_v35, %v735_v34  ;;  %v1271_v39 = vadd.f32 %v1270_v37, %v1269_v32  ;;  %v1334_v40 = vpop.f32.mrf.mxu1 }
 0x105   : > { %v1272_v41 = vpop.f32.mrf.mxu0  ;;  %v1335_v48 = vadd.f32 %v1334_v40, %v1333_v36 }
 0x106   : > { %v886_v43 = vmax.f32 %v832_v38, 0.0  ;;  %v740_v44 = vadd.f32 %v1271_v39, %v1619_v2  ;;  %v1336_v45 = vpop.f32.mrf.mxu1 }
 0x107   : > { %v1273_v46 = vpop.f32.mrf.mxu0 }
 0x108   : > { %v1202_v47 = vpack.c.bf16 %v886_v43, %v885_v42  ;;  %v1274_v49 = vadd.f32 %v1273_v46, %v1272_v41  ;;  %v1337_v50 = vpop.f32.mrf.mxu1  ;;  %v837_v52 = vadd.f32 %v1335_v48, %v740_v44 }
 0x109   : > { %v1275_v51 = vpop.f32.mrf.mxu0  ;;  %v1338_v54 = vadd.f32 %v1337_v50, %v1336_v45 }
 0x10a   : > { %1234 = vst [vmem:[%s1628_s28 + $0x8] sm:$0xff] %v1202_v47   ;;  %v743_v53 = vadd.f32 %v1274_v49, %v1619_v2  ;;  %v1339_v55 = vpop.f32.mrf.mxu1  ;;  %v887_v61 = vmax.f32 %v837_v52, 0.0 }
 0x10b   : > { %v1276_v56 = vpop.f32.mrf.mxu0 }
 0x10c   : > { %v840_v57 = vadd.f32 %v1338_v54, %v743_v53  ;;  %v1277_v58 = vadd.f32 %v1276_v56, %v1275_v51  ;;  %v1340_v59 = vpop.f32.mrf.mxu1 }
 0x10d   : > { %v1278_v60 = vpop.f32.mrf.mxu0  ;;  %v1341_v4 = vadd.f32 %v1340_v59, %v1339_v55 }
 0x10e   : > { %v888_v62 = vmax.f32 %v840_v57, 0.0  ;;  %v748_v63 = vadd.f32 %v1277_v58, %v1619_v2  ;;  %v1342_v0 = vpop.f32.mrf.mxu1 }
 0x10f   : > { %v1279_v1 = vpop.f32.mrf.mxu0 }
 0x110   : > { %v1207_v3 = vpack.c.bf16 %v888_v62, %v887_v61  ;;  %v1280_v5 = vadd.f32 %v1279_v1, %v1278_v60  ;;  %v1343_v6 = vpop.f32.mrf.mxu1  ;;  %v845_v8 = vadd.f32 %v1341_v4, %v748_v63 }
 0x111   : > { %v1281_v7 = vpop.f32.mrf.mxu0  ;;  %v1344_v10 = vadd.f32 %v1343_v6, %v1342_v0 }
 0x112   : > { %1235 = vst [vmem:[%s1628_s28 + $0x10] sm:$0xff] %v1207_v3   ;;  %v751_v9 = vadd.f32 %v1280_v5, %v1619_v2  ;;  %v1345_v11 = vpop.f32.mrf.mxu1  ;;  %v889_v17 = vmax.f32 %v845_v8, 0.0 }
 0x113   : > { %v1282_v12 = vpop.f32.mrf.mxu0 }
 0x114   : > { %v848_v13 = vadd.f32 %v1344_v10, %v751_v9  ;;  %v1283_v14 = vadd.f32 %v1282_v12, %v1281_v7  ;;  %v1346_v15 = vpop.f32.mrf.mxu1 }
 0x115   : > { %v1284_v16 = vpop.f32.mrf.mxu0  ;;  %v1347_v23 = vadd.f32 %v1346_v15, %v1345_v11 }
 0x116   : > { %v890_v18 = vmax.f32 %v848_v13, 0.0  ;;  %v756_v19 = vadd.f32 %v1283_v14, %v1619_v2  ;;  %v1348_v20 = vpop.f32.mrf.mxu1 }
 0x117   : > { %v1285_v21 = vpop.f32.mrf.mxu0 }
 0x118   : > { %v1212_v22 = vpack.c.bf16 %v890_v18, %v889_v17  ;;  %v1286_v24 = vadd.f32 %v1285_v21, %v1284_v16  ;;  %v1349_v25 = vpop.f32.mrf.mxu1  ;;  %v853_v27 = vadd.f32 %v1347_v23, %v756_v19 }
 0x119   : > { %v1287_v26 = vpop.f32.mrf.mxu0  ;;  %v1350_v29 = vadd.f32 %v1349_v25, %v1348_v20 }
 0x11a   : > { %1236 = vst [vmem:[%s1628_s28 + $0x18] sm:$0xff] %v1212_v22   ;;  %v759_v28 = vadd.f32 %v1286_v24, %v1619_v2  ;;  %v1351_v30 = vpop.f32.mrf.mxu1  ;;  %v891_v36 = vmax.f32 %v853_v27, 0.0 }
 0x11b   : > { %v1288_v31 = vpop.f32.mrf.mxu0 }
 0x11c   : > { %v856_v32 = vadd.f32 %v1350_v29, %v759_v28  ;;  %v1289_v33 = vadd.f32 %v1288_v31, %v1287_v26  ;;  %v1352_v34 = vpop.f32.mrf.mxu1 }
 0x11d   : > { %v1290_v35 = vpop.f32.mrf.mxu0  ;;  %v1353_v42 = vadd.f32 %v1352_v34, %v1351_v30 }
 0x11e   : > { %v892_v37 = vmax.f32 %v856_v32, 0.0  ;;  %v764_v38 = vadd.f32 %v1289_v33, %v1619_v2  ;;  %v1354_v39 = vpop.f32.mrf.mxu1 }
 0x11f   : > { %v1291_v40 = vpop.f32.mrf.mxu0 }
 0x120   : > { %v1217_v41 = vpack.c.bf16 %v892_v37, %v891_v36  ;;  %v1292_v43 = vadd.f32 %v1291_v40, %v1290_v35  ;;  %v1355_v44 = vpop.f32.mrf.mxu1  ;;  %v861_v46 = vadd.f32 %v1353_v42, %v764_v38 }
 0x121   : > { %v1293_v45 = vpop.f32.mrf.mxu0  ;;  %v1356_v48 = vadd.f32 %v1355_v44, %v1354_v39 }
 0x122   : > { %1237 = vst [vmem:[%s1628_s28 + $0x20] sm:$0xff] %v1217_v41   ;;  %v767_v47 = vadd.f32 %v1292_v43, %v1619_v2  ;;  %v1357_v49 = vpop.f32.mrf.mxu1  ;;  %v893_v55 = vmax.f32 %v861_v46, 0.0 }
 0x123   : > { %v1294_v50 = vpop.f32.mrf.mxu0 }
 0x124   : > { %v864_v51 = vadd.f32 %v1356_v48, %v767_v47  ;;  %v1295_v52 = vadd.f32 %v1294_v50, %v1293_v45  ;;  %v1358_v53 = vpop.f32.mrf.mxu1 }
 0x125   : > { %v1296_v54 = vpop.f32.mrf.mxu0  ;;  %v1359_v61 = vadd.f32 %v1358_v53, %v1357_v49 }
 0x126   : > { %v894_v56 = vmax.f32 %v864_v51, 0.0  ;;  %v772_v57 = vadd.f32 %v1295_v52, %v1619_v2  ;;  %v1360_v58 = vpop.f32.mrf.mxu1 }
 0x127   : > { %v1297_v59 = vpop.f32.mrf.mxu0 }
 0x128   : > { %v1222_v60 = vpack.c.bf16 %v894_v56, %v893_v55  ;;  %v1298_v62 = vadd.f32 %v1297_v59, %v1296_v54  ;;  %v1361_v63 = vpop.f32.mrf.mxu1  ;;  %v869_v1 = vadd.f32 %v1359_v61, %v772_v57 }
 0x129   : > { %v1299_v0 = vpop.f32.mrf.mxu0  ;;  %v1362_v4 = vadd.f32 %v1361_v63, %v1360_v58 }
 0x12a   : > { %1238 = vst [vmem:[%s1628_s28 + $0x28] sm:$0xff] %v1222_v60   ;;  %v775_v3 = vadd.f32 %v1298_v62, %v1619_v2  ;;  %v1363_v5 = vpop.f32.mrf.mxu1  ;;  %v895_v11 = vmax.f32 %v869_v1, 0.0 }
 0x12b   : > { %v1300_v6 = vpop.f32.mrf.mxu0 }
 0x12c   : > { %v872_v7 = vadd.f32 %v1362_v4, %v775_v3  ;;  %v1301_v8 = vadd.f32 %v1300_v6, %v1299_v0  ;;  %v1364_v9 = vpop.f32.mrf.mxu1 }
 0x12d   : > { %v1302_v10 = vpop.f32.mrf.mxu0  ;;  %v1365_v17 = vadd.f32 %v1364_v9, %v1363_v5 }
 0x12e   : > { %v896_v12 = vmax.f32 %v872_v7, 0.0  ;;  %v780_v13 = vadd.f32 %v1301_v8, %v1619_v2  ;;  %v1366_v14 = vpop.f32.mrf.mxu1 }
 0x12f   : > { %v1303_v15 = vpop.f32.mrf.mxu0 }
 0x130   : > { %v1227_v16 = vpack.c.bf16 %v896_v12, %v895_v11  ;;  %v1304_v18 = vadd.f32 %v1303_v15, %v1302_v10  ;;  %v1367_v19 = vpop.f32.mrf.mxu1  ;;  %v877_v20 = vadd.f32 %v1365_v17, %v780_v13 }
 0x131   : > { %v1368_v22 = vadd.f32 %v1367_v19, %v1366_v14 }
 0x132   : > { %1239 = vst [vmem:[%s1628_s28 + $0x30] sm:$0xff] %v1227_v16   ;;  %v783_v21 = vadd.f32 %v1304_v18, %v1619_v2  ;;  %v897_v24 = vmax.f32 %v877_v20, 0.0 }
 0x134   : > { %v880_v23 = vadd.f32 %v1368_v22, %v783_v21 }
 0x136   : > { %v898_v25 = vmax.f32 %v880_v23, 0.0 }
 0x138   : > { %v1232_v26 = vpack.c.bf16 %v898_v25, %v897_v24 }
 0x13a   : > { %1240 = vst [vmem:[%s1628_s28 + $0x38] sm:$0xff] %v1232_v26  }
 0x13b PF: > { %s13_s14 = sadd.s32 1, %s1495_s14   ;;  %s1664_s12 = smov %s1491_s13 }
 0x13c   : > { %p10_p5 = scmp.ge.s32.totalorder %s13_s14, 6   ;;  %s1665_s13 = smov %s1667_s15 }
 0x13e   :  { %12 = sbr.rel (!%p10_p5) target bundleno = 2 (0x2), region = 65 }

// kernel: vae_forward.16
= control target key start
LH: loop header
LB: loop body
LE: loop exit
PB: predicated region body
PF: predicated region fallthrough
CT: control target
= control target key end

     0   :  { %s2158_s12 = smov 0   ;;  %s2160_s13 = smov 0   ;;  %s2418_s0 = inlined_call_operand.vmem [shape: bf16[4,512,256], index: 0, kind: input, shape index: {}]   ;;  %s2419_s1 = inlined_call_operand.vmem [shape: bf16[4,256,128], index: 1, kind: input, shape index: {}]   ;;  %s2420_s2 = inlined_call_operand.vmem [shape: f32[1,1,128], index: 2, kind: input, shape index: {}]   ;;  %s2421_s3 = inlined_call_operand.vmem [shape: bf16[4,512,128], index: 3, kind: output, shape index: {}]  }
   0x1   :  { %s2162_s14 = smov 0  }
   0x2 LB: > { %s25_s15 = sadd.s32 1, %s2131_s13  ;;  %p1532_p0 = scmp.ge.s32.totalorder %s2135_s14, 1  ;;  %s2135_s14 = sphi %s2162_s14, %s13_s14   ;;  %s2131_s13 = sphi %s2160_s13, %s2423_s13   ;;  %s2127_s12 = sphi %s2158_s12, %s2422_s12  }
   0x3   : > { %p27_p1 = scmp.ge.s32.totalorder %s25_s15, 4  ;;  %p169_p2 = scmp.lt.s32.totalorder %s2135_s14, 5 }
   0x5   : > { %s2425_s15 = smov (%p27_p1, %s25_s15), 0  ;;  %p170_p3 = pnand %p1532_p0, %p169_p2 }
   0x6   : > { %p208_p4 = scmp.lt.s32.totalorder (!%p170_p3), %s2127_s12, 3 }
   0x7   : > { %173 = sbr.rel (%p170_p3) target bundleno = 403 (0x193), region = 32 }
   0xc   : > { %v2137_v0 = vmov 0   ;;  %s2427_s12 = smov (!%p208_p4, %s2127_s12), 3 }
   0xd   : > { %753 = vmatprep.subr.bf16.mxu0 %v2137_v0  ;;  %1944 = vmatprep.subr.bf16.mxu1 %v2137_v0  ;;  %s1687_s16 = sshll.u32 %s2427_s12, 7  ;;  %s1686_s20 = sshll.u32 %s2427_s12, 9 }
   0xe   : > { %s2184_s19 = scalar_lea.vmem %s2419_s1, %s1687_s16  ;;  %s2200_s23 = scalar_lea.vmem %s2418_s0, %s1686_s20 }
   0xf   : > { %v2001_v1 = vld [vmem:[%s2184_s19 + $0x38] sm:$0xff]   ;;  %v2002_v2 = vld [vmem:[%s2184_s19 + $0x30] sm:$0xff]   ;;  %v2003_v3 = vld [vmem:[%s2184_s19 + $0x28] sm:$0xff]   ;;  %s1688_s26 = sshll.u32 %s2427_s12, 8 }
  0x10   : > { %754 = vmatpush1.bf16.msra.mxu0 %v2001_v1  ;;  %1960 = vmatpush1.bf16.msra.mxu1 %v2001_v1  ;;  %v2004_v4 = vld [vmem:[%s2184_s19 + $0x20] sm:$0xff]   ;;  %v2005_v5 = vld [vmem:[%s2184_s19 + $0x18] sm:$0xff]   ;;  %v2006_v7 = vld [vmem:[%s2184_s19 + $0x10] sm:$0xff]   ;;  %s2315_s29 = scalar_lea.vmem %s2421_s3, %s1688_s26 }
  0x11   : > { %755 = vmatprep.subr.bf16.mxu0 %v2137_v0  ;;  %1945 = vmatprep.subr.bf16.mxu1 %v2137_v0  ;;  %v2019_v6 = vld [vmem:[%s2200_s23 + $0x4] ss:$8 sps:$4 sm:$0xff]   ;;  %v2009_v11 = vld [vmem:[%s2184_s19 + $0x78] sm:$0xff]   ;;  %v2010_v12 = vld [vmem:[%s2184_s19 + $0x70] sm:$0xff]  }
  0x12   : > { %v2022_v8 = vld [vmem:[%s2200_s23 + $0x104] ss:$8 sps:$4 sm:$0xff]   ;;  %785 = vmatprep.mubr.bf16.mxu0 %v2019_v6  ;;  %v2013_v15 = vld [vmem:[%s2184_s19 + $0x58] sm:$0xff]   ;;  %v2014_v16 = vld [vmem:[%s2184_s19 + $0x50] sm:$0xff]  }
  0x13   : > { %913 = vmatprep.mubr.bf16.mxu1 %v2022_v8  ;;  %v2007_v9 = vld [vmem:[%s2184_s19 + $0x8] sm:$0xff]   ;;  %v2008_v10 = vld [vmem:[%s2184_s19] sm:$0xff]   ;;  %v2023_v21 = vld [vmem:[%s2200_s23 + $0x14] ss:$8 sps:$4 sm:$0xff]  }
  0x14   : > { %756 = vmatpush1.bf16.msra.mxu0 %v2002_v2  ;;  %1961 = vmatpush1.bf16.msra.mxu1 %v2002_v2  ;;  %v2011_v13 = vld [vmem:[%s2184_s19 + $0x68] sm:$0xff]   ;;  %v2012_v14 = vld [vmem:[%s2184_s19 + $0x60] sm:$0xff]   ;;  %v2025_v22 = vld [vmem:[%s2200_s23 + $0x114] ss:$8 sps:$4 sm:$0xff]  }
  0x15   : > { %757 = vmatprep.subr.bf16.mxu0 %v2137_v0  ;;  %1946 = vmatprep.subr.bf16.mxu1 %v2137_v0  ;;  %v2015_v17 = vld [vmem:[%s2184_s19 + $0x48] sm:$0xff]   ;;  %v2016_v18 = vld [vmem:[%s2184_s19 + $0x40] sm:$0xff]   ;;  %v2027_v23 = vld [vmem:[%s2200_s23 + $0x10] ss:$8 sps:$4 sm:$0xff]  }
  0x16   : > { %v2017_v19 = vld [vmem:[%s2200_s23] ss:$8 sps:$4 sm:$0xff]   ;;  %v2028_v24 = vld [vmem:[%s2200_s23 + $0x110] ss:$8 sps:$4 sm:$0xff]   ;;  %v2029_v25 = vld [vmem:[%s2200_s23 + $0x24] ss:$8 sps:$4 sm:$0xff]  }
  0x17   : > { %v2020_v20 = vld [vmem:[%s2200_s23 + $0x100] ss:$8 sps:$4 sm:$0xff]   ;;  %v2031_v26 = vld [vmem:[%s2200_s23 + $0x124] ss:$8 sps:$4 sm:$0xff]   ;;  %v2035_v29 = vld [vmem:[%s2200_s23 + $0x34] ss:$8 sps:$4 sm:$0xff]  }
  0x18   : > { %758 = vmatpush1.bf16.msra.mxu0 %v2003_v3  ;;  %1962 = vmatpush1.bf16.msra.mxu1 %v2003_v3  ;;  %v2033_v27 = vld [vmem:[%s2200_s23 + $0x20] ss:$8 sps:$4 sm:$0xff]   ;;  %v2037_v30 = vld [vmem:[%s2200_s23 + $0x134] ss:$8 sps:$4 sm:$0xff]   ;;  %v2039_v31 = vld [vmem:[%s2200_s23 + $0x30] ss:$8 sps:$4 sm:$0xff]  }
  0x19   : > { %759 = vmatprep.subr.bf16.mxu0 %v2137_v0  ;;  %1947 = vmatprep.subr.bf16.mxu1 %v2137_v0  ;;  %v2034_v28 = vld [vmem:[%s2200_s23 + $0x120] ss:$8 sps:$4 sm:$0xff]   ;;  %v2040_v32 = vld [vmem:[%s2200_s23 + $0x130] ss:$8 sps:$4 sm:$0xff]   ;;  %v2041_v33 = vld [vmem:[%s2200_s23 + $0x44] ss:$8 sps:$4 sm:$0xff]  }
  0x1a   : > { %v2043_v34 = vld [vmem:[%s2200_s23 + $0x144] ss:$8 sps:$4 sm:$0xff]   ;;  %v2045_v35 = vld [vmem:[%s2200_s23 + $0x40] ss:$8 sps:$4 sm:$0xff]   ;;  %v2047_v37 = vld [vmem:[%s2200_s23 + $0x54] ss:$8 sps:$4 sm:$0xff]  }
  0x1b   : > { %v2046_v36 = vld [vmem:[%s2200_s23 + $0x140] ss:$8 sps:$4 sm:$0xff]   ;;  %v2049_v38 = vld [vmem:[%s2200_s23 + $0x154] ss:$8 sps:$4 sm:$0xff]   ;;  %v2051_v39 = vld [vmem:[%s2200_s23 + $0x50] ss:$8 sps:$4 sm:$0xff]  }
  0x1c   : > { %760 = vmatpush1.bf16.msra.mxu0 %v2004_v4  ;;  %1963 = vmatpush1.bf16.msra.mxu1 %v2004_v4  ;;  %v2052_v40 = vld [vmem:[%s2200_s23 + $0x150] ss:$8 sps:$4 sm:$0xff]   ;;  %v2053_v41 = vld [vmem:[%s2200_s23 + $0x64] ss:$8 sps:$4 sm:$0xff]   ;;  %v2057_v43 = vld [vmem:[%s2200_s23 + $0x60] ss:$8 sps:$4 sm:$0xff]  }
  0x1d   : > { %761 = vmatprep.subr.bf16.mxu0 %v2137_v0  ;;  %1948 = vmatprep.subr.bf16.mxu1 %v2137_v0  ;;  %v2055_v42 = vld [vmem:[%s2200_s23 + $0x164] ss:$8 sps:$4 sm:$0xff]   ;;  %v2058_v44 = vld [vmem:[%s2200_s23 + $0x160] ss:$8 sps:$4 sm:$0xff]   ;;  %v2059_v45 = vld [vmem:[%s2200_s23 + $0x74] ss:$8 sps:$4 sm:$0xff]  }
  0x1e   : > { %v2061_v46 = vld [vmem:[%s2200_s23 + $0x174] ss:$8 sps:$4 sm:$0xff]   ;;  %v2063_v47 = vld [vmem:[%s2200_s23 + $0x70] ss:$8 sps:$4 sm:$0xff]   ;;  %v2065_v49 = vld [vmem:[%s2200_s23 + $0x84] ss:$8 sps:$4 sm:$0xff]  }
  0x1f   : > { %v2064_v48 = vld [vmem:[%s2200_s23 + $0x170] ss:$8 sps:$4 sm:$0xff]   ;;  %v2067_v50 = vld [vmem:[%s2200_s23 + $0x184] ss:$8 sps:$4 sm:$0xff]   ;;  %v2069_v51 = vld [vmem:[%s2200_s23 + $0x80] ss:$8 sps:$4 sm:$0xff]  }
  0x20   : > { %762 = vmatpush1.bf16.msra.mxu0 %v2005_v5  ;;  %1964 = vmatpush1.bf16.msra.mxu1 %v2005_v5  ;;  %v2070_v52 = vld [vmem:[%s2200_s23 + $0x180] ss:$8 sps:$4 sm:$0xff]   ;;  %v2071_v53 = vld [vmem:[%s2200_s23 + $0x94] ss:$8 sps:$4 sm:$0xff]   ;;  %v2075_v55 = vld [vmem:[%s2200_s23 + $0x90] ss:$8 sps:$4 sm:$0xff]  }
  0x21   : > { %763 = vmatprep.subr.bf16.mxu0 %v2137_v0  ;;  %1949 = vmatprep.subr.bf16.mxu1 %v2137_v0  ;;  %v2073_v54 = vld [vmem:[%s2200_s23 + $0x194] ss:$8 sps:$4 sm:$0xff]   ;;  %v2076_v56 = vld [vmem:[%s2200_s23 + $0x190] ss:$8 sps:$4 sm:$0xff]   ;;  %v2077_v57 = vld [vmem:[%s2200_s23 + $0xa4] ss:$8 sps:$4 sm:$0xff]  }
  0x22   : > { %v2079_v58 = vld [vmem:[%s2200_s23 + $0x1a4] ss:$8 sps:$4 sm:$0xff]   ;;  %v2081_v59 = vld [vmem:[%s2200_s23 + $0xa0] ss:$8 sps:$4 sm:$0xff]   ;;  %v2083_v61 = vld [vmem:[%s2200_s23 + $0xb4] ss:$8 sps:$4 sm:$0xff]  }
  0x23   : > { %v2082_v60 = vld [vmem:[%s2200_s23 + $0x1a0] ss:$8 sps:$4 sm:$0xff]   ;;  %v2085_v62 = vld [vmem:[%s2200_s23 + $0x1b4] ss:$8 sps:$4 sm:$0xff]   ;;  %v2087_v63 = vld [vmem:[%s2200_s23 + $0xb0] ss:$8 sps:$4 sm:$0xff]  }
  0x24   : > { %764 = vmatpush1.bf16.msra.mxu0 %v2006_v7  ;;  %1965 = vmatpush1.bf16.msra.mxu1 %v2006_v7  ;;  %v2089_v1 = vld [vmem:[%s2200_s23 + $0xc4] ss:$8 sps:$4 sm:$0xff]   ;;  %v2093_v3 = vld [vmem:[%s2200_s23 + $0xc0] ss:$8 sps:$4 sm:$0xff]   ;;  %v2095_v5 = vld [vmem:[%s2200_s23 + $0xd4] ss:$8 sps:$4 sm:$0xff]  }
  0x25   : > { %765 = vmatprep.subr.bf16.mxu0 %v2137_v0  ;;  %1950 = vmatprep.subr.bf16.mxu1 %v2137_v0  ;;  %v2091_v2 = vld [vmem:[%s2200_s23 + $0x1c4] ss:$8 sps:$4 sm:$0xff]   ;;  %v2094_v4 = vld [vmem:[%s2200_s23 + $0x1c0] ss:$8 sps:$4 sm:$0xff]   ;;  %v2097_v6 = vld [vmem:[%s2200_s23 + $0x1d4] ss:$8 sps:$4 sm:$0xff]  }
  0x26   : > { %v2099_v7 = vld [vmem:[%s2200_s23 + $0xd0] ss:$8 sps:$4 sm:$0xff]  }
  0x27   : > { %v2100_v8 = vld [vmem:[%s2200_s23 + $0x1d0] ss:$8 sps:$4 sm:$0xff]  }
  0x28   : > { %766 = vmatpush1.bf16.msra.mxu0 %v2007_v9  ;;  %1966 = vmatpush1.bf16.msra.mxu1 %v2007_v9  ;;  %v2101_v9 = vld [vmem:[%s2200_s23 + $0xe4] ss:$8 sps:$4 sm:$0xff]  }
  0x29   : > { %767 = vmatprep.subr.bf16.mxu0 %v2137_v0  ;;  %1951 = vmatprep.subr.bf16.mxu1 %v2137_v0 }
  0x2c   : > { %768 = vmatpush1.bf16.msra.mxu0 %v2008_v10  ;;  %1967 = vmatpush1.bf16.msra.mxu1 %v2008_v10  ;;  %v2103_v10 = vld [vmem:[%s2200_s23 + $0x1e4] ss:$8 sps:$4 sm:$0xff]  }
  0x2d   : > { %769 = vmatprep.subr.bf16.mxu0 %v2137_v0  ;;  %1952 = vmatprep.subr.bf16.mxu1 %v2137_v0 }
  0x30   : > { %770 = vmatpush2.bf16.msra.mxu0 %v2009_v11  ;;  %1968 = vmatpush2.bf16.msra.mxu1 %v2009_v11  ;;  %v2105_v11 = vld [vmem:[%s2200_s23 + $0xe0] ss:$8 sps:$4 sm:$0xff]  }
  0x31   : > { %771 = vmatprep.subr.bf16.mxu0 %v2137_v0  ;;  %1953 = vmatprep.subr.bf16.mxu1 %v2137_v0 }
  0x34   : > { %772 = vmatpush2.bf16.msra.mxu0 %v2010_v12  ;;  %1969 = vmatpush2.bf16.msra.mxu1 %v2010_v12  ;;  %v2106_v12 = vld [vmem:[%s2200_s23 + $0x1e0] ss:$8 sps:$4 sm:$0xff]  }
  0x35   : > { %773 = vmatprep.subr.bf16.mxu0 %v2137_v0  ;;  %1954 = vmatprep.subr.bf16.mxu1 %v2137_v0 }
  0x38   : > { %774 = vmatpush2.bf16.msra.mxu0 %v2011_v13  ;;  %1970 = vmatpush2.bf16.msra.mxu1 %v2011_v13  ;;  %v2107_v13 = vld [vmem:[%s2200_s23 + $0xf4] ss:$8 sps:$4 sm:$0xff]  }
  0x39   : > { %775 = vmatprep.subr.bf16.mxu0 %v2137_v0  ;;  %1955 = vmatprep.subr.bf16.mxu1 %v2137_v0 }
  0x3c   : > { %776 = vmatpush2.bf16.msra.mxu0 %v2012_v14  ;;  %1971 = vmatpush2.bf16.msra.mxu1 %v2012_v14  ;;  %v2109_v14 = vld [vmem:[%s2200_s23 + $0x1f4] ss:$8 sps:$4 sm:$0xff]  }
  0x3d   : > { %777 = vmatprep.subr.bf16.mxu0 %v2137_v0  ;;  %1956 = vmatprep.subr.bf16.mxu1 %v2137_v0 }
  0x40   : > { %778 = vmatpush2.bf16.msra.mxu0 %v2013_v15  ;;  %1972 = vmatpush2.bf16.msra.mxu1 %v2013_v15  ;;  %v2111_v15 = vld [vmem:[%s2200_s23 + $0xf0] ss:$8 sps:$4 sm:$0xff]  }
  0x41   : > { %779 = vmatprep.subr.bf16.mxu0 %v2137_v0  ;;  %1957 = vmatprep.subr.bf16.mxu1 %v2137_v0 }
  0x44   : > { %780 = vmatpush2.bf16.msra.mxu0 %v2014_v16  ;;  %1973 = vmatpush2.bf16.msra.mxu1 %v2014_v16  ;;  %v2112_v16 = vld [vmem:[%s2200_s23 + $0x1f0] ss:$8 sps:$4 sm:$0xff]  }
  0x45   : > { %781 = vmatprep.subr.bf16.mxu0 %v2137_v0  ;;  %1958 = vmatprep.subr.bf16.mxu1 %v2137_v0 }
  0x48   : > { %782 = vmatpush2.bf16.msra.mxu0 %v2015_v17  ;;  %1974 = vmatpush2.bf16.msra.mxu1 %v2015_v17  ;;  %v2305_v17 = vld [vmem:[%s2420_s2] ss:$0 sm:$0xff] }
  0x49   : > { %783 = vmatprep.subr.bf16.mxu0 %v2137_v0  ;;  %1959 = vmatprep.subr.bf16.mxu1 %v2137_v0  ;;  %v2088_v0 = vld [vmem:[%s2200_s23 + $0x1b0] ss:$8 sps:$4 sm:$0xff]  }
  0x4c   : > { %784 = vmatpush2.bf16.msra.mxu0 %v2016_v18  ;;  %1975 = vmatpush2.bf16.msra.mxu1 %v2016_v18 }
  0x4f   : > { %786 = vmatmul.mubr.bf16.vlgmr.msra.gmra.mxu0 %v2017_v19  ;;  %914 = vmatmul.mubr.bf16.vlgmr.msra.gmra.mxu1 %v2020_v20 }
  0x50   : > { %793 = vmatprep.mubr.bf16.mxu0 %v2023_v21  ;;  %921 = vmatprep.mubr.bf16.mxu1 %v2025_v22 }
  0x57   : > { %794 = vmatmul.mubr.bf16.gmra.mxu0 %v2027_v23  ;;  %922 = vmatmul.mubr.bf16.gmra.mxu1 %v2028_v24 }
  0x58   : > { %801 = vmatprep.mubr.bf16.mxu0 %v2029_v25  ;;  %929 = vmatprep.mubr.bf16.mxu1 %v2031_v26 }
  0x5f   : > { %802 = vmatmul.mubr.bf16.gmra.mxu0 %v2033_v27  ;;  %930 = vmatmul.mubr.bf16.gmra.mxu1 %v2034_v28 }
  0x60   : > { %809 = vmatprep.mubr.bf16.mxu0 %v2035_v29  ;;  %937 = vmatprep.mubr.bf16.mxu1 %v2037_v30 }
  0x67   : > { %810 = vmatmul.mubr.bf16.gmra.mxu0 %v2039_v31  ;;  %938 = vmatmul.mubr.bf16.gmra.mxu1 %v2040_v32 }
  0x68   : > { %817 = vmatprep.mubr.bf16.mxu0 %v2041_v33  ;;  %945 = vmatprep.mubr.bf16.mxu1 %v2043_v34 }
  0x6f   : > { %818 = vmatmul.mubr.bf16.gmra.mxu0 %v2045_v35  ;;  %946 = vmatmul.mubr.bf16.gmra.mxu1 %v2046_v36 }
  0x70   : > { %825 = vmatprep.mubr.bf16.mxu0 %v2047_v37  ;;  %953 = vmatprep.mubr.bf16.mxu1 %v2049_v38 }
  0x77   : > { %826 = vmatmul.mubr.bf16.gmra.mxu0 %v2051_v39  ;;  %954 = vmatmul.mubr.bf16.gmra.mxu1 %v2052_v40 }
  0x78   : > { %833 = vmatprep.mubr.bf16.mxu0 %v2053_v41  ;;  %961 = vmatprep.mubr.bf16.mxu1 %v2055_v42 }
  0x7f   : > { %834 = vmatmul.mubr.bf16.gmra.mxu0 %v2057_v43  ;;  %962 = vmatmul.mubr.bf16.gmra.mxu1 %v2058_v44 }
  0x80   : > { %841 = vmatprep.mubr.bf16.mxu0 %v2059_v45  ;;  %969 = vmatprep.mubr.bf16.mxu1 %v2061_v46 }
  0x87   : > { %842 = vmatmul.mubr.bf16.gmra.mxu0 %v2063_v47  ;;  %970 = vmatmul.mubr.bf16.gmra.mxu1 %v2064_v48 }
  0x88   : > { %849 = vmatprep.mubr.bf16.mxu0 %v2065_v49  ;;  %977 = vmatprep.mubr.bf16.mxu1 %v2067_v50 }
  0x8f   : > { %850 = vmatmul.mubr.bf16.gmra.mxu0 %v2069_v51  ;;  %978 = vmatmul.mubr.bf16.gmra.mxu1 %v2070_v52 }
  0x90   : > { %857 = vmatprep.mubr.bf16.mxu0 %v2071_v53  ;;  %985 = vmatprep.mubr.bf16.mxu1 %v2073_v54 }
  0x97   : > { %858 = vmatmul.mubr.bf16.gmra.mxu0 %v2075_v55  ;;  %986 = vmatmul.mubr.bf16.gmra.mxu1 %v2076_v56 }
  0x98   : > { %865 = vmatprep.mubr.bf16.mxu0 %v2077_v57  ;;  %993 = vmatprep.mubr.bf16.mxu1 %v2079_v58 }
  0x9f   : > { %866 = vmatmul.mubr.bf16.gmra.mxu0 %v2081_v59  ;;  %994 = vmatmul.mubr.bf16.gmra.mxu1 %v2082_v60 }
  0xa0   : > { %873 = vmatprep.mubr.bf16.mxu0 %v2083_v61  ;;  %1001 = vmatprep.mubr.bf16.mxu1 %v2085_v62 }
  0xa7   : > { %874 = vmatmul.mubr.bf16.gmra.mxu0 %v2087_v63  ;;  %1002 = vmatmul.mubr.bf16.gmra.mxu1 %v2088_v0 }
  0xa8   : > { %881 = vmatprep.mubr.bf16.mxu0 %v2089_v1  ;;  %1009 = vmatprep.mubr.bf16.mxu1 %v2091_v2 }
  0xaf   : > { %882 = vmatmul.mubr.bf16.gmra.mxu0 %v2093_v3  ;;  %1010 = vmatmul.mubr.bf16.gmra.mxu1 %v2094_v4 }
  0xb0   : > { %889 = vmatprep.mubr.bf16.mxu0 %v2095_v5  ;;  %1017 = vmatprep.mubr.bf16.mxu1 %v2097_v6 }
  0xb7   : > { %890 = vmatmul.mubr.bf16.gmra.mxu0 %v2099_v7  ;;  %1018 = vmatmul.mubr.bf16.gmra.mxu1 %v2100_v8 }
  0xb8   : > { %897 = vmatprep.mubr.bf16.mxu0 %v2101_v9  ;;  %1025 = vmatprep.mubr.bf16.mxu1 %v2103_v10 }
  0xbf   : > { %898 = vmatmul.mubr.bf16.gmra.mxu0 %v2105_v11  ;;  %1026 = vmatmul.mubr.bf16.gmra.mxu1 %v2106_v12 }
  0xc0   : > { %905 = vmatprep.mubr.bf16.mxu0 %v2107_v13  ;;  %1033 = vmatprep.mubr.bf16.mxu1 %v2109_v14 }
  0xc7   : > { %906 = vmatmul.mubr.bf16.gmra.mxu0 %v2111_v15  ;;  %1034 = vmatmul.mubr.bf16.gmra.mxu1 %v2112_v16 }
 0x10f   : > { %v787_v18 = vpop.f32.mrf.mxu0  ;;  %v915_v19 = vpop.f32.mrf.mxu1 }
 0x110   : > { %v788_v22 = vadd.f32 %v2305_v17, %v787_v18  ;;  %v916_v23 = vadd.f32 %v2305_v17, %v915_v19 }
 0x111   : > { %v789_v20 = vpop.f32.mrf.mxu0  ;;  %v917_v21 = vpop.f32.mrf.mxu1 }
 0x112   : > { %v1042_v30 = vmax.f32 %v788_v22, 0.0  ;;  %v1074_v31 = vmax.f32 %v916_v23, 0.0 }
 0x113   : > { %v790_v24 = vpop.f32.mrf.mxu0  ;;  %v918_v25 = vpop.f32.mrf.mxu1 }
 0x114   : > { %v791_v26 = vadd.f32 %v2305_v17, %v790_v24  ;;  %v919_v27 = vadd.f32 %v2305_v17, %v918_v25 }
 0x115   : > { %v792_v28 = vpop.f32.mrf.mxu0  ;;  %v920_v29 = vpop.f32.mrf.mxu1 }
 0x116   : > { %v1043_v32 = vmax.f32 %v791_v26, 0.0  ;;  %v1075_v33 = vmax.f32 %v919_v27, 0.0 }
 0x117   : > { %v795_v34 = vpop.f32.mrf.mxu0  ;;  %v923_v35 = vpop.f32.mrf.mxu1 }
 0x118   : > { %v1756_v36 = vpack.c.bf16 %v1043_v32, %v1042_v30  ;;  %v1836_v37 = vpack.c.bf16 %v1075_v33, %v1074_v31  ;;  %v796_v40 = vadd.f32 %v2305_v17, %v795_v34  ;;  %v924_v41 = vadd.f32 %v2305_v17, %v923_v35 }
 0x119   : > { %v797_v38 = vpop.f32.mrf.mxu0  ;;  %v925_v39 = vpop.f32.mrf.mxu1 }
 0x11a   : > { %1757 = vst [vmem:[%s2315_s29] sm:$0xff] %v1756_v36   ;;  %1928 = vst [vmem:[%s2315_s29 + $0x80] sm:$0xff] %v1836_v37   ;;  %v1044_v48 = vmax.f32 %v796_v40, 0.0  ;;  %v1076_v49 = vmax.f32 %v924_v41, 0.0 }
 0x11b   : > { %v798_v42 = vpop.f32.mrf.mxu0  ;;  %v926_v43 = vpop.f32.mrf.mxu1 }
 0x11c   : > { %v799_v44 = vadd.f32 %v2305_v17, %v798_v42  ;;  %v927_v45 = vadd.f32 %v2305_v17, %v926_v43 }
 0x11d   : > { %v800_v46 = vpop.f32.mrf.mxu0  ;;  %v928_v47 = vpop.f32.mrf.mxu1 }
 0x11e   : > { %v1045_v50 = vmax.f32 %v799_v44, 0.0  ;;  %v1077_v51 = vmax.f32 %v927_v45, 0.0 }
 0x11f   : > { %v803_v52 = vpop.f32.mrf.mxu0  ;;  %v931_v53 = vpop.f32.mrf.mxu1 }
 0x120   : > { %v1761_v54 = vpack.c.bf16 %v1045_v50, %v1044_v48  ;;  %v1841_v55 = vpack.c.bf16 %v1077_v51, %v1076_v49  ;;  %v804_v58 = vadd.f32 %v2305_v17, %v803_v52  ;;  %v932_v59 = vadd.f32 %v2305_v17, %v931_v53 }
 0x121   : > { %v805_v56 = vpop.f32.mrf.mxu0  ;;  %v933_v57 = vpop.f32.mrf.mxu1 }
 0x122   : > { %1913 = vst [vmem:[%s2315_s29 + $0x8] sm:$0xff] %v1761_v54   ;;  %1929 = vst [vmem:[%s2315_s29 + $0x88] sm:$0xff] %v1841_v55   ;;  %v1046_v2 = vmax.f32 %v804_v58, 0.0  ;;  %v1078_v3 = vmax.f32 %v932_v59, 0.0 }
 0x123   : > { %v806_v60 = vpop.f32.mrf.mxu0  ;;  %v934_v61 = vpop.f32.mrf.mxu1 }
 0x124   : > { %v807_v62 = vadd.f32 %v2305_v17, %v806_v60  ;;  %v935_v63 = vadd.f32 %v2305_v17, %v934_v61 }
 0x125   : > { %v808_v0 = vpop.f32.mrf.mxu0  ;;  %v936_v1 = vpop.f32.mrf.mxu1 }
 0x126   : > { %v1047_v4 = vmax.f32 %v807_v62, 0.0  ;;  %v1079_v5 = vmax.f32 %v935_v63, 0.0 }
 0x127   : > { %v811_v6 = vpop.f32.mrf.mxu0  ;;  %v939_v7 = vpop.f32.mrf.mxu1 }
 0x128   : > { %v1766_v8 = vpack.c.bf16 %v1047_v4, %v1046_v2  ;;  %v1846_v9 = vpack.c.bf16 %v1079_v5, %v1078_v3  ;;  %v812_v12 = vadd.f32 %v2305_v17, %v811_v6  ;;  %v940_v13 = vadd.f32 %v2305_v17, %v939_v7 }
 0x129   : > { %v813_v10 = vpop.f32.mrf.mxu0  ;;  %v941_v11 = vpop.f32.mrf.mxu1 }
 0x12a   : > { %1914 = vst [vmem:[%s2315_s29 + $0x10] sm:$0xff] %v1766_v8   ;;  %1930 = vst [vmem:[%s2315_s29 + $0x90] sm:$0xff] %v1846_v9   ;;  %v1048_v21 = vmax.f32 %v812_v12, 0.0  ;;  %v1080_v22 = vmax.f32 %v940_v13, 0.0 }
 0x12b   : > { %v814_v14 = vpop.f32.mrf.mxu0  ;;  %v942_v15 = vpop.f32.mrf.mxu1 }
 0x12c   : > { %v815_v16 = vadd.f32 %v2305_v17, %v814_v14  ;;  %v943_v18 = vadd.f32 %v2305_v17, %v942_v15 }
 0x12d   : > { %v816_v19 = vpop.f32.mrf.mxu0  ;;  %v944_v20 = vpop.f32.mrf.mxu1 }
 0x12e   : > { %v1049_v23 = vmax.f32 %v815_v16, 0.0  ;;  %v1081_v24 = vmax.f32 %v943_v18, 0.0 }
 0x12f   : > { %v819_v25 = vpop.f32.mrf.mxu0  ;;  %v947_v26 = vpop.f32.mrf.mxu1 }
 0x130   : > { %v1771_v27 = vpack.c.bf16 %v1049_v23, %v1048_v21  ;;  %v1851_v28 = vpack.c.bf16 %v1081_v24, %v1080_v22  ;;  %v820_v31 = vadd.f32 %v2305_v17, %v819_v25  ;;  %v948_v32 = vadd.f32 %v2305_v17, %v947_v26 }
 0x131   : > { %v821_v29 = vpop.f32.mrf.mxu0  ;;  %v949_v30 = vpop.f32.mrf.mxu1 }
 0x132   : > { %1915 = vst [vmem:[%s2315_s29 + $0x18] sm:$0xff] %v1771_v27   ;;  %1931 = vst [vmem:[%s2315_s29 + $0x98] sm:$0xff] %v1851_v28   ;;  %v1050_v39 = vmax.f32 %v820_v31, 0.0  ;;  %v1082_v40 = vmax.f32 %v948_v32, 0.0 }
 0x133   : > { %v822_v33 = vpop.f32.mrf.mxu0  ;;  %v950_v34 = vpop.f32.mrf.mxu1 }
 0x134   : > { %v823_v35 = vadd.f32 %v2305_v17, %v822_v33  ;;  %v951_v36 = vadd.f32 %v2305_v17, %v950_v34 }
 0x135   : > { %v824_v37 = vpop.f32.mrf.mxu0  ;;  %v952_v38 = vpop.f32.mrf.mxu1 }
 0x136   : > { %v1051_v41 = vmax.f32 %v823_v35, 0.0  ;;  %v1083_v42 = vmax.f32 %v951_v36, 0.0 }
 0x137   : > { %v827_v43 = vpop.f32.mrf.mxu0  ;;  %v955_v44 = vpop.f32.mrf.mxu1 }
 0x138   : > { %v1776_v45 = vpack.c.bf16 %v1051_v41, %v1050_v39  ;;  %v1856_v46 = vpack.c.bf16 %v1083_v42, %v1082_v40  ;;  %v828_v49 = vadd.f32 %v2305_v17, %v827_v43  ;;  %v956_v50 = vadd.f32 %v2305_v17, %v955_v44 }
 0x139   : > { %v829_v47 = vpop.f32.mrf.mxu0  ;;  %v957_v48 = vpop.f32.mrf.mxu1 }
 0x13a   : > { %1916 = vst [vmem:[%s2315_s29 + $0x20] sm:$0xff] %v1776_v45   ;;  %1932 = vst [vmem:[%s2315_s29 + $0xa0] sm:$0xff] %v1856_v46   ;;  %v1052_v57 = vmax.f32 %v828_v49, 0.0  ;;  %v1084_v58 = vmax.f32 %v956_v50, 0.0 }
 0x13b   : > { %v830_v51 = vpop.f32.mrf.mxu0  ;;  %v958_v52 = vpop.f32.mrf.mxu1 }
 0x13c   : > { %v831_v53 = vadd.f32 %v2305_v17, %v830_v51  ;;  %v959_v54 = vadd.f32 %v2305_v17, %v958_v52 }
 0x13d   : > { %v832_v55 = vpop.f32.mrf.mxu0  ;;  %v960_v56 = vpop.f32.mrf.mxu1 }
 0x13e   : > { %v1053_v59 = vmax.f32 %v831_v53, 0.0  ;;  %v1085_v60 = vmax.f32 %v959_v54, 0.0 }
 0x13f   : > { %v835_v61 = vpop.f32.mrf.mxu0  ;;  %v963_v62 = vpop.f32.mrf.mxu1 }
 0x140   : > { %v1781_v63 = vpack.c.bf16 %v1053_v59, %v1052_v57  ;;  %v1861_v0 = vpack.c.bf16 %v1085_v60, %v1084_v58  ;;  %v836_v3 = vadd.f32 %v2305_v17, %v835_v61  ;;  %v964_v4 = vadd.f32 %v2305_v17, %v963_v62 }
 0x141   : > { %v837_v1 = vpop.f32.mrf.mxu0  ;;  %v965_v2 = vpop.f32.mrf.mxu1 }
 0x142   : > { %1917 = vst [vmem:[%s2315_s29 + $0x28] sm:$0xff] %v1781_v63   ;;  %1933 = vst [vmem:[%s2315_s29 + $0xa8] sm:$0xff] %v1861_v0   ;;  %v1054_v11 = vmax.f32 %v836_v3, 0.0  ;;  %v1086_v12 = vmax.f32 %v964_v4, 0.0 }
 0x143   : > { %v838_v5 = vpop.f32.mrf.mxu0  ;;  %v966_v6 = vpop.f32.mrf.mxu1 }
 0x144   : > { %v839_v7 = vadd.f32 %v2305_v17, %v838_v5  ;;  %v967_v8 = vadd.f32 %v2305_v17, %v966_v6 }
 0x145   : > { %v840_v9 = vpop.f32.mrf.mxu0  ;;  %v968_v10 = vpop.f32.mrf.mxu1 }
 0x146   : > { %v1055_v13 = vmax.f32 %v839_v7, 0.0  ;;  %v1087_v14 = vmax.f32 %v967_v8, 0.0 }
 0x147   : > { %v843_v15 = vpop.f32.mrf.mxu0  ;;  %v971_v16 = vpop.f32.mrf.mxu1 }
 0x148   : > { %v1786_v18 = vpack.c.bf16 %v1055_v13, %v1054_v11  ;;  %v1866_v19 = vpack.c.bf16 %v1087_v14, %v1086_v12  ;;  %v844_v22 = vadd.f32 %v2305_v17, %v843_v15  ;;  %v972_v23 = vadd.f32 %v2305_v17, %v971_v16 }
 0x149   : > { %v845_v20 = vpop.f32.mrf.mxu0  ;;  %v973_v21 = vpop.f32.mrf.mxu1 }
 0x14a   : > { %1918 = vst [vmem:[%s2315_s29 + $0x30] sm:$0xff] %v1786_v18   ;;  %1934 = vst [vmem:[%s2315_s29 + $0xb0] sm:$0xff] %v1866_v19   ;;  %v1056_v30 = vmax.f32 %v844_v22, 0.0  ;;  %v1088_v31 = vmax.f32 %v972_v23, 0.0 }
 0x14b   : > { %v846_v24 = vpop.f32.mrf.mxu0  ;;  %v974_v25 = vpop.f32.mrf.mxu1 }
 0x14c   : > { %v847_v26 = vadd.f32 %v2305_v17, %v846_v24  ;;  %v975_v27 = vadd.f32 %v2305_v17, %v974_v25 }
 0x14d   : > { %v848_v28 = vpop.f32.mrf.mxu0  ;;  %v976_v29 = vpop.f32.mrf.mxu1 }
 0x14e   : > { %v1057_v32 = vmax.f32 %v847_v26, 0.0  ;;  %v1089_v33 = vmax.f32 %v975_v27, 0.0 }
 0x14f   : > { %v851_v34 = vpop.f32.mrf.mxu0  ;;  %v979_v35 = vpop.f32.mrf.mxu1 }
 0x150   : > { %v1791_v36 = vpack.c.bf16 %v1057_v32, %v1056_v30  ;;  %v1871_v37 = vpack.c.bf16 %v1089_v33, %v1088_v31  ;;  %v852_v40 = vadd.f32 %v2305_v17, %v851_v34  ;;  %v980_v41 = vadd.f32 %v2305_v17, %v979_v35 }
 0x151   : > { %v853_v38 = vpop.f32.mrf.mxu0  ;;  %v981_v39 = vpop.f32.mrf.mxu1 }
 0x152   : > { %1919 = vst [vmem:[%s2315_s29 + $0x38] sm:$0xff] %v1791_v36   ;;  %1935 = vst [vmem:[%s2315_s29 + $0xb8] sm:$0xff] %v1871_v37   ;;  %v1058_v48 = vmax.f32 %v852_v40, 0.0  ;;  %v1090_v49 = vmax.f32 %v980_v41, 0.0 }
 0x153   : > { %v854_v42 = vpop.f32.mrf.mxu0  ;;  %v982_v43 = vpop.f32.mrf.mxu1 }
 0x154   : > { %v855_v44 = vadd.f32 %v2305_v17, %v854_v42  ;;  %v983_v45 = vadd.f32 %v2305_v17, %v982_v43 }
 0x155   : > { %v856_v46 = vpop.f32.mrf.mxu0  ;;  %v984_v47 = vpop.f32.mrf.mxu1 }
 0x156   : > { %v1059_v50 = vmax.f32 %v855_v44, 0.0  ;;  %v1091_v51 = vmax.f32 %v983_v45, 0.0 }
 0x157   : > { %v859_v52 = vpop.f32.mrf.mxu0  ;;  %v987_v53 = vpop.f32.mrf.mxu1 }
 0x158   : > { %v1796_v54 = vpack.c.bf16 %v1059_v50, %v1058_v48  ;;  %v1876_v55 = vpack.c.bf16 %v1091_v51, %v1090_v49  ;;  %v860_v58 = vadd.f32 %v2305_v17, %v859_v52  ;;  %v988_v59 = vadd.f32 %v2305_v17, %v987_v53 }
 0x159   : > { %v861_v56 = vpop.f32.mrf.mxu0  ;;  %v989_v57 = vpop.f32.mrf.mxu1 }
 0x15a   : > { %1920 = vst [vmem:[%s2315_s29 + $0x40] sm:$0xff] %v1796_v54   ;;  %1936 = vst [vmem:[%s2315_s29 + $0xc0] sm:$0xff] %v1876_v55   ;;  %v1060_v2 = vmax.f32 %v860_v58, 0.0  ;;  %v1092_v3 = vmax.f32 %v988_v59, 0.0 }
 0x15b   : > { %v862_v60 = vpop.f32.mrf.mxu0  ;;  %v990_v61 = vpop.f32.mrf.mxu1 }
 0x15c   : > { %v863_v62 = vadd.f32 %v2305_v17, %v862_v60  ;;  %v991_v63 = vadd.f32 %v2305_v17, %v990_v61 }
 0x15d   : > { %v864_v0 = vpop.f32.mrf.mxu0  ;;  %v992_v1 = vpop.f32.mrf.mxu1 }
 0x15e   : > { %v1061_v4 = vmax.f32 %v863_v62, 0.0  ;;  %v1093_v5 = vmax.f32 %v991_v63, 0.0 }
 0x15f   : > { %v867_v6 = vpop.f32.mrf.mxu0  ;;  %v995_v7 = vpop.f32.mrf.mxu1 }
 0x160   : > { %v1801_v8 = vpack.c.bf16 %v1061_v4, %v1060_v2  ;;  %v1881_v9 = vpack.c.bf16 %v1093_v5, %v1092_v3  ;;  %v868_v12 = vadd.f32 %v2305_v17, %v867_v6  ;;  %v996_v13 = vadd.f32 %v2305_v17, %v995_v7 }
 0x161   : > { %v869_v10 = vpop.f32.mrf.mxu0  ;;  %v997_v11 = vpop.f32.mrf.mxu1 }
 0x162   : > { %1921 = vst [vmem:[%s2315_s29 + $0x48] sm:$0xff] %v1801_v8   ;;  %1937 = vst [vmem:[%s2315_s29 + $0xc8] sm:$0xff] %v1881_v9   ;;  %v1062_v21 = vmax.f32 %v868_v12, 0.0  ;;  %v1094_v22 = vmax.f32 %v996_v13, 0.0 }
 0x163   : > { %v870_v14 = vpop.f32.mrf.mxu0  ;;  %v998_v15 = vpop.f32.mrf.mxu1 }
 0x164   : > { %v871_v16 = vadd.f32 %v2305_v17, %v870_v14  ;;  %v999_v18 = vadd.f32 %v2305_v17, %v998_v15 }
 0x165   : > { %v872_v19 = vpop.f32.mrf.mxu0  ;;  %v1000_v20 = vpop.f32.mrf.mxu1 }
 0x166   : > { %v1063_v23 = vmax.f32 %v871_v16, 0.0  ;;  %v1095_v24 = vmax.f32 %v999_v18, 0.0 }
 0x167   : > { %v875_v25 = vpop.f32.mrf.mxu0  ;;  %v1003_v26 = vpop.f32.mrf.mxu1 }
 0x168   : > { %v1806_v27 = vpack.c.bf16 %v1063_v23, %v1062_v21  ;;  %v1886_v28 = vpack.c.bf16 %v1095_v24, %v1094_v22  ;;  %v876_v31 = vadd.f32 %v2305_v17, %v875_v25  ;;  %v1004_v32 = vadd.f32 %v2305_v17, %v1003_v26 }
 0x169   : > { %v877_v29 = vpop.f32.mrf.mxu0  ;;  %v1005_v30 = vpop.f32.mrf.mxu1 }
 0x16a   : > { %1922 = vst [vmem:[%s2315_s29 + $0x50] sm:$0xff] %v1806_v27   ;;  %1938 = vst [vmem:[%s2315_s29 + $0xd0] sm:$0xff] %v1886_v28   ;;  %v1064_v39 = vmax.f32 %v876_v31, 0.0  ;;  %v1096_v40 = vmax.f32 %v1004_v32, 0.0 }
 0x16b   : > { %v878_v33 = vpop.f32.mrf.mxu0  ;;  %v1006_v34 = vpop.f32.mrf.mxu1 }
 0x16c   : > { %v879_v35 = vadd.f32 %v2305_v17, %v878_v33  ;;  %v1007_v36 = vadd.f32 %v2305_v17, %v1006_v34 }
 0x16d   : > { %v880_v37 = vpop.f32.mrf.mxu0  ;;  %v1008_v38 = vpop.f32.mrf.mxu1 }
 0x16e   : > { %v1065_v41 = vmax.f32 %v879_v35, 0.0  ;;  %v1097_v42 = vmax.f32 %v1007_v36, 0.0 }
 0x16f   : > { %v883_v43 = vpop.f32.mrf.mxu0  ;;  %v1011_v44 = vpop.f32.mrf.mxu1 }
 0x170   : > { %v1811_v45 = vpack.c.bf16 %v1065_v41, %v1064_v39  ;;  %v1891_v46 = vpack.c.bf16 %v1097_v42, %v1096_v40  ;;  %v884_v49 = vadd.f32 %v2305_v17, %v883_v43  ;;  %v1012_v50 = vadd.f32 %v2305_v17, %v1011_v44 }
 0x171   : > { %v885_v47 = vpop.f32.mrf.mxu0  ;;  %v1013_v48 = vpop.f32.mrf.mxu1 }
 0x172   : > { %1923 = vst [vmem:[%s2315_s29 + $0x58] sm:$0xff] %v1811_v45   ;;  %1939 = vst [vmem:[%s2315_s29 + $0xd8] sm:$0xff] %v1891_v46   ;;  %v1066_v57 = vmax.f32 %v884_v49, 0.0  ;;  %v1098_v58 = vmax.f32 %v1012_v50, 0.0 }
 0x173   : > { %v886_v51 = vpop.f32.mrf.mxu0  ;;  %v1014_v52 = vpop.f32.mrf.mxu1 }
 0x174   : > { %v887_v53 = vadd.f32 %v2305_v17, %v886_v51  ;;  %v1015_v54 = vadd.f32 %v2305_v17, %v1014_v52 }
 0x175   : > { %v888_v55 = vpop.f32.mrf.mxu0  ;;  %v1016_v56 = vpop.f32.mrf.mxu1 }
 0x176   : > { %v1067_v59 = vmax.f32 %v887_v53, 0.0  ;;  %v1099_v60 = vmax.f32 %v1015_v54, 0.0 }
 0x177   : > { %v891_v61 = vpop.f32.mrf.mxu0  ;;  %v1019_v62 = vpop.f32.mrf.mxu1 }
 0x178   : > { %v1816_v63 = vpack.c.bf16 %v1067_v59, %v1066_v57  ;;  %v1896_v0 = vpack.c.bf16 %v1099_v60, %v1098_v58  ;;  %v892_v3 = vadd.f32 %v2305_v17, %v891_v61  ;;  %v1020_v4 = vadd.f32 %v2305_v17, %v1019_v62 }
 0x179   : > { %v893_v1 = vpop.f32.mrf.mxu0  ;;  %v1021_v2 = vpop.f32.mrf.mxu1 }
 0x17a   : > { %1924 = vst [vmem:[%s2315_s29 + $0x60] sm:$0xff] %v1816_v63   ;;  %1940 = vst [vmem:[%s2315_s29 + $0xe0] sm:$0xff] %v1896_v0   ;;  %v1068_v11 = vmax.f32 %v892_v3, 0.0  ;;  %v1100_v12 = vmax.f32 %v1020_v4, 0.0 }
 0x17b   : > { %v894_v5 = vpop.f32.mrf.mxu0  ;;  %v1022_v6 = vpop.f32.mrf.mxu1 }
 0x17c   : > { %v895_v7 = vadd.f32 %v2305_v17, %v894_v5  ;;  %v1023_v8 = vadd.f32 %v2305_v17, %v1022_v6 }
 0x17d   : > { %v896_v9 = vpop.f32.mrf.mxu0  ;;  %v1024_v10 = vpop.f32.mrf.mxu1 }
 0x17e   : > { %v1069_v13 = vmax.f32 %v895_v7, 0.0  ;;  %v1101_v14 = vmax.f32 %v1023_v8, 0.0 }
 0x17f   : > { %v899_v15 = vpop.f32.mrf.mxu0  ;;  %v1027_v16 = vpop.f32.mrf.mxu1 }
 0x180   : > { %v1821_v18 = vpack.c.bf16 %v1069_v13, %v1068_v11  ;;  %v1901_v19 = vpack.c.bf16 %v1101_v14, %v1100_v12  ;;  %v900_v22 = vadd.f32 %v2305_v17, %v899_v15  ;;  %v1028_v23 = vadd.f32 %v2305_v17, %v1027_v16 }
 0x181   : > { %v901_v20 = vpop.f32.mrf.mxu0  ;;  %v1029_v21 = vpop.f32.mrf.mxu1 }
 0x182   : > { %1925 = vst [vmem:[%s2315_s29 + $0x68] sm:$0xff] %v1821_v18   ;;  %1941 = vst [vmem:[%s2315_s29 + $0xe8] sm:$0xff] %v1901_v19   ;;  %v1070_v30 = vmax.f32 %v900_v22, 0.0  ;;  %v1102_v31 = vmax.f32 %v1028_v23, 0.0 }
 0x183   : > { %v902_v24 = vpop.f32.mrf.mxu0  ;;  %v1030_v25 = vpop.f32.mrf.mxu1 }
 0x184   : > { %v903_v26 = vadd.f32 %v2305_v17, %v902_v24  ;;  %v1031_v27 = vadd.f32 %v2305_v17, %v1030_v25 }
 0x185   : > { %v904_v28 = vpop.f32.mrf.mxu0  ;;  %v1032_v29 = vpop.f32.mrf.mxu1 }
 0x186   : > { %v1071_v32 = vmax.f32 %v903_v26, 0.0  ;;  %v1103_v33 = vmax.f32 %v1031_v27, 0.0 }
 0x187   : > { %v907_v34 = vpop.f32.mrf.mxu0  ;;  %v1035_v35 = vpop.f32.mrf.mxu1 }
 0x188   : > { %v1826_v36 = vpack.c.bf16 %v1071_v32, %v1070_v30  ;;  %v1906_v37 = vpack.c.bf16 %v1103_v33, %v1102_v31  ;;  %v908_v40 = vadd.f32 %v2305_v17, %v907_v34  ;;  %v1036_v41 = vadd.f32 %v2305_v17, %v1035_v35 }
 0x189   : > { %v909_v38 = vpop.f32.mrf.mxu0  ;;  %v1037_v39 = vpop.f32.mrf.mxu1 }
 0x18a   : > { %1926 = vst [vmem:[%s2315_s29 + $0x70] sm:$0xff] %v1826_v36   ;;  %1942 = vst [vmem:[%s2315_s29 + $0xf0] sm:$0xff] %v1906_v37   ;;  %v1072_v48 = vmax.f32 %v908_v40, 0.0  ;;  %v1104_v49 = vmax.f32 %v1036_v41, 0.0 }
 0x18b   : > { %v910_v42 = vpop.f32.mrf.mxu0  ;;  %v1038_v43 = vpop.f32.mrf.mxu1 }
 0x18c   : > { %v911_v44 = vadd.f32 %v2305_v17, %v910_v42  ;;  %v1039_v45 = vadd.f32 %v2305_v17, %v1038_v43 }
 0x18d   : > { %v912_v46 = vpop.f32.mrf.mxu0  ;;  %v1040_v47 = vpop.f32.mrf.mxu1 }
 0x18e   : > { %v1073_v50 = vmax.f32 %v911_v44, 0.0  ;;  %v1105_v51 = vmax.f32 %v1039_v45, 0.0 }
 0x190   : > { %v1831_v52 = vpack.c.bf16 %v1073_v50, %v1072_v48  ;;  %v1911_v53 = vpack.c.bf16 %v1105_v51, %v1104_v49 }
 0x192   : > { %1927 = vst [vmem:[%s2315_s29 + $0x78] sm:$0xff] %v1831_v52   ;;  %1943 = vst [vmem:[%s2315_s29 + $0xf8] sm:$0xff] %v1911_v53  }
 0x193 PF: > { %s13_s14 = sadd.s32 1, %s2135_s14   ;;  %s2422_s12 = smov %s2131_s13 }
 0x194   : > { %p10_p5 = scmp.ge.s32.totalorder %s13_s14, 6   ;;  %s2423_s13 = smov %s2425_s15 }
 0x196   :  { %12 = sbr.rel (!%p10_p5) target bundleno = 2 (0x2), region = 65 }

// kernel: vae_forward.17
= control target key start
LH: loop header
LB: loop body
LE: loop exit
PB: predicated region body
PF: predicated region fallthrough
CT: control target
= control target key end

     0   :  { %s3492_s12 = smov 0   ;;  %s3494_s13 = smov 0   ;;  %s4058_s0 = inlined_call_operand.vmem [shape: bf16[4,2048,128], index: 0, kind: input, shape index: {}]   ;;  %s4059_s1 = inlined_call_operand.vmem [shape: bf16[4,128,3], index: 1, kind: input, shape index: {}]   ;;  %s4060_s2 = inlined_call_operand.vmem [shape: f32[1,1,3], index: 2, kind: input, shape index: {}]   ;;  %s4061_s3 = inlined_call_operand.vmem [shape: f32[4,2048,3], index: 3, kind: output, shape index: {}]  }
   0x1   :  { %s3496_s14 = smov 0   ;;  %s3498_s15 = smov 0  }
   0x2   :  { %s3500_s16 = smov 0  }
   0x3 LB: > { %s22_s17 = sadd.s32 1, %s3462_s14  ;;  %s25_s18 = sadd.s32 1, %s3466_s15  ;;  %s3470_s16 = sphi %s3500_s16, %s13_s16   ;;  %s3466_s15 = sphi %s3498_s15, %s4065_s15   ;;  %s3462_s14 = sphi %s3496_s14, %s4064_s14   ;;  %s3458_s13 = sphi %s3494_s13, %s4063_s13   ;;  %s3454_s12 = sphi %s3492_s12, %s4062_s12  }
   0x4   : > { %p23_p0 = scmp.ge.s32.totalorder %s22_s17, 2  ;;  %p2362_p1 = scmp.ge.s32.totalorder %s3470_s16, 1 }
   0x5   : > { %p168_p2 = scmp.lt.s32.totalorder %s3470_s16, 9 }
   0x6   : > { %s4067_s17 = smov (%p23_p0, %s22_s17), 0  ;;  %s4069_s18 = smov (!%p23_p0, %s25_s18), %s3466_s15 }
   0x7   : > { %p169_p3 = pnand %p2362_p1, %p168_p2  ;;  %p27_p4 = scmp.ge.s32.totalorder %s4069_s18, 4 }
   0x8   : > { %s2363_s19 = sshll.u32 (!%p169_p3), %s3454_s12, 7  ;;  %p206_p5 = scmp.lt.s32.totalorder (!%p169_p3), %s3458_s13, 3 }
   0x9   : > { %s4071_s18 = smov (%p27_p4, %s4069_s18), 0  ;;  %172 = sbr.rel (%p169_p3) target bundleno = 517 (0x205), region = 32 }
   0xa   : > { %p208_p6 = scmp.lt.s32.totalorder (!%p169_p3), %s2363_s19, 255 }
   0xe   : > { %s4073_s13 = smov (!%p206_p5, %s3458_s13), 3  ;;  %s4075_s19 = smov (!%p208_p6, %s2363_s19), 255  ;;  %vm2127_vm0 = vcmask 23552  }
   0xf   : > { %s2364_s20 = sshll.u32 %s4073_s13, 8  ;;  %s2574_s21 = sshll.u32 %s4073_s13, 6 }
  0x10   : > { %s3525_s24 = scalar_lea.vmem %s4059_s1, %s2574_s21  ;;  %s3527_s25 = sadd.s32 %s2364_s20, %s4075_s19 }
  0x11   : > { %v2847_v0 = vld [vmem:[%s3525_s24 + $0x38] sm:$0xff]   ;;  %v2848_v1 = vld [vmem:[%s3525_s24 + $0x30] sm:$0xff]   ;;  %s2365_s26 = sshll.u32 %s3527_s25, 2  ;;  %v2849_v2 = vld [vmem:[%s3525_s24 + $0x28] sm:$0xff]   ;;  %s2370_s5 = sshll.u32 %s3527_s25, 3 }
  0x12   : > { %2647 = vmatprep.subr.bf16.mxu0 %v2847_v0  ;;  %2791 = vmatprep.subr.bf16.mxu1 %v2847_v0  ;;  %s3536_s29 = scalar_lea.vmem %s4058_s0, %s2365_s26  ;;  %v2850_v3 = vld [vmem:[%s3525_s24 + $0x20] sm:$0xff]   ;;  %v2851_v6 = vld [vmem:[%s3525_s24 + $0x18] sm:$0xff]   ;;  %v2852_v7 = vld [vmem:[%s3525_s24 + $0x10] sm:$0xff]   ;;  %s3635_s8 = scalar_lea.vmem %s4061_s3, %s2370_s5 }
  0x13   : > { %2648 = vmatpush3.bf16.msra.mxu0 %v2847_v0  ;;  %2799 = vmatpush3.bf16.msra.mxu1 %v2847_v0  ;;  %v2855_v4 = vld [vmem:[%s3536_s29] sm:$0xff]   ;;  %v2853_v8 = vld [vmem:[%s3525_s24 + $0x8] sm:$0xff]   ;;  %v2859_v12 = vld [vmem:[%s3536_s29 + $0x10] sm:$0xff]  }
  0x14   : > { %2649 = vmatprep.subr.bf16.mxu0 %v2848_v1  ;;  %2792 = vmatprep.subr.bf16.mxu1 %v2848_v1  ;;  %v2856_v5 = vld [vmem:[%s3536_s29 + $0x100] sm:$0xff]   ;;  %v2857_v10 = vld [vmem:[%s3536_s29 + $0x8] sm:$0xff]   ;;  %v2860_v13 = vld [vmem:[%s3536_s29 + $0x110] sm:$0xff]  }
  0x15   : > { %2663 = vmatprep.mubr.bf16.mxu0 %v2855_v4  ;;  %2727 = vmatprep.mubr.bf16.mxu1 %v2856_v5  ;;  %v2854_v9 = vld [vmem:[%s3525_s24] sm:$0xff]   ;;  %v2858_v11 = vld [vmem:[%s3536_s29 + $0x108] sm:$0xff]   ;;  %v2861_v14 = vld [vmem:[%s3536_s29 + $0x18] sm:$0xff]  }
  0x16   : > { %v2862_v15 = vld [vmem:[%s3536_s29 + $0x118] sm:$0xff]   ;;  %v2863_v16 = vld [vmem:[%s3536_s29 + $0x20] sm:$0xff]   ;;  %v2865_v18 = vld [vmem:[%s3536_s29 + $0x28] sm:$0xff]  }
  0x17   : > { %2650 = vmatpush3.bf16.msra.mxu0 %v2848_v1  ;;  %2800 = vmatpush3.bf16.msra.mxu1 %v2848_v1  ;;  %v2864_v17 = vld [vmem:[%s3536_s29 + $0x120] sm:$0xff]   ;;  %v2866_v19 = vld [vmem:[%s3536_s29 + $0x128] sm:$0xff]   ;;  %v2867_v20 = vld [vmem:[%s3536_s29 + $0x30] sm:$0xff]  }
  0x18   : > { %2651 = vmatprep.subr.bf16.mxu0 %v2849_v2  ;;  %2793 = vmatprep.subr.bf16.mxu1 %v2849_v2  ;;  %v2868_v21 = vld [vmem:[%s3536_s29 + $0x130] sm:$0xff]   ;;  %v2869_v22 = vld [vmem:[%s3536_s29 + $0x38] sm:$0xff]   ;;  %v2871_v24 = vld [vmem:[%s3536_s29 + $0x40] sm:$0xff]  }
  0x19   : > { %v2870_v23 = vld [vmem:[%s3536_s29 + $0x138] sm:$0xff]   ;;  %v2872_v25 = vld [vmem:[%s3536_s29 + $0x140] sm:$0xff]   ;;  %v2873_v26 = vld [vmem:[%s3536_s29 + $0x48] sm:$0xff]  }
  0x1a   : > { %v2874_v27 = vld [vmem:[%s3536_s29 + $0x148] sm:$0xff]   ;;  %v2875_v28 = vld [vmem:[%s3536_s29 + $0x50] sm:$0xff]   ;;  %v2877_v30 = vld [vmem:[%s3536_s29 + $0x58] sm:$0xff]  }
  0x1b   : > { %2652 = vmatpush3.bf16.msra.mxu0 %v2849_v2  ;;  %2801 = vmatpush3.bf16.msra.mxu1 %v2849_v2  ;;  %v2876_v29 = vld [vmem:[%s3536_s29 + $0x150] sm:$0xff]   ;;  %v2878_v31 = vld [vmem:[%s3536_s29 + $0x158] sm:$0xff]   ;;  %v2879_v32 = vld [vmem:[%s3536_s29 + $0x60] sm:$0xff]  }
  0x1c   : > { %2653 = vmatprep.subr.bf16.mxu0 %v2850_v3  ;;  %2794 = vmatprep.subr.bf16.mxu1 %v2850_v3  ;;  %v2880_v33 = vld [vmem:[%s3536_s29 + $0x160] sm:$0xff]   ;;  %v2881_v34 = vld [vmem:[%s3536_s29 + $0x68] sm:$0xff]   ;;  %v2883_v36 = vld [vmem:[%s3536_s29 + $0x70] sm:$0xff]  }
  0x1d   : > { %v2882_v35 = vld [vmem:[%s3536_s29 + $0x168] sm:$0xff]   ;;  %v2884_v37 = vld [vmem:[%s3536_s29 + $0x170] sm:$0xff]   ;;  %v2885_v38 = vld [vmem:[%s3536_s29 + $0x78] sm:$0xff]  }
  0x1e   : > { %v2886_v39 = vld [vmem:[%s3536_s29 + $0x178] sm:$0xff]   ;;  %v2887_v40 = vld [vmem:[%s3536_s29 + $0x80] sm:$0xff]   ;;  %v2889_v42 = vld [vmem:[%s3536_s29 + $0x88] sm:$0xff]  }
  0x1f   : > { %2654 = vmatpush3.bf16.msra.mxu0 %v2850_v3  ;;  %2802 = vmatpush3.bf16.msra.mxu1 %v2850_v3  ;;  %v2888_v41 = vld [vmem:[%s3536_s29 + $0x180] sm:$0xff]   ;;  %v2890_v43 = vld [vmem:[%s3536_s29 + $0x188] sm:$0xff]   ;;  %v2891_v44 = vld [vmem:[%s3536_s29 + $0x90] sm:$0xff]  }
  0x20   : > { %2655 = vmatprep.subr.bf16.mxu0 %v2851_v6  ;;  %2795 = vmatprep.subr.bf16.mxu1 %v2851_v6  ;;  %v2892_v45 = vld [vmem:[%s3536_s29 + $0x190] sm:$0xff]   ;;  %v2893_v46 = vld [vmem:[%s3536_s29 + $0x98] sm:$0xff]   ;;  %v2895_v48 = vld [vmem:[%s3536_s29 + $0xa0] sm:$0xff]  }
  0x21   : > { %v2894_v47 = vld [vmem:[%s3536_s29 + $0x198] sm:$0xff]   ;;  %v2896_v49 = vld [vmem:[%s3536_s29 + $0x1a0] sm:$0xff]   ;;  %v2897_v50 = vld [vmem:[%s3536_s29 + $0xa8] sm:$0xff]  }
  0x22   : > { %v2898_v51 = vld [vmem:[%s3536_s29 + $0x1a8] sm:$0xff]   ;;  %v2899_v52 = vld [vmem:[%s3536_s29 + $0xb0] sm:$0xff]   ;;  %v2901_v54 = vld [vmem:[%s3536_s29 + $0xb8] sm:$0xff]  }
  0x23   : > { %2656 = vmatpush3.bf16.msra.mxu0 %v2851_v6  ;;  %2803 = vmatpush3.bf16.msra.mxu1 %v2851_v6  ;;  %v2900_v53 = vld [vmem:[%s3536_s29 + $0x1b0] sm:$0xff]   ;;  %v2902_v55 = vld [vmem:[%s3536_s29 + $0x1b8] sm:$0xff]   ;;  %v2903_v56 = vld [vmem:[%s3536_s29 + $0xc0] sm:$0xff]  }
  0x24   : > { %2657 = vmatprep.subr.bf16.mxu0 %v2852_v7  ;;  %2796 = vmatprep.subr.bf16.mxu1 %v2852_v7  ;;  %v2904_v57 = vld [vmem:[%s3536_s29 + $0x1c0] sm:$0xff]   ;;  %v2905_v58 = vld [vmem:[%s3536_s29 + $0xc8] sm:$0xff]   ;;  %v2907_v60 = vld [vmem:[%s3536_s29 + $0xd0] sm:$0xff]  }
  0x25   : > { %v2906_v59 = vld [vmem:[%s3536_s29 + $0x1c8] sm:$0xff]   ;;  %v2908_v61 = vld [vmem:[%s3536_s29 + $0x1d0] sm:$0xff]   ;;  %v2909_v62 = vld [vmem:[%s3536_s29 + $0xd8] sm:$0xff]  }
  0x26   : > { %v2910_v63 = vld [vmem:[%s3536_s29 + $0x1d8] sm:$0xff]   ;;  %v2911_v0 = vld [vmem:[%s3536_s29 + $0xe0] sm:$0xff]   ;;  %v2913_v2 = vld [vmem:[%s3536_s29 + $0xe8] sm:$0xff]  }
  0x27   : > { %2658 = vmatpush3.bf16.msra.mxu0 %v2852_v7  ;;  %2804 = vmatpush3.bf16.msra.mxu1 %v2852_v7  ;;  %v2912_v1 = vld [vmem:[%s3536_s29 + $0x1e0] sm:$0xff]   ;;  %v2914_v3 = vld [vmem:[%s3536_s29 + $0x1e8] sm:$0xff]   ;;  %v2915_v4 = vld [vmem:[%s3536_s29 + $0xf0] sm:$0xff]  }
  0x28   : > { %2659 = vmatprep.subr.bf16.mxu0 %v2853_v8  ;;  %2797 = vmatprep.subr.bf16.mxu1 %v2853_v8  ;;  %v2916_v5 = vld [vmem:[%s3536_s29 + $0x1f0] sm:$0xff]   ;;  %v2917_v6 = vld [vmem:[%s3536_s29 + $0xf8] sm:$0xff]  }
  0x29   : > { %v2918_v7 = vld [vmem:[%s3536_s29 + $0x1f8] sm:$0xff]  }
  0x2b   : > { %2660 = vmatpush3.bf16.msra.mxu0 %v2853_v8  ;;  %2805 = vmatpush3.bf16.msra.mxu1 %v2853_v8  ;;  %v3610_v8 = vld [vmem:[%s4060_s2] ss:$0 sm:$0xff] }
  0x2c   : > { %2661 = vmatprep.subr.bf16.mxu0 %v2854_v9  ;;  %2798 = vmatprep.subr.bf16.mxu1 %v2854_v9 }
  0x2f   : > { %2662 = vmatpush3.bf16.msra.mxu0 %v2854_v9  ;;  %2806 = vmatpush3.bf16.msra.mxu1 %v2854_v9 }
  0x32   : > { %2664 = vmatmul.mubr.bf16.vlgmr.msra.gmra.mxu0 %v2857_v10  ;;  %2728 = vmatmul.mubr.bf16.vlgmr.msra.gmra.mxu1 %v2858_v11 }
  0x33   : > { %2667 = vmatprep.mubr.bf16.mxu0 %v2859_v12  ;;  %2731 = vmatprep.mubr.bf16.mxu1 %v2860_v13 }
  0x3a   : > { %2668 = vmatmul.mubr.bf16.gmra.mxu0 %v2861_v14  ;;  %2732 = vmatmul.mubr.bf16.gmra.mxu1 %v2862_v15 }
  0x3b   : > { %2671 = vmatprep.mubr.bf16.mxu0 %v2863_v16  ;;  %2735 = vmatprep.mubr.bf16.mxu1 %v2864_v17 }
  0x42   : > { %2672 = vmatmul.mubr.bf16.gmra.mxu0 %v2865_v18  ;;  %2736 = vmatmul.mubr.bf16.gmra.mxu1 %v2866_v19 }
  0x43   : > { %2675 = vmatprep.mubr.bf16.mxu0 %v2867_v20  ;;  %2739 = vmatprep.mubr.bf16.mxu1 %v2868_v21 }
  0x4a   : > { %2676 = vmatmul.mubr.bf16.gmra.mxu0 %v2869_v22  ;;  %2740 = vmatmul.mubr.bf16.gmra.mxu1 %v2870_v23 }
  0x4b   : > { %2679 = vmatprep.mubr.bf16.mxu0 %v2871_v24  ;;  %2743 = vmatprep.mubr.bf16.mxu1 %v2872_v25 }
  0x52   : > { %2680 = vmatmul.mubr.bf16.gmra.mxu0 %v2873_v26  ;;  %2744 = vmatmul.mubr.bf16.gmra.mxu1 %v2874_v27 }
  0x53   : > { %2683 = vmatprep.mubr.bf16.mxu0 %v2875_v28  ;;  %2747 = vmatprep.mubr.bf16.mxu1 %v2876_v29 }
  0x5a   : > { %2684 = vmatmul.mubr.bf16.gmra.mxu0 %v2877_v30  ;;  %2748 = vmatmul.mubr.bf16.gmra.mxu1 %v2878_v31 }
  0x5b   : > { %2687 = vmatprep.mubr.bf16.mxu0 %v2879_v32  ;;  %2751 = vmatprep.mubr.bf16.mxu1 %v2880_v33 }
  0x62   : > { %2688 = vmatmul.mubr.bf16.gmra.mxu0 %v2881_v34  ;;  %2752 = vmatmul.mubr.bf16.gmra.mxu1 %v2882_v35 }
  0x63   : > { %2691 = vmatprep.mubr.bf16.mxu0 %v2883_v36  ;;  %2755 = vmatprep.mubr.bf16.mxu1 %v2884_v37 }
  0x6a   : > { %2692 = vmatmul.mubr.bf16.gmra.mxu0 %v2885_v38  ;;  %2756 = vmatmul.mubr.bf16.gmra.mxu1 %v2886_v39 }
  0x6b   : > { %2695 = vmatprep.mubr.bf16.mxu0 %v2887_v40  ;;  %2759 = vmatprep.mubr.bf16.mxu1 %v2888_v41 }
  0x72   : > { %2696 = vmatmul.mubr.bf16.gmra.mxu0 %v2889_v42  ;;  %2760 = vmatmul.mubr.bf16.gmra.mxu1 %v2890_v43 }
  0x73   : > { %2699 = vmatprep.mubr.bf16.mxu0 %v2891_v44  ;;  %2763 = vmatprep.mubr.bf16.mxu1 %v2892_v45 }
  0x7a   : > { %2700 = vmatmul.mubr.bf16.gmra.mxu0 %v2893_v46  ;;  %2764 = vmatmul.mubr.bf16.gmra.mxu1 %v2894_v47 }
  0x7b   : > { %2703 = vmatprep.mubr.bf16.mxu0 %v2895_v48  ;;  %2767 = vmatprep.mubr.bf16.mxu1 %v2896_v49 }
  0x82   : > { %2704 = vmatmul.mubr.bf16.gmra.mxu0 %v2897_v50  ;;  %2768 = vmatmul.mubr.bf16.gmra.mxu1 %v2898_v51 }
  0x83   : > { %2707 = vmatprep.mubr.bf16.mxu0 %v2899_v52  ;;  %2771 = vmatprep.mubr.bf16.mxu1 %v2900_v53 }
  0x8a   : > { %2708 = vmatmul.mubr.bf16.gmra.mxu0 %v2901_v54  ;;  %2772 = vmatmul.mubr.bf16.gmra.mxu1 %v2902_v55 }
  0x8b   : > { %2711 = vmatprep.mubr.bf16.mxu0 %v2903_v56  ;;  %2775 = vmatprep.mubr.bf16.mxu1 %v2904_v57 }
  0x92   : > { %2712 = vmatmul.mubr.bf16.gmra.mxu0 %v2905_v58  ;;  %2776 = vmatmul.mubr.bf16.gmra.mxu1 %v2906_v59 }
  0x93   : > { %2715 = vmatprep.mubr.bf16.mxu0 %v2907_v60  ;;  %2779 = vmatprep.mubr.bf16.mxu1 %v2908_v61 }
  0x9a   : > { %2716 = vmatmul.mubr.bf16.gmra.mxu0 %v2909_v62  ;;  %2780 = vmatmul.mubr.bf16.gmra.mxu1 %v2910_v63 }
  0x9b   : > { %2719 = vmatprep.mubr.bf16.mxu0 %v2911_v0  ;;  %2783 = vmatprep.mubr.bf16.mxu1 %v2912_v1 }
  0xa2   : > { %2720 = vmatmul.mubr.bf16.gmra.mxu0 %v2913_v2  ;;  %2784 = vmatmul.mubr.bf16.gmra.mxu1 %v2914_v3 }
  0xa3   : > { %2723 = vmatprep.mubr.bf16.mxu0 %v2915_v4  ;;  %2787 = vmatprep.mubr.bf16.mxu1 %v2916_v5 }
  0xaa   : > { %2724 = vmatmul.mubr.bf16.gmra.mxu0 %v2917_v6  ;;  %2788 = vmatmul.mubr.bf16.gmra.mxu1 %v2918_v7 }
  0xf2   : > { %v2665_v9 = vpop.f32.mrf.mxu0  ;;  %v2729_v10 = vpop.f32.mrf.mxu1 }
  0xf3   : > { %v857_v11 = vadd.f32 %v2665_v9, %v3610_v8  ;;  %v1113_v12 = vadd.f32 %v2729_v10, %v3610_v8 }
  0xf4   : > { %v848_v13 = vpop.f32.mrf.mxu0  ;;  %v1104_v14 = vpop.f32.mrf.mxu1 }
  0xf5   : > { %v2446_v15 = vmul.f32 -1.442695, %v857_v11  ;;  %v2510_v16 = vmul.f32 -1.442695, %v1113_v12  ;;  %v849_v17 = vadd.f32 %v3610_v8, %v848_v13  ;;  %v1105_v18 = vadd.f32 %v3610_v8, %v1104_v14 }
  0xf6   : > { %v2666_v19 = vpop.f32.mrf.mxu0  ;;  %v2730_v20 = vpop.f32.mrf.mxu1 }
  0xf7   : > { %2919 = vpow2.f32 %v2446_v15  ;;  %v2444_v21 = vmul.f32 -1.442695, %v849_v17  ;;  %v2508_v22 = vmul.f32 -1.442695, %v1105_v18  ;;  %v860_v23 = vadd.f32 %v2666_v19, %v3610_v8 }
  0xf8   : > { %2921 = vpow2.f32 %v2510_v16  ;;  %v1116_v24 = vadd.f32 %v2730_v20, %v3610_v8  ;;  %v851_v25 = vpop.f32.mrf.mxu0  ;;  %v1107_v26 = vpop.f32.mrf.mxu1 }
  0xf9   : > { %2923 = vpow2.f32 %v2444_v21  ;;  %v2447_v27 = vmul.f32 -1.442695, %v860_v23  ;;  %v852_v28 = vadd.f32 %v3610_v8, %v851_v25  ;;  %v1108_v29 = vadd.f32 %v3610_v8, %v1107_v26 }
  0xfa   : > { %2925 = vpow2.f32 %v2508_v22  ;;  %v2511_v30 = vmul.f32 -1.442695, %v1116_v24  ;;  %v2669_v31 = vpop.f32.mrf.mxu0  ;;  %v2733_v32 = vpop.f32.mrf.mxu1 }
  0xfb   : > { %2927 = vpow2.f32 %v2447_v27  ;;  %v2445_v33 = vmul.f32 -1.442695, %v852_v28  ;;  %v2509_v34 = vmul.f32 -1.442695, %v1108_v29  ;;  %v873_v35 = vadd.f32 %v2669_v31, %v3610_v8 }
  0xfc   : > { %2929 = vpow2.f32 %v2511_v30  ;;  %v1129_v36 = vadd.f32 %v2733_v32, %v3610_v8  ;;  %v864_v37 = vpop.f32.mrf.mxu0  ;;  %v1120_v38 = vpop.f32.mrf.mxu1 }
  0xfd   : > { %2931 = vpow2.f32 %v2445_v33  ;;  %v2450_v39 = vmul.f32 -1.442695, %v873_v35  ;;  %v865_v40 = vadd.f32 %v3610_v8, %v864_v37  ;;  %v1121_v41 = vadd.f32 %v3610_v8, %v1120_v38 }
  0xfe   : > { %2933 = vpow2.f32 %v2509_v34  ;;  %v2514_v42 = vmul.f32 -1.442695, %v1129_v36  ;;  %v2670_v43 = vpop.f32.mrf.mxu0  ;;  %v2734_v44 = vpop.f32.mrf.mxu1 }
  0xff   : > { %2935 = vpow2.f32 %v2450_v39  ;;  %v2448_v45 = vmul.f32 -1.442695, %v865_v40  ;;  %v2512_v46 = vmul.f32 -1.442695, %v1121_v41  ;;  %v876_v47 = vadd.f32 %v2670_v43, %v3610_v8 }
 0x100   : > { %2937 = vpow2.f32 %v2514_v42  ;;  %v1132_v48 = vadd.f32 %v2734_v44, %v3610_v8  ;;  %v867_v49 = vpop.f32.mrf.mxu0  ;;  %v1123_v50 = vpop.f32.mrf.mxu1 }
 0x101   : > { %2939 = vpow2.f32 %v2448_v45  ;;  %v2451_v51 = vmul.f32 -1.442695, %v876_v47  ;;  %v868_v52 = vadd.f32 %v3610_v8, %v867_v49  ;;  %v1124_v53 = vadd.f32 %v3610_v8, %v1123_v50 }
 0x102   : > { %2941 = vpow2.f32 %v2512_v46  ;;  %v2515_v54 = vmul.f32 -1.442695, %v1132_v48  ;;  %v2673_v55 = vpop.f32.mrf.mxu0  ;;  %v2737_v56 = vpop.f32.mrf.mxu1 }
 0x103   : > { %2943 = vpow2.f32 %v2451_v51  ;;  %v2449_v57 = vmul.f32 -1.442695, %v868_v52  ;;  %v2513_v58 = vmul.f32 -1.442695, %v1124_v53  ;;  %v889_v26 = vadd.f32 %v2673_v55, %v3610_v8 }
 0x104   : > { %v2920_v59 = vpop.eup %2919  ;;  %2945 = vpow2.f32 %v2515_v54  ;;  %v880_v60 = vpop.f32.mrf.mxu0  ;;  %v1145_v30 = vadd.f32 %v2737_v56, %v3610_v8 }
 0x105   : > { %v1136_v61 = vpop.f32.mrf.mxu1  ;;  %v2922_v62 = vpop.eup %2921  ;;  %v1745_v63 = vadd.f32 1.0, %v2920_v59  ;;  %2947 = vpow2.f32 %v2449_v57  ;;  %v881_v33 = vadd.f32 %v3610_v8, %v880_v60  ;;  %v2454_v40 = vmul.f32 -1.442695, %v889_v26 }
 0x106   : > { %v2924_v0 = vpop.eup %2923  ;;  %v1809_v1 = vadd.f32 1.0, %v2922_v62  ;;  %2949 = vpow2.f32 %v2513_v58  ;;  %v2674_v2 = vpop.f32.mrf.mxu0  ;;  %v1137_v36 = vadd.f32 %v3610_v8, %v1136_v61  ;;  %v2518_v45 = vmul.f32 -1.442695, %v1145_v30 }
 0x107   : > { %v2926_v3 = vpop.eup %2925  ;;  %2951 = vrcp.f32 %v1745_v63  ;;  %v1743_v4 = vadd.f32 1.0, %v2924_v0  ;;  %v2738_v5 = vpop.f32.mrf.mxu1  ;;  %v892_v41 = vadd.f32 %v2674_v2, %v3610_v8  ;;  %v2452_v48 = vmul.f32 -1.442695, %v881_v33 }
 0x108   : > { %v2928_v6 = vpop.eup %2927  ;;  %2953 = vrcp.f32 %v1809_v1  ;;  %v1807_v7 = vadd.f32 1.0, %v2926_v3  ;;  %v883_v13 = vpop.f32.mrf.mxu0  ;;  %v1148_v46 = vadd.f32 %v2738_v5, %v3610_v8  ;;  %v2516_v51 = vmul.f32 -1.442695, %v1137_v36 }
 0x109   : > { %v2930_v9 = vpop.eup %2929  ;;  %2955 = vrcp.f32 %v1743_v4  ;;  %v1746_v10 = vadd.f32 1.0, %v2928_v6  ;;  %v1139_v16 = vpop.f32.mrf.mxu1  ;;  %v884_v49 = vadd.f32 %v3610_v8, %v883_v13  ;;  %v2455_v55 = vmul.f32 -1.442695, %v892_v41 }
 0x10a   : > { %v2932_v11 = vpop.eup %2931  ;;  %2957 = vrcp.f32 %v1807_v7  ;;  %v1810_v12 = vadd.f32 1.0, %v2930_v9  ;;  %v2677_v23 = vpop.f32.mrf.mxu0  ;;  %v1140_v52 = vadd.f32 %v3610_v8, %v1139_v16  ;;  %v2519_v59 = vmul.f32 -1.442695, %v1148_v46 }
 0x10b   : > { %v2934_v14 = vpop.eup %2933  ;;  %2959 = vrcp.f32 %v1746_v10  ;;  %v1744_v15 = vadd.f32 1.0, %v2932_v11  ;;  %v2741_v27 = vpop.f32.mrf.mxu1  ;;  %v905_v56 = vadd.f32 %v2677_v23, %v3610_v8  ;;  %v2453_v62 = vmul.f32 -1.442695, %v884_v49 }
 0x10c   : > { %v2936_v17 = vpop.eup %2935  ;;  %2961 = vrcp.f32 %v1810_v12  ;;  %v1808_v18 = vadd.f32 1.0, %v2934_v14  ;;  %v896_v37 = vpop.f32.mrf.mxu0  ;;  %v1161_v60 = vadd.f32 %v2741_v27, %v3610_v8  ;;  %v2517_v1 = vmul.f32 -1.442695, %v1140_v52 }
 0x10d   : > { %v2938_v19 = vpop.eup %2937  ;;  %2963 = vrcp.f32 %v1744_v15  ;;  %v1749_v20 = vadd.f32 1.0, %v2936_v17  ;;  %v1152_v42 = vpop.f32.mrf.mxu1  ;;  %v897_v63 = vadd.f32 %v3610_v8, %v896_v37  ;;  %v2458_v5 = vmul.f32 -1.442695, %v905_v56 }
 0x10e   : > { %v2940_v21 = vpop.eup %2939  ;;  %2965 = vrcp.f32 %v1808_v18  ;;  %v1813_v22 = vadd.f32 1.0, %v2938_v19  ;;  %v2678_v53 = vpop.f32.mrf.mxu0  ;;  %v1153_v2 = vadd.f32 %v3610_v8, %v1152_v42  ;;  %v2522_v10 = vmul.f32 -1.442695, %v1161_v60 }
 0x10f   : > { %v2942_v24 = vpop.eup %2941  ;;  %2967 = vrcp.f32 %v1749_v20  ;;  %v1747_v25 = vadd.f32 1.0, %v2940_v21  ;;  %v2742_v57 = vpop.f32.mrf.mxu1  ;;  %v908_v6 = vadd.f32 %v2678_v53, %v3610_v8  ;;  %v2456_v13 = vmul.f32 -1.442695, %v897_v63 }
 0x110   : > { %v2944_v28 = vpop.eup %2943  ;;  %2969 = vrcp.f32 %v1813_v22  ;;  %v1811_v29 = vadd.f32 1.0, %v2942_v24  ;;  %v899_v3 = vpop.f32.mrf.mxu0  ;;  %v1164_v11 = vadd.f32 %v2742_v57, %v3610_v8  ;;  %v2520_v16 = vmul.f32 -1.442695, %v1153_v2 }
 0x111   : > { %v2946_v31 = vpop.eup %2945  ;;  %2971 = vrcp.f32 %v1747_v25  ;;  %v1750_v32 = vadd.f32 1.0, %v2944_v28  ;;  %v1155_v7 = vpop.f32.mrf.mxu1  ;;  %v900_v14 = vadd.f32 %v3610_v8, %v899_v3  ;;  %v2459_v20 = vmul.f32 -1.442695, %v908_v6 }
 0x112   : > { %v2948_v34 = vpop.eup %2947  ;;  %2973 = vrcp.f32 %v1811_v29  ;;  %v1814_v35 = vadd.f32 1.0, %v2946_v31  ;;  %v1156_v17 = vadd.f32 %v3610_v8, %v1155_v7  ;;  %v3670_v18 = vpop.f32.mrf.mxu0  ;;  %v2523_v23 = vmul.f32 -1.442695, %v1164_v11 }
 0x113   : > { %v2950_v38 = vpop.eup %2949  ;;  %2975 = vrcp.f32 %v1750_v32  ;;  %v1748_v39 = vadd.f32 1.0, %v2948_v34  ;;  %v3674_v21 = vpop.f32.mrf.mxu1  ;;  %v2457_v25 = vmul.f32 -1.442695, %v900_v14 }
 0x114   : > { %v2952_v43 = vpop.eup %2951  ;;  %2977 = vrcp.f32 %v1814_v35  ;;  %v1812_v44 = vadd.f32 1.0, %v2950_v38  ;;  %v2521_v27 = vmul.f32 -1.442695, %v1156_v17  ;;  %v912_v28 = vpop.f32.mrf.mxu0  ;;  %v1177_v63 = vadd.f32 %v3674_v21, %v3610_v8 }
 0x115   : > { %v2954_v47 = vpop.eup %2953  ;;  %2130 = vst.msk [vmem:[%s3635_s8 + $0x10] sm:$0xff] %vm2127_vm0, %v2952_v43  ;;  %2979 = vrcp.f32 %v1748_v39  ;;  %v1168_v30 = vpop.f32.mrf.mxu1  ;;  %v913_v2 = vadd.f32 %v3610_v8, %v912_v28 }
 0x116   : > { %v2956_v50 = vpop.eup %2955  ;;  %2194 = vst.msk [vmem:[%s3635_s8 + $0x210] sm:$0xff] %vm2127_vm0, %v2954_v47  ;;  %2981 = vrcp.f32 %v1812_v44  ;;  %v2682_v36 = vpop.f32.mrf.mxu0 }
 0x117   : > { %v2958_v54 = vpop.eup %2957  ;;  %2128 = vst.msk [vmem:[%s3635_s8] sm:$0xff] %vm2127_vm0, %v2956_v50  ;;  %2983 = vpow2.f32 %v2454_v40  ;;  %v2746_v39 = vpop.f32.mrf.mxu1  ;;  %v924_v11 = vadd.f32 %v2682_v36, %v3610_v8 }
 0x118   : > { %v2960_v58 = vpop.eup %2959  ;;  %2192 = vst.msk [vmem:[%s3635_s8 + $0x200] sm:$0xff] %vm2127_vm0, %v2958_v54  ;;  %2985 = vpow2.f32 %v2518_v45  ;;  %v915_v46 = vpop.f32.mrf.mxu0 }
 0x119   : > { %v2962_v61 = vpop.eup %2961  ;;  %2131 = vst.msk [vmem:[%s3635_s8 + $0x18] sm:$0xff] %vm2127_vm0, %v2960_v58  ;;  %2987 = vpow2.f32 %v2452_v48  ;;  %v1171_v49 = vpop.f32.mrf.mxu1 }
 0x11a   : > { %v2964_v0 = vpop.eup %2963  ;;  %2195 = vst.msk [vmem:[%s3635_s8 + $0x218] sm:$0xff] %vm2127_vm0, %v2962_v61  ;;  %2989 = vpow2.f32 %v2516_v51  ;;  %v2685_v56 = vpop.f32.mrf.mxu0 }
 0x11b   : > { %v2966_v4 = vpop.eup %2965  ;;  %2129 = vst.msk [vmem:[%s3635_s8 + $0x8] sm:$0xff] %vm2127_vm0, %v2964_v0  ;;  %2991 = vpow2.f32 %v2455_v55  ;;  %v2749_v60 = vpop.f32.mrf.mxu1 }
 0x11c   : > { %v2968_v9 = vpop.eup %2967  ;;  %2193 = vst.msk [vmem:[%s3635_s8 + $0x208] sm:$0xff] %vm2127_vm0, %v2966_v4  ;;  %2993 = vpow2.f32 %v2519_v59  ;;  %v921_v59 = vadd.f32 %v3670_v18, %v3610_v8  ;;  %v928_v6 = vpop.f32.mrf.mxu0  ;;  %v2460_v18 = vmul.f32 -1.442695, %v913_v2 }
 0x11d   : > { %v2970_v12 = vpop.eup %2969  ;;  %2134 = vst.msk [vmem:[%s3635_s8 + $0x30] sm:$0xff] %vm2127_vm0, %v2968_v9  ;;  %2995 = vpow2.f32 %v2453_v62 }
 0x11e   : > { %v2972_v15 = vpop.eup %2971  ;;  %2198 = vst.msk [vmem:[%s3635_s8 + $0x230] sm:$0xff] %vm2127_vm0, %v2970_v12  ;;  %2997 = vpow2.f32 %v2517_v1  ;;  %v1184_v12 = vpop.f32.mrf.mxu1 }
 0x11f   : > { %v2974_v19 = vpop.eup %2973  ;;  %2132 = vst.msk [vmem:[%s3635_s8 + $0x20] sm:$0xff] %vm2127_vm0, %v2972_v15  ;;  %2999 = vpow2.f32 %v2458_v5  ;;  %v1169_v5 = vadd.f32 %v3610_v8, %v1168_v30  ;;  %v2526_v15 = vmul.f32 -1.442695, %v1177_v63  ;;  %v1193_v30 = vadd.f32 %v2749_v60, %v3610_v8 }
 0x120   : > { %v2976_v22 = vpop.eup %2975  ;;  %2196 = vst.msk [vmem:[%s3635_s8 + $0x220] sm:$0xff] %vm2127_vm0, %v2974_v19  ;;  %3001 = vpow2.f32 %v2522_v10  ;;  %v2462_v10 = vmul.f32 -1.442695, %v921_v59  ;;  %v916_v19 = vadd.f32 %v3610_v8, %v915_v46  ;;  %v1185_v36 = vadd.f32 %v3610_v8, %v1184_v12 }
 0x121   : > { %v2978_v24 = vpop.eup %2977  ;;  %2135 = vst.msk [vmem:[%s3635_s8 + $0x38] sm:$0xff] %vm2127_vm0, %v2976_v22  ;;  %3003 = vpow2.f32 %v2456_v13  ;;  %v2524_v21 = vmul.f32 -1.442695, %v1169_v5  ;;  %v1172_v22 = vadd.f32 %v3610_v8, %v1171_v49 }
 0x122   : > { %v2980_v26 = vpop.eup %2979  ;;  %2199 = vst.msk [vmem:[%s3635_s8 + $0x238] sm:$0xff] %vm2127_vm0, %v2978_v24  ;;  %3005 = vpow2.f32 %v2520_v16  ;;  %v1180_v16 = vadd.f32 %v2746_v39, %v3610_v8  ;;  %v2528_v49 = vmul.f32 -1.442695, %v1185_v36 }
 0x123   : > { %v2982_v29 = vpop.eup %2981  ;;  %2133 = vst.msk [vmem:[%s3635_s8 + $0x28] sm:$0xff] %vm2127_vm0, %v2980_v26  ;;  %3007 = vpow2.f32 %v2459_v20  ;;  %v937_v26 = vadd.f32 %v2685_v56, %v3610_v8 }
 0x124   : > { %v2984_v31 = vpop.eup %2983  ;;  %2197 = vst.msk [vmem:[%s3635_s8 + $0x228] sm:$0xff] %vm2127_vm0, %v2982_v29  ;;  %3009 = vpow2.f32 %v2523_v23  ;;  %v2686_v23 = vpop.f32.mrf.mxu0  ;;  %v2527_v29 = vmul.f32 -1.442695, %v1180_v16 }
 0x125   : > { %v2986_v32 = vpop.eup %2985  ;;  %v1753_v33 = vadd.f32 1.0, %v2984_v31  ;;  %3011 = vpow2.f32 %v2457_v25  ;;  %v2463_v25 = vmul.f32 -1.442695, %v924_v11  ;;  %v2466_v39 = vmul.f32 -1.442695, %v937_v26 }
 0x126   : > { %v2988_v34 = vpop.eup %2987  ;;  %v1817_v35 = vadd.f32 1.0, %v2986_v32  ;;  %3013 = vpow2.f32 %v2521_v27  ;;  %v2750_v27 = vpop.f32.mrf.mxu1  ;;  %v2461_v32 = vmul.f32 -1.442695, %v916_v19 }
 0x127   : > { %v2990_v37 = vpop.eup %2989  ;;  %3015 = vrcp.f32 %v1753_v33  ;;  %v1751_v38 = vadd.f32 1.0, %v2988_v34  ;;  %v929_v33 = vadd.f32 %v3610_v8, %v928_v6 }
 0x128   : > { %v2992_v40 = vpop.eup %2991  ;;  %3017 = vrcp.f32 %v1817_v35  ;;  %v1815_v41 = vadd.f32 1.0, %v2990_v37  ;;  %v2525_v35 = vmul.f32 -1.442695, %v1172_v22  ;;  %v931_v37 = vpop.f32.mrf.mxu0 }
 0x129   : > { %v2994_v42 = vpop.eup %2993  ;;  %3019 = vrcp.f32 %v1751_v38  ;;  %v1754_v43 = vadd.f32 1.0, %v2992_v40  ;;  %v940_v40 = vadd.f32 %v2686_v23, %v3610_v8  ;;  %v2464_v46 = vmul.f32 -1.442695, %v929_v33 }
 0x12a   : > { %v2996_v44 = vpop.eup %2995  ;;  %3021 = vrcp.f32 %v1815_v41  ;;  %v1818_v45 = vadd.f32 1.0, %v2994_v42  ;;  %v1187_v41 = vpop.f32.mrf.mxu1 }
 0x12b   : > { %v2998_v47 = vpop.eup %2997  ;;  %3023 = vrcp.f32 %v1754_v43  ;;  %v1752_v48 = vadd.f32 1.0, %v2996_v44  ;;  %v2530_v43 = vmul.f32 -1.442695, %v1193_v30  ;;  %v1196_v44 = vadd.f32 %v2750_v27, %v3610_v8 }
 0x12c   : > { %v3000_v50 = vpop.eup %2999  ;;  %3025 = vrcp.f32 %v1818_v45  ;;  %v1816_v51 = vadd.f32 1.0, %v2998_v47  ;;  %v932_v47 = vadd.f32 %v3610_v8, %v931_v37 }
 0x12d   : > { %v3002_v52 = vpop.eup %3001  ;;  %3027 = vrcp.f32 %v1752_v48  ;;  %v1757_v53 = vadd.f32 1.0, %v3000_v50  ;;  %v1188_v50 = vadd.f32 %v3610_v8, %v1187_v41  ;;  %v2531_v56 = vmul.f32 -1.442695, %v1196_v44 }
 0x12e   : > { %v3004_v54 = vpop.eup %3003  ;;  %3029 = vrcp.f32 %v1816_v51  ;;  %v1821_v55 = vadd.f32 1.0, %v3002_v52  ;;  %v3724_v51 = vpop.f32.mrf.mxu0 }
 0x12f   : > { %v3006_v57 = vpop.eup %3005  ;;  %3031 = vrcp.f32 %v1757_v53  ;;  %v1755_v58 = vadd.f32 1.0, %v3004_v54  ;;  %v2467_v53 = vmul.f32 -1.442695, %v940_v40  ;;  %v3728_v54 = vpop.f32.mrf.mxu1  ;;  %v2529_v60 = vmul.f32 -1.442695, %v1188_v50 }
 0x130   : > { %v3008_v61 = vpop.eup %3007  ;;  %3033 = vrcp.f32 %v1821_v55  ;;  %v1819_v62 = vadd.f32 1.0, %v3006_v57  ;;  %v1209_v33 = vadd.f32 %v3728_v54, %v3610_v8 }
 0x131   : > { %v3010_v0 = vpop.eup %3009  ;;  %3035 = vrcp.f32 %v1755_v58  ;;  %v1758_v1 = vadd.f32 1.0, %v3008_v61  ;;  %v2465_v58 = vmul.f32 -1.442695, %v932_v47  ;;  %v944_v61 = vpop.f32.mrf.mxu0 }
 0x132   : > { %v3012_v3 = vpop.eup %3011  ;;  %3037 = vrcp.f32 %v1819_v62  ;;  %v1822_v4 = vadd.f32 1.0, %v3010_v0  ;;  %v1200_v63 = vpop.f32.mrf.mxu1  ;;  %v945_v36 = vadd.f32 %v3610_v8, %v944_v61 }
 0x133   : > { %v3014_v7 = vpop.eup %3013  ;;  %3039 = vrcp.f32 %v1758_v1  ;;  %v1756_v9 = vadd.f32 1.0, %v3012_v3  ;;  %v2690_v5 = vpop.f32.mrf.mxu0 }
 0x134   : > { %v3016_v13 = vpop.eup %3015  ;;  %3041 = vrcp.f32 %v1822_v4  ;;  %v1820_v14 = vadd.f32 1.0, %v3014_v7  ;;  %v956_v44 = vadd.f32 %v2690_v5, %v3610_v8 }
 0x135   : > { %v3018_v17 = vpop.eup %3017  ;;  %2138 = vst.msk [vmem:[%s3635_s8 + $0x50] sm:$0xff] %vm2127_vm0, %v3016_v13  ;;  %3043 = vrcp.f32 %v1756_v9  ;;  %v2754_v9 = vpop.f32.mrf.mxu1 }
 0x136   : > { %v3020_v20 = vpop.eup %3019  ;;  %2202 = vst.msk [vmem:[%s3635_s8 + $0x250] sm:$0xff] %vm2127_vm0, %v3018_v17  ;;  %3045 = vrcp.f32 %v1820_v14  ;;  %v947_v16 = vpop.f32.mrf.mxu0 }
 0x137   : > { %v3022_v24 = vpop.eup %3021  ;;  %2136 = vst.msk [vmem:[%s3635_s8 + $0x40] sm:$0xff] %vm2127_vm0, %v3020_v20  ;;  %3047 = vpow2.f32 %v2462_v10  ;;  %v1203_v19 = vpop.f32.mrf.mxu1 }
 0x138   : > { %v3024_v28 = vpop.eup %3023  ;;  %2200 = vst.msk [vmem:[%s3635_s8 + $0x240] sm:$0xff] %vm2127_vm0, %v3022_v24  ;;  %3049 = vpow2.f32 %v2526_v15  ;;  %v2693_v26 = vpop.f32.mrf.mxu0 }
 0x139   : > { %v3026_v31 = vpop.eup %3025  ;;  %2139 = vst.msk [vmem:[%s3635_s8 + $0x58] sm:$0xff] %vm2127_vm0, %v3024_v28  ;;  %3051 = vpow2.f32 %v2460_v18  ;;  %v2757_v30 = vpop.f32.mrf.mxu1 }
 0x13a   : > { %v3028_v34 = vpop.eup %3027  ;;  %2203 = vst.msk [vmem:[%s3635_s8 + $0x258] sm:$0xff] %vm2127_vm0, %v3026_v31  ;;  %3053 = vpow2.f32 %v2524_v21  ;;  %v960_v40 = vpop.f32.mrf.mxu0 }
 0x13b   : > { %v3030_v38 = vpop.eup %3029  ;;  %2137 = vst.msk [vmem:[%s3635_s8 + $0x48] sm:$0xff] %vm2127_vm0, %v3028_v34  ;;  %3055 = vpow2.f32 %v2463_v25 }
 0x13c   : > { %v3032_v42 = vpop.eup %3031  ;;  %2201 = vst.msk [vmem:[%s3635_s8 + $0x248] sm:$0xff] %vm2127_vm0, %v3030_v38  ;;  %3057 = vpow2.f32 %v2527_v29  ;;  %v953_v29 = vadd.f32 %v3724_v51, %v3610_v8  ;;  %v2468_v51 = vmul.f32 -1.442695, %v945_v36 }
 0x13d   : > { %v3034_v45 = vpop.eup %3033  ;;  %2142 = vst.msk [vmem:[%s3635_s8 + $0x70] sm:$0xff] %vm2127_vm0, %v3032_v42  ;;  %3059 = vpow2.f32 %v2461_v32 }
 0x13e   : > { %v3036_v48 = vpop.eup %3035  ;;  %2206 = vst.msk [vmem:[%s3635_s8 + $0x270] sm:$0xff] %vm2127_vm0, %v3034_v45  ;;  %3061 = vpow2.f32 %v2525_v35  ;;  %v1216_v45 = vpop.f32.mrf.mxu1 }
 0x13f   : > { %v3038_v52 = vpop.eup %3037  ;;  %2140 = vst.msk [vmem:[%s3635_s8 + $0x60] sm:$0xff] %vm2127_vm0, %v3036_v48  ;;  %3063 = vpow2.f32 %v2466_v39  ;;  %v1201_v39 = vadd.f32 %v3610_v8, %v1200_v63  ;;  %v2534_v48 = vmul.f32 -1.442695, %v1209_v33  ;;  %v1225_v63 = vadd.f32 %v2757_v30, %v3610_v8 }
 0x140   : > { %v3040_v55 = vpop.eup %3039  ;;  %2204 = vst.msk [vmem:[%s3635_s8 + $0x260] sm:$0xff] %vm2127_vm0, %v3038_v52  ;;  %3065 = vpow2.f32 %v2530_v43  ;;  %v2470_v43 = vmul.f32 -1.442695, %v953_v29  ;;  %v948_v52 = vadd.f32 %v3610_v8, %v947_v16  ;;  %v1217_v5 = vadd.f32 %v3610_v8, %v1216_v45 }
 0x141   : > { %v3042_v57 = vpop.eup %3041  ;;  %2143 = vst.msk [vmem:[%s3635_s8 + $0x78] sm:$0xff] %vm2127_vm0, %v3040_v55  ;;  %3067 = vpow2.f32 %v2464_v46  ;;  %v2532_v54 = vmul.f32 -1.442695, %v1201_v39  ;;  %v1204_v55 = vadd.f32 %v3610_v8, %v1203_v19 }
 0x142   : > { %v3044_v59 = vpop.eup %3043  ;;  %2207 = vst.msk [vmem:[%s3635_s8 + $0x278] sm:$0xff] %vm2127_vm0, %v3042_v57  ;;  %3069 = vpow2.f32 %v2528_v49  ;;  %v1212_v49 = vadd.f32 %v2754_v9, %v3610_v8  ;;  %v2536_v19 = vmul.f32 -1.442695, %v1217_v5 }
 0x143   : > { %v3046_v62 = vpop.eup %3045  ;;  %2141 = vst.msk [vmem:[%s3635_s8 + $0x68] sm:$0xff] %vm2127_vm0, %v3044_v59  ;;  %3071 = vpow2.f32 %v2467_v53  ;;  %v969_v59 = vadd.f32 %v2693_v26, %v3610_v8 }
 0x144   : > { %v3048_v0 = vpop.eup %3047  ;;  %2205 = vst.msk [vmem:[%s3635_s8 + $0x268] sm:$0xff] %vm2127_vm0, %v3046_v62  ;;  %3073 = vpow2.f32 %v2531_v56  ;;  %v2694_v56 = vpop.f32.mrf.mxu0  ;;  %v2535_v62 = vmul.f32 -1.442695, %v1212_v49 }
 0x145   : > { %v3050_v1 = vpop.eup %3049  ;;  %v1761_v2 = vadd.f32 1.0, %v3048_v0  ;;  %3075 = vpow2.f32 %v2465_v58  ;;  %v2471_v58 = vmul.f32 -1.442695, %v956_v44  ;;  %v2474_v9 = vmul.f32 -1.442695, %v969_v59 }
 0x146   : > { %v3052_v3 = vpop.eup %3051  ;;  %v1825_v4 = vadd.f32 1.0, %v3050_v1  ;;  %3077 = vpow2.f32 %v2529_v60  ;;  %v2758_v60 = vpop.f32.mrf.mxu1  ;;  %v2469_v1 = vmul.f32 -1.442695, %v948_v52 }
 0x147   : > { %v3054_v6 = vpop.eup %3053  ;;  %3079 = vrcp.f32 %v1761_v2  ;;  %v1759_v7 = vadd.f32 1.0, %v3052_v3  ;;  %v961_v2 = vadd.f32 %v3610_v8, %v960_v40 }
 0x148   : > { %v3056_v10 = vpop.eup %3055  ;;  %3081 = vrcp.f32 %v1825_v4  ;;  %v1823_v11 = vadd.f32 1.0, %v3054_v6  ;;  %v2533_v4 = vmul.f32 -1.442695, %v1204_v55  ;;  %v963_v6 = vpop.f32.mrf.mxu0 }
 0x149   : > { %v3058_v12 = vpop.eup %3057  ;;  %3083 = vrcp.f32 %v1759_v7  ;;  %v1762_v13 = vadd.f32 1.0, %v3056_v10  ;;  %v972_v10 = vadd.f32 %v2694_v56, %v3610_v8  ;;  %v2472_v16 = vmul.f32 -1.442695, %v961_v2 }
 0x14a   : > { %v3060_v14 = vpop.eup %3059  ;;  %3085 = vrcp.f32 %v1823_v11  ;;  %v1826_v15 = vadd.f32 1.0, %v3058_v12  ;;  %v1219_v11 = vpop.f32.mrf.mxu1 }
 0x14b   : > { %v3062_v17 = vpop.eup %3061  ;;  %3087 = vrcp.f32 %v1762_v13  ;;  %v1760_v18 = vadd.f32 1.0, %v3060_v14  ;;  %v2538_v13 = vmul.f32 -1.442695, %v1225_v63  ;;  %v1228_v14 = vadd.f32 %v2758_v60, %v3610_v8 }
 0x14c   : > { %v3064_v20 = vpop.eup %3063  ;;  %3089 = vrcp.f32 %v1826_v15  ;;  %v1824_v21 = vadd.f32 1.0, %v3062_v17  ;;  %v964_v17 = vadd.f32 %v3610_v8, %v963_v6 }
 0x14d   : > { %v3066_v22 = vpop.eup %3065  ;;  %3091 = vrcp.f32 %v1760_v18  ;;  %v1765_v23 = vadd.f32 1.0, %v3064_v20  ;;  %v1220_v20 = vadd.f32 %v3610_v8, %v1219_v11  ;;  %v2539_v26 = vmul.f32 -1.442695, %v1228_v14 }
 0x14e   : > { %v3068_v24 = vpop.eup %3067  ;;  %3093 = vrcp.f32 %v1824_v21  ;;  %v1829_v25 = vadd.f32 1.0, %v3066_v22  ;;  %v3778_v21 = vpop.f32.mrf.mxu0  ;;  %v2473_v8 = vmul.f32 -1.442695, %v964_v17 }
 0x14f   : > { %v3070_v27 = vpop.eup %3069  ;;  %3095 = vrcp.f32 %v1765_v23  ;;  %v1763_v28 = vadd.f32 1.0, %v3068_v24  ;;  %v2475_v23 = vmul.f32 -1.442695, %v972_v10  ;;  %v3782_v24 = vpop.f32.mrf.mxu1  ;;  %v2537_v29 = vmul.f32 -1.442695, %v1220_v20 }
 0x150   : > { %v3072_v31 = vpop.eup %3071  ;;  %3097 = vrcp.f32 %v1829_v25  ;;  %v1827_v32 = vadd.f32 1.0, %v3070_v27  ;;  %v976_v30 = vpop.f32.mrf.mxu0 }
 0x151   : > { %v3074_v34 = vpop.eup %3073  ;;  %3099 = vrcp.f32 %v1763_v28  ;;  %v1766_v35 = vadd.f32 1.0, %v3072_v31 }
 0x152   : > { %v3076_v37 = vpop.eup %3075  ;;  %3101 = vrcp.f32 %v1827_v32  ;;  %v1830_v38 = vadd.f32 1.0, %v3074_v34  ;;  %v1232_v32 = vpop.f32.mrf.mxu1 }
 0x153   : > { %v3078_v41 = vpop.eup %3077  ;;  %3103 = vrcp.f32 %v1766_v35  ;;  %v1764_v42 = vadd.f32 1.0, %v3076_v37 }
 0x154   : > { %v3080_v46 = vpop.eup %3079  ;;  %3105 = vrcp.f32 %v1830_v38  ;;  %v1828_v47 = vadd.f32 1.0, %v3078_v41  ;;  %v2698_v38 = vpop.f32.mrf.mxu0 }
 0x155   : > { %v3082_v50 = vpop.eup %3081  ;;  %2146 = vst.msk [vmem:[%s3635_s8 + $0x90] sm:$0xff] %vm2127_vm0, %v3080_v46  ;;  %3107 = vrcp.f32 %v1764_v42  ;;  %v2762_v41 = vpop.f32.mrf.mxu1 }
 0x156   : > { %v3084_v53 = vpop.eup %3083  ;;  %2210 = vst.msk [vmem:[%s3635_s8 + $0x290] sm:$0xff] %vm2127_vm0, %v3082_v50  ;;  %3109 = vrcp.f32 %v1828_v47 }
 0x157   : > { %v3086_v57 = vpop.eup %3085  ;;  %2144 = vst.msk [vmem:[%s3635_s8 + $0x80] sm:$0xff] %vm2127_vm0, %v3084_v53  ;;  %3111 = vpow2.f32 %v2470_v43 }
 0x158   : > { %v3088_v61 = vpop.eup %3087  ;;  %2208 = vst.msk [vmem:[%s3635_s8 + $0x280] sm:$0xff] %vm2127_vm0, %v3086_v57  ;;  %3113 = vpow2.f32 %v2534_v48  ;;  %v979_v48 = vpop.f32.mrf.mxu0 }
 0x159   : > { %v3090_v0 = vpop.eup %3089  ;;  %2147 = vst.msk [vmem:[%s3635_s8 + $0x98] sm:$0xff] %vm2127_vm0, %v3088_v61  ;;  %3115 = vpow2.f32 %v2468_v51  ;;  %v1235_v51 = vpop.f32.mrf.mxu1  ;;  %v3797_v61 = vld [vmem:[%s4060_s2] ss:$0 sm:$0xff] }
 0x15a   : > { %v3092_v3 = vpop.eup %3091  ;;  %2211 = vst.msk [vmem:[%s3635_s8 + $0x298] sm:$0xff] %vm2127_vm0, %v3090_v0  ;;  %3117 = vpow2.f32 %v2532_v54  ;;  %v1241_v2 = vadd.f32 %v3797_v61, %v3782_v24  ;;  %v977_v5 = vadd.f32 %v3797_v61, %v976_v30  ;;  %v988_v14 = vadd.f32 %v3797_v61, %v2698_v38 }
 0x15b   : > { %v3094_v7 = vpop.eup %3093  ;;  %2145 = vst.msk [vmem:[%s3635_s8 + $0x88] sm:$0xff] %vm2127_vm0, %v3092_v3  ;;  %3119 = vpow2.f32 %v2471_v58  ;;  %v2701_v58 = vpop.f32.mrf.mxu0 }
 0x15c   : > { %v3096_v12 = vpop.eup %3095  ;;  %2209 = vst.msk [vmem:[%s3635_s8 + $0x288] sm:$0xff] %vm2127_vm0, %v3094_v7  ;;  %3121 = vpow2.f32 %v2535_v62  ;;  %v985_v62 = vadd.f32 %v3797_v61, %v3778_v21  ;;  %v2765_v63 = vpop.f32.mrf.mxu1  ;;  %v2476_v21 = vmul.f32 -1.442695, %v977_v5 }
 0x15d   : > { %v3098_v15 = vpop.eup %3097  ;;  %2150 = vst.msk [vmem:[%s3635_s8 + $0xb0] sm:$0xff] %vm2127_vm0, %v3096_v12  ;;  %3123 = vpow2.f32 %v2469_v1  ;;  %v992_v10 = vpop.f32.mrf.mxu0 }
 0x15e   : > { %v3100_v18 = vpop.eup %3099  ;;  %2214 = vst.msk [vmem:[%s3635_s8 + $0x2b0] sm:$0xff] %vm2127_vm0, %v3098_v15  ;;  %3125 = vpow2.f32 %v2533_v4  ;;  %v1248_v15 = vpop.f32.mrf.mxu1 }
 0x15f   : > { %v3102_v22 = vpop.eup %3101  ;;  %2148 = vst.msk [vmem:[%s3635_s8 + $0xa0] sm:$0xff] %vm2127_vm0, %v3100_v18  ;;  %3127 = vpow2.f32 %v2474_v9  ;;  %v1233_v9 = vadd.f32 %v3797_v61, %v1232_v32  ;;  %v2542_v18 = vmul.f32 -1.442695, %v1241_v2  ;;  %v1257_v32 = vadd.f32 %v3797_v61, %v2765_v63 }
 0x160   : > { %v3104_v25 = vpop.eup %3103  ;;  %2212 = vst.msk [vmem:[%s3635_s8 + $0x2a0] sm:$0xff] %vm2127_vm0, %v3102_v22  ;;  %3129 = vpow2.f32 %v2538_v13  ;;  %v2478_v13 = vmul.f32 -1.442695, %v985_v62  ;;  %v980_v22 = vadd.f32 %v3797_v61, %v979_v48  ;;  %v1249_v38 = vadd.f32 %v3797_v61, %v1248_v15 }
 0x161   : > { %v3106_v27 = vpop.eup %3105  ;;  %2151 = vst.msk [vmem:[%s3635_s8 + $0xb8] sm:$0xff] %vm2127_vm0, %v3104_v25  ;;  %3131 = vpow2.f32 %v2472_v16  ;;  %v2540_v24 = vmul.f32 -1.442695, %v1233_v9  ;;  %v1236_v25 = vadd.f32 %v3797_v61, %v1235_v51 }
 0x162   : > { %v3108_v28 = vpop.eup %3107  ;;  %2215 = vst.msk [vmem:[%s3635_s8 + $0x2b8] sm:$0xff] %vm2127_vm0, %v3106_v27  ;;  %3133 = vpow2.f32 %v2536_v19  ;;  %v1244_v19 = vadd.f32 %v3797_v61, %v2762_v41  ;;  %v2544_v51 = vmul.f32 -1.442695, %v1249_v38 }
 0x163   : > { %v3110_v31 = vpop.eup %3109  ;;  %2149 = vst.msk [vmem:[%s3635_s8 + $0xa8] sm:$0xff] %vm2127_vm0, %v3108_v28  ;;  %3135 = vpow2.f32 %v2475_v23  ;;  %v1001_v28 = vadd.f32 %v3797_v61, %v2701_v58 }
 0x164   : > { %v3112_v33 = vpop.eup %3111  ;;  %2213 = vst.msk [vmem:[%s3635_s8 + $0x2a8] sm:$0xff] %vm2127_vm0, %v3110_v31  ;;  %3137 = vpow2.f32 %v2539_v26  ;;  %v2702_v26 = vpop.f32.mrf.mxu0  ;;  %v2543_v31 = vmul.f32 -1.442695, %v1244_v19 }
 0x165   : > { %v3114_v34 = vpop.eup %3113  ;;  %v1769_v35 = vadd.f32 1.0, %v3112_v33  ;;  %3139 = vpow2.f32 %v2473_v8  ;;  %v2479_v8 = vmul.f32 -1.442695, %v988_v14  ;;  %v2482_v41 = vmul.f32 -1.442695, %v1001_v28 }
 0x166   : > { %v3116_v36 = vpop.eup %3115  ;;  %v1833_v37 = vadd.f32 1.0, %v3114_v34  ;;  %3141 = vpow2.f32 %v2537_v29  ;;  %v2766_v29 = vpop.f32.mrf.mxu1  ;;  %v2477_v34 = vmul.f32 -1.442695, %v980_v22 }
 0x167   : > { %v3118_v39 = vpop.eup %3117  ;;  %3143 = vrcp.f32 %v1769_v35  ;;  %v1767_v40 = vadd.f32 1.0, %v3116_v36  ;;  %v993_v35 = vadd.f32 %v3797_v61, %v992_v10 }
 0x168   : > { %v3120_v42 = vpop.eup %3119  ;;  %3145 = vrcp.f32 %v1833_v37  ;;  %v1831_v43 = vadd.f32 1.0, %v3118_v39  ;;  %v2541_v37 = vmul.f32 -1.442695, %v1236_v25  ;;  %v995_v39 = vpop.f32.mrf.mxu0 }
 0x169   : > { %v3122_v44 = vpop.eup %3121  ;;  %3147 = vrcp.f32 %v1767_v40  ;;  %v1770_v45 = vadd.f32 1.0, %v3120_v42  ;;  %v1004_v42 = vadd.f32 %v3797_v61, %v2702_v26  ;;  %v2480_v48 = vmul.f32 -1.442695, %v993_v35 }
 0x16a   : > { %v3124_v46 = vpop.eup %3123  ;;  %3149 = vrcp.f32 %v1831_v43  ;;  %v1834_v47 = vadd.f32 1.0, %v3122_v44  ;;  %v1251_v43 = vpop.f32.mrf.mxu1 }
 0x16b   : > { %v3126_v49 = vpop.eup %3125  ;;  %3151 = vrcp.f32 %v1770_v45  ;;  %v1768_v50 = vadd.f32 1.0, %v3124_v46  ;;  %v2546_v45 = vmul.f32 -1.442695, %v1257_v32  ;;  %v1260_v46 = vadd.f32 %v3797_v61, %v2766_v29 }
 0x16c   : > { %v3128_v52 = vpop.eup %3127  ;;  %3153 = vrcp.f32 %v1834_v47  ;;  %v1832_v53 = vadd.f32 1.0, %v3126_v49  ;;  %v996_v49 = vadd.f32 %v3797_v61, %v995_v39 }
 0x16d   : > { %v3130_v54 = vpop.eup %3129  ;;  %3155 = vrcp.f32 %v1768_v50  ;;  %v1773_v55 = vadd.f32 1.0, %v3128_v52  ;;  %v1252_v52 = vadd.f32 %v3797_v61, %v1251_v43  ;;  %v2547_v58 = vmul.f32 -1.442695, %v1260_v46 }
 0x16e   : > { %v3132_v56 = vpop.eup %3131  ;;  %3157 = vrcp.f32 %v1832_v53  ;;  %v1837_v57 = vadd.f32 1.0, %v3130_v54  ;;  %v3837_v53 = vpop.f32.mrf.mxu0 }
 0x16f   : > { %v3134_v59 = vpop.eup %3133  ;;  %3159 = vrcp.f32 %v1773_v55  ;;  %v1771_v60 = vadd.f32 1.0, %v3132_v56  ;;  %v2483_v55 = vmul.f32 -1.442695, %v1004_v42  ;;  %v3841_v56 = vpop.f32.mrf.mxu1  ;;  %v2545_v63 = vmul.f32 -1.442695, %v1252_v52 }
 0x170   : > { %v3136_v0 = vpop.eup %3135  ;;  %3161 = vrcp.f32 %v1837_v57  ;;  %v1835_v1 = vadd.f32 1.0, %v3134_v59  ;;  %v1273_v35 = vadd.f32 %v3797_v61, %v3841_v56 }
 0x171   : > { %v3138_v3 = vpop.eup %3137  ;;  %3163 = vrcp.f32 %v1771_v60  ;;  %v1774_v4 = vadd.f32 1.0, %v3136_v0  ;;  %v2481_v60 = vmul.f32 -1.442695, %v996_v49  ;;  %v1008_v0 = vpop.f32.mrf.mxu0 }
 0x172   : > { %v3140_v6 = vpop.eup %3139  ;;  %3165 = vrcp.f32 %v1835_v1  ;;  %v1838_v7 = vadd.f32 1.0, %v3138_v3  ;;  %v1264_v2 = vpop.f32.mrf.mxu1  ;;  %v1009_v38 = vadd.f32 %v3797_v61, %v1008_v0 }
 0x173   : > { %v3142_v11 = vpop.eup %3141  ;;  %3167 = vrcp.f32 %v1774_v4  ;;  %v1772_v12 = vadd.f32 1.0, %v3140_v6  ;;  %v2706_v9 = vpop.f32.mrf.mxu0 }
 0x174   : > { %v3144_v16 = vpop.eup %3143  ;;  %3169 = vrcp.f32 %v1838_v7  ;;  %v1836_v17 = vadd.f32 1.0, %v3142_v11  ;;  %v1020_v46 = vadd.f32 %v3797_v61, %v2706_v9 }
 0x175   : > { %v3146_v20 = vpop.eup %3145  ;;  %2154 = vst.msk [vmem:[%s3635_s8 + $0xd0] sm:$0xff] %vm2127_vm0, %v3144_v16  ;;  %3171 = vrcp.f32 %v1772_v12  ;;  %v2770_v12 = vpop.f32.mrf.mxu1 }
 0x176   : > { %v3148_v23 = vpop.eup %3147  ;;  %2218 = vst.msk [vmem:[%s3635_s8 + $0x2d0] sm:$0xff] %vm2127_vm0, %v3146_v20  ;;  %3173 = vrcp.f32 %v1836_v17  ;;  %v1011_v19 = vpop.f32.mrf.mxu0 }
 0x177   : > { %v3150_v27 = vpop.eup %3149  ;;  %2152 = vst.msk [vmem:[%s3635_s8 + $0xc0] sm:$0xff] %vm2127_vm0, %v3148_v23  ;;  %3175 = vpow2.f32 %v2478_v13  ;;  %v1267_v22 = vpop.f32.mrf.mxu1 }
 0x178   : > { %v3152_v30 = vpop.eup %3151  ;;  %2216 = vst.msk [vmem:[%s3635_s8 + $0x2c0] sm:$0xff] %vm2127_vm0, %v3150_v27  ;;  %3177 = vpow2.f32 %v2542_v18  ;;  %v2709_v28 = vpop.f32.mrf.mxu0 }
 0x179   : > { %v3154_v33 = vpop.eup %3153  ;;  %2155 = vst.msk [vmem:[%s3635_s8 + $0xd8] sm:$0xff] %vm2127_vm0, %v3152_v30  ;;  %3179 = vpow2.f32 %v2476_v21  ;;  %v2773_v32 = vpop.f32.mrf.mxu1 }
 0x17a   : > { %v3156_v36 = vpop.eup %3155  ;;  %2219 = vst.msk [vmem:[%s3635_s8 + $0x2d8] sm:$0xff] %vm2127_vm0, %v3154_v33  ;;  %3181 = vpow2.f32 %v2540_v24  ;;  %v1024_v42 = vpop.f32.mrf.mxu0 }
 0x17b   : > { %v3158_v40 = vpop.eup %3157  ;;  %2153 = vst.msk [vmem:[%s3635_s8 + $0xc8] sm:$0xff] %vm2127_vm0, %v3156_v36  ;;  %3183 = vpow2.f32 %v2479_v8 }
 0x17c   : > { %v3160_v44 = vpop.eup %3159  ;;  %2217 = vst.msk [vmem:[%s3635_s8 + $0x2c8] sm:$0xff] %vm2127_vm0, %v3158_v40  ;;  %3185 = vpow2.f32 %v2543_v31  ;;  %v1017_v31 = vadd.f32 %v3797_v61, %v3837_v53  ;;  %v2484_v53 = vmul.f32 -1.442695, %v1009_v38 }
 0x17d   : > { %v3162_v47 = vpop.eup %3161  ;;  %2158 = vst.msk [vmem:[%s3635_s8 + $0xf0] sm:$0xff] %vm2127_vm0, %v3160_v44  ;;  %3187 = vpow2.f32 %v2477_v34 }
 0x17e   : > { %v3164_v50 = vpop.eup %3163  ;;  %2222 = vst.msk [vmem:[%s3635_s8 + $0x2f0] sm:$0xff] %vm2127_vm0, %v3162_v47  ;;  %3189 = vpow2.f32 %v2541_v37  ;;  %v1280_v47 = vpop.f32.mrf.mxu1 }
 0x17f   : > { %v3166_v54 = vpop.eup %3165  ;;  %2156 = vst.msk [vmem:[%s3635_s8 + $0xe0] sm:$0xff] %vm2127_vm0, %v3164_v50  ;;  %3191 = vpow2.f32 %v2482_v41  ;;  %v1265_v41 = vadd.f32 %v3797_v61, %v1264_v2  ;;  %v2550_v50 = vmul.f32 -1.442695, %v1273_v35  ;;  %v1289_v2 = vadd.f32 %v3797_v61, %v2773_v32 }
 0x180   : > { %v3168_v57 = vpop.eup %3167  ;;  %2220 = vst.msk [vmem:[%s3635_s8 + $0x2e0] sm:$0xff] %vm2127_vm0, %v3166_v54  ;;  %3193 = vpow2.f32 %v2546_v45  ;;  %v2486_v45 = vmul.f32 -1.442695, %v1017_v31  ;;  %v1012_v54 = vadd.f32 %v3797_v61, %v1011_v19  ;;  %v1281_v9 = vadd.f32 %v3797_v61, %v1280_v47 }
 0x181   : > { %v3170_v59 = vpop.eup %3169  ;;  %2159 = vst.msk [vmem:[%s3635_s8 + $0xf8] sm:$0xff] %vm2127_vm0, %v3168_v57  ;;  %3195 = vpow2.f32 %v2480_v48  ;;  %v2548_v56 = vmul.f32 -1.442695, %v1265_v41  ;;  %v1268_v57 = vadd.f32 %v3797_v61, %v1267_v22 }
 0x182   : > { %v3172_v62 = vpop.eup %3171  ;;  %2223 = vst.msk [vmem:[%s3635_s8 + $0x2f8] sm:$0xff] %vm2127_vm0, %v3170_v59  ;;  %3197 = vpow2.f32 %v2544_v51  ;;  %v1276_v51 = vadd.f32 %v3797_v61, %v2770_v12  ;;  %v2552_v22 = vmul.f32 -1.442695, %v1281_v9 }
 0x183   : > { %v3174_v1 = vpop.eup %3173  ;;  %2157 = vst.msk [vmem:[%s3635_s8 + $0xe8] sm:$0xff] %vm2127_vm0, %v3172_v62  ;;  %3199 = vpow2.f32 %v2483_v55  ;;  %v1033_v62 = vadd.f32 %v3797_v61, %v2709_v28 }
 0x184   : > { %v3176_v3 = vpop.eup %3175  ;;  %2221 = vst.msk [vmem:[%s3635_s8 + $0x2e8] sm:$0xff] %vm2127_vm0, %v3174_v1  ;;  %3201 = vpow2.f32 %v2547_v58  ;;  %v2710_v58 = vpop.f32.mrf.mxu0  ;;  %v2551_v1 = vmul.f32 -1.442695, %v1276_v51 }
 0x185   : > { %v3178_v4 = vpop.eup %3177  ;;  %v1777_v5 = vadd.f32 1.0, %v3176_v3  ;;  %3203 = vpow2.f32 %v2481_v60  ;;  %v2487_v60 = vmul.f32 -1.442695, %v1020_v46  ;;  %v2490_v12 = vmul.f32 -1.442695, %v1033_v62 }
 0x186   : > { %v3180_v6 = vpop.eup %3179  ;;  %v1841_v7 = vadd.f32 1.0, %v3178_v4  ;;  %3205 = vpow2.f32 %v2545_v63  ;;  %v2774_v63 = vpop.f32.mrf.mxu1  ;;  %v2485_v4 = vmul.f32 -1.442695, %v1012_v54 }
 0x187   : > { %v3182_v10 = vpop.eup %3181  ;;  %3207 = vrcp.f32 %v1777_v5  ;;  %v1775_v11 = vadd.f32 1.0, %v3180_v6  ;;  %v1025_v5 = vadd.f32 %v3797_v61, %v1024_v42 }
 0x188   : > { %v3184_v13 = vpop.eup %3183  ;;  %3209 = vrcp.f32 %v1841_v7  ;;  %v1839_v14 = vadd.f32 1.0, %v3182_v10  ;;  %v2549_v7 = vmul.f32 -1.442695, %v1268_v57  ;;  %v1027_v10 = vpop.f32.mrf.mxu0 }
 0x189   : > { %v3186_v15 = vpop.eup %3185  ;;  %3211 = vrcp.f32 %v1775_v11  ;;  %v1778_v16 = vadd.f32 1.0, %v3184_v13  ;;  %v1036_v13 = vadd.f32 %v3797_v61, %v2710_v58  ;;  %v2488_v19 = vmul.f32 -1.442695, %v1025_v5 }
 0x18a   : > { %v3188_v17 = vpop.eup %3187  ;;  %3213 = vrcp.f32 %v1839_v14  ;;  %v1842_v18 = vadd.f32 1.0, %v3186_v15  ;;  %v1283_v14 = vpop.f32.mrf.mxu1 }
 0x18b   : > { %v3190_v20 = vpop.eup %3189  ;;  %3215 = vrcp.f32 %v1778_v16  ;;  %v1776_v21 = vadd.f32 1.0, %v3188_v17  ;;  %v2554_v16 = vmul.f32 -1.442695, %v1289_v2  ;;  %v1292_v17 = vadd.f32 %v3797_v61, %v2774_v63 }
 0x18c   : > { %v3192_v23 = vpop.eup %3191  ;;  %3217 = vrcp.f32 %v1842_v18  ;;  %v1840_v24 = vadd.f32 1.0, %v3190_v20  ;;  %v1028_v20 = vadd.f32 %v3797_v61, %v1027_v10 }
 0x18d   : > { %v3194_v25 = vpop.eup %3193  ;;  %3219 = vrcp.f32 %v1776_v21  ;;  %v1781_v26 = vadd.f32 1.0, %v3192_v23  ;;  %v1284_v23 = vadd.f32 %v3797_v61, %v1283_v14  ;;  %v2555_v28 = vmul.f32 -1.442695, %v1292_v17 }
 0x18e   : > { %v3196_v27 = vpop.eup %3195  ;;  %3221 = vrcp.f32 %v1840_v24  ;;  %v1845_v8 = vadd.f32 1.0, %v3194_v25  ;;  %v3891_v24 = vpop.f32.mrf.mxu0 }
 0x18f   : > { %v3198_v29 = vpop.eup %3197  ;;  %3223 = vrcp.f32 %v1781_v26  ;;  %v1779_v30 = vadd.f32 1.0, %v3196_v27  ;;  %v2491_v26 = vmul.f32 -1.442695, %v1036_v13  ;;  %v3895_v27 = vpop.f32.mrf.mxu1  ;;  %v2553_v32 = vmul.f32 -1.442695, %v1284_v23 }
 0x190   : > { %v3200_v33 = vpop.eup %3199  ;;  %3225 = vrcp.f32 %v1845_v8  ;;  %v1843_v34 = vadd.f32 1.0, %v3198_v29  ;;  %v1305_v5 = vadd.f32 %v3797_v61, %v3895_v27 }
 0x191   : > { %v3202_v36 = vpop.eup %3201  ;;  %3227 = vrcp.f32 %v1779_v30  ;;  %v1782_v37 = vadd.f32 1.0, %v3200_v33  ;;  %v2489_v30 = vmul.f32 -1.442695, %v1028_v20  ;;  %v1040_v33 = vpop.f32.mrf.mxu0 }
 0x192   : > { %v3204_v39 = vpop.eup %3203  ;;  %3229 = vrcp.f32 %v1843_v34  ;;  %v1846_v40 = vadd.f32 1.0, %v3202_v36  ;;  %v1296_v35 = vpop.f32.mrf.mxu1  ;;  %v1041_v9 = vadd.f32 %v3797_v61, %v1040_v33 }
 0x193   : > { %v3206_v43 = vpop.eup %3205  ;;  %3231 = vrcp.f32 %v1782_v37  ;;  %v1780_v44 = vadd.f32 1.0, %v3204_v39  ;;  %v2714_v41 = vpop.f32.mrf.mxu0 }
 0x194   : > { %v3208_v48 = vpop.eup %3207  ;;  %3233 = vrcp.f32 %v1846_v40  ;;  %v1844_v49 = vadd.f32 1.0, %v3206_v43  ;;  %v1052_v17 = vadd.f32 %v3797_v61, %v2714_v41 }
 0x195   : > { %v3210_v52 = vpop.eup %3209  ;;  %2162 = vst.msk [vmem:[%s3635_s8 + $0x110] sm:$0xff] %vm2127_vm0, %v3208_v48  ;;  %3235 = vrcp.f32 %v1780_v44  ;;  %v2778_v44 = vpop.f32.mrf.mxu1 }
 0x196   : > { %v3212_v55 = vpop.eup %3211  ;;  %2226 = vst.msk [vmem:[%s3635_s8 + $0x310] sm:$0xff] %vm2127_vm0, %v3210_v52  ;;  %3237 = vrcp.f32 %v1844_v49  ;;  %v1043_v51 = vpop.f32.mrf.mxu0 }
 0x197   : > { %v3214_v59 = vpop.eup %3213  ;;  %2160 = vst.msk [vmem:[%s3635_s8 + $0x100] sm:$0xff] %vm2127_vm0, %v3212_v55  ;;  %3239 = vpow2.f32 %v2486_v45  ;;  %v1299_v54 = vpop.f32.mrf.mxu1 }
 0x198   : > { %v3216_v0 = vpop.eup %3215  ;;  %2224 = vst.msk [vmem:[%s3635_s8 + $0x300] sm:$0xff] %vm2127_vm0, %v3214_v59  ;;  %3241 = vpow2.f32 %v2550_v50  ;;  %v2717_v62 = vpop.f32.mrf.mxu0 }
 0x199   : > { %v3218_v3 = vpop.eup %3217  ;;  %2163 = vst.msk [vmem:[%s3635_s8 + $0x118] sm:$0xff] %vm2127_vm0, %v3216_v0  ;;  %3243 = vpow2.f32 %v2484_v53  ;;  %v2781_v2 = vpop.f32.mrf.mxu1 }
 0x19a   : > { %v3220_v6 = vpop.eup %3219  ;;  %2227 = vst.msk [vmem:[%s3635_s8 + $0x318] sm:$0xff] %vm2127_vm0, %v3218_v3  ;;  %3245 = vpow2.f32 %v2548_v56  ;;  %v1056_v13 = vpop.f32.mrf.mxu0 }
 0x19b   : > { %v3222_v11 = vpop.eup %3221  ;;  %2161 = vst.msk [vmem:[%s3635_s8 + $0x108] sm:$0xff] %vm2127_vm0, %v3220_v6  ;;  %3247 = vpow2.f32 %v2487_v60 }
 0x19c   : > { %v3224_v15 = vpop.eup %3223  ;;  %2225 = vst.msk [vmem:[%s3635_s8 + $0x308] sm:$0xff] %vm2127_vm0, %v3222_v11  ;;  %3249 = vpow2.f32 %v2551_v1  ;;  %v1049_v1 = vadd.f32 %v3797_v61, %v3891_v24  ;;  %v2492_v24 = vmul.f32 -1.442695, %v1041_v9 }
 0x19d   : > { %v3226_v18 = vpop.eup %3225  ;;  %2166 = vst.msk [vmem:[%s3635_s8 + $0x130] sm:$0xff] %vm2127_vm0, %v3224_v15  ;;  %3251 = vpow2.f32 %v2485_v4 }
 0x19e   : > { %v3228_v21 = vpop.eup %3227  ;;  %2230 = vst.msk [vmem:[%s3635_s8 + $0x330] sm:$0xff] %vm2127_vm0, %v3226_v18  ;;  %3253 = vpow2.f32 %v2549_v7  ;;  %v1312_v18 = vpop.f32.mrf.mxu1 }
 0x19f   : > { %v3230_v25 = vpop.eup %3229  ;;  %2164 = vst.msk [vmem:[%s3635_s8 + $0x120] sm:$0xff] %vm2127_vm0, %v3228_v21  ;;  %3255 = vpow2.f32 %v2490_v12  ;;  %v1297_v12 = vadd.f32 %v3797_v61, %v1296_v35  ;;  %v2558_v21 = vmul.f32 -1.442695, %v1305_v5  ;;  %v1321_v35 = vadd.f32 %v3797_v61, %v2781_v2 }
 0x1a0   : > { %v3232_v8 = vpop.eup %3231  ;;  %2228 = vst.msk [vmem:[%s3635_s8 + $0x320] sm:$0xff] %vm2127_vm0, %v3230_v25  ;;  %3257 = vpow2.f32 %v2554_v16  ;;  %v2494_v16 = vmul.f32 -1.442695, %v1049_v1  ;;  %v1044_v25 = vadd.f32 %v3797_v61, %v1043_v51  ;;  %v1313_v41 = vadd.f32 %v3797_v61, %v1312_v18 }
 0x1a1   : > { %v3234_v29 = vpop.eup %3233  ;;  %2167 = vst.msk [vmem:[%s3635_s8 + $0x138] sm:$0xff] %vm2127_vm0, %v3232_v8  ;;  %3259 = vpow2.f32 %v2488_v19  ;;  %v2556_v27 = vmul.f32 -1.442695, %v1297_v12  ;;  %v1300_v8 = vadd.f32 %v3797_v61, %v1299_v54 }
 0x1a2   : > { %v3236_v31 = vpop.eup %3235  ;;  %2231 = vst.msk [vmem:[%s3635_s8 + $0x338] sm:$0xff] %vm2127_vm0, %v3234_v29  ;;  %3261 = vpow2.f32 %v2552_v22  ;;  %v1308_v22 = vadd.f32 %v3797_v61, %v2778_v44  ;;  %v2560_v54 = vmul.f32 -1.442695, %v1313_v41 }
 0x1a3   : > { %v3238_v34 = vpop.eup %3237  ;;  %2165 = vst.msk [vmem:[%s3635_s8 + $0x128] sm:$0xff] %vm2127_vm0, %v3236_v31  ;;  %3263 = vpow2.f32 %v2491_v26  ;;  %v1065_v31 = vadd.f32 %v3797_v61, %v2717_v62 }
 0x1a4   : > { %v3240_v36 = vpop.eup %3239  ;;  %2229 = vst.msk [vmem:[%s3635_s8 + $0x328] sm:$0xff] %vm2127_vm0, %v3238_v34  ;;  %3265 = vpow2.f32 %v2555_v28  ;;  %v2718_v28 = vpop.f32.mrf.mxu0  ;;  %v2559_v34 = vmul.f32 -1.442695, %v1308_v22 }
 0x1a5   : > { %v3242_v37 = vpop.eup %3241  ;;  %v1785_v38 = vadd.f32 1.0, %v3240_v36  ;;  %3267 = vpow2.f32 %v2489_v30  ;;  %v2495_v30 = vmul.f32 -1.442695, %v1052_v17  ;;  %v2498_v44 = vmul.f32 -1.442695, %v1065_v31 }
 0x1a6   : > { %v3244_v39 = vpop.eup %3243  ;;  %v1849_v40 = vadd.f32 1.0, %v3242_v37  ;;  %3269 = vpow2.f32 %v2553_v32  ;;  %v2782_v32 = vpop.f32.mrf.mxu1  ;;  %v2493_v37 = vmul.f32 -1.442695, %v1044_v25 }
 0x1a7   : > { %v3246_v42 = vpop.eup %3245  ;;  %3271 = vrcp.f32 %v1785_v38  ;;  %v1783_v43 = vadd.f32 1.0, %v3244_v39  ;;  %v1057_v38 = vadd.f32 %v3797_v61, %v1056_v13 }
 0x1a8   : > { %v3248_v45 = vpop.eup %3247  ;;  %3273 = vrcp.f32 %v1849_v40  ;;  %v1847_v46 = vadd.f32 1.0, %v3246_v42  ;;  %v2557_v40 = vmul.f32 -1.442695, %v1300_v8  ;;  %v1059_v42 = vpop.f32.mrf.mxu0 }
 0x1a9   : > { %v3250_v47 = vpop.eup %3249  ;;  %3275 = vrcp.f32 %v1783_v43  ;;  %v1786_v48 = vadd.f32 1.0, %v3248_v45  ;;  %v1068_v45 = vadd.f32 %v3797_v61, %v2718_v28  ;;  %v2496_v51 = vmul.f32 -1.442695, %v1057_v38 }
 0x1aa   : > { %v3252_v49 = vpop.eup %3251  ;;  %3277 = vrcp.f32 %v1847_v46  ;;  %v1850_v50 = vadd.f32 1.0, %v3250_v47  ;;  %v1315_v46 = vpop.f32.mrf.mxu1 }
 0x1ab   : > { %v3254_v52 = vpop.eup %3253  ;;  %3279 = vrcp.f32 %v1786_v48  ;;  %v1784_v53 = vadd.f32 1.0, %v3252_v49  ;;  %v2562_v48 = vmul.f32 -1.442695, %v1321_v35  ;;  %v1324_v49 = vadd.f32 %v3797_v61, %v2782_v32 }
 0x1ac   : > { %v3256_v55 = vpop.eup %3255  ;;  %3281 = vrcp.f32 %v1850_v50  ;;  %v1848_v56 = vadd.f32 1.0, %v3254_v52  ;;  %v1060_v52 = vadd.f32 %v3797_v61, %v1059_v42 }
 0x1ad   : > { %v3258_v57 = vpop.eup %3257  ;;  %3283 = vrcp.f32 %v1784_v53  ;;  %v1789_v58 = vadd.f32 1.0, %v3256_v55  ;;  %v1316_v55 = vadd.f32 %v3797_v61, %v1315_v46  ;;  %v2563_v62 = vmul.f32 -1.442695, %v1324_v49 }
 0x1ae   : > { %v3260_v59 = vpop.eup %3259  ;;  %3285 = vrcp.f32 %v1848_v56  ;;  %v1853_v60 = vadd.f32 1.0, %v3258_v57  ;;  %v3945_v56 = vpop.f32.mrf.mxu0 }
 0x1af   : > { %v3262_v63 = vpop.eup %3261  ;;  %3287 = vrcp.f32 %v1789_v58  ;;  %v1787_v0 = vadd.f32 1.0, %v3260_v59  ;;  %v2499_v58 = vmul.f32 -1.442695, %v1068_v45  ;;  %v3949_v59 = vpop.f32.mrf.mxu1  ;;  %v2561_v2 = vmul.f32 -1.442695, %v1316_v55 }
 0x1b0   : > { %v3264_v3 = vpop.eup %3263  ;;  %3289 = vrcp.f32 %v1853_v60  ;;  %v1851_v4 = vadd.f32 1.0, %v3262_v63  ;;  %v1337_v38 = vadd.f32 %v3797_v61, %v3949_v59 }
 0x1b1   : > { %v3266_v6 = vpop.eup %3265  ;;  %3291 = vrcp.f32 %v1787_v0  ;;  %v1790_v7 = vadd.f32 1.0, %v3264_v3  ;;  %v2497_v0 = vmul.f32 -1.442695, %v1060_v52  ;;  %v1072_v3 = vpop.f32.mrf.mxu0 }
 0x1b2   : > { %v3268_v10 = vpop.eup %3267  ;;  %3293 = vrcp.f32 %v1851_v4  ;;  %v1854_v11 = vadd.f32 1.0, %v3266_v6  ;;  %v1328_v5 = vpop.f32.mrf.mxu1  ;;  %v1073_v41 = vadd.f32 %v3797_v61, %v1072_v3 }
 0x1b3   : > { %v3270_v14 = vpop.eup %3269  ;;  %3295 = vrcp.f32 %v1790_v7  ;;  %v1788_v15 = vadd.f32 1.0, %v3268_v10  ;;  %v2722_v12 = vpop.f32.mrf.mxu0 }
 0x1b4   : > { %v3272_v19 = vpop.eup %3271  ;;  %3297 = vrcp.f32 %v1854_v11  ;;  %v1852_v20 = vadd.f32 1.0, %v3270_v14  ;;  %v1084_v49 = vadd.f32 %v3797_v61, %v2722_v12 }
 0x1b5   : > { %v3274_v23 = vpop.eup %3273  ;;  %2170 = vst.msk [vmem:[%s3635_s8 + $0x150] sm:$0xff] %vm2127_vm0, %v3272_v19  ;;  %3299 = vrcp.f32 %v1788_v15  ;;  %v2786_v15 = vpop.f32.mrf.mxu1 }
 0x1b6   : > { %v3276_v26 = vpop.eup %3275  ;;  %2234 = vst.msk [vmem:[%s3635_s8 + $0x350] sm:$0xff] %vm2127_vm0, %v3274_v23  ;;  %3301 = vrcp.f32 %v1852_v20  ;;  %v1075_v22 = vpop.f32.mrf.mxu0 }
 0x1b7   : > { %v3278_v29 = vpop.eup %3277  ;;  %2168 = vst.msk [vmem:[%s3635_s8 + $0x140] sm:$0xff] %vm2127_vm0, %v3276_v26  ;;  %3303 = vpow2.f32 %v2494_v16  ;;  %v1331_v25 = vpop.f32.mrf.mxu1 }
 0x1b8   : > { %v3280_v33 = vpop.eup %3279  ;;  %2232 = vst.msk [vmem:[%s3635_s8 + $0x340] sm:$0xff] %vm2127_vm0, %v3278_v29  ;;  %3305 = vpow2.f32 %v2558_v21  ;;  %v2725_v31 = vpop.f32.mrf.mxu0 }
 0x1b9   : > { %v3282_v36 = vpop.eup %3281  ;;  %2171 = vst.msk [vmem:[%s3635_s8 + $0x158] sm:$0xff] %vm2127_vm0, %v3280_v33  ;;  %3307 = vpow2.f32 %v2492_v24  ;;  %v2789_v35 = vpop.f32.mrf.mxu1 }
 0x1ba   : > { %v3284_v39 = vpop.eup %3283  ;;  %2235 = vst.msk [vmem:[%s3635_s8 + $0x358] sm:$0xff] %vm2127_vm0, %v3282_v36  ;;  %3309 = vpow2.f32 %v2556_v27  ;;  %v1088_v45 = vpop.f32.mrf.mxu0 }
 0x1bb   : > { %v3286_v43 = vpop.eup %3285  ;;  %2169 = vst.msk [vmem:[%s3635_s8 + $0x148] sm:$0xff] %vm2127_vm0, %v3284_v39  ;;  %3311 = vpow2.f32 %v2495_v30 }
 0x1bc   : > { %v3288_v47 = vpop.eup %3287  ;;  %2233 = vst.msk [vmem:[%s3635_s8 + $0x348] sm:$0xff] %vm2127_vm0, %v3286_v43  ;;  %3313 = vpow2.f32 %v2559_v34  ;;  %v1081_v34 = vadd.f32 %v3797_v61, %v3945_v56  ;;  %v2500_v56 = vmul.f32 -1.442695, %v1073_v41 }
 0x1bd   : > { %v3290_v50 = vpop.eup %3289  ;;  %2174 = vst.msk [vmem:[%s3635_s8 + $0x170] sm:$0xff] %vm2127_vm0, %v3288_v47  ;;  %3315 = vpow2.f32 %v2493_v37 }
 0x1be   : > { %v3292_v53 = vpop.eup %3291  ;;  %2238 = vst.msk [vmem:[%s3635_s8 + $0x370] sm:$0xff] %vm2127_vm0, %v3290_v50  ;;  %3317 = vpow2.f32 %v2557_v40  ;;  %v1344_v50 = vpop.f32.mrf.mxu1 }
 0x1bf   : > { %v3294_v57 = vpop.eup %3293  ;;  %2172 = vst.msk [vmem:[%s3635_s8 + $0x160] sm:$0xff] %vm2127_vm0, %v3292_v53  ;;  %3319 = vpow2.f32 %v2498_v44  ;;  %v1329_v44 = vadd.f32 %v3797_v61, %v1328_v5  ;;  %v2566_v53 = vmul.f32 -1.442695, %v1337_v38  ;;  %v1353_v5 = vadd.f32 %v3797_v61, %v2789_v35 }
 0x1c0   : > { %v3296_v60 = vpop.eup %3295  ;;  %2236 = vst.msk [vmem:[%s3635_s8 + $0x360] sm:$0xff] %vm2127_vm0, %v3294_v57  ;;  %3321 = vpow2.f32 %v2562_v48  ;;  %v2502_v48 = vmul.f32 -1.442695, %v1081_v34  ;;  %v1076_v57 = vadd.f32 %v3797_v61, %v1075_v22  ;;  %v1345_v12 = vadd.f32 %v3797_v61, %v1344_v50 }
 0x1c1   : > { %v3298_v63 = vpop.eup %3297  ;;  %2175 = vst.msk [vmem:[%s3635_s8 + $0x178] sm:$0xff] %vm2127_vm0, %v3296_v60  ;;  %3323 = vpow2.f32 %v2496_v51  ;;  %v2564_v59 = vmul.f32 -1.442695, %v1329_v44  ;;  %v1332_v60 = vadd.f32 %v3797_v61, %v1331_v25 }
 0x1c2   : > { %v3300_v1 = vpop.eup %3299  ;;  %2239 = vst.msk [vmem:[%s3635_s8 + $0x378] sm:$0xff] %vm2127_vm0, %v3298_v63  ;;  %3325 = vpow2.f32 %v2560_v54  ;;  %v1340_v54 = vadd.f32 %v3797_v61, %v2786_v15  ;;  %v2568_v25 = vmul.f32 -1.442695, %v1345_v12 }
 0x1c3   : > { %v3302_v4 = vpop.eup %3301  ;;  %2173 = vst.msk [vmem:[%s3635_s8 + $0x168] sm:$0xff] %vm2127_vm0, %v3300_v1  ;;  %3327 = vpow2.f32 %v2499_v58  ;;  %v1097_v1 = vadd.f32 %v3797_v61, %v2725_v31 }
 0x1c4   : > { %v3304_v6 = vpop.eup %3303  ;;  %2237 = vst.msk [vmem:[%s3635_s8 + $0x368] sm:$0xff] %vm2127_vm0, %v3302_v4  ;;  %3329 = vpow2.f32 %v2563_v62  ;;  %v2726_v62 = vpop.f32.mrf.mxu0  ;;  %v2567_v4 = vmul.f32 -1.442695, %v1340_v54 }
 0x1c5   : > { %v3306_v7 = vpop.eup %3305  ;;  %v1793_v9 = vadd.f32 1.0, %v3304_v6  ;;  %3331 = vpow2.f32 %v2497_v0  ;;  %v2503_v0 = vmul.f32 -1.442695, %v1084_v49  ;;  %v2506_v15 = vmul.f32 -1.442695, %v1097_v1 }
 0x1c6   : > { %v3308_v10 = vpop.eup %3307  ;;  %v1857_v11 = vadd.f32 1.0, %v3306_v7  ;;  %3333 = vpow2.f32 %v2561_v2  ;;  %v2790_v2 = vpop.f32.mrf.mxu1  ;;  %v2501_v7 = vmul.f32 -1.442695, %v1076_v57 }
 0x1c7   : > { %v3310_v13 = vpop.eup %3309  ;;  %3335 = vrcp.f32 %v1793_v9  ;;  %v1791_v14 = vadd.f32 1.0, %v3308_v10  ;;  %v1089_v9 = vadd.f32 %v3797_v61, %v1088_v45 }
 0x1c8   : > { %v3312_v16 = vpop.eup %3311  ;;  %3337 = vrcp.f32 %v1857_v11  ;;  %v1855_v17 = vadd.f32 1.0, %v3310_v13  ;;  %v2565_v11 = vmul.f32 -1.442695, %v1332_v60  ;;  %v1091_v13 = vpop.f32.mrf.mxu0 }
 0x1c9   : > { %v3314_v18 = vpop.eup %3313  ;;  %3339 = vrcp.f32 %v1791_v14  ;;  %v1794_v19 = vadd.f32 1.0, %v3312_v16  ;;  %v1100_v16 = vadd.f32 %v3797_v61, %v2726_v62  ;;  %v2504_v22 = vmul.f32 -1.442695, %v1089_v9 }
 0x1ca   : > { %v3316_v20 = vpop.eup %3315  ;;  %3341 = vrcp.f32 %v1855_v17  ;;  %v1858_v21 = vadd.f32 1.0, %v3314_v18  ;;  %v1347_v17 = vpop.f32.mrf.mxu1 }
 0x1cb   : > { %v3318_v23 = vpop.eup %3317  ;;  %3343 = vrcp.f32 %v1794_v19  ;;  %v1792_v24 = vadd.f32 1.0, %v3316_v20  ;;  %v2570_v19 = vmul.f32 -1.442695, %v1353_v5  ;;  %v1356_v20 = vadd.f32 %v3797_v61, %v2790_v2 }
 0x1cc   : > { %v3320_v26 = vpop.eup %3319  ;;  %3345 = vrcp.f32 %v1858_v21  ;;  %v1856_v27 = vadd.f32 1.0, %v3318_v23  ;;  %v1092_v23 = vadd.f32 %v3797_v61, %v1091_v13 }
 0x1cd   : > { %v3322_v8 = vpop.eup %3321  ;;  %3347 = vrcp.f32 %v1792_v24  ;;  %v1797_v28 = vadd.f32 1.0, %v3320_v26  ;;  %v1348_v26 = vadd.f32 %v3797_v61, %v1347_v17 }
 0x1ce   : > { %v3324_v29 = vpop.eup %3323  ;;  %3349 = vrcp.f32 %v1856_v27  ;;  %v1861_v30 = vadd.f32 1.0, %v3322_v8  ;;  %v2507_v8 = vmul.f32 -1.442695, %v1100_v16  ;;  %v2505_v31 = vmul.f32 -1.442695, %v1092_v23 }
 0x1cf   : > { %v3326_v32 = vpop.eup %3325  ;;  %3351 = vrcp.f32 %v1797_v28  ;;  %v1795_v33 = vadd.f32 1.0, %v3324_v29  ;;  %v2571_v29 = vmul.f32 -1.442695, %v1356_v20  ;;  %v2569_v61 = vmul.f32 -1.442695, %v1348_v26 }
 0x1d0   : > { %v3328_v36 = vpop.eup %3327  ;;  %3353 = vrcp.f32 %v1861_v30  ;;  %v1859_v37 = vadd.f32 1.0, %v3326_v32 }
 0x1d1   : > { %v3330_v39 = vpop.eup %3329  ;;  %3355 = vrcp.f32 %v1795_v33  ;;  %v1798_v40 = vadd.f32 1.0, %v3328_v36 }
 0x1d2   : > { %v3332_v42 = vpop.eup %3331  ;;  %3357 = vrcp.f32 %v1859_v37  ;;  %v1862_v43 = vadd.f32 1.0, %v3330_v39 }
 0x1d3   : > { %v3334_v46 = vpop.eup %3333  ;;  %3359 = vrcp.f32 %v1798_v40  ;;  %v1796_v47 = vadd.f32 1.0, %v3332_v42 }
 0x1d4   : > { %v3336_v51 = vpop.eup %3335  ;;  %3361 = vrcp.f32 %v1862_v43  ;;  %v1860_v52 = vadd.f32 1.0, %v3334_v46 }
 0x1d5   : > { %v3338_v55 = vpop.eup %3337  ;;  %2178 = vst.msk [vmem:[%s3635_s8 + $0x190] sm:$0xff] %vm2127_vm0, %v3336_v51  ;;  %3363 = vrcp.f32 %v1796_v47 }
 0x1d6   : > { %v3340_v58 = vpop.eup %3339  ;;  %2242 = vst.msk [vmem:[%s3635_s8 + $0x390] sm:$0xff] %vm2127_vm0, %v3338_v55  ;;  %3365 = vrcp.f32 %v1860_v52 }
 0x1d7   : > { %v3342_v63 = vpop.eup %3341  ;;  %2176 = vst.msk [vmem:[%s3635_s8 + $0x180] sm:$0xff] %vm2127_vm0, %v3340_v58  ;;  %3367 = vpow2.f32 %v2502_v48 }
 0x1d8   : > { %v3344_v3 = vpop.eup %3343  ;;  %2240 = vst.msk [vmem:[%s3635_s8 + $0x380] sm:$0xff] %vm2127_vm0, %v3342_v63  ;;  %3369 = vpow2.f32 %v2566_v53 }
 0x1d9   : > { %v3346_v6 = vpop.eup %3345  ;;  %2179 = vst.msk [vmem:[%s3635_s8 + $0x198] sm:$0xff] %vm2127_vm0, %v3344_v3  ;;  %3371 = vpow2.f32 %v2500_v56 }
 0x1da   : > { %v3348_v10 = vpop.eup %3347  ;;  %2243 = vst.msk [vmem:[%s3635_s8 + $0x398] sm:$0xff] %vm2127_vm0, %v3346_v6  ;;  %3373 = vpow2.f32 %v2564_v59 }
 0x1db   : > { %v3350_v14 = vpop.eup %3349  ;;  %2177 = vst.msk [vmem:[%s3635_s8 + $0x188] sm:$0xff] %vm2127_vm0, %v3348_v10  ;;  %3375 = vpow2.f32 %v2503_v0 }
 0x1dc   : > { %v3352_v18 = vpop.eup %3351  ;;  %2241 = vst.msk [vmem:[%s3635_s8 + $0x388] sm:$0xff] %vm2127_vm0, %v3350_v14  ;;  %3377 = vpow2.f32 %v2567_v4 }
 0x1dd   : > { %v3354_v21 = vpop.eup %3353  ;;  %2182 = vst.msk [vmem:[%s3635_s8 + $0x1b0] sm:$0xff] %vm2127_vm0, %v3352_v18  ;;  %3379 = vpow2.f32 %v2501_v7 }
 0x1de   : > { %v3356_v24 = vpop.eup %3355  ;;  %2246 = vst.msk [vmem:[%s3635_s8 + $0x3b0] sm:$0xff] %vm2127_vm0, %v3354_v21  ;;  %3381 = vpow2.f32 %v2565_v11 }
 0x1df   : > { %v3358_v27 = vpop.eup %3357  ;;  %2180 = vst.msk [vmem:[%s3635_s8 + $0x1a0] sm:$0xff] %vm2127_vm0, %v3356_v24  ;;  %3383 = vpow2.f32 %v2506_v15 }
 0x1e0   : > { %v3360_v28 = vpop.eup %3359  ;;  %2244 = vst.msk [vmem:[%s3635_s8 + $0x3a0] sm:$0xff] %vm2127_vm0, %v3358_v27  ;;  %3385 = vpow2.f32 %v2570_v19 }
 0x1e1   : > { %v3362_v30 = vpop.eup %3361  ;;  %2183 = vst.msk [vmem:[%s3635_s8 + $0x1b8] sm:$0xff] %vm2127_vm0, %v3360_v28  ;;  %3387 = vpow2.f32 %v2504_v22 }
 0x1e2   : > { %v3364_v32 = vpop.eup %3363  ;;  %2247 = vst.msk [vmem:[%s3635_s8 + $0x3b8] sm:$0xff] %vm2127_vm0, %v3362_v30  ;;  %3389 = vpow2.f32 %v2568_v25 }
 0x1e3   : > { %v3366_v33 = vpop.eup %3365  ;;  %2181 = vst.msk [vmem:[%s3635_s8 + $0x1a8] sm:$0xff] %vm2127_vm0, %v3364_v32  ;;  %3391 = vpow2.f32 %v2507_v8 }
 0x1e4   : > { %v3368_v34 = vpop.eup %3367  ;;  %2245 = vst.msk [vmem:[%s3635_s8 + $0x3a8] sm:$0xff] %vm2127_vm0, %v3366_v33  ;;  %3393 = vpow2.f32 %v2571_v29 }
 0x1e5   : > { %v3370_v35 = vpop.eup %3369  ;;  %v1801_v36 = vadd.f32 1.0, %v3368_v34  ;;  %3395 = vpow2.f32 %v2505_v31 }
 0x1e6   : > { %v3372_v37 = vpop.eup %3371  ;;  %v1865_v38 = vadd.f32 1.0, %v3370_v35  ;;  %3397 = vpow2.f32 %v2569_v61 }
 0x1e7   : > { %v3374_v39 = vpop.eup %3373  ;;  %3399 = vrcp.f32 %v1801_v36  ;;  %v1799_v40 = vadd.f32 1.0, %v3372_v37 }
 0x1e8   : > { %v3376_v41 = vpop.eup %3375  ;;  %3401 = vrcp.f32 %v1865_v38  ;;  %v1863_v42 = vadd.f32 1.0, %v3374_v39 }
 0x1e9   : > { %v3378_v43 = vpop.eup %3377  ;;  %3403 = vrcp.f32 %v1799_v40  ;;  %v1802_v44 = vadd.f32 1.0, %v3376_v41 }
 0x1ea   : > { %v3380_v45 = vpop.eup %3379  ;;  %3405 = vrcp.f32 %v1863_v42  ;;  %v1866_v46 = vadd.f32 1.0, %v3378_v43 }
 0x1eb   : > { %v3382_v47 = vpop.eup %3381  ;;  %3407 = vrcp.f32 %v1802_v44  ;;  %v1800_v48 = vadd.f32 1.0, %v3380_v45 }
 0x1ec   : > { %v3384_v49 = vpop.eup %3383  ;;  %3409 = vrcp.f32 %v1866_v46  ;;  %v1864_v50 = vadd.f32 1.0, %v3382_v47 }
 0x1ed   : > { %v3386_v51 = vpop.eup %3385  ;;  %3411 = vrcp.f32 %v1800_v48  ;;  %v1805_v52 = vadd.f32 1.0, %v3384_v49 }
 0x1ee   : > { %v3388_v53 = vpop.eup %3387  ;;  %3413 = vrcp.f32 %v1864_v50  ;;  %v1869_v54 = vadd.f32 1.0, %v3386_v51 }
 0x1ef   : > { %v3390_v55 = vpop.eup %3389  ;;  %3415 = vrcp.f32 %v1805_v52  ;;  %v1803_v56 = vadd.f32 1.0, %v3388_v53 }
 0x1f0   : > { %v3392_v57 = vpop.eup %3391  ;;  %3417 = vrcp.f32 %v1869_v54  ;;  %v1867_v58 = vadd.f32 1.0, %v3390_v55 }
 0x1f1   : > { %v3394_v59 = vpop.eup %3393  ;;  %3419 = vrcp.f32 %v1803_v56  ;;  %v1806_v60 = vadd.f32 1.0, %v3392_v57 }
 0x1f2   : > { %v3396_v62 = vpop.eup %3395  ;;  %3421 = vrcp.f32 %v1867_v58  ;;  %v1870_v63 = vadd.f32 1.0, %v3394_v59 }
 0x1f3   : > { %v3398_v0 = vpop.eup %3397  ;;  %3423 = vrcp.f32 %v1806_v60  ;;  %v1804_v1 = vadd.f32 1.0, %v3396_v62 }
 0x1f4   : > { %v3400_v2 = vpop.eup %3399  ;;  %3425 = vrcp.f32 %v1870_v63  ;;  %v1868_v3 = vadd.f32 1.0, %v3398_v0 }
 0x1f5   : > { %v3402_v4 = vpop.eup %3401  ;;  %2186 = vst.msk [vmem:[%s3635_s8 + $0x1d0] sm:$0xff] %vm2127_vm0, %v3400_v2  ;;  %3427 = vrcp.f32 %v1804_v1 }
 0x1f6   : > { %v3404_v5 = vpop.eup %3403  ;;  %2250 = vst.msk [vmem:[%s3635_s8 + $0x3d0] sm:$0xff] %vm2127_vm0, %v3402_v4  ;;  %3429 = vrcp.f32 %v1868_v3 }
 0x1f7   : > { %v3406_v6 = vpop.eup %3405  ;;  %2184 = vst.msk [vmem:[%s3635_s8 + $0x1c0] sm:$0xff] %vm2127_vm0, %v3404_v5 }
 0x1f8   : > { %v3408_v7 = vpop.eup %3407  ;;  %2248 = vst.msk [vmem:[%s3635_s8 + $0x3c0] sm:$0xff] %vm2127_vm0, %v3406_v6 }
 0x1f9   : > { %v3410_v9 = vpop.eup %3409  ;;  %2187 = vst.msk [vmem:[%s3635_s8 + $0x1d8] sm:$0xff] %vm2127_vm0, %v3408_v7 }
 0x1fa   : > { %v3412_v10 = vpop.eup %3411  ;;  %2251 = vst.msk [vmem:[%s3635_s8 + $0x3d8] sm:$0xff] %vm2127_vm0, %v3410_v9 }
 0x1fb   : > { %v3414_v11 = vpop.eup %3413  ;;  %2185 = vst.msk [vmem:[%s3635_s8 + $0x1c8] sm:$0xff] %vm2127_vm0, %v3412_v10 }
 0x1fc   : > { %v3416_v12 = vpop.eup %3415  ;;  %2249 = vst.msk [vmem:[%s3635_s8 + $0x3c8] sm:$0xff] %vm2127_vm0, %v3414_v11 }
 0x1fd   : > { %v3418_v13 = vpop.eup %3417  ;;  %2190 = vst.msk [vmem:[%s3635_s8 + $0x1f0] sm:$0xff] %vm2127_vm0, %v3416_v12 }
 0x1fe   : > { %v3420_v14 = vpop.eup %3419  ;;  %2254 = vst.msk [vmem:[%s3635_s8 + $0x3f0] sm:$0xff] %vm2127_vm0, %v3418_v13 }
 0x1ff   : > { %v3422_v15 = vpop.eup %3421  ;;  %2188 = vst.msk [vmem:[%s3635_s8 + $0x1e0] sm:$0xff] %vm2127_vm0, %v3420_v14 }
 0x200   : > { %v3424_v16 = vpop.eup %3423  ;;  %2252 = vst.msk [vmem:[%s3635_s8 + $0x3e0] sm:$0xff] %vm2127_vm0, %v3422_v15 }
 0x201   : > { %v3426_v17 = vpop.eup %3425  ;;  %2191 = vst.msk [vmem:[%s3635_s8 + $0x1f8] sm:$0xff] %vm2127_vm0, %v3424_v16 }
 0x202   : > { %v3428_v18 = vpop.eup %3427  ;;  %2255 = vst.msk [vmem:[%s3635_s8 + $0x3f8] sm:$0xff] %vm2127_vm0, %v3426_v17 }
 0x203   : > { %v3430_v19 = vpop.eup %3429  ;;  %2189 = vst.msk [vmem:[%s3635_s8 + $0x1e8] sm:$0xff] %vm2127_vm0, %v3428_v18 }
 0x204   : > { %2253 = vst.msk [vmem:[%s3635_s8 + $0x3e8] sm:$0xff] %vm2127_vm0, %v3430_v19 }
 0x205 PF: > { %s13_s16 = sadd.s32 1, %s3470_s16   ;;  %s4062_s12 = smov %s3462_s14 }
 0x206   : > { %p10_p7 = scmp.ge.s32.totalorder %s13_s16, 10   ;;  %s4063_s13 = smov %s3466_s15 }
 0x207   : > { %s4064_s14 = smov %s4067_s17  ;;  %s4065_s15 = smov %s4071_s18 }
 0x208   :  { %12 = sbr.rel (!%p10_p7) target bundleno = 3 (0x3), region = 65 }

</bundles_post_ra>
